<compile_context>
chip_gen: v7x
topology: tpu7x:2x2x1
jax: 0.10.0
libtpu: 0.0.40
codegen_flags: <defaults>
</compile_context>

<pallas_src>
import jax
import jax.numpy as jnp
import numpy as np
from jax.experimental import pallas as pl
from jax.experimental.pallas import tpu as pltpu

_BN_EPS = 1e-5


def _fold_bn(gamma, beta, mean, var, eps=_BN_EPS):
    scale = gamma / jnp.sqrt(var + eps)
    bias = beta - mean * scale
    return scale[None, :], bias[None, :]          # (1, C) each


def _pick_tile_m(M):
    for t in (1024, 512, 256, 128, 64, 32, 16, 8):
        if M % t == 0:
            return t
    return M          # full-array block is always legal


# ---------------- fused conv_i1 + conv_i2 (pointwise, residual inside) ----------------

def _fused_pw_kernel(x_ref, s1_ref, b1_ref, w1_ref, s2_ref, b2_ref, w2_ref,
                     o_ref):
    x = x_ref[...]                                              # (tm, Cin) f32
    h1 = jnp.maximum(x * s1_ref[...] + b1_ref[...], 0.0)        # BN+ReLU (f32 VPU)
    t1 = jnp.dot(h1.astype(jnp.bfloat16), w1_ref[...],          # conv_i1
                 preferred_element_type=jnp.float32)            # (tm, Cix)
    h2 = jnp.maximum(t1 * s2_ref[...] + b2_ref[...], 0.0)
    y = x + jnp.dot(h2.astype(jnp.bfloat16), w2_ref[...],       # x + conv_i2
                    preferred_element_type=jnp.float32)
    o_ref[...] = y.astype(o_ref.dtype)


def fused_pointwise_block(x2d, s1, b1, w1, s2, b2, w2,
                          out_dtype=jnp.bfloat16):
    """x_in = x + conv_i2(relu(bn2(conv_i1(relu(bn1(x)))))); both convs 1x1x1.

    x2d: (M, Cin) f32; w1: (Cin, Cix) bf16; w2: (Cix, Cin) bf16.
    """
    M, Cin = x2d.shape
    Cix = w1.shape[1]
    tm = _pick_tile_m(M)
    return pl.pallas_call(
        _fused_pw_kernel,
        out_shape=jax.ShapeDtypeStruct((M, Cin), out_dtype),
        grid_spec=pltpu.PrefetchScalarGridSpec(
            num_scalar_prefetch=0,
            grid=(M // tm,),
            in_specs=[
                pl.BlockSpec((tm, Cin), lambda i: (i, 0)),
                pl.BlockSpec((1, Cin), lambda i: (0, 0)),
                pl.BlockSpec((1, Cin), lambda i: (0, 0)),
                pl.BlockSpec((Cin, Cix), lambda i: (0, 0)),
                pl.BlockSpec((1, Cix), lambda i: (0, 0)),
                pl.BlockSpec((1, Cix), lambda i: (0, 0)),
                pl.BlockSpec((Cix, Cin), lambda i: (0, 0)),
            ],
            out_specs=pl.BlockSpec((tm, Cin), lambda i: (i, 0)),
        ),
        compiler_params=pltpu.CompilerParams(
            dimension_semantics=("parallel",)),
    )(x2d, s1, b1, w1, s2, b2, w2)


# ------------- fused conv_m1 (ktx3x3) + conv_m2 (1x3x3) + residual, per batch -------------

def _zero_halo(ref, pt, T, H, W):
    """Zero the padding ring of a (pt+T+pt, H+2, W+2, C) scratch (pt may be 0).

    Only the halo is refreshed (the interior is fully rewritten every grid
    step).  Done every step — not under pl.when(pid==0) — because with a
    "parallel" grid axis the scratch is private per TensorCore under megacore.
    """
    Tp, Hp, Wp, C = ref.shape
    dt = ref.dtype
    if pt > 0:
        ref[0:pt] = jnp.zeros((pt, Hp, Wp, C), dt)
        ref[pt + T:Tp] = jnp.zeros((Tp - pt - T, Hp, Wp, C), dt)
    ref[pt:pt + T, 0:1] = jnp.zeros((T, 1, Wp, C), dt)
    ref[pt:pt + T, 1 + H:Hp] = jnp.zeros((T, Hp - 1 - H, Wp, C), dt)
    ref[pt:pt + T, 1:1 + H, 0:1] = jnp.zeros((T, H, 1, C), dt)
    ref[pt:pt + T, 1:1 + H, 1 + W:Wp] = jnp.zeros((T, H, Wp - 1 - W, C), dt)


def _make_fused_spatial_kernel(KT, T, H, W, Cin, Cmid, Cout):
    PT = (KT - 1) // 2
    M = T * H * W

    def kernel(x_ref, s1_ref, b1_ref, w1_ref, s2_ref, b2_ref, w2_ref,
               r_ref, o_ref, pad1_ref, pad2_ref):
        # refresh halo rings only (interiors are fully rewritten below)
        _zero_halo(pad1_ref, PT, T, H, W)
        _zero_halo(pad2_ref, 0, T, H, W)

        # ---- conv_m1: BN+ReLU (f32) -> zero-pad -> KTx3x3 conv ----
        h = jnp.maximum(x_ref[0] * s1_ref[...] + b1_ref[...], 0.0)  # (T,H,W,Cin) f32
        pad1_ref[PT:PT + T, 1:1 + H, 1:1 + W, :] = h
        acc1 = jnp.zeros((M, Cmid), jnp.float32)
        for kt in range(KT):
            for kh in range(3):
                for kw in range(3):
                    patch = pad1_ref[kt:kt + T, kh:kh + H, kw:kw + W, :]
                    acc1 = acc1 + jnp.dot(
                        patch.reshape(M, Cin).astype(jnp.bfloat16),
                        w1_ref[kt, kh, kw, :, :],
                        preferred_element_type=jnp.float32)

        # ---- conv_m2: BN+ReLU -> zero-pad (H,W only) -> 1x3x3 conv + residual ----
        h2 = jnp.maximum(acc1 * s2_ref[...] + b2_ref[...], 0.0)
        pad2_ref[:, 1:1 + H, 1:1 + W, :] = h2.reshape(T, H, W, Cmid)
        acc2 = jnp.zeros((M, Cout), jnp.float32)
        for kh in range(3):
            for kw in range(3):
                patch = pad2_ref[:, kh:kh + H, kw:kw + W, :]
                acc2 = acc2 + jnp.dot(
                    patch.reshape(M, Cmid).astype(jnp.bfloat16),
                    w2_ref[0, kh, kw, :, :],
                    preferred_element_type=jnp.float32)

        o_ref[0] = (acc2.reshape(T, H, W, Cout) + r_ref[0]).astype(o_ref.dtype)

    return kernel


def bn_relu_double_spatial_conv(x_in, s1, b1, w1, s2, b2, w2, residual):
    """out = conv_m2(relu(bn2(conv_m1(relu(bn1(x_in)))))) + residual.

    x_in: (N,T,H,W,Cin) bf16; w1: (KT,3,3,Cin,Cmid) bf16; w2: (1,3,3,Cmid,Cout)
    bf16; residual: (N,T,H,W,Cout) f32.  Stride 1, 'same' padding.
    """
    N, T, H, W, Cin = x_in.shape
    KT = w1.shape[0]
    Cmid = w1.shape[-1]
    Cout = w2.shape[-1]
    kernel = _make_fused_spatial_kernel(KT, T, H, W, Cin, Cmid, Cout)

    # explicit scoped-VMEM budget (defaults: v5e 16 MiB, v6e/v7x 32 MiB)
    pad1_b = (T + KT - 1) * (H + 2) * (W + 2) * Cin * 4
    pad2_b = T * (H + 2) * (W + 2) * Cmid * 4
    blk_b = T * H * W * (Cin * x_in.dtype.itemsize + Cin * 4 + Cout * 4)
    w_b = w1.size * w1.dtype.itemsize + w2.size * w2.dtype.itemsize
    vmem_limit = int(min(max(2 * blk_b + w_b + pad1_b + pad2_b + (4 << 20),
                             16 << 20), 40 << 20))
    # TODO(synk): for production-size T/H/W/C add a T (and H) block grid axis
    # with halo overlap so the working set fits v7x's 64 MiB VMEM and both
    # TensorCores stay busy when N is small.

    return pl.pallas_call(
        kernel,
        out_shape=jax.ShapeDtypeStruct((N, T, H, W, Cout), jnp.float32),
        grid_spec=pltpu.PrefetchScalarGridSpec(
            num_scalar_prefetch=0,
            grid=(N,),
            in_specs=[
                pl.BlockSpec((1, T, H, W, Cin), lambda n: (n, 0, 0, 0, 0)),
                pl.BlockSpec((1, Cin), lambda n: (0, 0)),
                pl.BlockSpec((1, Cin), lambda n: (0, 0)),
                pl.BlockSpec((KT, 3, 3, Cin, Cmid), lambda n: (0, 0, 0, 0, 0)),
                pl.BlockSpec((1, Cmid), lambda n: (0, 0)),
                pl.BlockSpec((1, Cmid), lambda n: (0, 0)),
                pl.BlockSpec((1, 3, 3, Cmid, Cout), lambda n: (0, 0, 0, 0, 0)),
                pl.BlockSpec((1, T, H, W, Cout), lambda n: (n, 0, 0, 0, 0)),
            ],
            out_specs=pl.BlockSpec((1, T, H, W, Cout),
                                   lambda n: (n, 0, 0, 0, 0)),
            scratch_shapes=[
                pltpu.VMEM((T + KT - 1, H + 2, W + 2, Cin), jnp.float32),
                pltpu.VMEM((T, H + 2, W + 2, Cmid), jnp.float32),
            ],
        ),
        compiler_params=pltpu.CompilerParams(
            dimension_semantics=("parallel",),
            vmem_limit_bytes=vmem_limit),
    )(x_in, s1, b1, w1, s2, b2, w2, residual)


# ----------------------------- MF_UNIT parameters & forward -----------------------------

def init_mf_unit_params(key, num_in, num_mid, num_out, use_3d=True):
    num_ix = num_mid // 4
    kt = 3 if use_3d else 1

    def bn_conv(k, cin, cout, kshape):
        ks = jax.random.split(k, 5)
        gamma = jax.random.uniform(ks[0], (cin,), jnp.float32, 0.5, 1.5)
        beta = 0.1 * jax.random.normal(ks[1], (cin,), jnp.float32)
        mean = 0.1 * jax.random.normal(ks[2], (cin,), jnp.float32)
        var = jax.random.uniform(ks[3], (cin,), jnp.float32, 0.5, 1.5)
        fan_in = cin * kshape[0] * kshape[1] * kshape[2]
        w = jax.random.normal(ks[4], kshape + (cin, cout),
                              jnp.float32) / np.sqrt(fan_in)
        return dict(gamma=gamma, beta=beta, mean=mean, var=var, w=w)

    ks = jax.random.split(key, 4)
    return dict(
        conv_i1=bn_conv(ks[0], num_in, num_ix, (1, 1, 1)),
        conv_i2=bn_conv(ks[1], num_ix, num_in, (1, 1, 1)),
        conv_m1=bn_conv(ks[2], num_in, num_mid, (kt, 3, 3)),
        conv_m2=bn_conv(ks[3], num_mid, num_out, (1, 3, 3)),
        # TODO(synk): first_block=True branch (conv_w1) and grouped convs (g>1)
        # are not instantiated in this configuration.
    )


def mf_unit_forward(params, x_ncdhw):
    x = jnp.transpose(x_ncdhw, (0, 2, 3, 4, 1)).astype(jnp.float32)  # NDHWC
    N, T, H, W, Cin = x.shape
    x2d = x.reshape(N * T * H * W, Cin)

    # conv_i1 + conv_i2 fused (pointwise); x_in kept in bf16 for the next stage
    pi1, pi2 = params['conv_i1'], params['conv_i2']
    s1, b1 = _fold_bn(pi1['gamma'], pi1['beta'], pi1['mean'], pi1['var'])
    s2, b2 = _fold_bn(pi2['gamma'], pi2['beta'], pi2['mean'], pi2['var'])
    wi1 = pi1['w'].reshape(pi1['w'].shape[-2],
                           pi1['w'].shape[-1]).astype(jnp.bfloat16)
    wi2 = pi2['w'].reshape(pi2['w'].shape[-2],
                           pi2['w'].shape[-1]).astype(jnp.bfloat16)
    x_in2d = fused_pointwise_block(x2d, s1, b1, wi1, s2, b2, wi2)    # (M, Cin) bf16
    x_in = x_in2d.reshape(N, T, H, W, Cin)

    # conv_m1 + conv_m2 fused (spatial), residual add in-kernel
    pm1, pm2 = params['conv_m1'], params['conv_m2']
    sm1, bm1 = _fold_bn(pm1['gamma'], pm1['beta'], pm1['mean'], pm1['var'])
    sm2, bm2 = _fold_bn(pm2['gamma'], pm2['beta'], pm2['mean'], pm2['var'])
    out = bn_relu_double_spatial_conv(
        x_in, sm1, bm1, pm1['w'].astype(jnp.bfloat16),
        sm2, bm2, pm2['w'].astype(jnp.bfloat16), residual=x)

    return jnp.transpose(out, (0, 4, 1, 2, 3))                       # NCDHW


# ----------------------------- pure-JAX reference (f32) -----------------------------

def _ref_bn_ac_conv(x, p, pad):
    s = p['gamma'] / jnp.sqrt(p['var'] + _BN_EPS)
    b = p['beta'] - p['mean'] * s
    h = jnp.maximum(x * s + b, 0.0)
    return jax.lax.conv_general_dilated(
        h, p['w'], window_strides=(1, 1, 1),
        padding=[(pad[0], pad[0]), (pad[1], pad[1]), (pad[2], pad[2])],
        dimension_numbers=('NDHWC', 'DHWIO', 'NDHWC'))


def mf_unit_ref(params, x_ncdhw):
    x = jnp.transpose(x_ncdhw, (0, 2, 3, 4, 1)).astype(jnp.float32)
    h = _ref_bn_ac_conv(x, params['conv_i1'], (0, 0, 0))
    x_in = x + _ref_bn_ac_conv(h, params['conv_i2'], (0, 0, 0))
    h = _ref_bn_ac_conv(x_in, params['conv_m1'], (1, 1, 1))
    h = _ref_bn_ac_conv(h, params['conv_m2'], (0, 1, 1))
    return jnp.transpose(h + x, (0, 4, 1, 2, 3))


if __name__ == "__main__":
    key = jax.random.PRNGKey(0)
    kx, kp = jax.random.split(key)

    # small shapes consistent with the module (NCDHW like PyTorch)
    N, C, T, H, W = 2, 16, 4, 8, 8
    num_in, num_mid, num_out = C, 16, 16          # residual needs num_out == num_in

    x = jax.random.normal(kx, (N, C, T, H, W), jnp.float32)
    params = init_mf_unit_params(kp, num_in, num_mid, num_out, use_3d=True)

    out = jax.jit(mf_unit_forward)(params, x)
    out = jax.block_until_ready(out)

    ref = mf_unit_ref(params, x)
    np.testing.assert_allclose(np.asarray(out), np.asarray(ref),
                               rtol=5e-2, atol=5e-2)
    print("KERNEL_OK")
</pallas_src>

<mosaic_0001>
module attributes {stable_mosaic.version = 11 : i64} {
  func.func @_fused_pw_kernel(%arg0: i32, %arg1: memref<512x16xf32, #tpu.memory_space<vmem>>, %arg2: memref<1x16xf32, #tpu.memory_space<vmem>>, %arg3: memref<1x16xf32, #tpu.memory_space<vmem>>, %arg4: memref<16x4xbf16, #tpu.memory_space<vmem>>, %arg5: memref<1x4xf32, #tpu.memory_space<vmem>>, %arg6: memref<1x4xf32, #tpu.memory_space<vmem>>, %arg7: memref<4x16xbf16, #tpu.memory_space<vmem>>, %arg8: memref<512x16xbf16, #tpu.memory_space<vmem>>) attributes {dimension_semantics = [#tpu.dimension_semantics<parallel>], iteration_bounds = array<i64: 1>, scalar_prefetch = 0 : i64, scratch_operands = 0 : i64, tpu.core_type = #tpu.core_type<tc>, window_params = [{transform_indices = @transform_0, window_bounds = array<i64: 512, 16>}, {pipeline_mode = #tpu.pipeline_mode<synchronous>, transform_indices = @transform_1, window_bounds = array<i64: 1, 16>}, {pipeline_mode = #tpu.pipeline_mode<synchronous>, transform_indices = @transform_2, window_bounds = array<i64: 1, 16>}, {pipeline_mode = #tpu.pipeline_mode<synchronous>, transform_indices = @transform_3, window_bounds = array<i64: 16, 4>}, {pipeline_mode = #tpu.pipeline_mode<synchronous>, transform_indices = @transform_4, window_bounds = array<i64: 1, 4>}, {pipeline_mode = #tpu.pipeline_mode<synchronous>, transform_indices = @transform_5, window_bounds = array<i64: 1, 4>}, {pipeline_mode = #tpu.pipeline_mode<synchronous>, transform_indices = @transform_6, window_bounds = array<i64: 4, 16>}, {transform_indices = @transform_7, window_bounds = array<i64: 512, 16>}]} {
    %c0 = arith.constant 0 : index
    %c0_0 = arith.constant 0 : index
    %0 = vector.load %arg1[%c0, %c0_0] : memref<512x16xf32, #tpu.memory_space<vmem>>, vector<512x16xf32>
    %c0_1 = arith.constant 0 : index
    %c0_2 = arith.constant 0 : index
    %1 = vector.load %arg2[%c0_1, %c0_2] : memref<1x16xf32, #tpu.memory_space<vmem>>, vector<1x16xf32>
    %2 = vector.broadcast %1 : vector<1x16xf32> to vector<512x16xf32>
    %3 = arith.mulf %0, %2 : vector<512x16xf32>
    %c0_3 = arith.constant 0 : index
    %c0_4 = arith.constant 0 : index
    %4 = vector.load %arg3[%c0_3, %c0_4] : memref<1x16xf32, #tpu.memory_space<vmem>>, vector<1x16xf32>
    %5 = vector.broadcast %4 : vector<1x16xf32> to vector<512x16xf32>
    %6 = arith.addf %3, %5 : vector<512x16xf32>
    %cst = arith.constant 0.000000e+00 : f32
    %7 = vector.broadcast %cst : f32 to vector<512x16xf32>
    %8 = arith.maximumf %6, %7 : vector<512x16xf32>
    %9 = arith.truncf %8 : vector<512x16xf32> to vector<512x16xbf16>
    %c0_5 = arith.constant 0 : index
    %c0_6 = arith.constant 0 : index
    %10 = vector.load %arg4[%c0_5, %c0_6] : memref<16x4xbf16, #tpu.memory_space<vmem>>, vector<16x4xbf16>
    %cst_7 = arith.constant dense<0.000000e+00> : vector<512x4xf32>
    %11 = tpu.matmul %9, %10, %cst_7 {dimension_numbers = #tpu.dot_dimension_numbers<[1], [0], [0], [1], [0, 0, 1, 1], [], []>} : vector<512x16xbf16>, vector<16x4xbf16>, vector<512x4xf32> -> vector<512x4xf32>
    %c0_8 = arith.constant 0 : index
    %c0_9 = arith.constant 0 : index
    %12 = vector.load %arg5[%c0_8, %c0_9] : memref<1x4xf32, #tpu.memory_space<vmem>>, vector<1x4xf32>
    %13 = vector.broadcast %12 : vector<1x4xf32> to vector<512x4xf32>
    %14 = arith.mulf %11, %13 : vector<512x4xf32>
    %c0_10 = arith.constant 0 : index
    %c0_11 = arith.constant 0 : index
    %15 = vector.load %arg6[%c0_10, %c0_11] : memref<1x4xf32, #tpu.memory_space<vmem>>, vector<1x4xf32>
    %16 = vector.broadcast %15 : vector<1x4xf32> to vector<512x4xf32>
    %17 = arith.addf %14, %16 : vector<512x4xf32>
    %cst_12 = arith.constant 0.000000e+00 : f32
    %18 = vector.broadcast %cst_12 : f32 to vector<512x4xf32>
    %19 = arith.maximumf %17, %18 : vector<512x4xf32>
    %20 = arith.truncf %19 : vector<512x4xf32> to vector<512x4xbf16>
    %c0_13 = arith.constant 0 : index
    %c0_14 = arith.constant 0 : index
    %21 = vector.load %arg7[%c0_13, %c0_14] : memref<4x16xbf16, #tpu.memory_space<vmem>>, vector<4x16xbf16>
    %cst_15 = arith.constant dense<0.000000e+00> : vector<512x16xf32>
    %22 = tpu.matmul %20, %21, %cst_15 {dimension_numbers = #tpu.dot_dimension_numbers<[1], [0], [0], [1], [0, 0, 1, 1], [], []>} : vector<512x4xbf16>, vector<4x16xbf16>, vector<512x16xf32> -> vector<512x16xf32>
    %23 = arith.addf %0, %22 : vector<512x16xf32>
    %24 = arith.truncf %23 : vector<512x16xf32> to vector<512x16xbf16>
    %c0_16 = arith.constant 0 : index
    %c0_17 = arith.constant 0 : index
    %25 = vector.load %arg8[%c0_16, %c0_17] : memref<512x16xbf16, #tpu.memory_space<vmem>>, vector<512x16xbf16>
    tpu.vector_store %arg8[%c0_16, %c0_17], %24 {strides = array<i32>} : memref<512x16xbf16, #tpu.memory_space<vmem>>, vector<512x16xbf16>,
    return
  }
  func.func @transform_0(%arg0: i32) -> (i32, i32) {
    %c0_i32 = arith.constant 0 : i32
    %c0_i32_0 = arith.constant 0 : i32
    return %arg0, %c0_i32 : i32, i32
  }
  func.func @transform_1(%arg0: i32) -> (i32, i32) {
    %c0_i32 = arith.constant 0 : i32
    %c0_i32_0 = arith.constant 0 : i32
    %c0_i32_1 = arith.constant 0 : i32
    return %c0_i32, %c0_i32_0 : i32, i32
  }
  func.func @transform_2(%arg0: i32) -> (i32, i32) {
    %c0_i32 = arith.constant 0 : i32
    %c0_i32_0 = arith.constant 0 : i32
    %c0_i32_1 = arith.constant 0 : i32
    return %c0_i32, %c0_i32_0 : i32, i32
  }
  func.func @transform_3(%arg0: i32) -> (i32, i32) {
    %c0_i32 = arith.constant 0 : i32
    %c0_i32_0 = arith.constant 0 : i32
    %c0_i32_1 = arith.constant 0 : i32
    return %c0_i32, %c0_i32_0 : i32, i32
  }
  func.func @transform_4(%arg0: i32) -> (i32, i32) {
    %c0_i32 = arith.constant 0 : i32
    %c0_i32_0 = arith.constant 0 : i32
    %c0_i32_1 = arith.constant 0 : i32
    return %c0_i32, %c0_i32_0 : i32, i32
  }
  func.func @transform_5(%arg0: i32) -> (i32, i32) {
    %c0_i32 = arith.constant 0 : i32
    %c0_i32_0 = arith.constant 0 : i32
    %c0_i32_1 = arith.constant 0 : i32
    return %c0_i32, %c0_i32_0 : i32, i32
  }
  func.func @transform_6(%arg0: i32) -> (i32, i32) {
    %c0_i32 = arith.constant 0 : i32
    %c0_i32_0 = arith.constant 0 : i32
    %c0_i32_1 = arith.constant 0 : i32
    return %c0_i32, %c0_i32_0 : i32, i32
  }
  func.func @transform_7(%arg0: i32) -> (i32, i32) {
    %c0_i32 = arith.constant 0 : i32
    %c0_i32_0 = arith.constant 0 : i32
    return %arg0, %c0_i32 : i32, i32
  }
}

module attributes {stable_mosaic.version = 11 : i64} {
  func.func @kernel(%arg0: i32, %arg1: memref<1x4x8x8x16xbf16, #tpu.memory_space<vmem>>, %arg2: memref<1x16xf32, #tpu.memory_space<vmem>>, %arg3: memref<1x16xf32, #tpu.memory_space<vmem>>, %arg4: memref<3x3x3x16x16xbf16, #tpu.memory_space<vmem>>, %arg5: memref<1x16xf32, #tpu.memory_space<vmem>>, %arg6: memref<1x16xf32, #tpu.memory_space<vmem>>, %arg7: memref<1x3x3x16x16xbf16, #tpu.memory_space<vmem>>, %arg8: memref<1x4x8x8x16xf32, #tpu.memory_space<vmem>>, %arg9: memref<1x4x8x8x16xf32, #tpu.memory_space<vmem>>, %arg10: memref<6x10x10x16xf32, #tpu.memory_space<vmem>>, %arg11: memref<4x10x10x16xf32, #tpu.memory_space<vmem>>) attributes {dimension_semantics = [#tpu.dimension_semantics<parallel>], iteration_bounds = array<i64: 2>, scalar_prefetch = 0 : i64, scratch_operands = 2 : i64, tpu.core_type = #tpu.core_type<tc>, window_params = [{transform_indices = @transform_0, window_bounds = array<i64: 1, 4, 8, 8, 16>}, {pipeline_mode = #tpu.pipeline_mode<synchronous>, transform_indices = @transform_1, window_bounds = array<i64: 1, 16>}, {pipeline_mode = #tpu.pipeline_mode<synchronous>, transform_indices = @transform_2, window_bounds = array<i64: 1, 16>}, {pipeline_mode = #tpu.pipeline_mode<synchronous>, transform_indices = @transform_3, window_bounds = array<i64: 3, 3, 3, 16, 16>}, {pipeline_mode = #tpu.pipeline_mode<synchronous>, transform_indices = @transform_4, window_bounds = array<i64: 1, 16>}, {pipeline_mode = #tpu.pipeline_mode<synchronous>, transform_indices = @transform_5, window_bounds = array<i64: 1, 16>}, {pipeline_mode = #tpu.pipeline_mode<synchronous>, transform_indices = @transform_6, window_bounds = array<i64: 1, 3, 3, 16, 16>}, {transform_indices = @transform_7, window_bounds = array<i64: 1, 4, 8, 8, 16>}, {transform_indices = @transform_8, window_bounds = array<i64: 1, 4, 8, 8, 16>}]} {
    %cst = arith.constant 0.000000e+00 : f32
    %0 = vector.broadcast %cst : f32 to vector<1x10x10x16xf32>
    %c0 = arith.constant 0 : index
    %c0_0 = arith.constant 0 : index
    %c0_1 = arith.constant 0 : index
    %c0_2 = arith.constant 0 : index
    %1 = vector.load %arg10[%c0, %c0_0, %c0_1, %c0_2] : memref<6x10x10x16xf32, #tpu.memory_space<vmem>>, vector<1x10x10x16xf32>
    tpu.vector_store %arg10[%c0, %c0_0, %c0_1, %c0_2], %0 {strides = array<i32>} : memref<6x10x10x16xf32, #tpu.memory_space<vmem>>, vector<1x10x10x16xf32>,
    %cst_3 = arith.constant 0.000000e+00 : f32
    %2 = vector.broadcast %cst_3 : f32 to vector<1x10x10x16xf32>
    %c5 = arith.constant 5 : index
    %c0_4 = arith.constant 0 : index
    %c0_5 = arith.constant 0 : index
    %c0_6 = arith.constant 0 : index
    %3 = vector.load %arg10[%c5, %c0_4, %c0_5, %c0_6] : memref<6x10x10x16xf32, #tpu.memory_space<vmem>>, vector<1x10x10x16xf32>
    tpu.vector_store %arg10[%c5, %c0_4, %c0_5, %c0_6], %2 {strides = array<i32>} : memref<6x10x10x16xf32, #tpu.memory_space<vmem>>, vector<1x10x10x16xf32>,
    %cst_7 = arith.constant 0.000000e+00 : f32
    %4 = vector.broadcast %cst_7 : f32 to vector<4x1x10x16xf32>
    %c1 = arith.constant 1 : index
    %c0_8 = arith.constant 0 : index
    %c0_9 = arith.constant 0 : index
    %c0_10 = arith.constant 0 : index
    %5 = vector.load %arg10[%c1, %c0_8, %c0_9, %c0_10] : memref<6x10x10x16xf32, #tpu.memory_space<vmem>>, vector<4x1x10x16xf32>
    tpu.vector_store %arg10[%c1, %c0_8, %c0_9, %c0_10], %4 {strides = array<i32>} : memref<6x10x10x16xf32, #tpu.memory_space<vmem>>, vector<4x1x10x16xf32>,
    %cst_11 = arith.constant 0.000000e+00 : f32
    %6 = vector.broadcast %cst_11 : f32 to vector<4x1x10x16xf32>
    %c1_12 = arith.constant 1 : index
    %c9 = arith.constant 9 : index
    %c0_13 = arith.constant 0 : index
    %c0_14 = arith.constant 0 : index
    %7 = vector.load %arg10[%c1_12, %c9, %c0_13, %c0_14] : memref<6x10x10x16xf32, #tpu.memory_space<vmem>>, vector<4x1x10x16xf32>
    tpu.vector_store %arg10[%c1_12, %c9, %c0_13, %c0_14], %6 {strides = array<i32>} : memref<6x10x10x16xf32, #tpu.memory_space<vmem>>, vector<4x1x10x16xf32>,
    %cst_15 = arith.constant 0.000000e+00 : f32
    %8 = vector.broadcast %cst_15 : f32 to vector<4x8x1x16xf32>
    %c1_16 = arith.constant 1 : index
    %c1_17 = arith.constant 1 : index
    %c0_18 = arith.constant 0 : index
    %c0_19 = arith.constant 0 : index
    %9 = vector.load %arg10[%c1_16, %c1_17, %c0_18, %c0_19] : memref<6x10x10x16xf32, #tpu.memory_space<vmem>>, vector<4x8x1x16xf32>
    tpu.vector_store %arg10[%c1_16, %c1_17, %c0_18, %c0_19], %8 {strides = array<i32>} : memref<6x10x10x16xf32, #tpu.memory_space<vmem>>, vector<4x8x1x16xf32>,
    %cst_20 = arith.constant 0.000000e+00 : f32
    %10 = vector.broadcast %cst_20 : f32 to vector<4x8x1x16xf32>
    %c1_21 = arith.constant 1 : index
    %c1_22 = arith.constant 1 : index
    %c9_23 = arith.constant 9 : index
    %c0_24 = arith.constant 0 : index
    %11 = vector.load %arg10[%c1_21, %c1_22, %c9_23, %c0_24] : memref<6x10x10x16xf32, #tpu.memory_space<vmem>>, vector<4x8x1x16xf32>
    tpu.vector_store %arg10[%c1_21, %c1_22, %c9_23, %c0_24], %10 {strides = array<i32>} : memref<6x10x10x16xf32, #tpu.memory_space<vmem>>, vector<4x8x1x16xf32>,
    %cst_25 = arith.constant 0.000000e+00 : f32
    %12 = vector.broadcast %cst_25 : f32 to vector<4x1x10x16xf32>
    %c0_26 = arith.constant 0 : index
    %c0_27 = arith.constant 0 : index
    %c0_28 = arith.constant 0 : index
    %c0_29 = arith.constant 0 : index
    %13 = vector.load %arg11[%c0_26, %c0_27, %c0_28, %c0_29] : memref<4x10x10x16xf32, #tpu.memory_space<vmem>>, vector<4x1x10x16xf32>
    tpu.vector_store %arg11[%c0_26, %c0_27, %c0_28, %c0_29], %12 {strides = array<i32>} : memref<4x10x10x16xf32, #tpu.memory_space<vmem>>, vector<4x1x10x16xf32>,
    %cst_30 = arith.constant 0.000000e+00 : f32
    %14 = vector.broadcast %cst_30 : f32 to vector<4x1x10x16xf32>
    %c0_31 = arith.constant 0 : index
    %c9_32 = arith.constant 9 : index
    %c0_33 = arith.constant 0 : index
    %c0_34 = arith.constant 0 : index
    %15 = vector.load %arg11[%c0_31, %c9_32, %c0_33, %c0_34] : memref<4x10x10x16xf32, #tpu.memory_space<vmem>>, vector<4x1x10x16xf32>
    tpu.vector_store %arg11[%c0_31, %c9_32, %c0_33, %c0_34], %14 {strides = array<i32>} : memref<4x10x10x16xf32, #tpu.memory_space<vmem>>, vector<4x1x10x16xf32>,
    %cst_35 = arith.constant 0.000000e+00 : f32
    %16 = vector.broadcast %cst_35 : f32 to vector<4x8x1x16xf32>
    %c0_36 = arith.constant 0 : index
    %c1_37 = arith.constant 1 : index
    %c0_38 = arith.constant 0 : index
    %c0_39 = arith.constant 0 : index
    %17 = vector.load %arg11[%c0_36, %c1_37, %c0_38, %c0_39] : memref<4x10x10x16xf32, #tpu.memory_space<vmem>>, vector<4x8x1x16xf32>
    tpu.vector_store %arg11[%c0_36, %c1_37, %c0_38, %c0_39], %16 {strides = array<i32>} : memref<4x10x10x16xf32, #tpu.memory_space<vmem>>, vector<4x8x1x16xf32>,
    %cst_40 = arith.constant 0.000000e+00 : f32
    %18 = vector.broadcast %cst_40 : f32 to vector<4x8x1x16xf32>
    %c0_41 = arith.constant 0 : index
    %c1_42 = arith.constant 1 : index
    %c9_43 = arith.constant 9 : index
    %c0_44 = arith.constant 0 : index
    %19 = vector.load %arg11[%c0_41, %c1_42, %c9_43, %c0_44] : memref<4x10x10x16xf32, #tpu.memory_space<vmem>>, vector<4x8x1x16xf32>
    tpu.vector_store %arg11[%c0_41, %c1_42, %c9_43, %c0_44], %18 {strides = array<i32>} : memref<4x10x10x16xf32, #tpu.memory_space<vmem>>, vector<4x8x1x16xf32>,
    %c0_45 = arith.constant 0 : index
    %c0_46 = arith.constant 0 : index
    %c0_47 = arith.constant 0 : index
    %c0_48 = arith.constant 0 : index
    %c0_49 = arith.constant 0 : index
    %20 = vector.load %arg1[%c0_45, %c0_46, %c0_47, %c0_48, %c0_49] : memref<1x4x8x8x16xbf16, #tpu.memory_space<vmem>>, vector<1x4x8x8x16xbf16>
    %21 = vector.shape_cast %20 : vector<1x4x8x8x16xbf16> to vector<4x8x8x16xbf16>
    %c0_50 = arith.constant 0 : index
    %c0_51 = arith.constant 0 : index
    %22 = vector.load %arg2[%c0_50, %c0_51] : memref<1x16xf32, #tpu.memory_space<vmem>>, vector<1x16xf32>
    %23 = arith.extf %21 : vector<4x8x8x16xbf16> to vector<4x8x8x16xf32>
    %24 = vector.shape_cast %22 : vector<1x16xf32> to vector<1x1x1x16xf32>
    %25 = vector.broadcast %24 : vector<1x1x1x16xf32> to vector<4x8x8x16xf32>
    %26 = arith.mulf %23, %25 : vector<4x8x8x16xf32>
    %c0_52 = arith.constant 0 : index
    %c0_53 = arith.constant 0 : index
    %27 = vector.load %arg3[%c0_52, %c0_53] : memref<1x16xf32, #tpu.memory_space<vmem>>, vector<1x16xf32>
    %28 = vector.shape_cast %27 : vector<1x16xf32> to vector<1x1x1x16xf32>
    %29 = vector.broadcast %28 : vector<1x1x1x16xf32> to vector<4x8x8x16xf32>
    %30 = arith.addf %26, %29 : vector<4x8x8x16xf32>
    %cst_54 = arith.constant 0.000000e+00 : f32
    %31 = vector.broadcast %cst_54 : f32 to vector<4x8x8x16xf32>
    %32 = arith.maximumf %30, %31 : vector<4x8x8x16xf32>
    %c1_55 = arith.constant 1 : index
    %c1_56 = arith.constant 1 : index
    %c1_57 = arith.constant 1 : index
    %c0_58 = arith.constant 0 : index
    %33 = vector.load %arg10[%c1_55, %c1_56, %c1_57, %c0_58] : memref<6x10x10x16xf32, #tpu.memory_space<vmem>>, vector<4x8x8x16xf32>
    tpu.vector_store %arg10[%c1_55, %c1_56, %c1_57, %c0_58], %32 {strides = array<i32>} : memref<6x10x10x16xf32, #tpu.memory_space<vmem>>, vector<4x8x8x16xf32>,
    %cst_59 = arith.constant 0.000000e+00 : f32
    %34 = vector.broadcast %cst_59 : f32 to vector<256x16xf32>
    %c0_60 = arith.constant 0 : index
    %c0_61 = arith.constant 0 : index
    %c0_62 = arith.constant 0 : index
    %c0_63 = arith.constant 0 : index
    %35 = vector.load %arg10[%c0_60, %c0_61, %c0_62, %c0_63] : memref<6x10x10x16xf32, #tpu.memory_space<vmem>>, vector<4x8x8x16xf32>
    %36 = vector.shape_cast %35 : vector<4x8x8x16xf32> to vector<256x16xf32>
    %37 = arith.truncf %36 : vector<256x16xf32> to vector<256x16xbf16>
    %c0_64 = arith.constant 0 : index
    %c0_65 = arith.constant 0 : index
    %c0_66 = arith.constant 0 : index
    %c0_67 = arith.constant 0 : index
    %c0_68 = arith.constant 0 : index
    %38 = vector.load %arg4[%c0_64, %c0_65, %c0_66, %c0_67, %c0_68] : memref<3x3x3x16x16xbf16, #tpu.memory_space<vmem>>, vector<1x1x1x16x16xbf16>
    %39 = vector.shape_cast %38 : vector<1x1x1x16x16xbf16> to vector<16x16xbf16>
    %cst_69 = arith.constant dense<0.000000e+00> : vector<256x16xf32>
    %40 = tpu.matmul %37, %39, %cst_69 {dimension_numbers = #tpu.dot_dimension_numbers<[1], [0], [0], [1], [0, 0, 1, 1], [], []>} : vector<256x16xbf16>, vector<16x16xbf16>, vector<256x16xf32> -> vector<256x16xf32>
    %41 = arith.addf %34, %40 : vector<256x16xf32>
    %c0_70 = arith.constant 0 : index
    %c0_71 = arith.constant 0 : index
    %c1_72 = arith.constant 1 : index
    %c0_73 = arith.constant 0 : index
    %42 = vector.load %arg10[%c0_70, %c0_71, %c1_72, %c0_73] : memref<6x10x10x16xf32, #tpu.memory_space<vmem>>, vector<4x8x8x16xf32>
    %43 = vector.shape_cast %42 : vector<4x8x8x16xf32> to vector<256x16xf32>
    %44 = arith.truncf %43 : vector<256x16xf32> to vector<256x16xbf16>
    %c0_74 = arith.constant 0 : index
    %c0_75 = arith.constant 0 : index
    %c1_76 = arith.constant 1 : index
    %c0_77 = arith.constant 0 : index
    %c0_78 = arith.constant 0 : index
    %45 = vector.load %arg4[%c0_74, %c0_75, %c1_76, %c0_77, %c0_78] : memref<3x3x3x16x16xbf16, #tpu.memory_space<vmem>>, vector<1x1x1x16x16xbf16>
    %46 = vector.shape_cast %45 : vector<1x1x1x16x16xbf16> to vector<16x16xbf16>
    %cst_79 = arith.constant dense<0.000000e+00> : vector<256x16xf32>
    %47 = tpu.matmul %44, %46, %cst_79 {dimension_numbers = #tpu.dot_dimension_numbers<[1], [0], [0], [1], [0, 0, 1, 1], [], []>} : vector<256x16xbf16>, vector<16x16xbf16>, vector<256x16xf32> -> vector<256x16xf32>
    %48 = arith.addf %41, %47 : vector<256x16xf32>
    %c0_80 = arith.constant 0 : index
    %c0_81 = arith.constant 0 : index
    %c2 = arith.constant 2 : index
    %c0_82 = arith.constant 0 : index
    %49 = vector.load %arg10[%c0_80, %c0_81, %c2, %c0_82] : memref<6x10x10x16xf32, #tpu.memory_space<vmem>>, vector<4x8x8x16xf32>
    %50 = vector.shape_cast %49 : vector<4x8x8x16xf32> to vector<256x16xf32>
    %51 = arith.truncf %50 : vector<256x16xf32> to vector<256x16xbf16>
    %c0_83 = arith.constant 0 : index
    %c0_84 = arith.constant 0 : index
    %c2_85 = arith.constant 2 : index
    %c0_86 = arith.constant 0 : index
    %c0_87 = arith.constant 0 : index
    %52 = vector.load %arg4[%c0_83, %c0_84, %c2_85, %c0_86, %c0_87] : memref<3x3x3x16x16xbf16, #tpu.memory_space<vmem>>, vector<1x1x1x16x16xbf16>
    %53 = vector.shape_cast %52 : vector<1x1x1x16x16xbf16> to vector<16x16xbf16>
    %cst_88 = arith.constant dense<0.000000e+00> : vector<256x16xf32>
    %54 = tpu.matmul %51, %53, %cst_88 {dimension_numbers = #tpu.dot_dimension_numbers<[1], [0], [0], [1], [0, 0, 1, 1], [], []>} : vector<256x16xbf16>, vector<16x16xbf16>, vector<256x16xf32> -> vector<256x16xf32>
    %55 = arith.addf %48, %54 : vector<256x16xf32>
    %c0_89 = arith.constant 0 : index
    %c1_90 = arith.constant 1 : index
    %c0_91 = arith.constant 0 : index
    %c0_92 = arith.constant 0 : index
    %56 = vector.load %arg10[%c0_89, %c1_90, %c0_91, %c0_92] : memref<6x10x10x16xf32, #tpu.memory_space<vmem>>, vector<4x8x8x16xf32>
    %57 = vector.shape_cast %56 : vector<4x8x8x16xf32> to vector<256x16xf32>
    %58 = arith.truncf %57 : vector<256x16xf32> to vector<256x16xbf16>
    %c0_93 = arith.constant 0 : index
    %c1_94 = arith.constant 1 : index
    %c0_95 = arith.constant 0 : index
    %c0_96 = arith.constant 0 : index
    %c0_97 = arith.constant 0 : index
    %59 = vector.load %arg4[%c0_93, %c1_94, %c0_95, %c0_96, %c0_97] : memref<3x3x3x16x16xbf16, #tpu.memory_space<vmem>>, vector<1x1x1x16x16xbf16>
    %60 = vector.shape_cast %59 : vector<1x1x1x16x16xbf16> to vector<16x16xbf16>
    %cst_98 = arith.constant dense<0.000000e+00> : vector<256x16xf32>
    %61 = tpu.matmul %58, %60, %cst_98 {dimension_numbers = #tpu.dot_dimension_numbers<[1], [0], [0], [1], [0, 0, 1, 1], [], []>} : vector<256x16xbf16>, vector<16x16xbf16>, vector<256x16xf32> -> vector<256x16xf32>
    %62 = arith.addf %55, %61 : vector<256x16xf32>
    %c0_99 = arith.constant 0 : index
    %c1_100 = arith.constant 1 : index
    %c1_101 = arith.constant 1 : index
    %c0_102 = arith.constant 0 : index
    %63 = vector.load %arg10[%c0_99, %c1_100, %c1_101, %c0_102] : memref<6x10x10x16xf32, #tpu.memory_space<vmem>>, vector<4x8x8x16xf32>
    %64 = vector.shape_cast %63 : vector<4x8x8x16xf32> to vector<256x16xf32>
    %65 = arith.truncf %64 : vector<256x16xf32> to vector<256x16xbf16>
    %c0_103 = arith.constant 0 : index
    %c1_104 = arith.constant 1 : index
    %c1_105 = arith.constant 1 : index
    %c0_106 = arith.constant 0 : index
    %c0_107 = arith.constant 0 : index
    %66 = vector.load %arg4[%c0_103, %c1_104, %c1_105, %c0_106, %c0_107] : memref<3x3x3x16x16xbf16, #tpu.memory_space<vmem>>, vector<1x1x1x16x16xbf16>
    %67 = vector.shape_cast %66 : vector<1x1x1x16x16xbf16> to vector<16x16xbf16>
    %cst_108 = arith.constant dense<0.000000e+00> : vector<256x16xf32>
    %68 = tpu.matmul %65, %67, %cst_108 {dimension_numbers = #tpu.dot_dimension_numbers<[1], [0], [0], [1], [0, 0, 1, 1], [], []>} : vector<256x16xbf16>, vector<16x16xbf16>, vector<256x16xf32> -> vector<256x16xf32>
    %69 = arith.addf %62, %68 : vector<256x16xf32>
    %c0_109 = arith.constant 0 : index
    %c1_110 = arith.constant 1 : index
    %c2_111 = arith.constant 2 : index
    %c0_112 = arith.constant 0 : index
    %70 = vector.load %arg10[%c0_109, %c1_110, %c2_111, %c0_112] : memref<6x10x10x16xf32, #tpu.memory_space<vmem>>, vector<4x8x8x16xf32>
    %71 = vector.shape_cast %70 : vector<4x8x8x16xf32> to vector<256x16xf32>
    %72 = arith.truncf %71 : vector<256x16xf32> to vector<256x16xbf16>
    %c0_113 = arith.constant 0 : index
    %c1_114 = arith.constant 1 : index
    %c2_115 = arith.constant 2 : index
    %c0_116 = arith.constant 0 : index
    %c0_117 = arith.constant 0 : index
    %73 = vector.load %arg4[%c0_113, %c1_114, %c2_115, %c0_116, %c0_117] : memref<3x3x3x16x16xbf16, #tpu.memory_space<vmem>>, vector<1x1x1x16x16xbf16>
    %74 = vector.shape_cast %73 : vector<1x1x1x16x16xbf16> to vector<16x16xbf16>
    %cst_118 = arith.constant dense<0.000000e+00> : vector<256x16xf32>
    %75 = tpu.matmul %72, %74, %cst_118 {dimension_numbers = #tpu.dot_dimension_numbers<[1], [0], [0], [1], [0, 0, 1, 1], [], []>} : vector<256x16xbf16>, vector<16x16xbf16>, vector<256x16xf32> -> vector<256x16xf32>
    %76 = arith.addf %69, %75 : vector<256x16xf32>
    %c0_119 = arith.constant 0 : index
    %c2_120 = arith.constant 2 : index
    %c0_121 = arith.constant 0 : index
    %c0_122 = arith.constant 0 : index
    %77 = vector.load %arg10[%c0_119, %c2_120, %c0_121, %c0_122] : memref<6x10x10x16xf32, #tpu.memory_space<vmem>>, vector<4x8x8x16xf32>
    %78 = vector.shape_cast %77 : vector<4x8x8x16xf32> to vector<256x16xf32>
    %79 = arith.truncf %78 : vector<256x16xf32> to vector<256x16xbf16>
    %c0_123 = arith.constant 0 : index
    %c2_124 = arith.constant 2 : index
    %c0_125 = arith.constant 0 : index
    %c0_126 = arith.constant 0 : index
    %c0_127 = arith.constant 0 : index
    %80 = vector.load %arg4[%c0_123, %c2_124, %c0_125, %c0_126, %c0_127] : memref<3x3x3x16x16xbf16, #tpu.memory_space<vmem>>, vector<1x1x1x16x16xbf16>
    %81 = vector.shape_cast %80 : vector<1x1x1x16x16xbf16> to vector<16x16xbf16>
    %cst_128 = arith.constant dense<0.000000e+00> : vector<256x16xf32>
    %82 = tpu.matmul %79, %81, %cst_128 {dimension_numbers = #tpu.dot_dimension_numbers<[1], [0], [0], [1], [0, 0, 1, 1], [], []>} : vector<256x16xbf16>, vector<16x16xbf16>, vector<256x16xf32> -> vector<256x16xf32>
    %83 = arith.addf %76, %82 : vector<256x16xf32>
    %c0_129 = arith.constant 0 : index
    %c2_130 = arith.constant 2 : index
    %c1_131 = arith.constant 1 : index
    %c0_132 = arith.constant 0 : index
    %84 = vector.load %arg10[%c0_129, %c2_130, %c1_131, %c0_132] : memref<6x10x10x16xf32, #tpu.memory_space<vmem>>, vector<4x8x8x16xf32>
    %85 = vector.shape_cast %84 : vector<4x8x8x16xf32> to vector<256x16xf32>
    %86 = arith.truncf %85 : vector<256x16xf32> to vector<256x16xbf16>
    %c0_133 = arith.constant 0 : index
    %c2_134 = arith.constant 2 : index
    %c1_135 = arith.constant 1 : index
    %c0_136 = arith.constant 0 : index
    %c0_137 = arith.constant 0 : index
    %87 = vector.load %arg4[%c0_133, %c2_134, %c1_135, %c0_136, %c0_137] : memref<3x3x3x16x16xbf16, #tpu.memory_space<vmem>>, vector<1x1x1x16x16xbf16>
    %88 = vector.shape_cast %87 : vector<1x1x1x16x16xbf16> to vector<16x16xbf16>
    %cst_138 = arith.constant dense<0.000000e+00> : vector<256x16xf32>
    %89 = tpu.matmul %86, %88, %cst_138 {dimension_numbers = #tpu.dot_dimension_numbers<[1], [0], [0], [1], [0, 0, 1, 1], [], []>} : vector<256x16xbf16>, vector<16x16xbf16>, vector<256x16xf32> -> vector<256x16xf32>
    %90 = arith.addf %83, %89 : vector<256x16xf32>
    %c0_139 = arith.constant 0 : index
    %c2_140 = arith.constant 2 : index
    %c2_141 = arith.constant 2 : index
    %c0_142 = arith.constant 0 : index
    %91 = vector.load %arg10[%c0_139, %c2_140, %c2_141, %c0_142] : memref<6x10x10x16xf32, #tpu.memory_space<vmem>>, vector<4x8x8x16xf32>
    %92 = vector.shape_cast %91 : vector<4x8x8x16xf32> to vector<256x16xf32>
    %93 = arith.truncf %92 : vector<256x16xf32> to vector<256x16xbf16>
    %c0_143 = arith.constant 0 : index
    %c2_144 = arith.constant 2 : index
    %c2_145 = arith.constant 2 : index
    %c0_146 = arith.constant 0 : index
    %c0_147 = arith.constant 0 : index
    %94 = vector.load %arg4[%c0_143, %c2_144, %c2_145, %c0_146, %c0_147] : memref<3x3x3x16x16xbf16, #tpu.memory_space<vmem>>, vector<1x1x1x16x16xbf16>
    %95 = vector.shape_cast %94 : vector<1x1x1x16x16xbf16> to vector<16x16xbf16>
    %cst_148 = arith.constant dense<0.000000e+00> : vector<256x16xf32>
    %96 = tpu.matmul %93, %95, %cst_148 {dimension_numbers = #tpu.dot_dimension_numbers<[1], [0], [0], [1], [0, 0, 1, 1], [], []>} : vector<256x16xbf16>, vector<16x16xbf16>, vector<256x16xf32> -> vector<256x16xf32>
    %97 = arith.addf %90, %96 : vector<256x16xf32>
    %c1_149 = arith.constant 1 : index
    %c0_150 = arith.constant 0 : index
    %c0_151 = arith.constant 0 : index
    %c0_152 = arith.constant 0 : index
    %98 = vector.load %arg10[%c1_149, %c0_150, %c0_151, %c0_152] : memref<6x10x10x16xf32, #tpu.memory_space<vmem>>, vector<4x8x8x16xf32>
    %99 = vector.shape_cast %98 : vector<4x8x8x16xf32> to vector<256x16xf32>
    %100 = arith.truncf %99 : vector<256x16xf32> to vector<256x16xbf16>
    %c1_153 = arith.constant 1 : index
    %c0_154 = arith.constant 0 : index
    %c0_155 = arith.constant 0 : index
    %c0_156 = arith.constant 0 : index
    %c0_157 = arith.constant 0 : index
    %101 = vector.load %arg4[%c1_153, %c0_154, %c0_155, %c0_156, %c0_157] : memref<3x3x3x16x16xbf16, #tpu.memory_space<vmem>>, vector<1x1x1x16x16xbf16>
    %102 = vector.shape_cast %101 : vector<1x1x1x16x16xbf16> to vector<16x16xbf16>
    %cst_158 = arith.constant dense<0.000000e+00> : vector<256x16xf32>
    %103 = tpu.matmul %100, %102, %cst_158 {dimension_numbers = #tpu.dot_dimension_numbers<[1], [0], [0], [1], [0, 0, 1, 1], [], []>} : vector<256x16xbf16>, vector<16x16xbf16>, vector<256x16xf32> -> vector<256x16xf32>
    %104 = arith.addf %97, %103 : vector<256x16xf32>
    %c1_159 = arith.constant 1 : index
    %c0_160 = arith.constant 0 : index
    %c1_161 = arith.constant 1 : index
    %c0_162 = arith.constant 0 : index
    %105 = vector.load %arg10[%c1_159, %c0_160, %c1_161, %c0_162] : memref<6x10x10x16xf32, #tpu.memory_space<vmem>>, vector<4x8x8x16xf32>
    %106 = vector.shape_cast %105 : vector<4x8x8x16xf32> to vector<256x16xf32>
    %107 = arith.truncf %106 : vector<256x16xf32> to vector<256x16xbf16>
    %c1_163 = arith.constant 1 : index
    %c0_164 = arith.constant 0 : index
    %c1_165 = arith.constant 1 : index
    %c0_166 = arith.constant 0 : index
    %c0_167 = arith.constant 0 : index
    %108 = vector.load %arg4[%c1_163, %c0_164, %c1_165, %c0_166, %c0_167] : memref<3x3x3x16x16xbf16, #tpu.memory_space<vmem>>, vector<1x1x1x16x16xbf16>
    %109 = vector.shape_cast %108 : vector<1x1x1x16x16xbf16> to vector<16x16xbf16>
    %cst_168 = arith.constant dense<0.000000e+00> : vector<256x16xf32>
    %110 = tpu.matmul %107, %109, %cst_168 {dimension_numbers = #tpu.dot_dimension_numbers<[1], [0], [0], [1], [0, 0, 1, 1], [], []>} : vector<256x16xbf16>, vector<16x16xbf16>, vector<256x16xf32> -> vector<256x16xf32>
    %111 = arith.addf %104, %110 : vector<256x16xf32>
    %c1_169 = arith.constant 1 : index
    %c0_170 = arith.constant 0 : index
    %c2_171 = arith.constant 2 : index
    %c0_172 = arith.constant 0 : index
    %112 = vector.load %arg10[%c1_169, %c0_170, %c2_171, %c0_172] : memref<6x10x10x16xf32, #tpu.memory_space<vmem>>, vector<4x8x8x16xf32>
    %113 = vector.shape_cast %112 : vector<4x8x8x16xf32> to vector<256x16xf32>
    %114 = arith.truncf %113 : vector<256x16xf32> to vector<256x16xbf16>
    %c1_173 = arith.constant 1 : index
    %c0_174 = arith.constant 0 : index
    %c2_175 = arith.constant 2 : index
    %c0_176 = arith.constant 0 : index
    %c0_177 = arith.constant 0 : index
    %115 = vector.load %arg4[%c1_173, %c0_174, %c2_175, %c0_176, %c0_177] : memref<3x3x3x16x16xbf16, #tpu.memory_space<vmem>>, vector<1x1x1x16x16xbf16>
    %116 = vector.shape_cast %115 : vector<1x1x1x16x16xbf16> to vector<16x16xbf16>
    %cst_178 = arith.constant dense<0.000000e+00> : vector<256x16xf32>
    %117 = tpu.matmul %114, %116, %cst_178 {dimension_numbers = #tpu.dot_dimension_numbers<[1], [0], [0], [1], [0, 0, 1, 1], [], []>} : vector<256x16xbf16>, vector<16x16xbf16>, vector<256x16xf32> -> vector<256x16xf32>
    %118 = arith.addf %111, %117 : vector<256x16xf32>
    %c1_179 = arith.constant 1 : index
    %c1_180 = arith.constant 1 : index
    %c0_181 = arith.constant 0 : index
    %c0_182 = arith.constant 0 : index
    %119 = vector.load %arg10[%c1_179, %c1_180, %c0_181, %c0_182] : memref<6x10x10x16xf32, #tpu.memory_space<vmem>>, vector<4x8x8x16xf32>
    %120 = vector.shape_cast %119 : vector<4x8x8x16xf32> to vector<256x16xf32>
    %121 = arith.truncf %120 : vector<256x16xf32> to vector<256x16xbf16>
    %c1_183 = arith.constant 1 : index
    %c1_184 = arith.constant 1 : index
    %c0_185 = arith.constant 0 : index
    %c0_186 = arith.constant 0 : index
    %c0_187 = arith.constant 0 : index
    %122 = vector.load %arg4[%c1_183, %c1_184, %c0_185, %c0_186, %c0_187] : memref<3x3x3x16x16xbf16, #tpu.memory_space<vmem>>, vector<1x1x1x16x16xbf16>
    %123 = vector.shape_cast %122 : vector<1x1x1x16x16xbf16> to vector<16x16xbf16>
    %cst_188 = arith.constant dense<0.000000e+00> : vector<256x16xf32>
    %124 = tpu.matmul %121, %123, %cst_188 {dimension_numbers = #tpu.dot_dimension_numbers<[1], [0], [0], [1], [0, 0, 1, 1], [], []>} : vector<256x16xbf16>, vector<16x16xbf16>, vector<256x16xf32> -> vector<256x16xf32>
    %125 = arith.addf %118, %124 : vector<256x16xf32>
    %c1_189 = arith.constant 1 : index
    %c1_190 = arith.constant 1 : index
    %c1_191 = arith.constant 1 : index
    %c0_192 = arith.constant 0 : index
    %126 = vector.load %arg10[%c1_189, %c1_190, %c1_191, %c0_192] : memref<6x10x10x16xf32, #tpu.memory_space<vmem>>, vector<4x8x8x16xf32>
    %127 = vector.shape_cast %126 : vector<4x8x8x16xf32> to vector<256x16xf32>
    %128 = arith.truncf %127 : vector<256x16xf32> to vector<256x16xbf16>
    %c1_193 = arith.constant 1 : index
    %c1_194 = arith.constant 1 : index
    %c1_195 = arith.constant 1 : index
    %c0_196 = arith.constant 0 : index
    %c0_197 = arith.constant 0 : index
    %129 = vector.load %arg4[%c1_193, %c1_194, %c1_195, %c0_196, %c0_197] : memref<3x3x3x16x16xbf16, #tpu.memory_space<vmem>>, vector<1x1x1x16x16xbf16>
    %130 = vector.shape_cast %129 : vector<1x1x1x16x16xbf16> to vector<16x16xbf16>
    %cst_198 = arith.constant dense<0.000000e+00> : vector<256x16xf32>
    %131 = tpu.matmul %128, %130, %cst_198 {dimension_numbers = #tpu.dot_dimension_numbers<[1], [0], [0], [1], [0, 0, 1, 1], [], []>} : vector<256x16xbf16>, vector<16x16xbf16>, vector<256x16xf32> -> vector<256x16xf32>
    %132 = arith.addf %125, %131 : vector<256x16xf32>
    %c1_199 = arith.constant 1 : index
    %c1_200 = arith.constant 1 : index
    %c2_201 = arith.constant 2 : index
    %c0_202 = arith.constant 0 : index
    %133 = vector.load %arg10[%c1_199, %c1_200, %c2_201, %c0_202] : memref<6x10x10x16xf32, #tpu.memory_space<vmem>>, vector<4x8x8x16xf32>
    %134 = vector.shape_cast %133 : vector<4x8x8x16xf32> to vector<256x16xf32>
    %135 = arith.truncf %134 : vector<256x16xf32> to vector<256x16xbf16>
    %c1_203 = arith.constant 1 : index
    %c1_204 = arith.constant 1 : index
    %c2_205 = arith.constant 2 : index
    %c0_206 = arith.constant 0 : index
    %c0_207 = arith.constant 0 : index
    %136 = vector.load %arg4[%c1_203, %c1_204, %c2_205, %c0_206, %c0_207] : memref<3x3x3x16x16xbf16, #tpu.memory_space<vmem>>, vector<1x1x1x16x16xbf16>
    %137 = vector.shape_cast %136 : vector<1x1x1x16x16xbf16> to vector<16x16xbf16>
    %cst_208 = arith.constant dense<0.000000e+00> : vector<256x16xf32>
    %138 = tpu.matmul %135, %137, %cst_208 {dimension_numbers = #tpu.dot_dimension_numbers<[1], [0], [0], [1], [0, 0, 1, 1], [], []>} : vector<256x16xbf16>, vector<16x16xbf16>, vector<256x16xf32> -> vector<256x16xf32>
    %139 = arith.addf %132, %138 : vector<256x16xf32>
    %c1_209 = arith.constant 1 : index
    %c2_210 = arith.constant 2 : index
    %c0_211 = arith.constant 0 : index
    %c0_212 = arith.constant 0 : index
    %140 = vector.load %arg10[%c1_209, %c2_210, %c0_211, %c0_212] : memref<6x10x10x16xf32, #tpu.memory_space<vmem>>, vector<4x8x8x16xf32>
    %141 = vector.shape_cast %140 : vector<4x8x8x16xf32> to vector<256x16xf32>
    %142 = arith.truncf %141 : vector<256x16xf32> to vector<256x16xbf16>
    %c1_213 = arith.constant 1 : index
    %c2_214 = arith.constant 2 : index
    %c0_215 = arith.constant 0 : index
    %c0_216 = arith.constant 0 : index
    %c0_217 = arith.constant 0 : index
    %143 = vector.load %arg4[%c1_213, %c2_214, %c0_215, %c0_216, %c0_217] : memref<3x3x3x16x16xbf16, #tpu.memory_space<vmem>>, vector<1x1x1x16x16xbf16>
    %144 = vector.shape_cast %143 : vector<1x1x1x16x16xbf16> to vector<16x16xbf16>
    %cst_218 = arith.constant dense<0.000000e+00> : vector<256x16xf32>
    %145 = tpu.matmul %142, %144, %cst_218 {dimension_numbers = #tpu.dot_dimension_numbers<[1], [0], [0], [1], [0, 0, 1, 1], [], []>} : vector<256x16xbf16>, vector<16x16xbf16>, vector<256x16xf32> -> vector<256x16xf32>
    %146 = arith.addf %139, %145 : vector<256x16xf32>
    %c1_219 = arith.constant 1 : index
    %c2_220 = arith.constant 2 : index
    %c1_221 = arith.constant 1 : index
    %c0_222 = arith.constant 0 : index
    %147 = vector.load %arg10[%c1_219, %c2_220, %c1_221, %c0_222] : memref<6x10x10x16xf32, #tpu.memory_space<vmem>>, vector<4x8x8x16xf32>
    %148 = vector.shape_cast %147 : vector<4x8x8x16xf32> to vector<256x16xf32>
    %149 = arith.truncf %148 : vector<256x16xf32> to vector<256x16xbf16>
    %c1_223 = arith.constant 1 : index
    %c2_224 = arith.constant 2 : index
    %c1_225 = arith.constant 1 : index
    %c0_226 = arith.constant 0 : index
    %c0_227 = arith.constant 0 : index
    %150 = vector.load %arg4[%c1_223, %c2_224, %c1_225, %c0_226, %c0_227] : memref<3x3x3x16x16xbf16, #tpu.memory_space<vmem>>, vector<1x1x1x16x16xbf16>
    %151 = vector.shape_cast %150 : vector<1x1x1x16x16xbf16> to vector<16x16xbf16>
    %cst_228 = arith.constant dense<0.000000e+00> : vector<256x16xf32>
    %152 = tpu.matmul %149, %151, %cst_228 {dimension_numbers = #tpu.dot_dimension_numbers<[1], [0], [0], [1], [0, 0, 1, 1], [], []>} : vector<256x16xbf16>, vector<16x16xbf16>, vector<256x16xf32> -> vector<256x16xf32>
    %153 = arith.addf %146, %152 : vector<256x16xf32>
    %c1_229 = arith.constant 1 : index
    %c2_230 = arith.constant 2 : index
    %c2_231 = arith.constant 2 : index
    %c0_232 = arith.constant 0 : index
    %154 = vector.load %arg10[%c1_229, %c2_230, %c2_231, %c0_232] : memref<6x10x10x16xf32, #tpu.memory_space<vmem>>, vector<4x8x8x16xf32>
    %155 = vector.shape_cast %154 : vector<4x8x8x16xf32> to vector<256x16xf32>
    %156 = arith.truncf %155 : vector<256x16xf32> to vector<256x16xbf16>
    %c1_233 = arith.constant 1 : index
    %c2_234 = arith.constant 2 : index
    %c2_235 = arith.constant 2 : index
    %c0_236 = arith.constant 0 : index
    %c0_237 = arith.constant 0 : index
    %157 = vector.load %arg4[%c1_233, %c2_234, %c2_235, %c0_236, %c0_237] : memref<3x3x3x16x16xbf16, #tpu.memory_space<vmem>>, vector<1x1x1x16x16xbf16>
    %158 = vector.shape_cast %157 : vector<1x1x1x16x16xbf16> to vector<16x16xbf16>
    %cst_238 = arith.constant dense<0.000000e+00> : vector<256x16xf32>
    %159 = tpu.matmul %156, %158, %cst_238 {dimension_numbers = #tpu.dot_dimension_numbers<[1], [0], [0], [1], [0, 0, 1, 1], [], []>} : vector<256x16xbf16>, vector<16x16xbf16>, vector<256x16xf32> -> vector<256x16xf32>
    %160 = arith.addf %153, %159 : vector<256x16xf32>
    %c2_239 = arith.constant 2 : index
    %c0_240 = arith.constant 0 : index
    %c0_241 = arith.constant 0 : index
    %c0_242 = arith.constant 0 : index
    %161 = vector.load %arg10[%c2_239, %c0_240, %c0_241, %c0_242] : memref<6x10x10x16xf32, #tpu.memory_space<vmem>>, vector<4x8x8x16xf32>
    %162 = vector.shape_cast %161 : vector<4x8x8x16xf32> to vector<256x16xf32>
    %163 = arith.truncf %162 : vector<256x16xf32> to vector<256x16xbf16>
    %c2_243 = arith.constant 2 : index
    %c0_244 = arith.constant 0 : index
    %c0_245 = arith.constant 0 : index
    %c0_246 = arith.constant 0 : index
    %c0_247 = arith.constant 0 : index
    %164 = vector.load %arg4[%c2_243, %c0_244, %c0_245, %c0_246, %c0_247] : memref<3x3x3x16x16xbf16, #tpu.memory_space<vmem>>, vector<1x1x1x16x16xbf16>
    %165 = vector.shape_cast %164 : vector<1x1x1x16x16xbf16> to vector<16x16xbf16>
    %cst_248 = arith.constant dense<0.000000e+00> : vector<256x16xf32>
    %166 = tpu.matmul %163, %165, %cst_248 {dimension_numbers = #tpu.dot_dimension_numbers<[1], [0], [0], [1], [0, 0, 1, 1], [], []>} : vector<256x16xbf16>, vector<16x16xbf16>, vector<256x16xf32> -> vector<256x16xf32>
    %167 = arith.addf %160, %166 : vector<256x16xf32>
    %c2_249 = arith.constant 2 : index
    %c0_250 = arith.constant 0 : index
    %c1_251 = arith.constant 1 : index
    %c0_252 = arith.constant 0 : index
    %168 = vector.load %arg10[%c2_249, %c0_250, %c1_251, %c0_252] : memref<6x10x10x16xf32, #tpu.memory_space<vmem>>, vector<4x8x8x16xf32>
    %169 = vector.shape_cast %168 : vector<4x8x8x16xf32> to vector<256x16xf32>
    %170 = arith.truncf %169 : vector<256x16xf32> to vector<256x16xbf16>
    %c2_253 = arith.constant 2 : index
    %c0_254 = arith.constant 0 : index
    %c1_255 = arith.constant 1 : index
    %c0_256 = arith.constant 0 : index
    %c0_257 = arith.constant 0 : index
    %171 = vector.load %arg4[%c2_253, %c0_254, %c1_255, %c0_256, %c0_257] : memref<3x3x3x16x16xbf16, #tpu.memory_space<vmem>>, vector<1x1x1x16x16xbf16>
    %172 = vector.shape_cast %171 : vector<1x1x1x16x16xbf16> to vector<16x16xbf16>
    %cst_258 = arith.constant dense<0.000000e+00> : vector<256x16xf32>
    %173 = tpu.matmul %170, %172, %cst_258 {dimension_numbers = #tpu.dot_dimension_numbers<[1], [0], [0], [1], [0, 0, 1, 1], [], []>} : vector<256x16xbf16>, vector<16x16xbf16>, vector<256x16xf32> -> vector<256x16xf32>
    %174 = arith.addf %167, %173 : vector<256x16xf32>
    %c2_259 = arith.constant 2 : index
    %c0_260 = arith.constant 0 : index
    %c2_261 = arith.constant 2 : index
    %c0_262 = arith.constant 0 : index
    %175 = vector.load %arg10[%c2_259, %c0_260, %c2_261, %c0_262] : memref<6x10x10x16xf32, #tpu.memory_space<vmem>>, vector<4x8x8x16xf32>
    %176 = vector.shape_cast %175 : vector<4x8x8x16xf32> to vector<256x16xf32>
    %177 = arith.truncf %176 : vector<256x16xf32> to vector<256x16xbf16>
    %c2_263 = arith.constant 2 : index
    %c0_264 = arith.constant 0 : index
    %c2_265 = arith.constant 2 : index
    %c0_266 = arith.constant 0 : index
    %c0_267 = arith.constant 0 : index
    %178 = vector.load %arg4[%c2_263, %c0_264, %c2_265, %c0_266, %c0_267] : memref<3x3x3x16x16xbf16, #tpu.memory_space<vmem>>, vector<1x1x1x16x16xbf16>
    %179 = vector.shape_cast %178 : vector<1x1x1x16x16xbf16> to vector<16x16xbf16>
    %cst_268 = arith.constant dense<0.000000e+00> : vector<256x16xf32>
    %180 = tpu.matmul %177, %179, %cst_268 {dimension_numbers = #tpu.dot_dimension_numbers<[1], [0], [0], [1], [0, 0, 1, 1], [], []>} : vector<256x16xbf16>, vector<16x16xbf16>, vector<256x16xf32> -> vector<256x16xf32>
    %181 = arith.addf %174, %180 : vector<256x16xf32>
    %c2_269 = arith.constant 2 : index
    %c1_270 = arith.constant 1 : index
    %c0_271 = arith.constant 0 : index
    %c0_272 = arith.constant 0 : index
    %182 = vector.load %arg10[%c2_269, %c1_270, %c0_271, %c0_272] : memref<6x10x10x16xf32, #tpu.memory_space<vmem>>, vector<4x8x8x16xf32>
    %183 = vector.shape_cast %182 : vector<4x8x8x16xf32> to vector<256x16xf32>
    %184 = arith.truncf %183 : vector<256x16xf32> to vector<256x16xbf16>
    %c2_273 = arith.constant 2 : index
    %c1_274 = arith.constant 1 : index
    %c0_275 = arith.constant 0 : index
    %c0_276 = arith.constant 0 : index
    %c0_277 = arith.constant 0 : index
    %185 = vector.load %arg4[%c2_273, %c1_274, %c0_275, %c0_276, %c0_277] : memref<3x3x3x16x16xbf16, #tpu.memory_space<vmem>>, vector<1x1x1x16x16xbf16>
    %186 = vector.shape_cast %185 : vector<1x1x1x16x16xbf16> to vector<16x16xbf16>
    %cst_278 = arith.constant dense<0.000000e+00> : vector<256x16xf32>
    %187 = tpu.matmul %184, %186, %cst_278 {dimension_numbers = #tpu.dot_dimension_numbers<[1], [0], [0], [1], [0, 0, 1, 1], [], []>} : vector<256x16xbf16>, vector<16x16xbf16>, vector<256x16xf32> -> vector<256x16xf32>
    %188 = arith.addf %181, %187 : vector<256x16xf32>
    %c2_279 = arith.constant 2 : index
    %c1_280 = arith.constant 1 : index
    %c1_281 = arith.constant 1 : index
    %c0_282 = arith.constant 0 : index
    %189 = vector.load %arg10[%c2_279, %c1_280, %c1_281, %c0_282] : memref<6x10x10x16xf32, #tpu.memory_space<vmem>>, vector<4x8x8x16xf32>
    %190 = vector.shape_cast %189 : vector<4x8x8x16xf32> to vector<256x16xf32>
    %191 = arith.truncf %190 : vector<256x16xf32> to vector<256x16xbf16>
    %c2_283 = arith.constant 2 : index
    %c1_284 = arith.constant 1 : index
    %c1_285 = arith.constant 1 : index
    %c0_286 = arith.constant 0 : index
    %c0_287 = arith.constant 0 : index
    %192 = vector.load %arg4[%c2_283, %c1_284, %c1_285, %c0_286, %c0_287] : memref<3x3x3x16x16xbf16, #tpu.memory_space<vmem>>, vector<1x1x1x16x16xbf16>
    %193 = vector.shape_cast %192 : vector<1x1x1x16x16xbf16> to vector<16x16xbf16>
    %cst_288 = arith.constant dense<0.000000e+00> : vector<256x16xf32>
    %194 = tpu.matmul %191, %193, %cst_288 {dimension_numbers = #tpu.dot_dimension_numbers<[1], [0], [0], [1], [0, 0, 1, 1], [], []>} : vector<256x16xbf16>, vector<16x16xbf16>, vector<256x16xf32> -> vector<256x16xf32>
    %195 = arith.addf %188, %194 : vector<256x16xf32>
    %c2_289 = arith.constant 2 : index
    %c1_290 = arith.constant 1 : index
    %c2_291 = arith.constant 2 : index
    %c0_292 = arith.constant 0 : index
    %196 = vector.load %arg10[%c2_289, %c1_290, %c2_291, %c0_292] : memref<6x10x10x16xf32, #tpu.memory_space<vmem>>, vector<4x8x8x16xf32>
    %197 = vector.shape_cast %196 : vector<4x8x8x16xf32> to vector<256x16xf32>
    %198 = arith.truncf %197 : vector<256x16xf32> to vector<256x16xbf16>
    %c2_293 = arith.constant 2 : index
    %c1_294 = arith.constant 1 : index
    %c2_295 = arith.constant 2 : index
    %c0_296 = arith.constant 0 : index
    %c0_297 = arith.constant 0 : index
    %199 = vector.load %arg4[%c2_293, %c1_294, %c2_295, %c0_296, %c0_297] : memref<3x3x3x16x16xbf16, #tpu.memory_space<vmem>>, vector<1x1x1x16x16xbf16>
    %200 = vector.shape_cast %199 : vector<1x1x1x16x16xbf16> to vector<16x16xbf16>
    %cst_298 = arith.constant dense<0.000000e+00> : vector<256x16xf32>
    %201 = tpu.matmul %198, %200, %cst_298 {dimension_numbers = #tpu.dot_dimension_numbers<[1], [0], [0], [1], [0, 0, 1, 1], [], []>} : vector<256x16xbf16>, vector<16x16xbf16>, vector<256x16xf32> -> vector<256x16xf32>
    %202 = arith.addf %195, %201 : vector<256x16xf32>
    %c2_299 = arith.constant 2 : index
    %c2_300 = arith.constant 2 : index
    %c0_301 = arith.constant 0 : index
    %c0_302 = arith.constant 0 : index
    %203 = vector.load %arg10[%c2_299, %c2_300, %c0_301, %c0_302] : memref<6x10x10x16xf32, #tpu.memory_space<vmem>>, vector<4x8x8x16xf32>
    %204 = vector.shape_cast %203 : vector<4x8x8x16xf32> to vector<256x16xf32>
    %205 = arith.truncf %204 : vector<256x16xf32> to vector<256x16xbf16>
    %c2_303 = arith.constant 2 : index
    %c2_304 = arith.constant 2 : index
    %c0_305 = arith.constant 0 : index
    %c0_306 = arith.constant 0 : index
    %c0_307 = arith.constant 0 : index
    %206 = vector.load %arg4[%c2_303, %c2_304, %c0_305, %c0_306, %c0_307] : memref<3x3x3x16x16xbf16, #tpu.memory_space<vmem>>, vector<1x1x1x16x16xbf16>
    %207 = vector.shape_cast %206 : vector<1x1x1x16x16xbf16> to vector<16x16xbf16>
    %cst_308 = arith.constant dense<0.000000e+00> : vector<256x16xf32>
    %208 = tpu.matmul %205, %207, %cst_308 {dimension_numbers = #tpu.dot_dimension_numbers<[1], [0], [0], [1], [0, 0, 1, 1], [], []>} : vector<256x16xbf16>, vector<16x16xbf16>, vector<256x16xf32> -> vector<256x16xf32>
    %209 = arith.addf %202, %208 : vector<256x16xf32>
    %c2_309 = arith.constant 2 : index
    %c2_310 = arith.constant 2 : index
    %c1_311 = arith.constant 1 : index
    %c0_312 = arith.constant 0 : index
    %210 = vector.load %arg10[%c2_309, %c2_310, %c1_311, %c0_312] : memref<6x10x10x16xf32, #tpu.memory_space<vmem>>, vector<4x8x8x16xf32>
    %211 = vector.shape_cast %210 : vector<4x8x8x16xf32> to vector<256x16xf32>
    %212 = arith.truncf %211 : vector<256x16xf32> to vector<256x16xbf16>
    %c2_313 = arith.constant 2 : index
    %c2_314 = arith.constant 2 : index
    %c1_315 = arith.constant 1 : index
    %c0_316 = arith.constant 0 : index
    %c0_317 = arith.constant 0 : index
    %213 = vector.load %arg4[%c2_313, %c2_314, %c1_315, %c0_316, %c0_317] : memref<3x3x3x16x16xbf16, #tpu.memory_space<vmem>>, vector<1x1x1x16x16xbf16>
    %214 = vector.shape_cast %213 : vector<1x1x1x16x16xbf16> to vector<16x16xbf16>
    %cst_318 = arith.constant dense<0.000000e+00> : vector<256x16xf32>
    %215 = tpu.matmul %212, %214, %cst_318 {dimension_numbers = #tpu.dot_dimension_numbers<[1], [0], [0], [1], [0, 0, 1, 1], [], []>} : vector<256x16xbf16>, vector<16x16xbf16>, vector<256x16xf32> -> vector<256x16xf32>
    %216 = arith.addf %209, %215 : vector<256x16xf32>
    %c2_319 = arith.constant 2 : index
    %c2_320 = arith.constant 2 : index
    %c2_321 = arith.constant 2 : index
    %c0_322 = arith.constant 0 : index
    %217 = vector.load %arg10[%c2_319, %c2_320, %c2_321, %c0_322] : memref<6x10x10x16xf32, #tpu.memory_space<vmem>>, vector<4x8x8x16xf32>
    %218 = vector.shape_cast %217 : vector<4x8x8x16xf32> to vector<256x16xf32>
    %219 = arith.truncf %218 : vector<256x16xf32> to vector<256x16xbf16>
    %c2_323 = arith.constant 2 : index
    %c2_324 = arith.constant 2 : index
    %c2_325 = arith.constant 2 : index
    %c0_326 = arith.constant 0 : index
    %c0_327 = arith.constant 0 : index
    %220 = vector.load %arg4[%c2_323, %c2_324, %c2_325, %c0_326, %c0_327] : memref<3x3x3x16x16xbf16, #tpu.memory_space<vmem>>, vector<1x1x1x16x16xbf16>
    %221 = vector.shape_cast %220 : vector<1x1x1x16x16xbf16> to vector<16x16xbf16>
    %cst_328 = arith.constant dense<0.000000e+00> : vector<256x16xf32>
    %222 = tpu.matmul %219, %221, %cst_328 {dimension_numbers = #tpu.dot_dimension_numbers<[1], [0], [0], [1], [0, 0, 1, 1], [], []>} : vector<256x16xbf16>, vector<16x16xbf16>, vector<256x16xf32> -> vector<256x16xf32>
    %223 = arith.addf %216, %222 : vector<256x16xf32>
    %c0_329 = arith.constant 0 : index
    %c0_330 = arith.constant 0 : index
    %224 = vector.load %arg5[%c0_329, %c0_330] : memref<1x16xf32, #tpu.memory_space<vmem>>, vector<1x16xf32>
    %225 = vector.broadcast %224 : vector<1x16xf32> to vector<256x16xf32>
    %226 = arith.mulf %223, %225 : vector<256x16xf32>
    %c0_331 = arith.constant 0 : index
    %c0_332 = arith.constant 0 : index
    %227 = vector.load %arg6[%c0_331, %c0_332] : memref<1x16xf32, #tpu.memory_space<vmem>>, vector<1x16xf32>
    %228 = vector.broadcast %227 : vector<1x16xf32> to vector<256x16xf32>
    %229 = arith.addf %226, %228 : vector<256x16xf32>
    %cst_333 = arith.constant 0.000000e+00 : f32
    %230 = vector.broadcast %cst_333 : f32 to vector<256x16xf32>
    %231 = arith.maximumf %229, %230 : vector<256x16xf32>
    %232 = vector.shape_cast %231 : vector<256x16xf32> to vector<4x8x8x16xf32>
    %c0_334 = arith.constant 0 : index
    %c1_335 = arith.constant 1 : index
    %c1_336 = arith.constant 1 : index
    %c0_337 = arith.constant 0 : index
    %233 = vector.load %arg11[%c0_334, %c1_335, %c1_336, %c0_337] : memref<4x10x10x16xf32, #tpu.memory_space<vmem>>, vector<4x8x8x16xf32>
    tpu.vector_store %arg11[%c0_334, %c1_335, %c1_336, %c0_337], %232 {strides = array<i32>} : memref<4x10x10x16xf32, #tpu.memory_space<vmem>>, vector<4x8x8x16xf32>,
    %cst_338 = arith.constant 0.000000e+00 : f32
    %234 = vector.broadcast %cst_338 : f32 to vector<256x16xf32>
    %c0_339 = arith.constant 0 : index
    %c0_340 = arith.constant 0 : index
    %c0_341 = arith.constant 0 : index
    %c0_342 = arith.constant 0 : index
    %235 = vector.load %arg11[%c0_339, %c0_340, %c0_341, %c0_342] : memref<4x10x10x16xf32, #tpu.memory_space<vmem>>, vector<4x8x8x16xf32>
    %236 = vector.shape_cast %235 : vector<4x8x8x16xf32> to vector<256x16xf32>
    %237 = arith.truncf %236 : vector<256x16xf32> to vector<256x16xbf16>
    %c0_343 = arith.constant 0 : index
    %c0_344 = arith.constant 0 : index
    %c0_345 = arith.constant 0 : index
    %c0_346 = arith.constant 0 : index
    %c0_347 = arith.constant 0 : index
    %238 = vector.load %arg7[%c0_343, %c0_344, %c0_345, %c0_346, %c0_347] : memref<1x3x3x16x16xbf16, #tpu.memory_space<vmem>>, vector<1x1x1x16x16xbf16>
    %239 = vector.shape_cast %238 : vector<1x1x1x16x16xbf16> to vector<16x16xbf16>
    %cst_348 = arith.constant dense<0.000000e+00> : vector<256x16xf32>
    %240 = tpu.matmul %237, %239, %cst_348 {dimension_numbers = #tpu.dot_dimension_numbers<[1], [0], [0], [1], [0, 0, 1, 1], [], []>} : vector<256x16xbf16>, vector<16x16xbf16>, vector<256x16xf32> -> vector<256x16xf32>
    %241 = arith.addf %234, %240 : vector<256x16xf32>
    %c0_349 = arith.constant 0 : index
    %c0_350 = arith.constant 0 : index
    %c1_351 = arith.constant 1 : index
    %c0_352 = arith.constant 0 : index
    %242 = vector.load %arg11[%c0_349, %c0_350, %c1_351, %c0_352] : memref<4x10x10x16xf32, #tpu.memory_space<vmem>>, vector<4x8x8x16xf32>
    %243 = vector.shape_cast %242 : vector<4x8x8x16xf32> to vector<256x16xf32>
    %244 = arith.truncf %243 : vector<256x16xf32> to vector<256x16xbf16>
    %c0_353 = arith.constant 0 : index
    %c0_354 = arith.constant 0 : index
    %c1_355 = arith.constant 1 : index
    %c0_356 = arith.constant 0 : index
    %c0_357 = arith.constant 0 : index
    %245 = vector.load %arg7[%c0_353, %c0_354, %c1_355, %c0_356, %c0_357] : memref<1x3x3x16x16xbf16, #tpu.memory_space<vmem>>, vector<1x1x1x16x16xbf16>
    %246 = vector.shape_cast %245 : vector<1x1x1x16x16xbf16> to vector<16x16xbf16>
    %cst_358 = arith.constant dense<0.000000e+00> : vector<256x16xf32>
    %247 = tpu.matmul %244, %246, %cst_358 {dimension_numbers = #tpu.dot_dimension_numbers<[1], [0], [0], [1], [0, 0, 1, 1], [], []>} : vector<256x16xbf16>, vector<16x16xbf16>, vector<256x16xf32> -> vector<256x16xf32>
    %248 = arith.addf %241, %247 : vector<256x16xf32>
    %c0_359 = arith.constant 0 : index
    %c0_360 = arith.constant 0 : index
    %c2_361 = arith.constant 2 : index
    %c0_362 = arith.constant 0 : index
    %249 = vector.load %arg11[%c0_359, %c0_360, %c2_361, %c0_362] : memref<4x10x10x16xf32, #tpu.memory_space<vmem>>, vector<4x8x8x16xf32>
    %250 = vector.shape_cast %249 : vector<4x8x8x16xf32> to vector<256x16xf32>
    %251 = arith.truncf %250 : vector<256x16xf32> to vector<256x16xbf16>
    %c0_363 = arith.constant 0 : index
    %c0_364 = arith.constant 0 : index
    %c2_365 = arith.constant 2 : index
    %c0_366 = arith.constant 0 : index
    %c0_367 = arith.constant 0 : index
    %252 = vector.load %arg7[%c0_363, %c0_364, %c2_365, %c0_366, %c0_367] : memref<1x3x3x16x16xbf16, #tpu.memory_space<vmem>>, vector<1x1x1x16x16xbf16>
    %253 = vector.shape_cast %252 : vector<1x1x1x16x16xbf16> to vector<16x16xbf16>
    %cst_368 = arith.constant dense<0.000000e+00> : vector<256x16xf32>
    %254 = tpu.matmul %251, %253, %cst_368 {dimension_numbers = #tpu.dot_dimension_numbers<[1], [0], [0], [1], [0, 0, 1, 1], [], []>} : vector<256x16xbf16>, vector<16x16xbf16>, vector<256x16xf32> -> vector<256x16xf32>
    %255 = arith.addf %248, %254 : vector<256x16xf32>
    %c0_369 = arith.constant 0 : index
    %c1_370 = arith.constant 1 : index
    %c0_371 = arith.constant 0 : index
    %c0_372 = arith.constant 0 : index
    %256 = vector.load %arg11[%c0_369, %c1_370, %c0_371, %c0_372] : memref<4x10x10x16xf32, #tpu.memory_space<vmem>>, vector<4x8x8x16xf32>
    %257 = vector.shape_cast %256 : vector<4x8x8x16xf32> to vector<256x16xf32>
    %258 = arith.truncf %257 : vector<256x16xf32> to vector<256x16xbf16>
    %c0_373 = arith.constant 0 : index
    %c1_374 = arith.constant 1 : index
    %c0_375 = arith.constant 0 : index
    %c0_376 = arith.constant 0 : index
    %c0_377 = arith.constant 0 : index
    %259 = vector.load %arg7[%c0_373, %c1_374, %c0_375, %c0_376, %c0_377] : memref<1x3x3x16x16xbf16, #tpu.memory_space<vmem>>, vector<1x1x1x16x16xbf16>
    %260 = vector.shape_cast %259 : vector<1x1x1x16x16xbf16> to vector<16x16xbf16>
    %cst_378 = arith.constant dense<0.000000e+00> : vector<256x16xf32>
    %261 = tpu.matmul %258, %260, %cst_378 {dimension_numbers = #tpu.dot_dimension_numbers<[1], [0], [0], [1], [0, 0, 1, 1], [], []>} : vector<256x16xbf16>, vector<16x16xbf16>, vector<256x16xf32> -> vector<256x16xf32>
    %262 = arith.addf %255, %261 : vector<256x16xf32>
    %c0_379 = arith.constant 0 : index
    %c1_380 = arith.constant 1 : index
    %c1_381 = arith.constant 1 : index
    %c0_382 = arith.constant 0 : index
    %263 = vector.load %arg11[%c0_379, %c1_380, %c1_381, %c0_382] : memref<4x10x10x16xf32, #tpu.memory_space<vmem>>, vector<4x8x8x16xf32>
    %264 = vector.shape_cast %263 : vector<4x8x8x16xf32> to vector<256x16xf32>
    %265 = arith.truncf %264 : vector<256x16xf32> to vector<256x16xbf16>
    %c0_383 = arith.constant 0 : index
    %c1_384 = arith.constant 1 : index
    %c1_385 = arith.constant 1 : index
    %c0_386 = arith.constant 0 : index
    %c0_387 = arith.constant 0 : index
    %266 = vector.load %arg7[%c0_383, %c1_384, %c1_385, %c0_386, %c0_387] : memref<1x3x3x16x16xbf16, #tpu.memory_space<vmem>>, vector<1x1x1x16x16xbf16>
    %267 = vector.shape_cast %266 : vector<1x1x1x16x16xbf16> to vector<16x16xbf16>
    %cst_388 = arith.constant dense<0.000000e+00> : vector<256x16xf32>
    %268 = tpu.matmul %265, %267, %cst_388 {dimension_numbers = #tpu.dot_dimension_numbers<[1], [0], [0], [1], [0, 0, 1, 1], [], []>} : vector<256x16xbf16>, vector<16x16xbf16>, vector<256x16xf32> -> vector<256x16xf32>
    %269 = arith.addf %262, %268 : vector<256x16xf32>
    %c0_389 = arith.constant 0 : index
    %c1_390 = arith.constant 1 : index
    %c2_391 = arith.constant 2 : index
    %c0_392 = arith.constant 0 : index
    %270 = vector.load %arg11[%c0_389, %c1_390, %c2_391, %c0_392] : memref<4x10x10x16xf32, #tpu.memory_space<vmem>>, vector<4x8x8x16xf32>
    %271 = vector.shape_cast %270 : vector<4x8x8x16xf32> to vector<256x16xf32>
    %272 = arith.truncf %271 : vector<256x16xf32> to vector<256x16xbf16>
    %c0_393 = arith.constant 0 : index
    %c1_394 = arith.constant 1 : index
    %c2_395 = arith.constant 2 : index
    %c0_396 = arith.constant 0 : index
    %c0_397 = arith.constant 0 : index
    %273 = vector.load %arg7[%c0_393, %c1_394, %c2_395, %c0_396, %c0_397] : memref<1x3x3x16x16xbf16, #tpu.memory_space<vmem>>, vector<1x1x1x16x16xbf16>
    %274 = vector.shape_cast %273 : vector<1x1x1x16x16xbf16> to vector<16x16xbf16>
    %cst_398 = arith.constant dense<0.000000e+00> : vector<256x16xf32>
    %275 = tpu.matmul %272, %274, %cst_398 {dimension_numbers = #tpu.dot_dimension_numbers<[1], [0], [0], [1], [0, 0, 1, 1], [], []>} : vector<256x16xbf16>, vector<16x16xbf16>, vector<256x16xf32> -> vector<256x16xf32>
    %276 = arith.addf %269, %275 : vector<256x16xf32>
    %c0_399 = arith.constant 0 : index
    %c2_400 = arith.constant 2 : index
    %c0_401 = arith.constant 0 : index
    %c0_402 = arith.constant 0 : index
    %277 = vector.load %arg11[%c0_399, %c2_400, %c0_401, %c0_402] : memref<4x10x10x16xf32, #tpu.memory_space<vmem>>, vector<4x8x8x16xf32>
    %278 = vector.shape_cast %277 : vector<4x8x8x16xf32> to vector<256x16xf32>
    %279 = arith.truncf %278 : vector<256x16xf32> to vector<256x16xbf16>
    %c0_403 = arith.constant 0 : index
    %c2_404 = arith.constant 2 : index
    %c0_405 = arith.constant 0 : index
    %c0_406 = arith.constant 0 : index
    %c0_407 = arith.constant 0 : index
    %280 = vector.load %arg7[%c0_403, %c2_404, %c0_405, %c0_406, %c0_407] : memref<1x3x3x16x16xbf16, #tpu.memory_space<vmem>>, vector<1x1x1x16x16xbf16>
    %281 = vector.shape_cast %280 : vector<1x1x1x16x16xbf16> to vector<16x16xbf16>
    %cst_408 = arith.constant dense<0.000000e+00> : vector<256x16xf32>
    %282 = tpu.matmul %279, %281, %cst_408 {dimension_numbers = #tpu.dot_dimension_numbers<[1], [0], [0], [1], [0, 0, 1, 1], [], []>} : vector<256x16xbf16>, vector<16x16xbf16>, vector<256x16xf32> -> vector<256x16xf32>
    %283 = arith.addf %276, %282 : vector<256x16xf32>
    %c0_409 = arith.constant 0 : index
    %c2_410 = arith.constant 2 : index
    %c1_411 = arith.constant 1 : index
    %c0_412 = arith.constant 0 : index
    %284 = vector.load %arg11[%c0_409, %c2_410, %c1_411, %c0_412] : memref<4x10x10x16xf32, #tpu.memory_space<vmem>>, vector<4x8x8x16xf32>
    %285 = vector.shape_cast %284 : vector<4x8x8x16xf32> to vector<256x16xf32>
    %286 = arith.truncf %285 : vector<256x16xf32> to vector<256x16xbf16>
    %c0_413 = arith.constant 0 : index
    %c2_414 = arith.constant 2 : index
    %c1_415 = arith.constant 1 : index
    %c0_416 = arith.constant 0 : index
    %c0_417 = arith.constant 0 : index
    %287 = vector.load %arg7[%c0_413, %c2_414, %c1_415, %c0_416, %c0_417] : memref<1x3x3x16x16xbf16, #tpu.memory_space<vmem>>, vector<1x1x1x16x16xbf16>
    %288 = vector.shape_cast %287 : vector<1x1x1x16x16xbf16> to vector<16x16xbf16>
    %cst_418 = arith.constant dense<0.000000e+00> : vector<256x16xf32>
    %289 = tpu.matmul %286, %288, %cst_418 {dimension_numbers = #tpu.dot_dimension_numbers<[1], [0], [0], [1], [0, 0, 1, 1], [], []>} : vector<256x16xbf16>, vector<16x16xbf16>, vector<256x16xf32> -> vector<256x16xf32>
    %290 = arith.addf %283, %289 : vector<256x16xf32>
    %c0_419 = arith.constant 0 : index
    %c2_420 = arith.constant 2 : index
    %c2_421 = arith.constant 2 : index
    %c0_422 = arith.constant 0 : index
    %291 = vector.load %arg11[%c0_419, %c2_420, %c2_421, %c0_422] : memref<4x10x10x16xf32, #tpu.memory_space<vmem>>, vector<4x8x8x16xf32>
    %292 = vector.shape_cast %291 : vector<4x8x8x16xf32> to vector<256x16xf32>
    %293 = arith.truncf %292 : vector<256x16xf32> to vector<256x16xbf16>
    %c0_423 = arith.constant 0 : index
    %c2_424 = arith.constant 2 : index
    %c2_425 = arith.constant 2 : index
    %c0_426 = arith.constant 0 : index
    %c0_427 = arith.constant 0 : index
    %294 = vector.load %arg7[%c0_423, %c2_424, %c2_425, %c0_426, %c0_427] : memref<1x3x3x16x16xbf16, #tpu.memory_space<vmem>>, vector<1x1x1x16x16xbf16>
    %295 = vector.shape_cast %294 : vector<1x1x1x16x16xbf16> to vector<16x16xbf16>
    %cst_428 = arith.constant dense<0.000000e+00> : vector<256x16xf32>
    %296 = tpu.matmul %293, %295, %cst_428 {dimension_numbers = #tpu.dot_dimension_numbers<[1], [0], [0], [1], [0, 0, 1, 1], [], []>} : vector<256x16xbf16>, vector<16x16xbf16>, vector<256x16xf32> -> vector<256x16xf32>
    %297 = arith.addf %290, %296 : vector<256x16xf32>
    %298 = vector.shape_cast %297 : vector<256x16xf32> to vector<4x8x8x16xf32>
    %c0_429 = arith.constant 0 : index
    %c0_430 = arith.constant 0 : index
    %c0_431 = arith.constant 0 : index
    %c0_432 = arith.constant 0 : index
    %c0_433 = arith.constant 0 : index
    %299 = vector.load %arg8[%c0_429, %c0_430, %c0_431, %c0_432, %c0_433] : memref<1x4x8x8x16xf32, #tpu.memory_space<vmem>>, vector<1x4x8x8x16xf32>
    %300 = vector.shape_cast %299 : vector<1x4x8x8x16xf32> to vector<4x8x8x16xf32>
    %301 = arith.addf %298, %300 : vector<4x8x8x16xf32>
    %c0_434 = arith.constant 0 : index
    %c0_435 = arith.constant 0 : index
    %c0_436 = arith.constant 0 : index
    %c0_437 = arith.constant 0 : index
    %c0_438 = arith.constant 0 : index
    %302 = vector.load %arg9[%c0_434, %c0_435, %c0_436, %c0_437, %c0_438] : memref<1x4x8x8x16xf32, #tpu.memory_space<vmem>>, vector<1x4x8x8x16xf32>
    %303 = vector.shape_cast %302 : vector<1x4x8x8x16xf32> to vector<4x8x8x16xf32>
    %304 = vector.shape_cast %301 : vector<4x8x8x16xf32> to vector<1x4x8x8x16xf32>
    tpu.vector_store %arg9[%c0_434, %c0_435, %c0_436, %c0_437, %c0_438], %304 {strides = array<i32>} : memref<1x4x8x8x16xf32, #tpu.memory_space<vmem>>, vector<1x4x8x8x16xf32>,
    return
  }
  func.func @transform_0(%arg0: i32) -> (i32, i32, i32, i32, i32) {
    %c0_i32 = arith.constant 0 : i32
    %c0_i32_0 = arith.constant 0 : i32
    %c0_i32_1 = arith.constant 0 : i32
    %c0_i32_2 = arith.constant 0 : i32
    %c0_i32_3 = arith.constant 0 : i32
    return %arg0, %c0_i32, %c0_i32_0, %c0_i32_1, %c0_i32_2 : i32, i32, i32, i32, i32
  }
  func.func @transform_1(%arg0: i32) -> (i32, i32) {
    %c0_i32 = arith.constant 0 : i32
    %c0_i32_0 = arith.constant 0 : i32
    %c0_i32_1 = arith.constant 0 : i32
    return %c0_i32, %c0_i32_0 : i32, i32
  }
  func.func @transform_2(%arg0: i32) -> (i32, i32) {
    %c0_i32 = arith.constant 0 : i32
    %c0_i32_0 = arith.constant 0 : i32
    %c0_i32_1 = arith.constant 0 : i32
    return %c0_i32, %c0_i32_0 : i32, i32
  }
  func.func @transform_3(%arg0: i32) -> (i32, i32, i32, i32, i32) {
    %c0_i32 = arith.constant 0 : i32
    %c0_i32_0 = arith.constant 0 : i32
    %c0_i32_1 = arith.constant 0 : i32
    %c0_i32_2 = arith.constant 0 : i32
    %c0_i32_3 = arith.constant 0 : i32
    %c0_i32_4 = arith.constant 0 : i32
    return %c0_i32, %c0_i32_0, %c0_i32_1, %c0_i32_2, %c0_i32_3 : i32, i32, i32, i32, i32
  }
  func.func @transform_4(%arg0: i32) -> (i32, i32) {
    %c0_i32 = arith.constant 0 : i32
    %c0_i32_0 = arith.constant 0 : i32
    %c0_i32_1 = arith.constant 0 : i32
    return %c0_i32, %c0_i32_0 : i32, i32
  }
  func.func @transform_5(%arg0: i32) -> (i32, i32) {
    %c0_i32 = arith.constant 0 : i32
    %c0_i32_0 = arith.constant 0 : i32
    %c0_i32_1 = arith.constant 0 : i32
    return %c0_i32, %c0_i32_0 : i32, i32
  }
  func.func @transform_6(%arg0: i32) -> (i32, i32, i32, i32, i32) {
    %c0_i32 = arith.constant 0 : i32
    %c0_i32_0 = arith.constant 0 : i32
    %c0_i32_1 = arith.constant 0 : i32
    %c0_i32_2 = arith.constant 0 : i32
    %c0_i32_3 = arith.constant 0 : i32
    %c0_i32_4 = arith.constant 0 : i32
    return %c0_i32, %c0_i32_0, %c0_i32_1, %c0_i32_2, %c0_i32_3 : i32, i32, i32, i32, i32
  }
  func.func @transform_7(%arg0: i32) -> (i32, i32, i32, i32, i32) {
    %c0_i32 = arith.constant 0 : i32
    %c0_i32_0 = arith.constant 0 : i32
    %c0_i32_1 = arith.constant 0 : i32
    %c0_i32_2 = arith.constant 0 : i32
    %c0_i32_3 = arith.constant 0 : i32
    return %arg0, %c0_i32, %c0_i32_0, %c0_i32_1, %c0_i32_2 : i32, i32, i32, i32, i32
  }
  func.func @transform_8(%arg0: i32) -> (i32, i32, i32, i32, i32) {
    %c0_i32 = arith.constant 0 : i32
    %c0_i32_0 = arith.constant 0 : i32
    %c0_i32_1 = arith.constant 0 : i32
    %c0_i32_2 = arith.constant 0 : i32
    %c0_i32_3 = arith.constant 0 : i32
    return %arg0, %c0_i32, %c0_i32_0, %c0_i32_1, %c0_i32_2 : i32, i32, i32, i32, i32
  }
}

</mosaic_0001>

<bundles_post_ra>
// kernel: mf_unit_forward.2
= control target key start
LH: loop header
LB: loop body
LE: loop exit
PB: predicated region body
PF: predicated region fallthrough
CT: control target
= control target key end

     0   :  { %vm337_vm0 = vcmask 130048   ;;  %vm1059_vm1 = vcmask 1041408   ;;  %vm962_vm2 = vcmask 31744   ;;  %vm1672_vm3 = vcmask 125952   ;;  %s3282_s3 = inlined_call_operand.vmem [shape: bf16[16,4], index: 3, kind: input, shape index: {}]   ;;  %s3283_s0 = inlined_call_operand.vmem [shape: f32[512,16], index: 0, kind: input, shape index: {}]   ;;  %s3284_s1 = inlined_call_operand.vmem [shape: f32[1,16], index: 1, kind: input, shape index: {}]   ;;  %s3285_s2 = inlined_call_operand.vmem [shape: f32[1,16], index: 2, kind: input, shape index: {}]   ;;  %s3286_s6 = inlined_call_operand.vmem [shape: bf16[4,16], index: 6, kind: input, shape index: {}]   ;;  %s3287_s4 = inlined_call_operand.vmem [shape: f32[1,4], index: 4, kind: input, shape index: {}]   ;;  %s3288_s5 = inlined_call_operand.vmem [shape: f32[1,4], index: 5, kind: input, shape index: {}]   ;;  %s3289_s7 = inlined_call_operand.vmem [shape: bf16[512,16], index: 7, kind: output, shape index: {}]  }
   0x1   :  { %v2137_v0 = vld [vmem:[%s3282_s3] sm:$0xff]   ;;  %v28_v2 = vld [vmem:[%s3283_s0 + $0x8] sm:$0xff]  ;;  %v29_v7 = vld [vmem:[%s3283_s0 + $0x10] sm:$0xff] }
   0x2   :  { %v27_v1 = vld [vmem:[%s3283_s0] sm:$0xff]  ;;  %2004 = vmatprep.subr.bf16.mxu0 %v2137_v0  ;;  %v30_v8 = vld [vmem:[%s3283_s0 + $0x18] sm:$0xff]  ;;  %v32_v12 = vld [vmem:[%s3283_s0 + $0x28] sm:$0xff] }
   0x3   :  { %v2254_v3 = vld [vmem:[%s3284_s1] ss:$0 sm:$0xff]  ;;  %2005 = vmatpush3.bf16.msra.mxu0 %v2137_v0  ;;  %v33_v13 = vld [vmem:[%s3283_s0 + $0x30] sm:$0xff]  ;;  %v34_v18 = vld [vmem:[%s3283_s0 + $0x38] sm:$0xff] }
   0x4   :  { %v98_v4 = vmul.f32 %v2254_v3, %v27_v1  ;;  %v99_v5 = vmul.f32 %v2254_v3, %v28_v2  ;;  %v2261_v6 = vld [vmem:[%s3285_s2] ss:$0 sm:$0xff]  ;;  %v100_v9 = vmul.f32 %v2254_v3, %v29_v7  ;;  %v101_v10 = vmul.f32 %v2254_v3, %v30_v8  ;;  %v36_v28 = vld [vmem:[%s3283_s0 + $0x48] sm:$0xff]  ;;  %v37_v33 = vld [vmem:[%s3283_s0 + $0x50] sm:$0xff] }
   0x5   :  { %v31_v11 = vld [vmem:[%s3283_s0 + $0x20] sm:$0xff]  ;;  %v103_v17 = vmul.f32 %v2254_v3, %v32_v12  ;;  %v104_v21 = vmul.f32 %v2254_v3, %v33_v13  ;;  %v105_v22 = vmul.f32 %v2254_v3, %v34_v18  ;;  %v38_v34 = vld [vmem:[%s3283_s0 + $0x58] sm:$0xff]  ;;  %v40_v40 = vld [vmem:[%s3283_s0 + $0x68] sm:$0xff]  ;;  %v107_v43 = vmul.f32 %v2254_v3, %v36_v28 }
   0x6   :  { %v169_v14 = vadd.f32 %v2261_v6, %v98_v4  ;;  %v170_v15 = vadd.f32 %v2261_v6, %v99_v5  ;;  %v102_v16 = vmul.f32 %v2254_v3, %v31_v11  ;;  %v171_v19 = vadd.f32 %v2261_v6, %v100_v9  ;;  %v35_v23 = vld [vmem:[%s3283_s0 + $0x40] sm:$0xff]  ;;  %v41_v44 = vld [vmem:[%s3283_s0 + $0x70] sm:$0xff]  ;;  %v42_v49 = vld [vmem:[%s3283_s0 + $0x78] sm:$0xff] }
   0x7   :  { %v172_v20 = vadd.f32 %v2261_v6, %v101_v10  ;;  %v174_v27 = vadd.f32 %v2261_v6, %v103_v17  ;;  %v175_v31 = vadd.f32 %v2261_v6, %v104_v21  ;;  %v176_v32 = vadd.f32 %v2261_v6, %v105_v22  ;;  %v39_v39 = vld [vmem:[%s3283_s0 + $0x60] sm:$0xff]  ;;  %v44_v63 = vld [vmem:[%s3283_s0 + $0x88] sm:$0xff]  ;;  %v45_v1 = vld [vmem:[%s3283_s0 + $0x90] sm:$0xff] }
   0x8   :  { %v233_v24 = vmax.f32 %v169_v14, 0.0  ;;  %v234_v25 = vmax.f32 %v170_v15, 0.0  ;;  %v173_v26 = vadd.f32 %v2261_v6, %v102_v16  ;;  %v235_v29 = vmax.f32 %v171_v19, 0.0  ;;  %v43_v54 = vld [vmem:[%s3283_s0 + $0x80] sm:$0xff]  ;;  %v46_v2 = vld [vmem:[%s3283_s0 + $0x98] sm:$0xff]  ;;  %v48_v9 = vld [vmem:[%s3283_s0 + $0xa8] sm:$0xff] }
   0x9   :  { %v236_v30 = vmax.f32 %v172_v20, 0.0  ;;  %v238_v37 = vmax.f32 %v174_v27, 0.0  ;;  %v106_v38 = vmul.f32 %v2254_v3, %v35_v23  ;;  %v239_v42 = vmax.f32 %v175_v31, 0.0  ;;  %v47_v8 = vld [vmem:[%s3283_s0 + $0xa0] sm:$0xff]  ;;  %v49_v14 = vld [vmem:[%s3283_s0 + $0xb0] sm:$0xff]  ;;  %v50_v19 = vld [vmem:[%s3283_s0 + $0xb8] sm:$0xff] }
   0xa   :  { %v297_v35 = vpack.c.bf16 %v234_v25, %v233_v24  ;;  %v237_v36 = vmax.f32 %v173_v26, 0.0  ;;  %v108_v47 = vmul.f32 %v2254_v3, %v37_v33  ;;  %v109_v48 = vmul.f32 %v2254_v3, %v38_v34  ;;  %v51_v24 = vld [vmem:[%s3283_s0 + $0xc0] sm:$0xff]  ;;  %v52_v33 = vld [vmem:[%s3283_s0 + $0xc8] sm:$0xff] }
   0xb   :  { %v298_v41 = vpack.c.bf16 %v236_v30, %v235_v29  ;;  %v177_v46 = vadd.f32 %v2261_v6, %v106_v38  ;;  %v240_v50 = vmax.f32 %v176_v32, 0.0  ;;  %v178_v51 = vadd.f32 %v2261_v6, %v107_v43  ;;  %v53_v38 = vld [vmem:[%s3283_s0 + $0xd0] sm:$0xff] }
   0xc   :  { %2006 = vmatprep.mubr.msk.bf16.mxu0 %vm337_vm0, %v297_v35  ;;  %v299_v45 = vpack.c.bf16 %v238_v37, %v237_v36  ;;  %v110_v52 = vmul.f32 %v2254_v3, %v39_v39  ;;  %v111_v53 = vmul.f32 %v2254_v3, %v40_v40  ;;  %v179_v56 = vadd.f32 %v2261_v6, %v108_v47  ;;  %v54_v39 = vld [vmem:[%s3283_s0 + $0xd8] sm:$0xff] }
   0xd   :  { %2007 = vmatmul.mubr.msk.bf16.vlgmr.msra.gmra.mrb[0].mxu0 %vm337_vm0, %v298_v41  ;;  %v241_v55 = vmax.f32 %v177_v46, 0.0  ;;  %v180_v57 = vadd.f32 %v2261_v6, %v109_v48  ;;  %v112_v58 = vmul.f32 %v2254_v3, %v41_v44  ;;  %v242_v59 = vmax.f32 %v178_v51, 0.0  ;;  %v55_v44 = vld [vmem:[%s3283_s0 + $0xe0] sm:$0xff] }
   0xe   :  { %2010 = vmatprep.mubr.msk.bf16.mxu0 %vm337_vm0, %v299_v45  ;;  %v181_v60 = vadd.f32 %v2261_v6, %v110_v52  ;;  %v182_v61 = vadd.f32 %v2261_v6, %v111_v53  ;;  %v113_v62 = vmul.f32 %v2254_v3, %v42_v49  ;;  %v114_v0 = vmul.f32 %v2254_v3, %v43_v54  ;;  %v56_v45 = vld [vmem:[%s3283_s0 + $0xe8] sm:$0xff] }
   0xf   :  { %v300_v4 = vpack.c.bf16 %v240_v50, %v239_v42  ;;  %v243_v5 = vmax.f32 %v179_v56, 0.0  ;;  %v244_v7 = vmax.f32 %v180_v57, 0.0  ;;  %v301_v10 = vpack.c.bf16 %v242_v59, %v241_v55  ;;  %v57_v50 = vld [vmem:[%s3283_s0 + $0xf0] sm:$0xff]  ;;  %v58_v59 = vld [vmem:[%s3283_s0 + $0xf8] sm:$0xff] }
  0x10   :  { %v245_v11 = vmax.f32 %v181_v60, 0.0  ;;  %v2356_v12 = vadd.f32 %v2261_v6, %v112_v58  ;;  %v115_v13 = vmul.f32 %v2254_v3, %v44_v63  ;;  %v246_v15 = vmax.f32 %v182_v61, 0.0 }
  0x11   :  { %v184_v16 = vadd.f32 %v2261_v6, %v113_v62  ;;  %v116_v17 = vmul.f32 %v2254_v3, %v45_v1  ;;  %v117_v18 = vmul.f32 %v2254_v3, %v46_v2  ;;  %v185_v20 = vadd.f32 %v2261_v6, %v114_v0 }
  0x12   :  { %v186_v21 = vadd.f32 %v2261_v6, %v115_v13  ;;  %v118_v22 = vmul.f32 %v2254_v3, %v47_v8  ;;  %v119_v23 = vmul.f32 %v2254_v3, %v48_v9  ;;  %v302_v25 = vpack.c.bf16 %v244_v7, %v243_v5  ;;  %v61_v9 = vld [vmem:[%s3283_s0 + $0x110] sm:$0xff] }
  0x13   :  { %v187_v26 = vadd.f32 %v2261_v6, %v116_v17  ;;  %v188_v27 = vadd.f32 %v2261_v6, %v117_v18  ;;  %v120_v28 = vmul.f32 %v2254_v3, %v49_v14  ;;  %v247_v29 = vmax.f32 %v2356_v12, 0.0 }
  0x14   :  { %v189_v30 = vadd.f32 %v2261_v6, %v118_v22  ;;  %v190_v31 = vadd.f32 %v2261_v6, %v119_v23  ;;  %v121_v32 = vmul.f32 %v2254_v3, %v50_v19  ;;  %v303_v34 = vpack.c.bf16 %v246_v15, %v245_v11  ;;  %v63_v15 = vld [vmem:[%s3283_s0 + $0x120] sm:$0xff]  ;;  %v65_v22 = vld [vmem:[%s3283_s0 + $0x130] sm:$0xff] }
  0x15   :  { %2011 = vmatmul.mubr.msk.bf16.gmra.mrb[4].mxu0 %vm337_vm0, %v300_v4  ;;  %v248_v35 = vmax.f32 %v184_v16, 0.0  ;;  %v191_v36 = vadd.f32 %v2261_v6, %v120_v28  ;;  %v122_v37 = vmul.f32 %v2254_v3, %v51_v24  ;;  %v249_v40 = vmax.f32 %v185_v20, 0.0  ;;  %v59_v4 = vld [vmem:[%s3283_s0 + $0x100] sm:$0xff]  ;;  %v64_v16 = vld [vmem:[%s3283_s0 + $0x128] sm:$0xff] }
  0x16   :  { %2014 = vmatprep.mubr.msk.bf16.mxu0 %vm337_vm0, %v301_v10  ;;  %v250_v41 = vmax.f32 %v186_v21, 0.0  ;;  %v251_v42 = vmax.f32 %v187_v26, 0.0  ;;  %v192_v43 = vadd.f32 %v2261_v6, %v121_v32  ;;  %v252_v46 = vmax.f32 %v188_v27, 0.0  ;;  %v62_v10 = vld [vmem:[%s3283_s0 + $0x118] sm:$0xff]  ;;  %v60_v20 = vld [vmem:[%s3283_s0 + $0x108] sm:$0xff]  ;;  %v67_v32 = vld [vmem:[%s3283_s0 + $0x140] sm:$0xff] }
  0x17   :  { %v253_v47 = vmax.f32 %v189_v30, 0.0  ;;  %v123_v48 = vmul.f32 %v2254_v3, %v52_v33  ;;  %v193_v49 = vadd.f32 %v2261_v6, %v122_v37  ;;  %v254_v51 = vmax.f32 %v190_v31, 0.0  ;;  %v66_v27 = vld [vmem:[%s3283_s0 + $0x138] sm:$0xff] }
  0x18   :  { %v255_v52 = vmax.f32 %v191_v36, 0.0  ;;  %v124_v53 = vmul.f32 %v2254_v3, %v53_v38  ;;  %v125_v54 = vmul.f32 %v2254_v3, %v54_v39  ;;  %v256_v55 = vmax.f32 %v192_v43, 0.0 }
  0x19   :  { %v194_v56 = vadd.f32 %v2261_v6, %v123_v48  ;;  %v126_v57 = vmul.f32 %v2254_v3, %v55_v44  ;;  %v127_v58 = vmul.f32 %v2254_v3, %v56_v45  ;;  %v257_v60 = vmax.f32 %v193_v49, 0.0 }
  0x1a   :  { %v195_v61 = vadd.f32 %v2261_v6, %v124_v53  ;;  %v196_v62 = vadd.f32 %v2261_v6, %v125_v54  ;;  %v128_v63 = vmul.f32 %v2254_v3, %v57_v50  ;;  %v129_v8 = vmul.f32 %v2254_v3, %v58_v59  ;;  %v72_v53 = vld [vmem:[%s3283_s0 + $0x168] sm:$0xff] }
  0x1b   :  { %v258_v0 = vmax.f32 %v194_v56, 0.0  ;;  %v197_v1 = vadd.f32 %v2261_v6, %v126_v57  ;;  %v198_v2 = vadd.f32 %v2261_v6, %v127_v58  ;;  %v304_v11 = vpack.c.bf16 %v248_v35, %v247_v29  ;;  %v73_v58 = vld [vmem:[%s3283_s0 + $0x170] sm:$0xff] }
  0x1c   :  { %v259_v5 = vmax.f32 %v195_v61, 0.0  ;;  %v260_v7 = vmax.f32 %v196_v62, 0.0  ;;  %v305_v12 = vpack.c.bf16 %v250_v41, %v249_v40  ;;  %v2432_v13 = vpack.c.bf16 %v252_v46, %v251_v42  ;;  %v68_v41 = vld [vmem:[%s3283_s0 + $0x148] sm:$0xff]  ;;  %v69_v46 = vld [vmem:[%s3283_s0 + $0x150] sm:$0xff] }
  0x1d   :  { %2015 = vmatmul.mubr.msk.bf16.gmra.mrb[8].mxu0 %vm337_vm0, %v302_v25  ;;  %v2434_v14 = vpack.c.bf16 %v254_v51, %v253_v47  ;;  %v2442_v17 = vpack.c.bf16 %v256_v55, %v255_v52  ;;  %v2444_v18 = vpack.c.bf16 %v258_v0, %v257_v60  ;;  %v2447_v19 = vadd.f32 %v2261_v6, %v128_v63  ;;  %v70_v47 = vld [vmem:[%s3283_s0 + $0x158] sm:$0xff]  ;;  %v71_v52 = vld [vmem:[%s3283_s0 + $0x160] sm:$0xff] }
  0x1e   :  { %2018 = vmatprep.mubr.msk.bf16.mxu0 %vm337_vm0, %v303_v34  ;;  %v130_v21 = vmul.f32 %v2254_v3, %v59_v4  ;;  %v261_v23 = vmax.f32 %v197_v1, 0.0  ;;  %v262_v24 = vmax.f32 %v198_v2, 0.0  ;;  %v132_v25 = vmul.f32 %v2254_v3, %v61_v9  ;;  %v74_v63 = vld [vmem:[%s3283_s0 + $0x178] sm:$0xff] }
  0x1f   :  { %v133_v26 = vmul.f32 %v2254_v3, %v62_v10  ;;  %v2461_v28 = vpack.c.bf16 %v260_v7, %v259_v5  ;;  %v2464_v29 = vadd.f32 %v2261_v6, %v129_v8  ;;  %v134_v30 = vmul.f32 %v2254_v3, %v63_v15  ;;  %v75_v5 = vld [vmem:[%s3283_s0 + $0x180] sm:$0xff] }
  0x20   :  { %v135_v31 = vmul.f32 %v2254_v3, %v64_v16  ;;  %v2472_v33 = vmul.f32 %v2254_v3, %v60_v20  ;;  %v203_v34 = vadd.f32 %v2261_v6, %v132_v25  ;;  %v136_v36 = vmul.f32 %v2254_v3, %v65_v22  ;;  %v76_v20 = vld [vmem:[%s3283_s0 + $0x188] sm:$0xff]  ;;  %v77_v25 = vld [vmem:[%s3283_s0 + $0x190] sm:$0xff] }
  0x21   :  { %v204_v35 = vadd.f32 %v2261_v6, %v133_v26  ;;  %v2478_v37 = vadd.f32 %v2261_v6, %v130_v21  ;;  %v205_v38 = vadd.f32 %v2261_v6, %v134_v30  ;;  %v137_v40 = vmul.f32 %v2254_v3, %v66_v27  ;;  %v78_v26 = vld [vmem:[%s3283_s0 + $0x198] sm:$0xff] }
  0x22   :  { %v206_v39 = vadd.f32 %v2261_v6, %v135_v31  ;;  %v267_v42 = vmax.f32 %v203_v34, 0.0  ;;  %v207_v44 = vadd.f32 %v2261_v6, %v136_v36  ;;  %v138_v45 = vmul.f32 %v2254_v3, %v67_v32  ;;  %v79_v34 = vld [vmem:[%s3283_s0 + $0x1a0] sm:$0xff] }
  0x23   :  { %v268_v43 = vmax.f32 %v204_v35, 0.0  ;;  %v2496_v48 = vpack.c.bf16 %v262_v24, %v261_v23  ;;  %v269_v49 = vmax.f32 %v205_v38, 0.0  ;;  %v208_v51 = vadd.f32 %v2261_v6, %v137_v40  ;;  %v80_v35 = vld [vmem:[%s3283_s0 + $0x1a8] sm:$0xff]  ;;  %v81_v40 = vld [vmem:[%s3283_s0 + $0x1b0] sm:$0xff] }
  0x24   :  { %v270_v50 = vmax.f32 %v206_v39, 0.0  ;;  %v271_v55 = vmax.f32 %v207_v44, 0.0  ;;  %v139_v56 = vmul.f32 %v2254_v3, %v68_v41  ;;  %v209_v57 = vadd.f32 %v2261_v6, %v138_v45 }
  0x25   :  { %2019 = vmatmul.mubr.msk.bf16.gmra.mrb[12].mxu0 %vm337_vm0, %v304_v11  ;;  %v2505_v54 = vpack.c.bf16 %v268_v43, %v267_v42  ;;  %v272_v60 = vmax.f32 %v208_v51, 0.0  ;;  %v140_v61 = vmul.f32 %v2254_v3, %v69_v46  ;;  %v141_v62 = vmul.f32 %v2254_v3, %v70_v47 }
  0x26   :  { %2022 = vmatprep.mubr.msk.bf16.mxu0 %vm337_vm0, %v305_v12  ;;  %v2512_v59 = vpack.c.bf16 %v270_v50, %v269_v49  ;;  %v210_v0 = vadd.f32 %v2261_v6, %v139_v56  ;;  %v273_v1 = vmax.f32 %v209_v57, 0.0  ;;  %v142_v2 = vmul.f32 %v2254_v3, %v71_v52  ;;  %v83_v50 = vld [vmem:[%s3283_s0 + $0x1c0] sm:$0xff] }
  0x27   :  { %v143_v4 = vmul.f32 %v2254_v3, %v72_v53  ;;  %v2525_v7 = vpack.c.bf16 %v272_v60, %v271_v55  ;;  %v211_v8 = vadd.f32 %v2261_v6, %v140_v61  ;;  %v212_v9 = vadd.f32 %v2261_v6, %v141_v62  ;;  %v84_v61 = vld [vmem:[%s3283_s0 + $0x1c8] sm:$0xff] }
  0x28   :  { %v144_v10 = vmul.f32 %v2254_v3, %v73_v58  ;;  %v274_v11 = vmax.f32 %v210_v0, 0.0  ;;  %v213_v12 = vadd.f32 %v2261_v6, %v142_v2  ;;  %v145_v16 = vmul.f32 %v2254_v3, %v74_v63  ;;  %v85_v2 = vld [vmem:[%s3283_s0 + $0x1d0] sm:$0xff] }
  0x29   :  { %v214_v15 = vadd.f32 %v2261_v6, %v143_v4  ;;  %v275_v21 = vmax.f32 %v211_v8, 0.0  ;;  %v276_v22 = vmax.f32 %v212_v9, 0.0  ;;  %v146_v24 = vmul.f32 %v2254_v3, %v75_v5  ;;  %v86_v4 = vld [vmem:[%s3283_s0 + $0x1d8] sm:$0xff] }
  0x2a   :  { %v215_v23 = vadd.f32 %v2261_v6, %v144_v10  ;;  %v2546_v27 = vpack.c.bf16 %v274_v11, %v273_v1  ;;  %v277_v30 = vmax.f32 %v213_v12, 0.0  ;;  %v216_v32 = vadd.f32 %v2261_v6, %v145_v16  ;;  %v87_v11 = vld [vmem:[%s3283_s0 + $0x1e0] sm:$0xff]  ;;  %v88_v12 = vld [vmem:[%s3283_s0 + $0x1e8] sm:$0xff] }
  0x2b   :  { %v278_v31 = vmax.f32 %v214_v15, 0.0  ;;  %v2557_v36 = vpack.c.bf16 %v276_v22, %v275_v21  ;;  %v147_v38 = vmul.f32 %v2254_v3, %v76_v20  ;;  %v217_v39 = vadd.f32 %v2261_v6, %v146_v24  ;;  %v89_v22 = vld [vmem:[%s3283_s0 + $0x1f0] sm:$0xff] }
  0x2c   :  { %v280_v42 = vmax.f32 %v216_v32, 0.0  ;;  %v148_v43 = vmul.f32 %v2254_v3, %v77_v25  ;;  %v149_v44 = vmul.f32 %v2254_v3, %v78_v26  ;;  %v150_v47 = vmul.f32 %v2254_v3, %v79_v34 }
  0x2d   :  { %2023 = vmatmul.mubr.msk.bf16.gmra.mrb[16].mxu0 %vm337_vm0, %v2432_v13  ;;  %v279_v13 = vmax.f32 %v215_v23, 0.0  ;;  %v2564_v41 = vpack.c.bf16 %v278_v31, %v277_v30  ;;  %v218_v45 = vadd.f32 %v2261_v6, %v147_v38  ;;  %v281_v46 = vmax.f32 %v217_v39, 0.0 }
  0x2e   :  { %2026 = vmatprep.mubr.msk.bf16.mxu0 %vm337_vm0, %v2434_v14  ;;  %v82_v14 = vld [vmem:[%s3283_s0 + $0x1b8] sm:$0xff]  ;;  %v151_v49 = vmul.f32 %v2254_v3, %v80_v35  ;;  %v219_v52 = vadd.f32 %v2261_v6, %v148_v43  ;;  %v220_v53 = vadd.f32 %v2261_v6, %v149_v44  ;;  %v152_v55 = vmul.f32 %v2254_v3, %v81_v40 }
  0x2f   :  { %v2577_v51 = vpack.c.bf16 %v280_v42, %v279_v13  ;;  %v282_v56 = vmax.f32 %v218_v45, 0.0  ;;  %v221_v57 = vadd.f32 %v2261_v6, %v150_v47  ;;  %v153_v60 = vmul.f32 %v2254_v3, %v82_v14 }
  0x30   :  { %v222_v58 = vadd.f32 %v2261_v6, %v151_v49  ;;  %v283_v62 = vmax.f32 %v219_v52, 0.0  ;;  %v284_v63 = vmax.f32 %v220_v53, 0.0  ;;  %v223_v0 = vadd.f32 %v2261_v6, %v152_v55 }
  0x31   :  { %v154_v1 = vmul.f32 %v2254_v3, %v83_v50  ;;  %v321_v5 = vpack.c.bf16 %v282_v56, %v281_v46  ;;  %v285_v8 = vmax.f32 %v221_v57, 0.0  ;;  %v224_v10 = vadd.f32 %v2261_v6, %v153_v60 }
  0x32   :  { %v286_v9 = vmax.f32 %v222_v58, 0.0  ;;  %v322_v15 = vpack.c.bf16 %v284_v63, %v283_v62  ;;  %v287_v16 = vmax.f32 %v223_v0, 0.0  ;;  %v155_v20 = vmul.f32 %v2254_v3, %v84_v61 }
  0x33   :  { %v225_v21 = vadd.f32 %v2261_v6, %v154_v1  ;;  %v288_v24 = vmax.f32 %v224_v10, 0.0  ;;  %v156_v25 = vmul.f32 %v2254_v3, %v85_v2  ;;  %v157_v26 = vmul.f32 %v2254_v3, %v86_v4 }
  0x34   :  { %v323_v23 = vpack.c.bf16 %v286_v9, %v285_v8  ;;  %v226_v30 = vadd.f32 %v2261_v6, %v155_v20  ;;  %v158_v32 = vmul.f32 %v2254_v3, %v87_v11  ;;  %v159_v34 = vmul.f32 %v2254_v3, %v88_v12 }
  0x35   :  { %2027 = vmatmul.mubr.msk.bf16.gmra.mrb[20].mxu0 %vm337_vm0, %v2442_v17  ;;  %v90_v17 = vld [vmem:[%s3283_s0 + $0x1f8] sm:$0xff]  ;;  %v289_v31 = vmax.f32 %v225_v21, 0.0  ;;  %v324_v35 = vpack.c.bf16 %v288_v24, %v287_v16  ;;  %v228_v13 = vadd.f32 %v2261_v6, %v157_v26  ;;  %v160_v38 = vmul.f32 %v2254_v3, %v89_v22 }
  0x36   :  { %2030 = vmatprep.mubr.msk.bf16.mxu0 %vm337_vm0, %v2444_v18  ;;  %v227_v18 = vadd.f32 %v2261_v6, %v156_v25  ;;  %v290_v39 = vmax.f32 %v226_v30, 0.0  ;;  %v229_v40 = vadd.f32 %v2261_v6, %v158_v32  ;;  %v230_v42 = vadd.f32 %v2261_v6, %v159_v34 }
  0x37   :  { %v161_v43 = vmul.f32 %v2254_v3, %v90_v17  ;;  %v202_v44 = vadd.f32 %v2261_v6, %v2472_v33  ;;  %v292_v45 = vmax.f32 %v228_v13, 0.0  ;;  %v231_v46 = vadd.f32 %v2261_v6, %v160_v38 }
  0x38   :  { %v291_v14 = vmax.f32 %v227_v18, 0.0  ;;  %v325_v47 = vpack.c.bf16 %v290_v39, %v289_v31  ;;  %v293_v49 = vmax.f32 %v229_v40, 0.0  ;;  %v294_v50 = vmax.f32 %v230_v42, 0.0 }
  0x39   :  { %v232_v52 = vadd.f32 %v2261_v6, %v161_v43  ;;  %v295_v55 = vmax.f32 %v231_v46, 0.0  ;;  %v263_v56 = vmax.f32 %v2447_v19, 0.0  ;;  %v264_v3 = vmax.f32 %v2464_v29, 0.0  ;;  %v961_v19 = vld [vmem:[%s3286_s6] sm:$0x3] }
  0x3a   :  { %v326_v53 = vpack.c.bf16 %v292_v45, %v291_v14  ;;  %v327_v57 = vpack.c.bf16 %v294_v50, %v293_v49  ;;  %v265_v58 = vmax.f32 %v2478_v37, 0.0  ;;  %v266_v60 = vmax.f32 %v202_v44, 0.0  ;;  %2136 = vmatprep.subr.msk.bf16.mxu1 %vm1059_vm1, %v961_v19  ;;  %v2667_v29 = vld [vmem:[%s3287_s4] ss:$0 sm:$0xff] }
  0x3b   :  { %v296_v33 = vmax.f32 %v232_v52, 0.0  ;;  %v312_v62 = vpack.c.bf16 %v264_v3, %v263_v56 }
  0x3c   :  { %v313_v6 = vpack.c.bf16 %v266_v60, %v265_v58 }
  0x3d   :  { %2031 = vmatmul.mubr.msk.bf16.gmra.mrb[24].mxu0 %vm337_vm0, %v2461_v28  ;;  %v328_v61 = vpack.c.bf16 %v296_v33, %v295_v55  ;;  %v1061_v28 = vsel %vm1059_vm1, %v961_v19, 0 }
  0x3e   :  { %2034 = vmatprep.mubr.msk.bf16.mxu0 %vm337_vm0, %v2496_v48  ;;  %2071 = vmatpush3.bf16.msra.mxu1 %v1061_v28  ;;  %v2672_v48 = vld [vmem:[%s3288_s5] ss:$0 sm:$0xff] }
  0x45   :  { %2035 = vmatmul.mubr.msk.bf16.gmra.mrb[28].mxu0 %vm337_vm0, %v312_v62 }
  0x46   :  { %2038 = vmatprep.mubr.msk.bf16.mxu0 %vm337_vm0, %v313_v6 }
  0x4d   :  { %2039 = vmatmul.mubr.msk.bf16.gmra.mrb[32].mxu0 %vm337_vm0, %v2505_v54 }
  0x4e   :  { %2042 = vmatprep.mubr.msk.bf16.mxu0 %vm337_vm0, %v2512_v59 }
  0x55   :  { %2043 = vmatmul.mubr.msk.bf16.gmra.mrb[36].mxu0 %vm337_vm0, %v2525_v7 }
  0x56   :  { %2046 = vmatprep.mubr.msk.bf16.mxu0 %vm337_vm0, %v2546_v27 }
  0x5d   :  { %2047 = vmatmul.mubr.msk.bf16.gmra.mrb[40].mxu0 %vm337_vm0, %v2557_v36 }
  0x5e   :  { %2050 = vmatprep.mubr.msk.bf16.mxu0 %vm337_vm0, %v2564_v41 }
  0x65   :  { %2051 = vmatmul.mubr.msk.bf16.gmra.mrb[44].mxu0 %vm337_vm0, %v2577_v51 }
  0x66   :  { %2054 = vmatprep.mubr.msk.bf16.mxu0 %vm337_vm0, %v321_v5 }
  0x6d   :  { %2055 = vmatmul.mubr.msk.bf16.gmra.mrb[48].mxu0 %vm337_vm0, %v322_v15 }
  0x6e   :  { %2058 = vmatprep.mubr.msk.bf16.mxu0 %vm337_vm0, %v323_v23 }
  0x75   :  { %2059 = vmatmul.mubr.msk.bf16.gmra.mrb[52].mxu0 %vm337_vm0, %v324_v35 }
  0x76   :  { %2062 = vmatprep.mubr.msk.bf16.mxu0 %vm337_vm0, %v325_v47 }
  0x7d   :  { %2063 = vmatmul.mubr.msk.bf16.gmra.mrb[56].mxu0 %vm337_vm0, %v326_v53 }
  0x7e   :  { %2066 = vmatprep.mubr.msk.bf16.mxu0 %vm337_vm0, %v327_v57 }
  0x85   :  { %2067 = vmatmul.mubr.msk.bf16.gmra.mrb[60].mxu0 %vm337_vm0, %v328_v61 }
  0xe0   :  { %v2008_v37 = vpop.f32.mrb[0].mxu0 }
  0xe1   :  { %v732_v54 = vmul.f32 %v2008_v37, %v2667_v29  ;;  %v468_v59 = vpop.f32.mrb[1].mxu0 }
  0xe2   :  { %v730_v7 = vmul.f32 %v2667_v29, %v468_v59  ;;  %v2009_v27 = vpop.f32.mrb[2].mxu0 }
  0xe3   :  { %v803_v36 = vadd.f32 %v2672_v48, %v732_v54  ;;  %v733_v41 = vmul.f32 %v2009_v27, %v2667_v29  ;;  %v471_v51 = vpop.f32.mrb[3].mxu0 }
  0xe4   :  { %v801_v63 = vadd.f32 %v2672_v48, %v730_v7  ;;  %v731_v0 = vmul.f32 %v2667_v29, %v471_v51 }
  0xe5   :  { %v804_v1 = vadd.f32 %v2672_v48, %v733_v41  ;;  %v867_v4 = vmax.f32 %v803_v36, 0.0 }
  0xe6   :  { %v802_v2 = vadd.f32 %v2672_v48, %v731_v0  ;;  %v865_v8 = vmax.f32 %v801_v63, 0.0 }
  0xe7   :  { %v868_v5 = vmax.f32 %v804_v1, 0.0 }
  0xe8   :  { %v866_v9 = vmax.f32 %v802_v2, 0.0  ;;  %v2012_v10 = vpop.f32.mrb[4].mxu0 }
  0xe9   :  { %v930_v11 = vpack.c.bf16 %v868_v5, %v867_v4  ;;  %v736_v12 = vmul.f32 %v2012_v10, %v2667_v29  ;;  %v484_v15 = vpop.f32.mrb[5].mxu0 }
  0xea   :  { %v734_v16 = vmul.f32 %v2667_v29, %v484_v15  ;;  %v2013_v20 = vpop.f32.mrb[6].mxu0  ;;  %v929_v21 = vpack.c.bf16 %v866_v9, %v865_v8 }
  0xeb   :  { %v807_v22 = vadd.f32 %v2672_v48, %v736_v12  ;;  %v737_v23 = vmul.f32 %v2013_v20, %v2667_v29  ;;  %v487_v24 = vpop.f32.mrb[7].mxu0 }
  0xec   :  { %v805_v25 = vadd.f32 %v2672_v48, %v734_v16  ;;  %v735_v26 = vmul.f32 %v2667_v29, %v487_v24  ;;  %2072 = vmatprep.mubr.msk.bf16.mxu1 %vm962_vm2, %v929_v21 }
  0xed   :  { %v808_v17 = vadd.f32 %v2672_v48, %v737_v23  ;;  %2073 = vmatmul.mubr.msk.bf16.vlgmr.msra.gmra.mrb[0].mxu1 %vm962_vm2, %v930_v11  ;;  %v871_v31 = vmax.f32 %v807_v22, 0.0 }
  0xee   :  { %v806_v30 = vadd.f32 %v2672_v48, %v735_v26  ;;  %v869_v34 = vmax.f32 %v805_v25, 0.0 }
  0xef   :  { %v872_v32 = vmax.f32 %v808_v17, 0.0 }
  0xf0   :  { %v870_v35 = vmax.f32 %v806_v30, 0.0  ;;  %v2016_v18 = vpop.f32.mrb[8].mxu0 }
  0xf1   :  { %v932_v13 = vpack.c.bf16 %v872_v32, %v871_v31  ;;  %v740_v38 = vmul.f32 %v2016_v18, %v2667_v29  ;;  %v500_v39 = vpop.f32.mrb[9].mxu0 }
  0xf2   :  { %v931_v40 = vpack.c.bf16 %v870_v35, %v869_v34  ;;  %v738_v42 = vmul.f32 %v2667_v29, %v500_v39  ;;  %v2017_v43 = vpop.f32.mrb[10].mxu0 }
  0xf3   :  { %v811_v44 = vadd.f32 %v2672_v48, %v740_v38  ;;  %v741_v14 = vmul.f32 %v2017_v43, %v2667_v29  ;;  %v503_v45 = vpop.f32.mrb[11].mxu0 }
  0xf4   :  { %v809_v46 = vadd.f32 %v2672_v48, %v738_v42  ;;  %v739_v47 = vmul.f32 %v2667_v29, %v503_v45  ;;  %2076 = vmatprep.mubr.msk.bf16.mxu1 %vm962_vm2, %v931_v40 }
  0xf5   :  { %v812_v49 = vadd.f32 %v2672_v48, %v741_v14  ;;  %2077 = vmatmul.mubr.msk.bf16.gmra.mrb[4].mxu1 %vm962_vm2, %v932_v13  ;;  %v875_v52 = vmax.f32 %v811_v44, 0.0 }
  0xf6   :  { %v810_v50 = vadd.f32 %v2672_v48, %v739_v47  ;;  %v873_v55 = vmax.f32 %v809_v46, 0.0 }
  0xf7   :  { %v876_v53 = vmax.f32 %v812_v49, 0.0 }
  0xf8   :  { %v874_v56 = vmax.f32 %v810_v50, 0.0  ;;  %v2020_v3 = vpop.f32.mrb[12].mxu0 }
  0xf9   :  { %v934_v57 = vpack.c.bf16 %v876_v53, %v875_v52  ;;  %v744_v33 = vmul.f32 %v2020_v3, %v2667_v29  ;;  %v516_v58 = vpop.f32.mrb[13].mxu0 }
  0xfa   :  { %v933_v60 = vpack.c.bf16 %v874_v56, %v873_v55  ;;  %v742_v61 = vmul.f32 %v2667_v29, %v516_v58  ;;  %v2021_v62 = vpop.f32.mrb[14].mxu0 }
  0xfb   :  { %v815_v6 = vadd.f32 %v2672_v48, %v744_v33  ;;  %v745_v19 = vmul.f32 %v2021_v62, %v2667_v29  ;;  %v519_v28 = vpop.f32.mrb[15].mxu0 }
  0xfc   :  { %v813_v37 = vadd.f32 %v2672_v48, %v742_v61  ;;  %v743_v54 = vmul.f32 %v2667_v29, %v519_v28  ;;  %2080 = vmatprep.mubr.msk.bf16.mxu1 %vm962_vm2, %v933_v60 }
  0xfd   :  { %v816_v59 = vadd.f32 %v2672_v48, %v745_v19  ;;  %2081 = vmatmul.mubr.msk.bf16.gmra.mrb[8].mxu1 %vm962_vm2, %v934_v57  ;;  %v879_v27 = vmax.f32 %v815_v6, 0.0 }
  0xfe   :  { %v814_v7 = vadd.f32 %v2672_v48, %v743_v54  ;;  %v877_v41 = vmax.f32 %v813_v37, 0.0 }
  0xff   :  { %v880_v36 = vmax.f32 %v816_v59, 0.0 }
 0x100   :  { %v878_v51 = vmax.f32 %v814_v7, 0.0  ;;  %v2024_v63 = vpop.f32.mrb[16].mxu0 }
 0x101   :  { %v936_v0 = vpack.c.bf16 %v880_v36, %v879_v27  ;;  %v748_v1 = vmul.f32 %v2024_v63, %v2667_v29  ;;  %v532_v2 = vpop.f32.mrb[17].mxu0 }
 0x102   :  { %v935_v4 = vpack.c.bf16 %v878_v51, %v877_v41  ;;  %v746_v5 = vmul.f32 %v2667_v29, %v532_v2  ;;  %v2025_v8 = vpop.f32.mrb[18].mxu0 }
 0x103   :  { %v819_v9 = vadd.f32 %v2672_v48, %v748_v1  ;;  %v749_v10 = vmul.f32 %v2025_v8, %v2667_v29  ;;  %v535_v11 = vpop.f32.mrb[19].mxu0 }
 0x104   :  { %v817_v12 = vadd.f32 %v2672_v48, %v746_v5  ;;  %v747_v15 = vmul.f32 %v2667_v29, %v535_v11  ;;  %2084 = vmatprep.mubr.msk.bf16.mxu1 %vm962_vm2, %v935_v4 }
 0x105   :  { %v820_v16 = vadd.f32 %v2672_v48, %v749_v10  ;;  %2085 = vmatmul.mubr.msk.bf16.gmra.mrb[12].mxu1 %vm962_vm2, %v936_v0  ;;  %v883_v21 = vmax.f32 %v819_v9, 0.0 }
 0x106   :  { %v818_v20 = vadd.f32 %v2672_v48, %v747_v15  ;;  %v881_v23 = vmax.f32 %v817_v12, 0.0 }
 0x107   :  { %v884_v22 = vmax.f32 %v820_v16, 0.0 }
 0x108   :  { %v882_v24 = vmax.f32 %v818_v20, 0.0  ;;  %v2028_v25 = vpop.f32.mrb[20].mxu0 }
 0x109   :  { %v938_v26 = vpack.c.bf16 %v884_v22, %v883_v21  ;;  %v752_v17 = vmul.f32 %v2028_v25, %v2667_v29  ;;  %v548_v30 = vpop.f32.mrb[21].mxu0 }
 0x10a   :  { %v937_v31 = vpack.c.bf16 %v882_v24, %v881_v23  ;;  %v750_v32 = vmul.f32 %v2667_v29, %v548_v30  ;;  %v2029_v34 = vpop.f32.mrb[22].mxu0 }
 0x10b   :  { %v823_v35 = vadd.f32 %v2672_v48, %v752_v17  ;;  %v753_v18 = vmul.f32 %v2029_v34, %v2667_v29  ;;  %v551_v13 = vpop.f32.mrb[23].mxu0 }
 0x10c   :  { %v821_v38 = vadd.f32 %v2672_v48, %v750_v32  ;;  %v751_v39 = vmul.f32 %v2667_v29, %v551_v13  ;;  %2088 = vmatprep.mubr.msk.bf16.mxu1 %vm962_vm2, %v937_v31 }
 0x10d   :  { %v824_v40 = vadd.f32 %v2672_v48, %v753_v18  ;;  %2089 = vmatmul.mubr.msk.bf16.gmra.mrb[16].mxu1 %vm962_vm2, %v938_v26  ;;  %v887_v43 = vmax.f32 %v823_v35, 0.0 }
 0x10e   :  { %v822_v42 = vadd.f32 %v2672_v48, %v751_v39  ;;  %v885_v14 = vmax.f32 %v821_v38, 0.0 }
 0x10f   :  { %v888_v44 = vmax.f32 %v824_v40, 0.0 }
 0x110   :  { %v886_v45 = vmax.f32 %v822_v42, 0.0  ;;  %v2032_v46 = vpop.f32.mrb[24].mxu0 }
 0x111   :  { %v940_v47 = vpack.c.bf16 %v888_v44, %v887_v43  ;;  %v756_v49 = vmul.f32 %v2032_v46, %v2667_v29  ;;  %v564_v50 = vpop.f32.mrb[25].mxu0 }
 0x112   :  { %v939_v52 = vpack.c.bf16 %v886_v45, %v885_v14  ;;  %v754_v53 = vmul.f32 %v2667_v29, %v564_v50  ;;  %v2033_v55 = vpop.f32.mrb[26].mxu0 }
 0x113   :  { %v827_v56 = vadd.f32 %v2672_v48, %v756_v49  ;;  %v757_v3 = vmul.f32 %v2033_v55, %v2667_v29  ;;  %v567_v57 = vpop.f32.mrb[27].mxu0 }
 0x114   :  { %v825_v33 = vadd.f32 %v2672_v48, %v754_v53  ;;  %v755_v58 = vmul.f32 %v2667_v29, %v567_v57  ;;  %2092 = vmatprep.mubr.msk.bf16.mxu1 %vm962_vm2, %v939_v52 }
 0x115   :  { %v828_v60 = vadd.f32 %v2672_v48, %v757_v3  ;;  %2093 = vmatmul.mubr.msk.bf16.gmra.mrb[20].mxu1 %vm962_vm2, %v940_v47  ;;  %v891_v62 = vmax.f32 %v827_v56, 0.0 }
 0x116   :  { %v826_v61 = vadd.f32 %v2672_v48, %v755_v58  ;;  %v889_v19 = vmax.f32 %v825_v33, 0.0 }
 0x117   :  { %v892_v6 = vmax.f32 %v828_v60, 0.0 }
 0x118   :  { %v890_v28 = vmax.f32 %v826_v61, 0.0  ;;  %v2036_v37 = vpop.f32.mrb[28].mxu0 }
 0x119   :  { %v942_v54 = vpack.c.bf16 %v892_v6, %v891_v62  ;;  %v760_v59 = vmul.f32 %v2036_v37, %v2667_v29  ;;  %v580_v7 = vpop.f32.mrb[29].mxu0 }
 0x11a   :  { %v941_v27 = vpack.c.bf16 %v890_v28, %v889_v19  ;;  %v758_v36 = vmul.f32 %v2667_v29, %v580_v7  ;;  %v2037_v41 = vpop.f32.mrb[30].mxu0 }
 0x11b   :  { %v831_v51 = vadd.f32 %v2672_v48, %v760_v59  ;;  %v761_v63 = vmul.f32 %v2037_v41, %v2667_v29  ;;  %v583_v0 = vpop.f32.mrb[31].mxu0 }
 0x11c   :  { %v829_v1 = vadd.f32 %v2672_v48, %v758_v36  ;;  %v759_v2 = vmul.f32 %v2667_v29, %v583_v0  ;;  %2096 = vmatprep.mubr.msk.bf16.mxu1 %vm962_vm2, %v941_v27 }
 0x11d   :  { %v832_v4 = vadd.f32 %v2672_v48, %v761_v63  ;;  %2097 = vmatmul.mubr.msk.bf16.gmra.mrb[24].mxu1 %vm962_vm2, %v942_v54  ;;  %v895_v8 = vmax.f32 %v831_v51, 0.0 }
 0x11e   :  { %v830_v5 = vadd.f32 %v2672_v48, %v759_v2  ;;  %v893_v10 = vmax.f32 %v829_v1, 0.0 }
 0x11f   :  { %v896_v9 = vmax.f32 %v832_v4, 0.0 }
 0x120   :  { %v894_v11 = vmax.f32 %v830_v5, 0.0  ;;  %v2040_v12 = vpop.f32.mrb[32].mxu0 }
 0x121   :  { %v944_v15 = vpack.c.bf16 %v896_v9, %v895_v8  ;;  %v764_v16 = vmul.f32 %v2040_v12, %v2667_v29  ;;  %v596_v20 = vpop.f32.mrb[33].mxu0 }
 0x122   :  { %v943_v21 = vpack.c.bf16 %v894_v11, %v893_v10  ;;  %v762_v22 = vmul.f32 %v2667_v29, %v596_v20  ;;  %v2041_v23 = vpop.f32.mrb[34].mxu0 }
 0x123   :  { %v835_v24 = vadd.f32 %v2672_v48, %v764_v16  ;;  %v765_v25 = vmul.f32 %v2041_v23, %v2667_v29  ;;  %v599_v26 = vpop.f32.mrb[35].mxu0 }
 0x124   :  { %v833_v17 = vadd.f32 %v2672_v48, %v762_v22  ;;  %v763_v30 = vmul.f32 %v2667_v29, %v599_v26  ;;  %2100 = vmatprep.mubr.msk.bf16.mxu1 %vm962_vm2, %v943_v21 }
 0x125   :  { %v836_v31 = vadd.f32 %v2672_v48, %v765_v25  ;;  %2101 = vmatmul.mubr.msk.bf16.gmra.mrb[28].mxu1 %vm962_vm2, %v944_v15  ;;  %v899_v34 = vmax.f32 %v835_v24, 0.0 }
 0x126   :  { %v834_v32 = vadd.f32 %v2672_v48, %v763_v30  ;;  %v897_v18 = vmax.f32 %v833_v17, 0.0 }
 0x127   :  { %v900_v35 = vmax.f32 %v836_v31, 0.0 }
 0x128   :  { %v898_v13 = vmax.f32 %v834_v32, 0.0  ;;  %v2044_v38 = vpop.f32.mrb[36].mxu0 }
 0x129   :  { %v946_v39 = vpack.c.bf16 %v900_v35, %v899_v34  ;;  %v768_v40 = vmul.f32 %v2044_v38, %v2667_v29  ;;  %v612_v42 = vpop.f32.mrb[37].mxu0 }
 0x12a   :  { %v945_v43 = vpack.c.bf16 %v898_v13, %v897_v18  ;;  %v766_v44 = vmul.f32 %v2667_v29, %v612_v42  ;;  %v2045_v14 = vpop.f32.mrb[38].mxu0 }
 0x12b   :  { %v839_v45 = vadd.f32 %v2672_v48, %v768_v40  ;;  %v769_v46 = vmul.f32 %v2045_v14, %v2667_v29  ;;  %v615_v47 = vpop.f32.mrb[39].mxu0 }
 0x12c   :  { %v837_v49 = vadd.f32 %v2672_v48, %v766_v44  ;;  %v767_v50 = vmul.f32 %v2667_v29, %v615_v47  ;;  %2104 = vmatprep.mubr.msk.bf16.mxu1 %vm962_vm2, %v945_v43 }
 0x12d   :  { %v840_v52 = vadd.f32 %v2672_v48, %v769_v46  ;;  %2105 = vmatmul.mubr.msk.bf16.gmra.mrb[32].mxu1 %vm962_vm2, %v946_v39  ;;  %v903_v55 = vmax.f32 %v839_v45, 0.0 }
 0x12e   :  { %v838_v53 = vadd.f32 %v2672_v48, %v767_v50  ;;  %v901_v3 = vmax.f32 %v837_v49, 0.0 }
 0x12f   :  { %v904_v56 = vmax.f32 %v840_v52, 0.0 }
 0x130   :  { %v902_v57 = vmax.f32 %v838_v53, 0.0  ;;  %v2048_v33 = vpop.f32.mrb[40].mxu0 }
 0x131   :  { %v948_v58 = vpack.c.bf16 %v904_v56, %v903_v55  ;;  %v772_v60 = vmul.f32 %v2048_v33, %v2667_v29  ;;  %v628_v61 = vpop.f32.mrb[41].mxu0 }
 0x132   :  { %v947_v62 = vpack.c.bf16 %v902_v57, %v901_v3  ;;  %v770_v6 = vmul.f32 %v2667_v29, %v628_v61  ;;  %v2049_v19 = vpop.f32.mrb[42].mxu0 }
 0x133   :  { %v843_v28 = vadd.f32 %v2672_v48, %v772_v60  ;;  %v773_v37 = vmul.f32 %v2049_v19, %v2667_v29  ;;  %v631_v54 = vpop.f32.mrb[43].mxu0 }
 0x134   :  { %v841_v59 = vadd.f32 %v2672_v48, %v770_v6  ;;  %v771_v7 = vmul.f32 %v2667_v29, %v631_v54  ;;  %2108 = vmatprep.mubr.msk.bf16.mxu1 %vm962_vm2, %v947_v62 }
 0x135   :  { %v844_v27 = vadd.f32 %v2672_v48, %v773_v37  ;;  %2109 = vmatmul.mubr.msk.bf16.gmra.mrb[36].mxu1 %vm962_vm2, %v948_v58  ;;  %v907_v41 = vmax.f32 %v843_v28, 0.0 }
 0x136   :  { %v842_v36 = vadd.f32 %v2672_v48, %v771_v7  ;;  %v905_v63 = vmax.f32 %v841_v59, 0.0 }
 0x137   :  { %v908_v51 = vmax.f32 %v844_v27, 0.0 }
 0x138   :  { %v906_v0 = vmax.f32 %v842_v36, 0.0  ;;  %v2052_v1 = vpop.f32.mrb[44].mxu0 }
 0x139   :  { %v950_v2 = vpack.c.bf16 %v908_v51, %v907_v41  ;;  %v776_v4 = vmul.f32 %v2052_v1, %v2667_v29  ;;  %v644_v5 = vpop.f32.mrb[45].mxu0 }
 0x13a   :  { %v949_v8 = vpack.c.bf16 %v906_v0, %v905_v63  ;;  %v774_v9 = vmul.f32 %v2667_v29, %v644_v5  ;;  %v2053_v10 = vpop.f32.mrb[46].mxu0 }
 0x13b   :  { %v847_v11 = vadd.f32 %v2672_v48, %v776_v4  ;;  %v777_v12 = vmul.f32 %v2053_v10, %v2667_v29  ;;  %v647_v15 = vpop.f32.mrb[47].mxu0 }
 0x13c   :  { %v845_v16 = vadd.f32 %v2672_v48, %v774_v9  ;;  %v775_v20 = vmul.f32 %v2667_v29, %v647_v15  ;;  %2112 = vmatprep.mubr.msk.bf16.mxu1 %vm962_vm2, %v949_v8 }
 0x13d   :  { %v848_v21 = vadd.f32 %v2672_v48, %v777_v12  ;;  %2113 = vmatmul.mubr.msk.bf16.gmra.mrb[40].mxu1 %vm962_vm2, %v950_v2  ;;  %v911_v23 = vmax.f32 %v847_v11, 0.0 }
 0x13e   :  { %v846_v22 = vadd.f32 %v2672_v48, %v775_v20  ;;  %v909_v25 = vmax.f32 %v845_v16, 0.0 }
 0x13f   :  { %v912_v24 = vmax.f32 %v848_v21, 0.0 }
 0x140   :  { %v910_v26 = vmax.f32 %v846_v22, 0.0  ;;  %v2056_v17 = vpop.f32.mrb[48].mxu0 }
 0x141   :  { %v952_v30 = vpack.c.bf16 %v912_v24, %v911_v23  ;;  %v780_v31 = vmul.f32 %v2056_v17, %v2667_v29  ;;  %v660_v32 = vpop.f32.mrb[49].mxu0 }
 0x142   :  { %v951_v34 = vpack.c.bf16 %v910_v26, %v909_v25  ;;  %v778_v35 = vmul.f32 %v2667_v29, %v660_v32  ;;  %v2057_v18 = vpop.f32.mrb[50].mxu0 }
 0x143   :  { %v851_v13 = vadd.f32 %v2672_v48, %v780_v31  ;;  %v781_v38 = vmul.f32 %v2057_v18, %v2667_v29  ;;  %v663_v39 = vpop.f32.mrb[51].mxu0 }
 0x144   :  { %v849_v40 = vadd.f32 %v2672_v48, %v778_v35  ;;  %v779_v42 = vmul.f32 %v2667_v29, %v663_v39  ;;  %2116 = vmatprep.mubr.msk.bf16.mxu1 %vm962_vm2, %v951_v34 }
 0x145   :  { %v852_v43 = vadd.f32 %v2672_v48, %v781_v38  ;;  %2117 = vmatmul.mubr.msk.bf16.gmra.mrb[44].mxu1 %vm962_vm2, %v952_v30  ;;  %v915_v14 = vmax.f32 %v851_v13, 0.0 }
 0x146   :  { %v850_v44 = vadd.f32 %v2672_v48, %v779_v42  ;;  %v913_v46 = vmax.f32 %v849_v40, 0.0 }
 0x147   :  { %v916_v45 = vmax.f32 %v852_v43, 0.0 }
 0x148   :  { %v914_v47 = vmax.f32 %v850_v44, 0.0  ;;  %v2060_v49 = vpop.f32.mrb[52].mxu0 }
 0x149   :  { %v954_v50 = vpack.c.bf16 %v916_v45, %v915_v14  ;;  %v784_v52 = vmul.f32 %v2060_v49, %v2667_v29  ;;  %v676_v53 = vpop.f32.mrb[53].mxu0  ;;  %v2140_v49 = vld [vmem:[%s3283_s0 + $0x18] sm:$0xff] }
 0x14a   :  { %v953_v55 = vpack.c.bf16 %v914_v47, %v913_v46  ;;  %v782_v56 = vmul.f32 %v2667_v29, %v676_v53  ;;  %v2061_v3 = vpop.f32.mrb[54].mxu0 }
 0x14b   :  { %v855_v57 = vadd.f32 %v2672_v48, %v784_v52  ;;  %v785_v33 = vmul.f32 %v2061_v3, %v2667_v29  ;;  %v679_v58 = vpop.f32.mrb[55].mxu0 }
 0x14c   :  { %v853_v60 = vadd.f32 %v2672_v48, %v782_v56  ;;  %v783_v61 = vmul.f32 %v2667_v29, %v679_v58  ;;  %2120 = vmatprep.mubr.msk.bf16.mxu1 %vm962_vm2, %v953_v55  ;;  %v2141_v55 = vld [vmem:[%s3283_s0 + $0x8] sm:$0xff]  ;;  %v2142_v58 = vld [vmem:[%s3283_s0 + $0x30] sm:$0xff] }
 0x14d   :  { %v856_v62 = vadd.f32 %v2672_v48, %v785_v33  ;;  %2121 = vmatmul.mubr.msk.bf16.gmra.mrb[48].mxu1 %vm962_vm2, %v954_v50  ;;  %v919_v19 = vmax.f32 %v855_v57, 0.0 }
 0x14e   :  { %v854_v6 = vadd.f32 %v2672_v48, %v783_v61  ;;  %v917_v37 = vmax.f32 %v853_v60, 0.0 }
 0x14f   :  { %v920_v28 = vmax.f32 %v856_v62, 0.0  ;;  %v2143_v62 = vld [vmem:[%s3283_s0 + $0x20] sm:$0xff] }
 0x150   :  { %v918_v54 = vmax.f32 %v854_v6, 0.0  ;;  %v2064_v59 = vpop.f32.mrb[56].mxu0 }
 0x151   :  { %v956_v7 = vpack.c.bf16 %v920_v28, %v919_v19  ;;  %v788_v27 = vmul.f32 %v2064_v59, %v2667_v29  ;;  %v692_v36 = vpop.f32.mrb[57].mxu0 }
 0x152   :  { %v955_v41 = vpack.c.bf16 %v918_v54, %v917_v37  ;;  %v786_v51 = vmul.f32 %v2667_v29, %v692_v36  ;;  %v2065_v63 = vpop.f32.mrb[58].mxu0  ;;  %v2144_v37 = vld [vmem:[%s3283_s0 + $0x38] sm:$0xff] }
 0x153   :  { %v859_v0 = vadd.f32 %v2672_v48, %v788_v27  ;;  %v789_v1 = vmul.f32 %v2065_v63, %v2667_v29  ;;  %v695_v2 = vpop.f32.mrb[59].mxu0  ;;  %v2145_v27 = vld [vmem:[%s3283_s0 + $0x28] sm:$0xff] }
 0x154   :  { %v857_v4 = vadd.f32 %v2672_v48, %v786_v51  ;;  %v787_v5 = vmul.f32 %v2667_v29, %v695_v2  ;;  %2124 = vmatprep.mubr.msk.bf16.mxu1 %vm962_vm2, %v955_v41 }
 0x155   :  { %v860_v8 = vadd.f32 %v2672_v48, %v789_v1  ;;  %2125 = vmatmul.mubr.msk.bf16.gmra.mrb[52].mxu1 %vm962_vm2, %v956_v7  ;;  %v923_v10 = vmax.f32 %v859_v0, 0.0  ;;  %v2146_v0 = vld [vmem:[%s3283_s0 + $0x50] sm:$0xff] }
 0x156   :  { %v858_v9 = vadd.f32 %v2672_v48, %v787_v5  ;;  %v921_v12 = vmax.f32 %v857_v4, 0.0  ;;  %v2147_v4 = vld [vmem:[%s3283_s0 + $0x40] sm:$0xff] }
 0x157   :  { %v924_v11 = vmax.f32 %v860_v8, 0.0 }
 0x158   :  { %v922_v15 = vmax.f32 %v858_v9, 0.0  ;;  %v2068_v16 = vpop.f32.mrb[60].mxu0 }
 0x159   :  { %v958_v20 = vpack.c.bf16 %v924_v11, %v923_v10  ;;  %v792_v21 = vmul.f32 %v2068_v16, %v2667_v29  ;;  %v708_v22 = vpop.f32.mrb[61].mxu0  ;;  %v2148_v10 = vld [vmem:[%s3283_s0 + $0x58] sm:$0xff]  ;;  %v2149_v16 = vld [vmem:[%s3283_s0 + $0x48] sm:$0xff] }
 0x15a   :  { %v957_v23 = vpack.c.bf16 %v922_v15, %v921_v12  ;;  %v790_v24 = vmul.f32 %v2667_v29, %v708_v22  ;;  %v2069_v25 = vpop.f32.mrb[62].mxu0 }
 0x15b   :  { %v863_v26 = vadd.f32 %v2672_v48, %v792_v21  ;;  %v793_v17 = vmul.f32 %v2069_v25, %v2667_v29  ;;  %v711_v30 = vpop.f32.mrb[63].mxu0 }
 0x15c   :  { %v861_v31 = vadd.f32 %v2672_v48, %v790_v24  ;;  %v791_v32 = vmul.f32 %v2667_v29, %v711_v30  ;;  %2128 = vmatprep.mubr.msk.bf16.mxu1 %vm962_vm2, %v957_v23  ;;  %v2138_v29 = vld [vmem:[%s3283_s0 + $0x10] sm:$0xff] }
 0x15d   :  { %v864_v34 = vadd.f32 %v2672_v48, %v793_v17  ;;  %2129 = vmatmul.mubr.msk.bf16.gmra.mrb[56].mxu1 %vm962_vm2, %v958_v20  ;;  %v927_v18 = vmax.f32 %v863_v26, 0.0  ;;  %v2150_v24 = vld [vmem:[%s3283_s0 + $0x70] sm:$0xff]  ;;  %v2151_v17 = vld [vmem:[%s3283_s0 + $0x60] sm:$0xff] }
 0x15e   :  { %v862_v35 = vadd.f32 %v2672_v48, %v791_v32  ;;  %v925_v38 = vmax.f32 %v861_v31, 0.0  ;;  %v2139_v48 = vld [vmem:[%s3283_s0] sm:$0xff] }
 0x15f   :  { %v928_v13 = vmax.f32 %v864_v34, 0.0  ;;  %v2152_v34 = vld [vmem:[%s3283_s0 + $0x78] sm:$0xff] }
 0x160   :  { %v926_v39 = vmax.f32 %v862_v35, 0.0 }
 0x161   :  { %v960_v40 = vpack.c.bf16 %v928_v13, %v927_v18 }
 0x162   :  { %v959_v42 = vpack.c.bf16 %v926_v39, %v925_v38  ;;  %v2153_v38 = vld [vmem:[%s3283_s0 + $0x68] sm:$0xff] }
 0x164   :  { %2132 = vmatprep.mubr.msk.bf16.mxu1 %vm962_vm2, %v959_v42 }
 0x165   :  { %2133 = vmatmul.mubr.msk.bf16.gmra.mrb[60].mxu1 %vm962_vm2, %v960_v40 }
 0x1c0   :  { %v2074_v43 = vpop.f32.mrb[0].mxu1 }
 0x1c1   :  { %v1354_v44 = vadd.f32 %v2138_v29, %v2074_v43  ;;  %v1097_v14 = vpop.f32.mrb[1].mxu1  ;;  %v2154_v29 = vld [vmem:[%s3283_s0 + $0x90] sm:$0xff] }
 0x1c2   :  { %v1352_v45 = vadd.f32 %v2139_v48, %v1097_v14  ;;  %v2075_v46 = vpop.f32.mrb[2].mxu1  ;;  %v2155_v48 = vld [vmem:[%s3283_s0 + $0x80] sm:$0xff] }
 0x1c3   :  { %v1876_v47 = vpack.c.bf16 %v1354_v44, %v1354_v44  ;;  %v1355_v50 = vadd.f32 %v2140_v49, %v2075_v46  ;;  %v1100_v52 = vpop.f32.mrb[3].mxu1  ;;  %v2156_v49 = vld [vmem:[%s3283_s0 + $0x98] sm:$0xff] }
 0x1c4   :  { %v1874_v53 = vpack.c.bf16 %v1352_v45, %v1352_v45  ;;  %v1353_v56 = vadd.f32 %v2141_v55, %v1100_v52  ;;  %v2157_v55 = vld [vmem:[%s3283_s0 + $0x88] sm:$0xff] }
 0x1c5   :  { %1675 = vst.msk [vmem:[%s3289_s7 + $0x8] sm:$0xf] %vm1672_vm3, %v1876_v47  ;;  %v1877_v3 = vpack.c.bf16 %v1355_v50, %v1355_v50 }
 0x1c6   :  { %1673 = vst.msk [vmem:[%s3289_s7] sm:$0xf] %vm1672_vm3, %v1874_v53  ;;  %v1875_v57 = vpack.c.bf16 %v1353_v56, %v1353_v56 }
 0x1c7   :  { %1676 = vst.msk [vmem:[%s3289_s7 + $0xc] sm:$0xf] %vm1672_vm3, %v1877_v3 }
 0x1c8   :  { %1674 = vst.msk [vmem:[%s3289_s7 + $0x4] sm:$0xf] %vm1672_vm3, %v1875_v57  ;;  %v2078_v33 = vpop.f32.mrb[4].mxu1 }
 0x1c9   :  { %v1358_v60 = vadd.f32 %v2142_v58, %v2078_v33  ;;  %v1113_v61 = vpop.f32.mrb[5].mxu1  ;;  %v2158_v58 = vld [vmem:[%s3283_s0 + $0xb0] sm:$0xff] }
 0x1ca   :  { %v1356_v6 = vadd.f32 %v2143_v62, %v1113_v61  ;;  %v2079_v19 = vpop.f32.mrb[6].mxu1  ;;  %v2159_v62 = vld [vmem:[%s3283_s0 + $0xa0] sm:$0xff] }
 0x1cb   :  { %v1880_v28 = vpack.c.bf16 %v1358_v60, %v1358_v60  ;;  %v1359_v54 = vadd.f32 %v2144_v37, %v2079_v19  ;;  %v1116_v59 = vpop.f32.mrb[7].mxu1  ;;  %v2160_v37 = vld [vmem:[%s3283_s0 + $0xb8] sm:$0xff] }
 0x1cc   :  { %v1878_v7 = vpack.c.bf16 %v1356_v6, %v1356_v6  ;;  %v1357_v36 = vadd.f32 %v2145_v27, %v1116_v59  ;;  %v2161_v27 = vld [vmem:[%s3283_s0 + $0xa8] sm:$0xff] }
 0x1cd   :  { %1679 = vst.msk [vmem:[%s3289_s7 + $0x18] sm:$0xf] %vm1672_vm3, %v1880_v28  ;;  %v1881_v41 = vpack.c.bf16 %v1359_v54, %v1359_v54 }
 0x1ce   :  { %1677 = vst.msk [vmem:[%s3289_s7 + $0x10] sm:$0xf] %vm1672_vm3, %v1878_v7  ;;  %v1879_v51 = vpack.c.bf16 %v1357_v36, %v1357_v36 }
 0x1cf   :  { %1680 = vst.msk [vmem:[%s3289_s7 + $0x1c] sm:$0xf] %vm1672_vm3, %v1881_v41 }
 0x1d0   :  { %1678 = vst.msk [vmem:[%s3289_s7 + $0x14] sm:$0xf] %vm1672_vm3, %v1879_v51  ;;  %v2082_v63 = vpop.f32.mrb[8].mxu1 }
 0x1d1   :  { %v1362_v1 = vadd.f32 %v2146_v0, %v2082_v63  ;;  %v1129_v2 = vpop.f32.mrb[9].mxu1  ;;  %v2162_v0 = vld [vmem:[%s3283_s0 + $0xd0] sm:$0xff] }
 0x1d2   :  { %v1360_v5 = vadd.f32 %v2147_v4, %v1129_v2  ;;  %v2083_v8 = vpop.f32.mrb[10].mxu1  ;;  %v2163_v4 = vld [vmem:[%s3283_s0 + $0xc0] sm:$0xff] }
 0x1d3   :  { %v1884_v9 = vpack.c.bf16 %v1362_v1, %v1362_v1  ;;  %v1363_v11 = vadd.f32 %v2148_v10, %v2083_v8  ;;  %v1132_v12 = vpop.f32.mrb[11].mxu1  ;;  %v2164_v10 = vld [vmem:[%s3283_s0 + $0xd8] sm:$0xff] }
 0x1d4   :  { %v1882_v15 = vpack.c.bf16 %v1360_v5, %v1360_v5  ;;  %v1361_v20 = vadd.f32 %v2149_v16, %v1132_v12  ;;  %v2165_v16 = vld [vmem:[%s3283_s0 + $0xc8] sm:$0xff] }
 0x1d5   :  { %1683 = vst.msk [vmem:[%s3289_s7 + $0x28] sm:$0xf] %vm1672_vm3, %v1884_v9  ;;  %v1885_v21 = vpack.c.bf16 %v1363_v11, %v1363_v11 }
 0x1d6   :  { %1681 = vst.msk [vmem:[%s3289_s7 + $0x20] sm:$0xf] %vm1672_vm3, %v1882_v15  ;;  %v1883_v22 = vpack.c.bf16 %v1361_v20, %v1361_v20 }
 0x1d7   :  { %1684 = vst.msk [vmem:[%s3289_s7 + $0x2c] sm:$0xf] %vm1672_vm3, %v1885_v21 }
 0x1d8   :  { %1682 = vst.msk [vmem:[%s3289_s7 + $0x24] sm:$0xf] %vm1672_vm3, %v1883_v22  ;;  %v2086_v23 = vpop.f32.mrb[12].mxu1 }
 0x1d9   :  { %v1366_v25 = vadd.f32 %v2150_v24, %v2086_v23  ;;  %v1145_v26 = vpop.f32.mrb[13].mxu1  ;;  %v2166_v24 = vld [vmem:[%s3283_s0 + $0xf0] sm:$0xff] }
 0x1da   :  { %v1364_v30 = vadd.f32 %v2151_v17, %v1145_v26  ;;  %v2087_v31 = vpop.f32.mrb[14].mxu1  ;;  %v2167_v17 = vld [vmem:[%s3283_s0 + $0xe0] sm:$0xff] }
 0x1db   :  { %v1888_v32 = vpack.c.bf16 %v1366_v25, %v1366_v25  ;;  %v1367_v35 = vadd.f32 %v2152_v34, %v2087_v31  ;;  %v1148_v18 = vpop.f32.mrb[15].mxu1  ;;  %v2168_v34 = vld [vmem:[%s3283_s0 + $0xf8] sm:$0xff] }
 0x1dc   :  { %v1886_v13 = vpack.c.bf16 %v1364_v30, %v1364_v30  ;;  %v1365_v39 = vadd.f32 %v2153_v38, %v1148_v18  ;;  %v2169_v38 = vld [vmem:[%s3283_s0 + $0xe8] sm:$0xff] }
 0x1dd   :  { %1687 = vst.msk [vmem:[%s3289_s7 + $0x38] sm:$0xf] %vm1672_vm3, %v1888_v32  ;;  %v1889_v40 = vpack.c.bf16 %v1367_v35, %v1367_v35 }
 0x1de   :  { %1685 = vst.msk [vmem:[%s3289_s7 + $0x30] sm:$0xf] %vm1672_vm3, %v1886_v13  ;;  %v1887_v42 = vpack.c.bf16 %v1365_v39, %v1365_v39 }
 0x1df   :  { %1688 = vst.msk [vmem:[%s3289_s7 + $0x3c] sm:$0xf] %vm1672_vm3, %v1889_v40 }
 0x1e0   :  { %1686 = vst.msk [vmem:[%s3289_s7 + $0x34] sm:$0xf] %vm1672_vm3, %v1887_v42  ;;  %v2090_v43 = vpop.f32.mrb[16].mxu1 }
 0x1e1   :  { %v1370_v44 = vadd.f32 %v2154_v29, %v2090_v43  ;;  %v1161_v14 = vpop.f32.mrb[17].mxu1  ;;  %v2170_v29 = vld [vmem:[%s3283_s0 + $0x110] sm:$0xff] }
 0x1e2   :  { %v1368_v45 = vadd.f32 %v2155_v48, %v1161_v14  ;;  %v2091_v46 = vpop.f32.mrb[18].mxu1  ;;  %v2171_v48 = vld [vmem:[%s3283_s0 + $0x100] sm:$0xff] }
 0x1e3   :  { %v1892_v47 = vpack.c.bf16 %v1370_v44, %v1370_v44  ;;  %v1371_v50 = vadd.f32 %v2156_v49, %v2091_v46  ;;  %v1164_v52 = vpop.f32.mrb[19].mxu1  ;;  %v2172_v49 = vld [vmem:[%s3283_s0 + $0x118] sm:$0xff] }
 0x1e4   :  { %v1890_v53 = vpack.c.bf16 %v1368_v45, %v1368_v45  ;;  %v1369_v56 = vadd.f32 %v2157_v55, %v1164_v52  ;;  %v2173_v55 = vld [vmem:[%s3283_s0 + $0x108] sm:$0xff] }
 0x1e5   :  { %1691 = vst.msk [vmem:[%s3289_s7 + $0x48] sm:$0xf] %vm1672_vm3, %v1892_v47  ;;  %v1893_v3 = vpack.c.bf16 %v1371_v50, %v1371_v50 }
 0x1e6   :  { %1689 = vst.msk [vmem:[%s3289_s7 + $0x40] sm:$0xf] %vm1672_vm3, %v1890_v53  ;;  %v1891_v57 = vpack.c.bf16 %v1369_v56, %v1369_v56 }
 0x1e7   :  { %1692 = vst.msk [vmem:[%s3289_s7 + $0x4c] sm:$0xf] %vm1672_vm3, %v1893_v3 }
 0x1e8   :  { %1690 = vst.msk [vmem:[%s3289_s7 + $0x44] sm:$0xf] %vm1672_vm3, %v1891_v57  ;;  %v2094_v33 = vpop.f32.mrb[20].mxu1 }
 0x1e9   :  { %v1374_v60 = vadd.f32 %v2158_v58, %v2094_v33  ;;  %v1177_v61 = vpop.f32.mrb[21].mxu1  ;;  %v2174_v58 = vld [vmem:[%s3283_s0 + $0x130] sm:$0xff] }
 0x1ea   :  { %v1372_v6 = vadd.f32 %v2159_v62, %v1177_v61  ;;  %v2095_v19 = vpop.f32.mrb[22].mxu1  ;;  %v2175_v62 = vld [vmem:[%s3283_s0 + $0x120] sm:$0xff] }
 0x1eb   :  { %v1896_v28 = vpack.c.bf16 %v1374_v60, %v1374_v60  ;;  %v1375_v54 = vadd.f32 %v2160_v37, %v2095_v19  ;;  %v1180_v59 = vpop.f32.mrb[23].mxu1  ;;  %v2176_v37 = vld [vmem:[%s3283_s0 + $0x138] sm:$0xff] }
 0x1ec   :  { %v1894_v7 = vpack.c.bf16 %v1372_v6, %v1372_v6  ;;  %v1373_v36 = vadd.f32 %v2161_v27, %v1180_v59  ;;  %v2177_v27 = vld [vmem:[%s3283_s0 + $0x128] sm:$0xff] }
 0x1ed   :  { %1695 = vst.msk [vmem:[%s3289_s7 + $0x58] sm:$0xf] %vm1672_vm3, %v1896_v28  ;;  %v1897_v41 = vpack.c.bf16 %v1375_v54, %v1375_v54 }
 0x1ee   :  { %1693 = vst.msk [vmem:[%s3289_s7 + $0x50] sm:$0xf] %vm1672_vm3, %v1894_v7  ;;  %v1895_v51 = vpack.c.bf16 %v1373_v36, %v1373_v36 }
 0x1ef   :  { %1696 = vst.msk [vmem:[%s3289_s7 + $0x5c] sm:$0xf] %vm1672_vm3, %v1897_v41 }
 0x1f0   :  { %1694 = vst.msk [vmem:[%s3289_s7 + $0x54] sm:$0xf] %vm1672_vm3, %v1895_v51  ;;  %v2098_v63 = vpop.f32.mrb[24].mxu1 }
 0x1f1   :  { %v1378_v1 = vadd.f32 %v2162_v0, %v2098_v63  ;;  %v1193_v2 = vpop.f32.mrb[25].mxu1  ;;  %v2178_v0 = vld [vmem:[%s3283_s0 + $0x150] sm:$0xff] }
 0x1f2   :  { %v1376_v5 = vadd.f32 %v2163_v4, %v1193_v2  ;;  %v2099_v8 = vpop.f32.mrb[26].mxu1  ;;  %v2179_v4 = vld [vmem:[%s3283_s0 + $0x140] sm:$0xff] }
 0x1f3   :  { %v1900_v9 = vpack.c.bf16 %v1378_v1, %v1378_v1  ;;  %v1379_v11 = vadd.f32 %v2164_v10, %v2099_v8  ;;  %v1196_v12 = vpop.f32.mrb[27].mxu1  ;;  %v2180_v10 = vld [vmem:[%s3283_s0 + $0x158] sm:$0xff] }
 0x1f4   :  { %v1898_v15 = vpack.c.bf16 %v1376_v5, %v1376_v5  ;;  %v1377_v20 = vadd.f32 %v2165_v16, %v1196_v12  ;;  %v2181_v16 = vld [vmem:[%s3283_s0 + $0x148] sm:$0xff] }
 0x1f5   :  { %1699 = vst.msk [vmem:[%s3289_s7 + $0x68] sm:$0xf] %vm1672_vm3, %v1900_v9  ;;  %v1901_v21 = vpack.c.bf16 %v1379_v11, %v1379_v11 }
 0x1f6   :  { %1697 = vst.msk [vmem:[%s3289_s7 + $0x60] sm:$0xf] %vm1672_vm3, %v1898_v15  ;;  %v1899_v22 = vpack.c.bf16 %v1377_v20, %v1377_v20 }
 0x1f7   :  { %1700 = vst.msk [vmem:[%s3289_s7 + $0x6c] sm:$0xf] %vm1672_vm3, %v1901_v21 }
 0x1f8   :  { %1698 = vst.msk [vmem:[%s3289_s7 + $0x64] sm:$0xf] %vm1672_vm3, %v1899_v22  ;;  %v2102_v23 = vpop.f32.mrb[28].mxu1 }
 0x1f9   :  { %v1382_v25 = vadd.f32 %v2166_v24, %v2102_v23  ;;  %v1209_v26 = vpop.f32.mrb[29].mxu1  ;;  %v2182_v24 = vld [vmem:[%s3283_s0 + $0x170] sm:$0xff] }
 0x1fa   :  { %v1380_v30 = vadd.f32 %v2167_v17, %v1209_v26  ;;  %v2103_v31 = vpop.f32.mrb[30].mxu1  ;;  %v2183_v17 = vld [vmem:[%s3283_s0 + $0x160] sm:$0xff] }
 0x1fb   :  { %v1904_v32 = vpack.c.bf16 %v1382_v25, %v1382_v25  ;;  %v1383_v35 = vadd.f32 %v2168_v34, %v2103_v31  ;;  %v1212_v18 = vpop.f32.mrb[31].mxu1  ;;  %v2184_v34 = vld [vmem:[%s3283_s0 + $0x178] sm:$0xff] }
 0x1fc   :  { %v1902_v13 = vpack.c.bf16 %v1380_v30, %v1380_v30  ;;  %v1381_v39 = vadd.f32 %v2169_v38, %v1212_v18  ;;  %v2185_v38 = vld [vmem:[%s3283_s0 + $0x168] sm:$0xff] }
 0x1fd   :  { %1703 = vst.msk [vmem:[%s3289_s7 + $0x78] sm:$0xf] %vm1672_vm3, %v1904_v32  ;;  %v1905_v40 = vpack.c.bf16 %v1383_v35, %v1383_v35 }
 0x1fe   :  { %1701 = vst.msk [vmem:[%s3289_s7 + $0x70] sm:$0xf] %vm1672_vm3, %v1902_v13  ;;  %v1903_v42 = vpack.c.bf16 %v1381_v39, %v1381_v39 }
 0x1ff   :  { %1704 = vst.msk [vmem:[%s3289_s7 + $0x7c] sm:$0xf] %vm1672_vm3, %v1905_v40 }
 0x200   :  { %1702 = vst.msk [vmem:[%s3289_s7 + $0x74] sm:$0xf] %vm1672_vm3, %v1903_v42  ;;  %v2106_v43 = vpop.f32.mrb[32].mxu1 }
 0x201   :  { %v1386_v44 = vadd.f32 %v2170_v29, %v2106_v43  ;;  %v1225_v14 = vpop.f32.mrb[33].mxu1  ;;  %v2186_v29 = vld [vmem:[%s3283_s0 + $0x190] sm:$0xff] }
 0x202   :  { %v1384_v45 = vadd.f32 %v2171_v48, %v1225_v14  ;;  %v2107_v46 = vpop.f32.mrb[34].mxu1  ;;  %v2187_v48 = vld [vmem:[%s3283_s0 + $0x180] sm:$0xff] }
 0x203   :  { %v1908_v47 = vpack.c.bf16 %v1386_v44, %v1386_v44  ;;  %v1387_v50 = vadd.f32 %v2172_v49, %v2107_v46  ;;  %v1228_v52 = vpop.f32.mrb[35].mxu1  ;;  %v2188_v49 = vld [vmem:[%s3283_s0 + $0x198] sm:$0xff] }
 0x204   :  { %v1906_v53 = vpack.c.bf16 %v1384_v45, %v1384_v45  ;;  %v1385_v56 = vadd.f32 %v2173_v55, %v1228_v52  ;;  %v2189_v55 = vld [vmem:[%s3283_s0 + $0x188] sm:$0xff] }
 0x205   :  { %1707 = vst.msk [vmem:[%s3289_s7 + $0x88] sm:$0xf] %vm1672_vm3, %v1908_v47  ;;  %v1909_v3 = vpack.c.bf16 %v1387_v50, %v1387_v50 }
 0x206   :  { %1705 = vst.msk [vmem:[%s3289_s7 + $0x80] sm:$0xf] %vm1672_vm3, %v1906_v53  ;;  %v1907_v57 = vpack.c.bf16 %v1385_v56, %v1385_v56 }
 0x207   :  { %1708 = vst.msk [vmem:[%s3289_s7 + $0x8c] sm:$0xf] %vm1672_vm3, %v1909_v3 }
 0x208   :  { %1706 = vst.msk [vmem:[%s3289_s7 + $0x84] sm:$0xf] %vm1672_vm3, %v1907_v57  ;;  %v2110_v33 = vpop.f32.mrb[36].mxu1 }
 0x209   :  { %v1390_v60 = vadd.f32 %v2174_v58, %v2110_v33  ;;  %v1241_v61 = vpop.f32.mrb[37].mxu1  ;;  %v2190_v58 = vld [vmem:[%s3283_s0 + $0x1b0] sm:$0xff] }
 0x20a   :  { %v1388_v6 = vadd.f32 %v2175_v62, %v1241_v61  ;;  %v2111_v19 = vpop.f32.mrb[38].mxu1  ;;  %v2191_v62 = vld [vmem:[%s3283_s0 + $0x1a0] sm:$0xff] }
 0x20b   :  { %v1912_v28 = vpack.c.bf16 %v1390_v60, %v1390_v60  ;;  %v1391_v54 = vadd.f32 %v2176_v37, %v2111_v19  ;;  %v1244_v59 = vpop.f32.mrb[39].mxu1  ;;  %v2192_v37 = vld [vmem:[%s3283_s0 + $0x1b8] sm:$0xff] }
 0x20c   :  { %v1910_v7 = vpack.c.bf16 %v1388_v6, %v1388_v6  ;;  %v1389_v36 = vadd.f32 %v2177_v27, %v1244_v59  ;;  %v2193_v27 = vld [vmem:[%s3283_s0 + $0x1a8] sm:$0xff] }
 0x20d   :  { %1711 = vst.msk [vmem:[%s3289_s7 + $0x98] sm:$0xf] %vm1672_vm3, %v1912_v28  ;;  %v1913_v41 = vpack.c.bf16 %v1391_v54, %v1391_v54 }
 0x20e   :  { %1709 = vst.msk [vmem:[%s3289_s7 + $0x90] sm:$0xf] %vm1672_vm3, %v1910_v7  ;;  %v1911_v51 = vpack.c.bf16 %v1389_v36, %v1389_v36 }
 0x20f   :  { %1712 = vst.msk [vmem:[%s3289_s7 + $0x9c] sm:$0xf] %vm1672_vm3, %v1913_v41 }
 0x210   :  { %1710 = vst.msk [vmem:[%s3289_s7 + $0x94] sm:$0xf] %vm1672_vm3, %v1911_v51  ;;  %v2114_v63 = vpop.f32.mrb[40].mxu1 }
 0x211   :  { %v1394_v1 = vadd.f32 %v2178_v0, %v2114_v63  ;;  %v1257_v2 = vpop.f32.mrb[41].mxu1  ;;  %v2194_v0 = vld [vmem:[%s3283_s0 + $0x1d0] sm:$0xff] }
 0x212   :  { %v1392_v5 = vadd.f32 %v2179_v4, %v1257_v2  ;;  %v2115_v8 = vpop.f32.mrb[42].mxu1  ;;  %v2195_v4 = vld [vmem:[%s3283_s0 + $0x1c0] sm:$0xff] }
 0x213   :  { %v1916_v9 = vpack.c.bf16 %v1394_v1, %v1394_v1  ;;  %v1395_v11 = vadd.f32 %v2180_v10, %v2115_v8  ;;  %v1260_v12 = vpop.f32.mrb[43].mxu1  ;;  %v2196_v10 = vld [vmem:[%s3283_s0 + $0x1d8] sm:$0xff] }
 0x214   :  { %v1914_v15 = vpack.c.bf16 %v1392_v5, %v1392_v5  ;;  %v1393_v20 = vadd.f32 %v2181_v16, %v1260_v12  ;;  %v2197_v16 = vld [vmem:[%s3283_s0 + $0x1c8] sm:$0xff] }
 0x215   :  { %1715 = vst.msk [vmem:[%s3289_s7 + $0xa8] sm:$0xf] %vm1672_vm3, %v1916_v9  ;;  %v1917_v21 = vpack.c.bf16 %v1395_v11, %v1395_v11 }
 0x216   :  { %1713 = vst.msk [vmem:[%s3289_s7 + $0xa0] sm:$0xf] %vm1672_vm3, %v1914_v15  ;;  %v1915_v22 = vpack.c.bf16 %v1393_v20, %v1393_v20 }
 0x217   :  { %1716 = vst.msk [vmem:[%s3289_s7 + $0xac] sm:$0xf] %vm1672_vm3, %v1917_v21 }
 0x218   :  { %1714 = vst.msk [vmem:[%s3289_s7 + $0xa4] sm:$0xf] %vm1672_vm3, %v1915_v22  ;;  %v2118_v23 = vpop.f32.mrb[44].mxu1 }
 0x219   :  { %v1398_v25 = vadd.f32 %v2182_v24, %v2118_v23  ;;  %v1273_v26 = vpop.f32.mrb[45].mxu1  ;;  %v2198_v24 = vld [vmem:[%s3283_s0 + $0x1f0] sm:$0xff] }
 0x21a   :  { %v1396_v30 = vadd.f32 %v2183_v17, %v1273_v26  ;;  %v2119_v31 = vpop.f32.mrb[46].mxu1  ;;  %v2199_v17 = vld [vmem:[%s3283_s0 + $0x1e0] sm:$0xff] }
 0x21b   :  { %v1920_v32 = vpack.c.bf16 %v1398_v25, %v1398_v25  ;;  %v1399_v35 = vadd.f32 %v2184_v34, %v2119_v31  ;;  %v1276_v18 = vpop.f32.mrb[47].mxu1  ;;  %v2200_v34 = vld [vmem:[%s3283_s0 + $0x1f8] sm:$0xff] }
 0x21c   :  { %v1918_v13 = vpack.c.bf16 %v1396_v30, %v1396_v30  ;;  %v1397_v39 = vadd.f32 %v2185_v38, %v1276_v18  ;;  %v2201_v38 = vld [vmem:[%s3283_s0 + $0x1e8] sm:$0xff] }
 0x21d   :  { %1719 = vst.msk [vmem:[%s3289_s7 + $0xb8] sm:$0xf] %vm1672_vm3, %v1920_v32  ;;  %v1921_v40 = vpack.c.bf16 %v1399_v35, %v1399_v35 }
 0x21e   :  { %1717 = vst.msk [vmem:[%s3289_s7 + $0xb0] sm:$0xf] %vm1672_vm3, %v1918_v13  ;;  %v1919_v42 = vpack.c.bf16 %v1397_v39, %v1397_v39 }
 0x21f   :  { %1720 = vst.msk [vmem:[%s3289_s7 + $0xbc] sm:$0xf] %vm1672_vm3, %v1921_v40 }
 0x220   :  { %1718 = vst.msk [vmem:[%s3289_s7 + $0xb4] sm:$0xf] %vm1672_vm3, %v1919_v42  ;;  %v2122_v43 = vpop.f32.mrb[48].mxu1 }
 0x221   :  { %v1402_v44 = vadd.f32 %v2186_v29, %v2122_v43  ;;  %v1289_v14 = vpop.f32.mrb[49].mxu1 }
 0x222   :  { %v1400_v45 = vadd.f32 %v2187_v48, %v1289_v14  ;;  %v2123_v46 = vpop.f32.mrb[50].mxu1 }
 0x223   :  { %v1924_v47 = vpack.c.bf16 %v1402_v44, %v1402_v44  ;;  %v1403_v50 = vadd.f32 %v2188_v49, %v2123_v46  ;;  %v1292_v52 = vpop.f32.mrb[51].mxu1 }
 0x224   :  { %v1922_v53 = vpack.c.bf16 %v1400_v45, %v1400_v45  ;;  %v1401_v56 = vadd.f32 %v2189_v55, %v1292_v52 }
 0x225   :  { %1723 = vst.msk [vmem:[%s3289_s7 + $0xc8] sm:$0xf] %vm1672_vm3, %v1924_v47  ;;  %v1925_v3 = vpack.c.bf16 %v1403_v50, %v1403_v50 }
 0x226   :  { %1721 = vst.msk [vmem:[%s3289_s7 + $0xc0] sm:$0xf] %vm1672_vm3, %v1922_v53  ;;  %v1923_v57 = vpack.c.bf16 %v1401_v56, %v1401_v56 }
 0x227   :  { %1724 = vst.msk [vmem:[%s3289_s7 + $0xcc] sm:$0xf] %vm1672_vm3, %v1925_v3 }
 0x228   :  { %1722 = vst.msk [vmem:[%s3289_s7 + $0xc4] sm:$0xf] %vm1672_vm3, %v1923_v57  ;;  %v2126_v33 = vpop.f32.mrb[52].mxu1 }
 0x229   :  { %v1406_v60 = vadd.f32 %v2190_v58, %v2126_v33  ;;  %v1305_v61 = vpop.f32.mrb[53].mxu1 }
 0x22a   :  { %v1404_v6 = vadd.f32 %v2191_v62, %v1305_v61  ;;  %v2127_v19 = vpop.f32.mrb[54].mxu1 }
 0x22b   :  { %v1928_v28 = vpack.c.bf16 %v1406_v60, %v1406_v60  ;;  %v1407_v54 = vadd.f32 %v2192_v37, %v2127_v19  ;;  %v1308_v59 = vpop.f32.mrb[55].mxu1 }
 0x22c   :  { %v1926_v7 = vpack.c.bf16 %v1404_v6, %v1404_v6  ;;  %v1405_v36 = vadd.f32 %v2193_v27, %v1308_v59 }
 0x22d   :  { %1727 = vst.msk [vmem:[%s3289_s7 + $0xd8] sm:$0xf] %vm1672_vm3, %v1928_v28  ;;  %v1929_v41 = vpack.c.bf16 %v1407_v54, %v1407_v54 }
 0x22e   :  { %1725 = vst.msk [vmem:[%s3289_s7 + $0xd0] sm:$0xf] %vm1672_vm3, %v1926_v7  ;;  %v1927_v51 = vpack.c.bf16 %v1405_v36, %v1405_v36 }
 0x22f   :  { %1728 = vst.msk [vmem:[%s3289_s7 + $0xdc] sm:$0xf] %vm1672_vm3, %v1929_v41 }
 0x230   :  { %1726 = vst.msk [vmem:[%s3289_s7 + $0xd4] sm:$0xf] %vm1672_vm3, %v1927_v51  ;;  %v2130_v63 = vpop.f32.mrb[56].mxu1 }
 0x231   :  { %v1410_v1 = vadd.f32 %v2194_v0, %v2130_v63  ;;  %v1321_v2 = vpop.f32.mrb[57].mxu1 }
 0x232   :  { %v1408_v5 = vadd.f32 %v2195_v4, %v1321_v2  ;;  %v2131_v8 = vpop.f32.mrb[58].mxu1 }
 0x233   :  { %v1932_v9 = vpack.c.bf16 %v1410_v1, %v1410_v1  ;;  %v1411_v11 = vadd.f32 %v2196_v10, %v2131_v8  ;;  %v1324_v12 = vpop.f32.mrb[59].mxu1 }
 0x234   :  { %v1930_v15 = vpack.c.bf16 %v1408_v5, %v1408_v5  ;;  %v1409_v20 = vadd.f32 %v2197_v16, %v1324_v12 }
 0x235   :  { %1731 = vst.msk [vmem:[%s3289_s7 + $0xe8] sm:$0xf] %vm1672_vm3, %v1932_v9  ;;  %v1933_v21 = vpack.c.bf16 %v1411_v11, %v1411_v11 }
 0x236   :  { %1729 = vst.msk [vmem:[%s3289_s7 + $0xe0] sm:$0xf] %vm1672_vm3, %v1930_v15  ;;  %v1931_v22 = vpack.c.bf16 %v1409_v20, %v1409_v20 }
 0x237   :  { %1732 = vst.msk [vmem:[%s3289_s7 + $0xec] sm:$0xf] %vm1672_vm3, %v1933_v21 }
 0x238   :  { %1730 = vst.msk [vmem:[%s3289_s7 + $0xe4] sm:$0xf] %vm1672_vm3, %v1931_v22  ;;  %v2134_v23 = vpop.f32.mrb[60].mxu1 }
 0x239   :  { %v1414_v25 = vadd.f32 %v2198_v24, %v2134_v23  ;;  %v1337_v26 = vpop.f32.mrb[61].mxu1 }
 0x23a   :  { %v1412_v30 = vadd.f32 %v2199_v17, %v1337_v26  ;;  %v2135_v31 = vpop.f32.mrb[62].mxu1 }
 0x23b   :  { %v1936_v32 = vpack.c.bf16 %v1414_v25, %v1414_v25  ;;  %v1415_v35 = vadd.f32 %v2200_v34, %v2135_v31  ;;  %v1340_v18 = vpop.f32.mrb[63].mxu1 }
 0x23c   :  { %v1934_v13 = vpack.c.bf16 %v1412_v30, %v1412_v30  ;;  %v1413_v39 = vadd.f32 %v2201_v38, %v1340_v18 }
 0x23d   :  { %1735 = vst.msk [vmem:[%s3289_s7 + $0xf8] sm:$0xf] %vm1672_vm3, %v1936_v32  ;;  %v1937_v40 = vpack.c.bf16 %v1415_v35, %v1415_v35 }
 0x23e   :  { %1733 = vst.msk [vmem:[%s3289_s7 + $0xf0] sm:$0xf] %vm1672_vm3, %v1934_v13  ;;  %v1935_v42 = vpack.c.bf16 %v1413_v39, %v1413_v39 }
 0x23f   :  { %1736 = vst.msk [vmem:[%s3289_s7 + $0xfc] sm:$0xf] %vm1672_vm3, %v1937_v40 }
 0x240   :  { %1734 = vst.msk [vmem:[%s3289_s7 + $0xf4] sm:$0xf] %vm1672_vm3, %v1935_v42 }

// kernel: mf_unit_forward.3
= control target key start
LH: loop header
LB: loop body
LE: loop exit
PB: predicated region body
PF: predicated region fallthrough
CT: control target
= control target key end

     0   :  { %13 = vsyncpa [#allocation5], 0  ;;  %s19152_s0 = inlined_call_operand.vmem [shape: bf16[2,4,8,8,16], index: 0, kind: input, shape index: {}]   ;;  %s19153_s1 = inlined_call_operand.vmem [shape: f32[1,16], index: 1, kind: input, shape index: {}]   ;;  %s19154_s2 = inlined_call_operand.vmem [shape: f32[1,16], index: 2, kind: input, shape index: {}]   ;;  %s19155_s3 = inlined_call_operand.vmem [shape: bf16[3,3,3,16,16], index: 3, kind: input, shape index: {}]   ;;  %s19156_s4 = inlined_call_operand.vmem [shape: f32[1,16], index: 4, kind: input, shape index: {}]   ;;  %s19157_s5 = inlined_call_operand.vmem [shape: f32[1,16], index: 5, kind: input, shape index: {}]   ;;  %s19158_s6 = inlined_call_operand.vmem [shape: bf16[1,3,3,16,16], index: 6, kind: input, shape index: {}]   ;;  %s19159_s7 = inlined_call_operand.vmem [shape: f32[2,4,8,8,16], index: 7, kind: input, shape index: {}]   ;;  %s19160_s8 = inlined_call_operand.hbm [shape: f32[2,4,8,8,16], index: 8, kind: output, shape index: {}]  }
   0x1   :  { %15 = vsyncpa [#allocation5 + $0x1], 0  ;;  %s15566_s27 = smov 0   ;;  %s15568_s28 = smov 0  }
   0x2   :  { %s15570_s29 = smov 0   ;;  %s15572_s30 = smov 0  }
   0x3 LB: > { %s15587_s9 = sadd.s32 4294967295, %s15515_s30   ;;  %s11671_s10 = sadd.s32 4294967294, %s15515_s30   ;;  %s15515_s30 = sphi %s15572_s30, %s19748_s30   ;;  %s15511_s29 = sphi %s15570_s29, %s19747_s29   ;;  %s15507_s28 = sphi %s15568_s28, %s19746_s28   ;;  %s15503_s27 = sphi %s15566_s27, %s19745_s27  }
   0x4   : > { %s15591_s11 = sadd.s32 1, %s15515_s30   ;;  %s206_s12 = sadd.s32 1, %s15511_s29 }
   0x5   : > { %s203_s13 = ssub.s32 %s15515_s30, %s15591_s11  ;;  %p216_p0 = scmp.ne.s32.totalorder %s15511_s29, %s15507_s28 }
   0x6   : > { %p204_p1 = scmp.eq.s32.totalorder %s203_s13, 0  ;;  %p217_p2 = scmp.eq.s32.totalorder %s15587_s9, 1 }
   0x7   : > { %p222_p3 = scmp.ne.s32.totalorder %s15507_s28, %s15503_s27  ;;  %p223_p4 = scmp.eq.s32.totalorder %s11671_s10, 1 }
   0x8   : > { %s15602_s14 = scalar_select %p204_p1, %s15511_s29, %s206_s12  }
   0x9   : > { %p15604_p5 = por %p217_p2, %p216_p0  ;;  %p15608_p6 = por %p223_p4, %p222_p3 }
   0xa   : > { %p11674_p7 = scmp.ge.s32.totalorder %s15515_s30, 1  ;;  %p275_p8 = scmp.lt.s32.totalorder %s15515_s30, 3 }
   0xc   : > { %p276_p9 = pnand %p11674_p7, %p275_p8 }
   0xe   : > { %279 = sbr.rel (%p276_p9) target bundleno = 2257 (0x8d1), region = 52 }
  0x15   : > { %v15617_v0 = vld [vmem:[%s19155_s3 + $0x48] sm:$0xff]   ;;  %p314_p10 = scmp.lt.s32.totalorder %s15587_s9, 1  ;;  %vm325_vm0 = vcmask 130048   ;;  %vm387_vm1 = vcmask 122880   ;;  %v15623_v1 = vld [vmem:[%s19155_s3 + $0x50] sm:$0xff]   ;;  %v15517_v2 = vmov 0.0  }
  0x16   : > { %13369 = vmatprep.subr.bf16.mxu0 %v15617_v0  ;;  %369 = vst.msk [vmem:[#allocation2 + $0xa0] sm:$0xff] %vm325_vm0, %v15517_v2  ;;  %326 = vst.msk [vmem:[#allocation2] sm:$0xff] %vm325_vm0, %v15517_v2  ;;  %v15419_v3 = vld [vmem:[%s19155_s3 + $0x8] sm:$0xff]   ;;  %v15965_v4 = vld [vmem:[%s19153_s1] ss:$0 sm:$0xff]  ;;  %vm327_vm2 = vcmask 123904  }
  0x17   : > { %s15627_s21 = scalar_select %p314_p10, %s15587_s9, 1  ;;  %388 = vst.msk [vmem:[#allocation2 + $0xb0] sm:$0x1] %vm387_vm1, %v15517_v2  ;;  %389 = vst.msk [vmem:[#allocation2 + $0xc0] sm:$0x1] %vm387_vm1, %v15517_v2  ;;  %13370 = vmatpush3.bf16.msra.mxu0 %v15617_v0  ;;  %13063 = vmatprep.subr.bf16.mxu1 %v15419_v3  ;;  %v16099_v60 = vld [vmem:[%s19155_s3] sm:$0xff]  }
  0x18   : > { %329 = vst.msk [vmem:[#allocation2 + $0x10] sm:$0xff] %vm325_vm0, %v15517_v2  ;;  %331 = vst.msk [vmem:[#allocation2 + $0x20] sm:$0xff] %vm325_vm0, %v15517_v2  ;;  %13403 = vmatprep.subr.bf16.mxu0 %v15623_v1  ;;  %13064 = vmatpush3.bf16.msra.mxu1 %v15419_v3  ;;  %v16055_v14 = vld [vmem:[%s19154_s2] ss:$0 sm:$0xff]  ;;  %s311_s18 = sand.u32 1, %s15507_s28  }
  0x19   : > { %333 = vst.msk [vmem:[#allocation2 + $0x30] sm:$0xff] %vm325_vm0, %v15517_v2  ;;  %335 = vst.msk [vmem:[#allocation2 + $0x40] sm:$0xff] %vm325_vm0, %v15517_v2  ;;  %s12369_s24 = sshll.u32 %s15627_s21, 7  ;;  %13097 = vmatprep.subr.bf16.mxu1 %v16099_v60  ;;  %s12370_s17 = sshll.u32 %s15627_s21, 8 }
  0x1a   : > { %337 = vst.msk [vmem:[#allocation2 + $0x50] sm:$0xff] %vm325_vm0, %v15517_v2  ;;  %339 = vst.msk [vmem:[#allocation2 + $0x60] sm:$0xff] %vm325_vm0, %v15517_v2  ;;  %s15971_s13 = scalar_lea.vmem %s19152_s0, %s12369_s24  ;;  %s18998_s22 = scalar_lea.vmem %s19159_s7, %s12370_s17 }
  0x1b   : > { %341 = vst.msk [vmem:[#allocation2 + $0x70] sm:$0xff] %vm325_vm0, %v15517_v2  ;;  %343 = vst.msk [vmem:[#allocation2 + $0x80] sm:$0xff] %vm325_vm0, %v15517_v2  ;;  %v12373_v5 = vld [vmem:[%s15971_s13] sm:$0xff]   ;;  %v12436_v6 = vld [vmem:[%s15971_s13 + $0x8] sm:$0xff]   ;;  %s11675_s23 = sshll.u32 %s311_s18, 8  ;;  %s12371_s24 = sshll.u32 %s15587_s9, 12 }
  0x1c   : > { %345 = vst.msk [vmem:[#allocation2 + $0x90] sm:$0xff] %vm325_vm0, %v15517_v2  ;;  %348 = vst.msk [vmem:[#allocation2 + $0x320] sm:$0xff] %vm325_vm0, %v15517_v2  ;;  %v12437_v7 = vld [vmem:[%s15971_s13 + $0x10] sm:$0xff]   ;;  %v12374_v8 = vunpack.c.l.bf16 %v12373_v5  ;;  %v12375_v9 = vunpack.c.h.bf16 %v12373_v5  ;;  %v12378_v10 = vunpack.c.l.bf16 %v12436_v6  ;;  %v12379_v11 = vunpack.c.h.bf16 %v12436_v6  ;;  %v16049_v12 = vld [vmem:[%s15971_s13 + $0x18] sm:$0xff]   ;;  %s19006_s21 = scalar_lea.vmem [#allocation4], %s11675_s23  ;;  %s19099_s12 = scalar_lea.hbm %s19160_s8, %s12371_s24 }
  0x1d   : > { %350 = vst.msk [vmem:[#allocation2 + $0x330] sm:$0xff] %vm325_vm0, %v15517_v2  ;;  %352 = vst.msk [vmem:[#allocation2 + $0x340] sm:$0xff] %vm325_vm0, %v15517_v2  ;;  %v12439_v13 = vld [vmem:[%s15971_s13 + $0x20] sm:$0xff]   ;;  %v12382_v15 = vunpack.c.l.bf16 %v12437_v7  ;;  %v12383_v16 = vunpack.c.h.bf16 %v12437_v7  ;;  %v12386_v17 = vunpack.c.l.bf16 %v16049_v12  ;;  %v12440_v35 = vld [vmem:[%s15971_s13 + $0x28] sm:$0xff]   ;;  %s11597_s25 = sshll.u32 %s19006_s21, 4  ;;  %s19111_s9 = scalar_lea.sflag [#allocation5], %s311_s18  ;;  %s19101_s25 = int_to_ptr.vmem [resolvable:$true] %s11597_s25 }
  0x1e   : > { %354 = vst.msk [vmem:[#allocation2 + $0x350] sm:$0xff] %vm325_vm0, %v15517_v2  ;;  %356 = vst.msk [vmem:[#allocation2 + $0x360] sm:$0xff] %vm325_vm0, %v15517_v2  ;;  %v12390_v18 = vunpack.c.l.bf16 %v12439_v13  ;;  %v605_v19 = vmul.f32 %v12374_v8, %v15965_v4  ;;  %v606_v20 = vmul.f32 %v12375_v9, %v15965_v4  ;;  %v607_v21 = vmul.f32 %v12378_v10, %v15965_v4  ;;  %v12441_v36 = vld [vmem:[%s15971_s13 + $0x30] sm:$0xff]   ;;  %v16077_v41 = vld [vmem:[%s15971_s13 + $0x38] sm:$0xff]   ;;  %s15518_s17 = smov [#allocation4]  }
  0x1f   : > { %358 = vst.msk [vmem:[#allocation2 + $0x370] sm:$0xff] %vm325_vm0, %v15517_v2  ;;  %360 = vst.msk [vmem:[#allocation2 + $0x380] sm:$0xff] %vm325_vm0, %v15517_v2  ;;  %v608_v22 = vmul.f32 %v12379_v11, %v15965_v4  ;;  %v609_v23 = vmul.f32 %v12382_v15, %v15965_v4  ;;  %v610_v24 = vmul.f32 %v12383_v16, %v15965_v4  ;;  %v12443_v42 = vld [vmem:[%s15971_s13 + $0x40] sm:$0xff]   ;;  %v12391_v47 = vunpack.c.h.bf16 %v12439_v13  ;;  %v16085_v51 = vld [vmem:[%s15971_s13 + $0x48] sm:$0xff]   ;;  %s15457_s19 = sshll.u32 %s15518_s17, 4  ;;  %s15458_s19 = int_to_ptr.vmem [resolvable:$false] %s15457_s19 }
  0x20   : > { %362 = vst.msk [vmem:[#allocation2 + $0x390] sm:$0xff] %vm325_vm0, %v15517_v2  ;;  %364 = vst.msk [vmem:[#allocation2 + $0x3a0] sm:$0xff] %vm325_vm0, %v15517_v2  ;;  %v611_v25 = vmul.f32 %v12386_v17, %v15965_v4  ;;  %v613_v26 = vmul.f32 %v12390_v18, %v15965_v4  ;;  %v644_v27 = vadd.f32 %v16055_v14, %v605_v19  ;;  %v12394_v48 = vunpack.c.l.bf16 %v12440_v35  ;;  %v12445_v13 = vld [vmem:[%s15971_s13 + $0x50] sm:$0xff]   ;;  %v16116_v19 = vld [vmem:[%s15971_s13 + $0x58] sm:$0xff]   ;;  %s15459_s20 = scalar_lea.vmem %s15458_s19, 8192  ;;  %p15460_p0 = scmp.lt.s32.totalorder %s19101_s25, %s15458_s19 }
  0x21   : > { %366 = vst.msk [vmem:[#allocation2 + $0x3b0] sm:$0xff] %vm325_vm0, %v15517_v2  ;;  %371 = vst.msk [vmem:[#allocation2 + $0x140] sm:$0xff] %vm325_vm0, %v15517_v2  ;;  %v645_v28 = vadd.f32 %v16055_v14, %v606_v20  ;;  %v646_v29 = vadd.f32 %v16055_v14, %v607_v21  ;;  %v647_v30 = vadd.f32 %v16055_v14, %v608_v22  ;;  %v12395_v49 = vunpack.c.h.bf16 %v12440_v35 }
  0x22   : > { %373 = vst.msk [vmem:[#allocation2 + $0x1e0] sm:$0xff] %vm325_vm0, %v15517_v2  ;;  %375 = vst.msk [vmem:[#allocation2 + $0x280] sm:$0xff] %vm325_vm0, %v15517_v2  ;;  %v648_v31 = vadd.f32 %v16055_v14, %v609_v23  ;;  %v649_v32 = vadd.f32 %v16055_v14, %v610_v24  ;;  %v650_v33 = vadd.f32 %v16055_v14, %v611_v25  ;;  %v676_v37 = vmax.f32 %v644_v27, 0.0  ;;  %v16122_v27 = vld [vmem:[%s19155_s3 + $0x58] sm:$0xff]  }
  0x23   : > { %378 = vst.msk [vmem:[#allocation2 + $0x130] sm:$0xff] %vm325_vm0, %v15517_v2  ;;  %380 = vst.msk [vmem:[#allocation2 + $0x1d0] sm:$0xff] %vm325_vm0, %v15517_v2  ;;  %v652_v34 = vadd.f32 %v16055_v14, %v613_v26  ;;  %v677_v38 = vmax.f32 %v645_v28, 0.0  ;;  %v678_v39 = vmax.f32 %v646_v29, 0.0  ;;  %v679_v40 = vmax.f32 %v647_v30, 0.0 }
  0x24   : > { %382 = vst.msk [vmem:[#allocation2 + $0x270] sm:$0xff] %vm325_vm0, %v15517_v2  ;;  %384 = vst.msk [vmem:[#allocation2 + $0x310] sm:$0xff] %vm325_vm0, %v15517_v2  ;;  %v680_v43 = vmax.f32 %v648_v31, 0.0  ;;  %v681_v44 = vmax.f32 %v649_v32, 0.0  ;;  %v682_v45 = vmax.f32 %v650_v33, 0.0  ;;  %v12398_v50 = vunpack.c.l.bf16 %v12441_v36 }
  0x25   : > { %390 = vst.msk [vmem:[#allocation2 + $0xd0] sm:$0x1] %vm387_vm1, %v15517_v2  ;;  %391 = vst.msk [vmem:[#allocation2 + $0xe0] sm:$0x1] %vm387_vm1, %v15517_v2  ;;  %v684_v46 = vmax.f32 %v652_v34, 0.0  ;;  %v12399_v52 = vunpack.c.h.bf16 %v12441_v36  ;;  %v12402_v53 = vunpack.c.l.bf16 %v16077_v41  ;;  %v12406_v54 = vunpack.c.l.bf16 %v12443_v42 }
  0x26   : > { %392 = vst.msk [vmem:[#allocation2 + $0xf0] sm:$0x1] %vm387_vm1, %v15517_v2  ;;  %393 = vst.msk [vmem:[#allocation2 + $0x100] sm:$0x1] %vm387_vm1, %v15517_v2  ;;  %v12407_v55 = vunpack.c.h.bf16 %v12443_v42  ;;  %v614_v56 = vmul.f32 %v12391_v47, %v15965_v4  ;;  %v615_v57 = vmul.f32 %v12394_v48, %v15965_v4  ;;  %v616_v58 = vmul.f32 %v12395_v49, %v15965_v4  ;;  %v12448_v42 = vld [vmem:[%s15971_s13 + $0x68] sm:$0xff]  }
  0x27   : > { %394 = vst.msk [vmem:[#allocation2 + $0x110] sm:$0x1] %vm387_vm1, %v15517_v2  ;;  %395 = vst.msk [vmem:[#allocation2 + $0x120] sm:$0x1] %vm387_vm1, %v15517_v2  ;;  %v617_v59 = vmul.f32 %v12398_v50, %v15965_v4  ;;  %v618_v61 = vmul.f32 %v12399_v52, %v15965_v4  ;;  %v619_v62 = vmul.f32 %v12402_v53, %v15965_v4  ;;  %v12410_v0 = vunpack.c.l.bf16 %v16085_v51 }
  0x28   : > { %396 = vst.msk [vmem:[#allocation2 + $0x150] sm:$0x1] %vm387_vm1, %v15517_v2  ;;  %397 = vst.msk [vmem:[#allocation2 + $0x160] sm:$0x1] %vm387_vm1, %v15517_v2  ;;  %v621_v63 = vmul.f32 %v12406_v54, %v15965_v4  ;;  %v653_v3 = vadd.f32 %v16055_v14, %v614_v56  ;;  %v654_v5 = vadd.f32 %v16055_v14, %v615_v57  ;;  %v12411_v34 = vunpack.c.h.bf16 %v16085_v51  ;;  %v12449_v54 = vld [vmem:[%s15971_s13 + $0x70] sm:$0xff]  }
  0x29   : > { %398 = vst.msk [vmem:[#allocation2 + $0x170] sm:$0x1] %vm387_vm1, %v15517_v2  ;;  %399 = vst.msk [vmem:[#allocation2 + $0x180] sm:$0x1] %vm387_vm1, %v15517_v2  ;;  %v655_v6 = vadd.f32 %v16055_v14, %v616_v58  ;;  %v656_v7 = vadd.f32 %v16055_v14, %v617_v59  ;;  %v657_v8 = vadd.f32 %v16055_v14, %v618_v61  ;;  %v12418_v48 = vunpack.c.l.bf16 %v16116_v19 }
  0x2a   : > { %400 = vst.msk [vmem:[#allocation2 + $0x190] sm:$0x1] %vm387_vm1, %v15517_v2  ;;  %401 = vst.msk [vmem:[#allocation2 + $0x1a0] sm:$0x1] %vm387_vm1, %v15517_v2  ;;  %v658_v9 = vadd.f32 %v16055_v14, %v619_v62  ;;  %v660_v10 = vadd.f32 %v16055_v14, %v621_v63  ;;  %v622_v11 = vmul.f32 %v12407_v55, %v15965_v4  ;;  %v685_v15 = vmax.f32 %v653_v3, 0.0  ;;  %v3367_v55 = vld [vmem:[#allocation2 + $0x140] sm:$0xff] }
  0x2b   : > { %402 = vst.msk [vmem:[#allocation2 + $0x1b0] sm:$0x1] %vm387_vm1, %v15517_v2  ;;  %403 = vst.msk [vmem:[#allocation2 + $0x1c0] sm:$0x1] %vm387_vm1, %v15517_v2  ;;  %v686_v16 = vmax.f32 %v654_v5, 0.0  ;;  %v687_v17 = vmax.f32 %v655_v6, 0.0  ;;  %v623_v26 = vmul.f32 %v12410_v0, %v15965_v4  ;;  %v12426_v53 = vunpack.c.l.bf16 %v12448_v42 }
  0x2c   : > { %404 = vst.msk [vmem:[#allocation2 + $0x1f0] sm:$0x1] %vm387_vm1, %v15517_v2  ;;  %405 = vst.msk [vmem:[#allocation2 + $0x200] sm:$0x1] %vm387_vm1, %v15517_v2  ;;  %v688_v18 = vmax.f32 %v656_v7, 0.0  ;;  %v689_v23 = vmax.f32 %v657_v8, 0.0  ;;  %v661_v33 = vadd.f32 %v16055_v14, %v622_v11  ;;  %v627_v58 = vmul.f32 %v12418_v48, %v15965_v4 }
  0x2d   : > { %406 = vst.msk [vmem:[#allocation2 + $0x210] sm:$0x1] %vm387_vm1, %v15517_v2  ;;  %407 = vst.msk [vmem:[#allocation2 + $0x220] sm:$0x1] %vm387_vm1, %v15517_v2  ;;  %v690_v24 = vmax.f32 %v658_v9, 0.0  ;;  %v692_v25 = vmax.f32 %v660_v10, 0.0  ;;  %v12427_v59 = vunpack.c.h.bf16 %v12448_v42  ;;  %v631_v0 = vmul.f32 %v12426_v53, %v15965_v4 }
  0x2e   : > { %408 = vst.msk [vmem:[#allocation2 + $0x230] sm:$0x1] %vm387_vm1, %v15517_v2  ;;  %409 = vst.msk [vmem:[#allocation2 + $0x240] sm:$0x1] %vm387_vm1, %v15517_v2  ;;  %v666_v3 = vadd.f32 %v16055_v14, %v627_v58  ;;  %v12430_v6 = vunpack.c.l.bf16 %v12449_v54  ;;  %v16171_v11 = vld [vmem:[%s15971_s13 + $0x78] sm:$0xff]  }
  0x2f   : > { %410 = vst.msk [vmem:[#allocation2 + $0x250] sm:$0x1] %vm387_vm1, %v15517_v2  ;;  %411 = vst.msk [vmem:[#allocation2 + $0x260] sm:$0x1] %vm387_vm1, %v15517_v2  ;;  %v670_v10 = vadd.f32 %v16055_v14, %v631_v0 }
  0x30   : > { %412 = vst.msk [vmem:[#allocation2 + $0x290] sm:$0x1] %vm387_vm1, %v15517_v2  ;;  %413 = vst.msk [vmem:[#allocation2 + $0x2a0] sm:$0x1] %vm387_vm1, %v15517_v2 }
  0x31   : > { %414 = vst.msk [vmem:[#allocation2 + $0x2b0] sm:$0x1] %vm387_vm1, %v15517_v2  ;;  %415 = vst.msk [vmem:[#allocation2 + $0x2c0] sm:$0x1] %vm387_vm1, %v15517_v2 }
  0x32   : > { %416 = vst.msk [vmem:[#allocation2 + $0x2d0] sm:$0x1] %vm387_vm1, %v15517_v2  ;;  %417 = vst.msk [vmem:[#allocation2 + $0x2e0] sm:$0x1] %vm387_vm1, %v15517_v2 }
  0x33   : > { %418 = vst.msk [vmem:[#allocation2 + $0x2f0] sm:$0x1] %vm387_vm1, %v15517_v2  ;;  %419 = vst.msk [vmem:[#allocation2 + $0x300] sm:$0x1] %vm387_vm1, %v15517_v2 }
  0x34   : > { %420 = vst.msk [vmem:[#allocation2 + $0xb9] sm:$0x1] %vm387_vm1, %v15517_v2  ;;  %421 = vst.msk [vmem:[#allocation2 + $0xc9] sm:$0x1] %vm387_vm1, %v15517_v2 }
  0x35   : > { %422 = vst.msk [vmem:[#allocation2 + $0xd9] sm:$0x1] %vm387_vm1, %v15517_v2  ;;  %423 = vst.msk [vmem:[#allocation2 + $0xe9] sm:$0x1] %vm387_vm1, %v15517_v2 }
  0x36   : > { %424 = vst.msk [vmem:[#allocation2 + $0xf9] sm:$0x1] %vm387_vm1, %v15517_v2  ;;  %425 = vst.msk [vmem:[#allocation2 + $0x109] sm:$0x1] %vm387_vm1, %v15517_v2 }
  0x37   : > { %426 = vst.msk [vmem:[#allocation2 + $0x119] sm:$0x1] %vm387_vm1, %v15517_v2  ;;  %427 = vst.msk [vmem:[#allocation2 + $0x129] sm:$0x1] %vm387_vm1, %v15517_v2 }
  0x38   : > { %428 = vst.msk [vmem:[#allocation2 + $0x159] sm:$0x1] %vm387_vm1, %v15517_v2  ;;  %429 = vst.msk [vmem:[#allocation2 + $0x169] sm:$0x1] %vm387_vm1, %v15517_v2 }
  0x39   : > { %430 = vst.msk [vmem:[#allocation2 + $0x179] sm:$0x1] %vm387_vm1, %v15517_v2  ;;  %431 = vst.msk [vmem:[#allocation2 + $0x189] sm:$0x1] %vm387_vm1, %v15517_v2 }
  0x3a   : > { %432 = vst.msk [vmem:[#allocation2 + $0x199] sm:$0x1] %vm387_vm1, %v15517_v2  ;;  %433 = vst.msk [vmem:[#allocation2 + $0x1a9] sm:$0x1] %vm387_vm1, %v15517_v2 }
  0x3b   : > { %434 = vst.msk [vmem:[#allocation2 + $0x1b9] sm:$0x1] %vm387_vm1, %v15517_v2  ;;  %435 = vst.msk [vmem:[#allocation2 + $0x1c9] sm:$0x1] %vm387_vm1, %v15517_v2 }
  0x3c   : > { %436 = vst.msk [vmem:[#allocation2 + $0x1f9] sm:$0x1] %vm387_vm1, %v15517_v2  ;;  %437 = vst.msk [vmem:[#allocation2 + $0x209] sm:$0x1] %vm387_vm1, %v15517_v2 }
  0x3d   : > { %438 = vst.msk [vmem:[#allocation2 + $0x219] sm:$0x1] %vm387_vm1, %v15517_v2  ;;  %439 = vst.msk [vmem:[#allocation2 + $0x229] sm:$0x1] %vm387_vm1, %v15517_v2 }
  0x3e   : > { %440 = vst.msk [vmem:[#allocation2 + $0x239] sm:$0x1] %vm387_vm1, %v15517_v2  ;;  %441 = vst.msk [vmem:[#allocation2 + $0x249] sm:$0x1] %vm387_vm1, %v15517_v2 }
  0x3f   : > { %442 = vst.msk [vmem:[#allocation2 + $0x259] sm:$0x1] %vm387_vm1, %v15517_v2  ;;  %443 = vst.msk [vmem:[#allocation2 + $0x269] sm:$0x1] %vm387_vm1, %v15517_v2 }
  0x40   : > { %444 = vst.msk [vmem:[#allocation2 + $0x299] sm:$0x1] %vm387_vm1, %v15517_v2  ;;  %445 = vst.msk [vmem:[#allocation2 + $0x2a9] sm:$0x1] %vm387_vm1, %v15517_v2 }
  0x41   : > { %446 = vst.msk [vmem:[#allocation2 + $0x2b9] sm:$0x1] %vm387_vm1, %v15517_v2  ;;  %447 = vst.msk [vmem:[#allocation2 + $0x2c9] sm:$0x1] %vm387_vm1, %v15517_v2 }
  0x42   : > { %448 = vst.msk [vmem:[#allocation2 + $0x2d9] sm:$0x1] %vm387_vm1, %v15517_v2  ;;  %449 = vst.msk [vmem:[#allocation2 + $0x2e9] sm:$0x1] %vm387_vm1, %v15517_v2 }
  0x43   : > { %450 = vst.msk [vmem:[#allocation2 + $0x2f9] sm:$0x1] %vm387_vm1, %v15517_v2  ;;  %451 = vst.msk [vmem:[#allocation2 + $0x309] sm:$0x1] %vm387_vm1, %v15517_v2 }
  0x44   : > { %452 = vst.msk [vmem:[#allocation3] sm:$0xff] %vm325_vm0, %v15517_v2  ;;  %454 = vst.msk [vmem:[#allocation3 + $0xa0] sm:$0xff] %vm325_vm0, %v15517_v2 }
  0x45   : > { %456 = vst.msk [vmem:[#allocation3 + $0x140] sm:$0xff] %vm325_vm0, %v15517_v2  ;;  %458 = vst.msk [vmem:[#allocation3 + $0x1e0] sm:$0xff] %vm325_vm0, %v15517_v2 }
  0x46   : > { %461 = vst.msk [vmem:[#allocation3 + $0x90] sm:$0xff] %vm325_vm0, %v15517_v2  ;;  %463 = vst.msk [vmem:[#allocation3 + $0x130] sm:$0xff] %vm325_vm0, %v15517_v2 }
  0x47   : > { %465 = vst.msk [vmem:[#allocation3 + $0x1d0] sm:$0xff] %vm325_vm0, %v15517_v2  ;;  %467 = vst.msk [vmem:[#allocation3 + $0x270] sm:$0xff] %vm325_vm0, %v15517_v2 }
  0x48   : > { %470 = vst.msk [vmem:[#allocation3 + $0x10] sm:$0x1] %vm387_vm1, %v15517_v2  ;;  %471 = vst.msk [vmem:[#allocation3 + $0x20] sm:$0x1] %vm387_vm1, %v15517_v2 }
  0x49   : > { %472 = vst.msk [vmem:[#allocation3 + $0x30] sm:$0x1] %vm387_vm1, %v15517_v2  ;;  %473 = vst.msk [vmem:[#allocation3 + $0x40] sm:$0x1] %vm387_vm1, %v15517_v2 }
  0x4a   : > { %474 = vst.msk [vmem:[#allocation3 + $0x50] sm:$0x1] %vm387_vm1, %v15517_v2  ;;  %475 = vst.msk [vmem:[#allocation3 + $0x60] sm:$0x1] %vm387_vm1, %v15517_v2 }
  0x4b   : > { %476 = vst.msk [vmem:[#allocation3 + $0x70] sm:$0x1] %vm387_vm1, %v15517_v2  ;;  %477 = vst.msk [vmem:[#allocation3 + $0x80] sm:$0x1] %vm387_vm1, %v15517_v2 }
  0x4c   : > { %478 = vst.msk [vmem:[#allocation3 + $0xb0] sm:$0x1] %vm387_vm1, %v15517_v2  ;;  %479 = vst.msk [vmem:[#allocation3 + $0xc0] sm:$0x1] %vm387_vm1, %v15517_v2 }
  0x4d   : > { %480 = vst.msk [vmem:[#allocation3 + $0xd0] sm:$0x1] %vm387_vm1, %v15517_v2  ;;  %481 = vst.msk [vmem:[#allocation3 + $0xe0] sm:$0x1] %vm387_vm1, %v15517_v2 }
  0x4e   : > { %482 = vst.msk [vmem:[#allocation3 + $0xf0] sm:$0x1] %vm387_vm1, %v15517_v2  ;;  %483 = vst.msk [vmem:[#allocation3 + $0x100] sm:$0x1] %vm387_vm1, %v15517_v2 }
  0x4f   : > { %484 = vst.msk [vmem:[#allocation3 + $0x110] sm:$0x1] %vm387_vm1, %v15517_v2  ;;  %485 = vst.msk [vmem:[#allocation3 + $0x120] sm:$0x1] %vm387_vm1, %v15517_v2 }
  0x50   : > { %486 = vst.msk [vmem:[#allocation3 + $0x150] sm:$0x1] %vm387_vm1, %v15517_v2  ;;  %487 = vst.msk [vmem:[#allocation3 + $0x160] sm:$0x1] %vm387_vm1, %v15517_v2 }
  0x51   : > { %488 = vst.msk [vmem:[#allocation3 + $0x170] sm:$0x1] %vm387_vm1, %v15517_v2  ;;  %489 = vst.msk [vmem:[#allocation3 + $0x180] sm:$0x1] %vm387_vm1, %v15517_v2 }
  0x52   : > { %490 = vst.msk [vmem:[#allocation3 + $0x190] sm:$0x1] %vm387_vm1, %v15517_v2  ;;  %491 = vst.msk [vmem:[#allocation3 + $0x1a0] sm:$0x1] %vm387_vm1, %v15517_v2 }
  0x53   : > { %492 = vst.msk [vmem:[#allocation3 + $0x1b0] sm:$0x1] %vm387_vm1, %v15517_v2  ;;  %493 = vst.msk [vmem:[#allocation3 + $0x1c0] sm:$0x1] %vm387_vm1, %v15517_v2 }
  0x54   : > { %494 = vst.msk [vmem:[#allocation3 + $0x1f0] sm:$0x1] %vm387_vm1, %v15517_v2  ;;  %495 = vst.msk [vmem:[#allocation3 + $0x200] sm:$0x1] %vm387_vm1, %v15517_v2 }
  0x55   : > { %496 = vst.msk [vmem:[#allocation3 + $0x210] sm:$0x1] %vm387_vm1, %v15517_v2  ;;  %497 = vst.msk [vmem:[#allocation3 + $0x220] sm:$0x1] %vm387_vm1, %v15517_v2 }
  0x56   : > { %498 = vst.msk [vmem:[#allocation3 + $0x230] sm:$0x1] %vm387_vm1, %v15517_v2  ;;  %499 = vst.msk [vmem:[#allocation3 + $0x240] sm:$0x1] %vm387_vm1, %v15517_v2 }
  0x57   : > { %500 = vst.msk [vmem:[#allocation3 + $0x250] sm:$0x1] %vm387_vm1, %v15517_v2  ;;  %501 = vst.msk [vmem:[#allocation3 + $0x260] sm:$0x1] %vm387_vm1, %v15517_v2 }
  0x58   : > { %502 = vst.msk [vmem:[#allocation3 + $0x19] sm:$0x1] %vm387_vm1, %v15517_v2  ;;  %503 = vst.msk [vmem:[#allocation3 + $0x29] sm:$0x1] %vm387_vm1, %v15517_v2 }
  0x59   : > { %504 = vst.msk [vmem:[#allocation3 + $0x39] sm:$0x1] %vm387_vm1, %v15517_v2  ;;  %505 = vst.msk [vmem:[#allocation3 + $0x49] sm:$0x1] %vm387_vm1, %v15517_v2 }
  0x5a   : > { %506 = vst.msk [vmem:[#allocation3 + $0x59] sm:$0x1] %vm387_vm1, %v15517_v2  ;;  %507 = vst.msk [vmem:[#allocation3 + $0x69] sm:$0x1] %vm387_vm1, %v15517_v2 }
  0x5b   : > { %508 = vst.msk [vmem:[#allocation3 + $0x79] sm:$0x1] %vm387_vm1, %v15517_v2  ;;  %509 = vst.msk [vmem:[#allocation3 + $0x89] sm:$0x1] %vm387_vm1, %v15517_v2 }
  0x5c   : > { %510 = vst.msk [vmem:[#allocation3 + $0xb9] sm:$0x1] %vm387_vm1, %v15517_v2  ;;  %511 = vst.msk [vmem:[#allocation3 + $0xc9] sm:$0x1] %vm387_vm1, %v15517_v2 }
  0x5d   : > { %512 = vst.msk [vmem:[#allocation3 + $0xd9] sm:$0x1] %vm387_vm1, %v15517_v2  ;;  %513 = vst.msk [vmem:[#allocation3 + $0xe9] sm:$0x1] %vm387_vm1, %v15517_v2 }
  0x5e   : > { %514 = vst.msk [vmem:[#allocation3 + $0xf9] sm:$0x1] %vm387_vm1, %v15517_v2  ;;  %515 = vst.msk [vmem:[#allocation3 + $0x109] sm:$0x1] %vm387_vm1, %v15517_v2 }
  0x5f   : > { %516 = vst.msk [vmem:[#allocation3 + $0x119] sm:$0x1] %vm387_vm1, %v15517_v2  ;;  %517 = vst.msk [vmem:[#allocation3 + $0x129] sm:$0x1] %vm387_vm1, %v15517_v2 }
  0x60   : > { %518 = vst.msk [vmem:[#allocation3 + $0x159] sm:$0x1] %vm387_vm1, %v15517_v2  ;;  %519 = vst.msk [vmem:[#allocation3 + $0x169] sm:$0x1] %vm387_vm1, %v15517_v2 }
  0x61   : > { %520 = vst.msk [vmem:[#allocation3 + $0x179] sm:$0x1] %vm387_vm1, %v15517_v2  ;;  %521 = vst.msk [vmem:[#allocation3 + $0x189] sm:$0x1] %vm387_vm1, %v15517_v2 }
  0x62   : > { %522 = vst.msk [vmem:[#allocation3 + $0x199] sm:$0x1] %vm387_vm1, %v15517_v2  ;;  %523 = vst.msk [vmem:[#allocation3 + $0x1a9] sm:$0x1] %vm387_vm1, %v15517_v2 }
  0x63   : > { %524 = vst.msk [vmem:[#allocation3 + $0x1b9] sm:$0x1] %vm387_vm1, %v15517_v2  ;;  %525 = vst.msk [vmem:[#allocation3 + $0x1c9] sm:$0x1] %vm387_vm1, %v15517_v2 }
  0x64   : > { %526 = vst.msk [vmem:[#allocation3 + $0x1f9] sm:$0x1] %vm387_vm1, %v15517_v2  ;;  %527 = vst.msk [vmem:[#allocation3 + $0x209] sm:$0x1] %vm387_vm1, %v15517_v2 }
  0x65   : > { %528 = vst.msk [vmem:[#allocation3 + $0x219] sm:$0x1] %vm387_vm1, %v15517_v2  ;;  %529 = vst.msk [vmem:[#allocation3 + $0x229] sm:$0x1] %vm387_vm1, %v15517_v2 }
  0x66   : > { %530 = vst.msk [vmem:[#allocation3 + $0x239] sm:$0x1] %vm387_vm1, %v15517_v2  ;;  %531 = vst.msk [vmem:[#allocation3 + $0x249] sm:$0x1] %vm387_vm1, %v15517_v2 }
  0x67   : > { %532 = vst.msk [vmem:[#allocation3 + $0x259] sm:$0x1] %vm387_vm1, %v15517_v2  ;;  %533 = vst.msk [vmem:[#allocation3 + $0x269] sm:$0x1] %vm387_vm1, %v15517_v2 }
  0x68   : > { %328 = vst.msk [vmem:[#allocation2 + $0x8] sm:$0x3] %vm327_vm2, %v15517_v2  ;;  %330 = vst.msk [vmem:[#allocation2 + $0x18] sm:$0x3] %vm327_vm2, %v15517_v2 }
  0x69   : > { %332 = vst.msk [vmem:[#allocation2 + $0x28] sm:$0x3] %vm327_vm2, %v15517_v2  ;;  %334 = vst.msk [vmem:[#allocation2 + $0x38] sm:$0x3] %vm327_vm2, %v15517_v2 }
  0x6a   : > { %336 = vst.msk [vmem:[#allocation2 + $0x48] sm:$0x3] %vm327_vm2, %v15517_v2  ;;  %338 = vst.msk [vmem:[#allocation2 + $0x58] sm:$0x3] %vm327_vm2, %v15517_v2 }
  0x6b   : > { %340 = vst.msk [vmem:[#allocation2 + $0x68] sm:$0x3] %vm327_vm2, %v15517_v2  ;;  %342 = vst.msk [vmem:[#allocation2 + $0x78] sm:$0x3] %vm327_vm2, %v15517_v2 }
  0x6c   : > { %344 = vst.msk [vmem:[#allocation2 + $0x88] sm:$0x3] %vm327_vm2, %v15517_v2  ;;  %346 = vst.msk [vmem:[#allocation2 + $0x98] sm:$0x3] %vm327_vm2, %v15517_v2 }
  0x6d   : > { %349 = vst.msk [vmem:[#allocation2 + $0x328] sm:$0x3] %vm327_vm2, %v15517_v2  ;;  %351 = vst.msk [vmem:[#allocation2 + $0x338] sm:$0x3] %vm327_vm2, %v15517_v2 }
  0x6e   : > { %353 = vst.msk [vmem:[#allocation2 + $0x348] sm:$0x3] %vm327_vm2, %v15517_v2  ;;  %355 = vst.msk [vmem:[#allocation2 + $0x358] sm:$0x3] %vm327_vm2, %v15517_v2 }
  0x6f   : > { %357 = vst.msk [vmem:[#allocation2 + $0x368] sm:$0x3] %vm327_vm2, %v15517_v2  ;;  %359 = vst.msk [vmem:[#allocation2 + $0x378] sm:$0x3] %vm327_vm2, %v15517_v2 }
  0x70   : > { %361 = vst.msk [vmem:[#allocation2 + $0x388] sm:$0x3] %vm327_vm2, %v15517_v2  ;;  %363 = vst.msk [vmem:[#allocation2 + $0x398] sm:$0x3] %vm327_vm2, %v15517_v2 }
  0x71   : > { %365 = vst.msk [vmem:[#allocation2 + $0x3a8] sm:$0x3] %vm327_vm2, %v15517_v2  ;;  %367 = vst.msk [vmem:[#allocation2 + $0x3b8] sm:$0x3] %vm327_vm2, %v15517_v2 }
  0x72   : > { %370 = vst.msk [vmem:[#allocation2 + $0xa8] sm:$0x3] %vm327_vm2, %v15517_v2  ;;  %372 = vst.msk [vmem:[#allocation2 + $0x148] sm:$0x3] %vm327_vm2, %v15517_v2 }
  0x73   : > { %374 = vst.msk [vmem:[#allocation2 + $0x1e8] sm:$0x3] %vm327_vm2, %v15517_v2  ;;  %376 = vst.msk [vmem:[#allocation2 + $0x288] sm:$0x3] %vm327_vm2, %v15517_v2 }
  0x74   : > { %379 = vst.msk [vmem:[#allocation2 + $0x138] sm:$0x3] %vm327_vm2, %v15517_v2  ;;  %381 = vst.msk [vmem:[#allocation2 + $0x1d8] sm:$0x3] %vm327_vm2, %v15517_v2 }
  0x75   : > { %383 = vst.msk [vmem:[#allocation2 + $0x278] sm:$0x3] %vm327_vm2, %v15517_v2  ;;  %385 = vst.msk [vmem:[#allocation2 + $0x318] sm:$0x3] %vm327_vm2, %v15517_v2 }
  0x76   : > { %453 = vst.msk [vmem:[#allocation3 + $0x8] sm:$0x3] %vm327_vm2, %v15517_v2  ;;  %455 = vst.msk [vmem:[#allocation3 + $0xa8] sm:$0x3] %vm327_vm2, %v15517_v2 }
  0x77   : > { %457 = vst.msk [vmem:[#allocation3 + $0x148] sm:$0x3] %vm327_vm2, %v15517_v2  ;;  %459 = vst.msk [vmem:[#allocation3 + $0x1e8] sm:$0x3] %vm327_vm2, %v15517_v2 }
  0x78   : > { %462 = vst.msk [vmem:[#allocation3 + $0x98] sm:$0x3] %vm327_vm2, %v15517_v2  ;;  %464 = vst.msk [vmem:[#allocation3 + $0x138] sm:$0x3] %vm327_vm2, %v15517_v2 }
  0x79   : > { %466 = vst.msk [vmem:[#allocation3 + $0x1d8] sm:$0x3] %vm327_vm2, %v15517_v2  ;;  %468 = vst.msk [vmem:[#allocation3 + $0x278] sm:$0x3] %vm327_vm2, %v15517_v2  ;;  %v3359_v2 = vld [vmem:[#allocation2 + $0xa0] sm:$0xff] }
  0x7a   : > { %708 = vst.msk [vmem:[#allocation2 + $0xb1] sm:$0xff] %vm325_vm0, %v676_v37  ;;  %709 = vst.msk [vmem:[#allocation2 + $0xc1] sm:$0xff] %vm325_vm0, %v677_v38  ;;  %v662_v37 = vadd.f32 %v16055_v14, %v623_v26  ;;  %v12414_v38 = vunpack.c.l.bf16 %v12445_v13  ;;  %v12431_v26 = vunpack.c.h.bf16 %v12449_v54 }
  0x7b   : > { %710 = vst.msk [vmem:[#allocation2 + $0xd1] sm:$0xff] %vm325_vm0, %v678_v39  ;;  %711 = vst.msk [vmem:[#allocation2 + $0xe1] sm:$0xff] %vm325_vm0, %v679_v40  ;;  %v12415_v39 = vunpack.c.h.bf16 %v12445_v13  ;;  %v12447_v40 = vld [vmem:[%s15971_s13 + $0x60] sm:$0xff]   ;;  %s15453_s13 = scalar_lea.vmem %s19101_s25, 4096 }
  0x7c   : > { %712 = vst.msk [vmem:[#allocation2 + $0xf1] sm:$0xff] %vm325_vm0, %v680_v43  ;;  %713 = vst.msk [vmem:[#allocation2 + $0x101] sm:$0xff] %vm325_vm0, %v681_v44  ;;  %v693_v44 = vmax.f32 %v661_v33, 0.0  ;;  %v625_v47 = vmul.f32 %v12414_v38, %v15965_v4  ;;  %v12422_v51 = vunpack.c.l.bf16 %v12447_v40  ;;  %v12423_v52 = vunpack.c.h.bf16 %v12447_v40  ;;  %v790_v13 = vld [vmem:[#allocation2 + $0x1] sm:$0xff]  ;;  %p15454_p11 = scmp.ne.s32.totalorder %s19101_s25, %s15453_s13  ;;  %p15461_p1 = scmp.lt.s32.totalorder %s15459_s20, %s15453_s13 }
  0x7d   : > { %714 = vst.msk [vmem:[#allocation2 + $0x111] sm:$0xff] %vm325_vm0, %v682_v45  ;;  %716 = vst.msk [vmem:[#allocation2 + $0x151] sm:$0xff] %vm325_vm0, %v684_v46  ;;  %v624_v45 = vmul.f32 %v12411_v34, %v15965_v4  ;;  %v694_v46 = vmax.f32 %v662_v37, 0.0  ;;  %v626_v49 = vmul.f32 %v12415_v39, %v15965_v4  ;;  %v634_v42 = vmul.f32 %v12431_v26, %v15965_v4 }
  0x7e   : > { %717 = vst.msk [vmem:[#allocation2 + $0x161] sm:$0xff] %vm325_vm0, %v685_v15  ;;  %718 = vst.msk [vmem:[#allocation2 + $0x171] sm:$0xff] %vm325_vm0, %v686_v16  ;;  %v664_v57 = vadd.f32 %v16055_v14, %v625_v47  ;;  %v629_v62 = vmul.f32 %v12422_v51, %v15965_v4  ;;  %v630_v63 = vmul.f32 %v12423_v52, %v15965_v4  ;;  %v698_v15 = vmax.f32 %v666_v3, 0.0  ;;  %v796_v51 = vld [vmem:[#allocation2 + $0x61] sm:$0xff]  ;;  %v797_v52 = vld [vmem:[#allocation2 + $0x71] sm:$0xff]  ;;  %p15455_p12 = pnand %p15454_p11, %p15604_p5  ;;  %p15462_p2 = por %p15461_p1, %p15460_p0 }
  0x7f   : > { %719 = vst.msk [vmem:[#allocation2 + $0x181] sm:$0xff] %vm325_vm0, %v687_v17  ;;  %720 = vst.msk [vmem:[#allocation2 + $0x191] sm:$0xff] %vm325_vm0, %v688_v18  ;;  %v663_v50 = vadd.f32 %v16055_v14, %v624_v45  ;;  %v632_v16 = vmul.f32 %v12427_v59, %v15965_v4  ;;  %v791_v17 = vld [vmem:[#allocation2 + $0x11] sm:$0xff]  ;;  %v792_v18 = vld [vmem:[#allocation2 + $0x21] sm:$0xff]  ;;  %v673_v48 = vadd.f32 %v16055_v14, %v634_v42 }
  0x80   : > { %721 = vst.msk [vmem:[#allocation2 + $0x1a1] sm:$0xff] %vm325_vm0, %v689_v23  ;;  %722 = vst.msk [vmem:[#allocation2 + $0x1b1] sm:$0xff] %vm325_vm0, %v690_v24  ;;  %v668_v8 = vadd.f32 %v16055_v14, %v629_v62  ;;  %v669_v9 = vadd.f32 %v16055_v14, %v630_v63  ;;  %v702_v23 = vmax.f32 %v670_v10, 0.0  ;;  %v633_v24 = vmul.f32 %v12430_v6, %v15965_v4  ;;  %p15456_p13 = pneg %p15455_p12 }
  0x81   : > { %v3360_v20 = vld [vmem:[#allocation2 + $0xb0] sm:$0xff]  ;;  %v3361_v21 = vld [vmem:[#allocation2 + $0xc0] sm:$0xff]  ;;  %724 = vst.msk [vmem:[#allocation2 + $0x1f1] sm:$0xff] %vm325_vm0, %v692_v25  ;;  %725 = vst.msk [vmem:[#allocation2 + $0x201] sm:$0xff] %vm325_vm0, %v693_v44  ;;  %v695_v61 = vmax.f32 %v663_v50, 0.0  ;;  %v671_v25 = vadd.f32 %v16055_v14, %v632_v16  ;;  %v822_v34 = vpack.c.bf16 %v791_v17, %v790_v13  ;;  %v705_v53 = vmax.f32 %v673_v48, 0.0 }
  0x82   : > { %v3362_v22 = vld [vmem:[#allocation2 + $0xd0] sm:$0xff]  ;;  %v3391_v28 = vpack.c.bf16 %v3360_v20, %v3359_v2  ;;  %v3363_v30 = vld [vmem:[#allocation2 + $0xe0] sm:$0xff]  ;;  %726 = vst.msk [vmem:[#allocation2 + $0x211] sm:$0xff] %vm325_vm0, %v694_v46  ;;  %v696_v2 = vmax.f32 %v664_v57, 0.0  ;;  %730 = vst.msk [vmem:[#allocation2 + $0x251] sm:$0xff] %vm325_vm0, %v698_v15  ;;  %v672_v39 = vadd.f32 %v16055_v14, %v633_v24  ;;  %v825_v57 = vpack.c.bf16 %v797_v52, %v796_v51  ;;  %p15463_p3 = pnand %p15462_p2, %p15456_p13 }
  0x83   : > { %v16124_v29 = vpack.c.bf16 %v3362_v22, %v3361_v21  ;;  %v3364_v31 = vld [vmem:[#allocation2 + $0xf0] sm:$0xff]  ;;  %v3365_v32 = vld [vmem:[#allocation2 + $0x100] sm:$0xff]  ;;  %727 = vst.msk [vmem:[#allocation2 + $0x221] sm:$0xff] %vm325_vm0, %v695_v61  ;;  %v700_v21 = vmax.f32 %v668_v8, 0.0  ;;  %v701_v22 = vmax.f32 %v669_v9, 0.0  ;;  %734 = vst.msk [vmem:[#allocation2 + $0x2b1] sm:$0xff] %vm325_vm0, %v702_v23  ;;  %13065 = vmatprep.mubr.msk.bf16.mxu1 %vm325_vm0, %v822_v34 }
  0x84   : > { %v16132_v35 = vpack.c.bf16 %v3364_v31, %v3363_v30  ;;  %v3366_v36 = vld [vmem:[#allocation2 + $0x110] sm:$0xff]  ;;  %13371 = vmatprep.mubr.msk.bf16.mxu0 %vm325_vm0, %v3391_v28  ;;  %728 = vst.msk [vmem:[#allocation2 + $0x231] sm:$0xff] %vm325_vm0, %v696_v2  ;;  %v12434_v28 = vunpack.c.l.bf16 %v16171_v11  ;;  %v794_v30 = vld [vmem:[#allocation2 + $0x41] sm:$0xff]  ;;  %v703_v40 = vmax.f32 %v671_v25, 0.0  ;;  %v704_v47 = vmax.f32 %v672_v39, 0.0  ;;  %737 = vst.msk [vmem:[#allocation2 + $0x2e1] sm:$0xff] %vm325_vm0, %v705_v53 }
  0x85   : > { %v16141_v43 = vpack.c.bf16 %v3366_v36, %v3365_v32  ;;  %13372 = vmatmul.mubr.msk.bf16.vlgmr.msra.gmra.mrb[0].mxu0 %vm325_vm0, %v16124_v29  ;;  %v3368_v56 = vld [vmem:[#allocation2 + $0x150] sm:$0xff]  ;;  %v3369_v32 = vld [vmem:[#allocation2 + $0x160] sm:$0xff]  ;;  %732 = vst.msk [vmem:[#allocation2 + $0x291] sm:$0xff] %vm325_vm0, %v700_v21  ;;  %733 = vst.msk [vmem:[#allocation2 + $0x2a1] sm:$0xff] %vm325_vm0, %v701_v22 }
  0x86   : > { %13404 = vmatpush3.bf16.msra.mxu0 %v15623_v1  ;;  %13375 = vmatprep.mubr.msk.bf16.mxu0 %vm325_vm0, %v16132_v35  ;;  %v665_v1 = vadd.f32 %v16055_v14, %v626_v49  ;;  %v16164_v7 = vpack.c.bf16 %v3368_v56, %v3367_v55  ;;  %v793_v20 = vld [vmem:[#allocation2 + $0x31] sm:$0xff]  ;;  %v16187_v37 = vld [vmem:[#allocation2 + $0x180] sm:$0xff]  ;;  %v635_v44 = vmul.f32 %v12434_v28, %v15965_v4 }
  0x87   : > { %13437 = vmatprep.subr.bf16.mxu0 %v16122_v27  ;;  %v795_v31 = vld [vmem:[#allocation2 + $0x51] sm:$0xff]  ;;  %v823_v36 = vpack.c.bf16 %v793_v20, %v792_v18  ;;  %735 = vst.msk [vmem:[#allocation2 + $0x2c1] sm:$0xff] %vm325_vm0, %v703_v40  ;;  %736 = vst.msk [vmem:[#allocation2 + $0x2d1] sm:$0xff] %vm325_vm0, %v704_v47  ;;  %v3657_v55 = vld [vmem:[#allocation2 + $0xa1] sm:$0xff] }
  0x88   : > { %v697_v5 = vmax.f32 %v665_v1, 0.0  ;;  %v3370_v33 = vld [vmem:[#allocation2 + $0x170] sm:$0xff]  ;;  %v824_v45 = vpack.c.bf16 %v795_v31, %v794_v30  ;;  %v674_v50 = vadd.f32 %v16055_v14, %v635_v44  ;;  %v16215_v58 = vld [vmem:[#allocation2 + $0x1a0] sm:$0xff] }
  0x89   : > { %v16189_v38 = vld [vmem:[#allocation2 + $0x190] sm:$0xff]  ;;  %v16195_v46 = vpack.c.bf16 %v3370_v33, %v3369_v32  ;;  %13066 = vmatmul.mubr.msk.bf16.vlgmr.msra.gmra.mrb[0].mxu1 %vm325_vm0, %v823_v36  ;;  %v16235_v0 = vld [vmem:[#allocation2 + $0xc1] sm:$0xff] }
  0x8a   : > { %729 = vst.msk [vmem:[#allocation2 + $0x241] sm:$0xff] %vm325_vm0, %v697_v5  ;;  %v16202_v49 = vpack.c.bf16 %v16189_v38, %v16187_v37  ;;  %13069 = vmatprep.mubr.msk.bf16.mxu1 %vm325_vm0, %v824_v45  ;;  %13098 = vmatpush3.bf16.msra.mxu1 %v16099_v60  ;;  %v706_v54 = vmax.f32 %v674_v50, 0.0  ;;  %v16211_v56 = vld [vmem:[#allocation2 + $0xb1] sm:$0xff]  ;;  %v3375_v60 = vld [vmem:[#allocation2 + $0x1e0] sm:$0xff] }
  0x8b   : > { %v16217_v1 = vld [vmem:[#allocation2 + $0x1b0] sm:$0xff]  ;;  %v16223_v61 = vpack.c.bf16 %v16211_v56, %v3657_v55  ;;  %v16241_v3 = vld [vmem:[#allocation2 + $0x200] sm:$0xff] }
  0x8c   : > { %738 = vst.msk [vmem:[#allocation2 + $0x2f1] sm:$0xff] %vm325_vm0, %v706_v54  ;;  %v16220_v59 = vld [vmem:[#allocation2 + $0x1f0] sm:$0xff]  ;;  %v16227_v62 = vpack.c.bf16 %v16217_v1, %v16215_v58  ;;  %v16243_v5 = vld [vmem:[#allocation2 + $0xe1] sm:$0xff] }
  0x8d   : > { %13376 = vmatmul.mubr.msk.bf16.gmra.mrb[4].mxu0 %vm325_vm0, %v16141_v43  ;;  %v16231_v63 = vpack.c.bf16 %v16220_v59, %v3375_v60  ;;  %v16237_v2 = vld [vmem:[#allocation2 + $0xd1] sm:$0xff]  ;;  %v16251_v9 = vld [vmem:[#allocation2 + $0x220] sm:$0xff] }
  0x8e   : > { %13379 = vmatprep.mubr.msk.bf16.mxu0 %vm325_vm0, %v16164_v7  ;;  %v16245_v6 = vld [vmem:[#allocation2 + $0xf1] sm:$0xff]  ;;  %v16257_v13 = vpack.c.bf16 %v16237_v2, %v16235_v0  ;;  %v16273_v18 = vld [vmem:[#allocation2 + $0x101] sm:$0xff] }
  0x8f   : > { %v16249_v8 = vld [vmem:[#allocation2 + $0x210] sm:$0xff]  ;;  %v16261_v15 = vpack.c.bf16 %v16245_v6, %v16243_v5  ;;  %v3665_v21 = vld [vmem:[#allocation2 + $0x141] sm:$0xff] }
  0x90   : > { %v16253_v10 = vld [vmem:[#allocation2 + $0x230] sm:$0xff]  ;;  %v16265_v16 = vpack.c.bf16 %v16249_v8, %v16241_v3  ;;  %v3383_v23 = vld [vmem:[#allocation2 + $0x280] sm:$0xff] }
  0x91   : > { %13070 = vmatmul.mubr.msk.bf16.gmra.mrb[4].mxu1 %vm325_vm0, %v825_v57  ;;  %v16271_v17 = vpack.c.bf16 %v16253_v10, %v16251_v9  ;;  %v16275_v20 = vld [vmem:[#allocation2 + $0x111] sm:$0xff]  ;;  %v16281_v22 = vld [vmem:[#allocation2 + $0x240] sm:$0xff] }
  0x92   : > { %13073 = vmatprep.mubr.msk.bf16.mxu1 %vm325_vm0, %v16223_v61  ;;  %v16283_v24 = vld [vmem:[#allocation2 + $0x151] sm:$0xff]  ;;  %v16293_v28 = vpack.c.bf16 %v16275_v20, %v16273_v18  ;;  %v16305_v33 = vld [vmem:[#allocation2 + $0x161] sm:$0xff] }
  0x93   : > { %19331 = vst [vmem:[#allocation7_spill] sm:$0xff] %v16283_v24  ;;  %v16287_v25 = vld [vmem:[#allocation2 + $0x250] sm:$0xff]  ;;  %v16296_v30 = vpack.c.bf16 %v16283_v24, %v3665_v21  ;;  %19332 = vst [vmem:[#allocation8_spill] sm:$0xff] %v16305_v33  ;;  %v16311_v36 = vld [vmem:[#allocation2 + $0x181] sm:$0xff] }
  0x94   : > { %v16289_v26 = vld [vmem:[#allocation2 + $0x290] sm:$0xff]  ;;  %v16300_v31 = vpack.c.bf16 %v16287_v25, %v16281_v22  ;;  %19334 = vst [vmem:[#allocation10_spill] sm:$0xff] %v16311_v36  ;;  %v16317_v40 = vld [vmem:[#allocation2 + $0x2a0] sm:$0xff] }
  0x95   : > { %13380 = vmatmul.mubr.msk.bf16.gmra.mrb[8].mxu0 %vm325_vm0, %v16195_v46  ;;  %v3403_v32 = vpack.c.bf16 %v16289_v26, %v3383_v23  ;;  %v16307_v34 = vld [vmem:[#allocation2 + $0x171] sm:$0xff]  ;;  %v16322_v44 = vld [vmem:[#allocation2 + $0x2c0] sm:$0xff] }
  0x96   : > { %13383 = vmatprep.mubr.msk.bf16.mxu0 %vm325_vm0, %v16202_v49  ;;  %19333 = vst [vmem:[#allocation9_spill] sm:$0xff] %v16307_v34  ;;  %v16313_v39 = vld [vmem:[#allocation2 + $0x191] sm:$0xff]  ;;  %v16328_v47 = vpack.c.bf16 %v16307_v34, %v16305_v33  ;;  %v16342_v52 = vld [vmem:[#allocation2 + $0x1a1] sm:$0xff] }
  0x97   : > { %19335 = vst [vmem:[#allocation11_spill] sm:$0xff] %v16313_v39  ;;  %v16319_v42 = vld [vmem:[#allocation2 + $0x2b0] sm:$0xff]  ;;  %v16332_v48 = vpack.c.bf16 %v16313_v39, %v16311_v36  ;;  %19336 = vst [vmem:[#allocation12_spill] sm:$0xff] %v16342_v52  ;;  %v3673_v54 = vld [vmem:[#allocation2 + $0x1e1] sm:$0xff] }
  0x98   : > { %v16324_v45 = vld [vmem:[#allocation2 + $0x2d0] sm:$0xff]  ;;  %v3404_v50 = vpack.c.bf16 %v16319_v42, %v16317_v40  ;;  %v16350_v57 = vld [vmem:[#allocation2 + $0x2e0] sm:$0xff] }
  0x99   : > { %13074 = vmatmul.mubr.msk.bf16.gmra.mrb[8].mxu1 %vm325_vm0, %v16257_v13  ;;  %v3405_v51 = vpack.c.bf16 %v16324_v45, %v16322_v44  ;;  %v16344_v53 = vld [vmem:[#allocation2 + $0x1b1] sm:$0xff]  ;;  %v740_v33 = vld [vmem:[#allocation2] sm:$0xff] }
  0x9a   : > { %13077 = vmatprep.mubr.msk.bf16.mxu1 %vm325_vm0, %v16261_v15  ;;  %19337 = vst [vmem:[#allocation13_spill] sm:$0xff] %v16344_v53  ;;  %v16347_v55 = vld [vmem:[#allocation2 + $0x1f1] sm:$0xff]  ;;  %v3696_v21 = vpack.c.bf16 %v16344_v53, %v16342_v52 }
  0x9b   : > { %19338 = vst [vmem:[#allocation14_spill] sm:$0xff] %v16347_v55  ;;  %v16352_v60 = vld [vmem:[#allocation2 + $0x2f0] sm:$0xff]  ;;  %v16357_v23 = vpack.c.bf16 %v16347_v55, %v3673_v54  ;;  %v16373_v54 = vld [vmem:[#allocation2 + $0x221] sm:$0xff] }
  0x9c   : > { %v16367_v39 = vld [vmem:[#allocation2 + $0x211] sm:$0xff]  ;;  %19341 = vst [vmem:[#allocation17_spill] sm:$0xff] %v16373_v54 }
  0x9d   : > { %13384 = vmatmul.mubr.msk.bf16.gmra.mrb[12].mxu0 %vm325_vm0, %v16227_v62  ;;  %19340 = vst [vmem:[#allocation16_spill] sm:$0xff] %v16367_v39  ;;  %v15423_v53 = vld [vmem:[%s19155_s3 + $0x10] sm:$0xff]  }
  0x9e   : > { %13387 = vmatprep.mubr.msk.bf16.mxu0 %vm325_vm0, %v16231_v63  ;;  %v16375_v55 = vld [vmem:[#allocation2 + $0x231] sm:$0xff]  ;;  %13131 = vmatprep.subr.bf16.mxu1 %v15423_v53 }
  0x9f   : > { %19342 = vst [vmem:[#allocation18_spill] sm:$0xff] %v16375_v55  ;;  %v3699_v34 = vpack.c.bf16 %v16375_v55, %v16373_v54  ;;  %v16387_v24 = vld [vmem:[#allocation2 + $0x10] sm:$0xff] }
  0xa0   : > { %v16412_v54 = vld [vmem:[#allocation2 + $0x30] sm:$0xff] }
  0xa1   : > { %13078 = vmatmul.mubr.msk.bf16.gmra.mrb[12].mxu1 %vm325_vm0, %v16293_v28 }
  0xa2   : > { %13081 = vmatprep.mubr.msk.bf16.mxu1 %vm325_vm0, %v16296_v30 }
  0xa5   : > { %13388 = vmatmul.mubr.msk.bf16.gmra.mrb[16].mxu0 %vm325_vm0, %v16265_v16 }
  0xa6   : > { %13391 = vmatprep.mubr.msk.bf16.mxu0 %vm325_vm0, %v16271_v17 }
  0xa9   : > { %13082 = vmatmul.mubr.msk.bf16.gmra.mrb[16].mxu1 %vm325_vm0, %v16328_v47 }
  0xaa   : > { %13085 = vmatprep.mubr.msk.bf16.mxu1 %vm325_vm0, %v16332_v48 }
  0xad   : > { %13392 = vmatmul.mubr.msk.bf16.gmra.mrb[20].mxu0 %vm325_vm0, %v16300_v31 }
  0xae   : > { %13395 = vmatprep.mubr.msk.bf16.mxu0 %vm325_vm0, %v3403_v32  ;;  %v3406_v32 = vpack.c.bf16 %v16352_v60, %v16350_v57 }
  0xb1   : > { %13086 = vmatmul.mubr.msk.bf16.gmra.mrb[20].mxu1 %vm325_vm0, %v3696_v21 }
  0xb2   : > { %13089 = vmatprep.mubr.msk.bf16.mxu1 %vm325_vm0, %v16357_v23 }
  0xb5   : > { %13396 = vmatmul.mubr.msk.bf16.gmra.mrb[24].mxu0 %vm325_vm0, %v3404_v50  ;;  %v12387_v50 = vunpack.c.h.bf16 %v16049_v12 }
  0xb6   : > { %13399 = vmatprep.mubr.msk.bf16.mxu0 %vm325_vm0, %v3405_v51  ;;  %v16365_v51 = vld [vmem:[#allocation2 + $0x201] sm:$0xff] }
  0xb7   : > { %19339 = vst [vmem:[#allocation15_spill] sm:$0xff] %v16365_v51  ;;  %v612_v52 = vmul.f32 %v12387_v50, %v15965_v4  ;;  %v3698_v12 = vpack.c.bf16 %v16367_v39, %v16365_v51  ;;  %v16395_v50 = vld [vmem:[#allocation2 + $0x241] sm:$0xff] }
  0xb8   : > { %19343 = vst [vmem:[#allocation19_spill] sm:$0xff] %v16395_v50  ;;  %v748_v51 = vld [vmem:[#allocation2 + $0xa0] sm:$0xff] }
  0xb9   : > { %v651_v36 = vadd.f32 %v16055_v14, %v612_v52  ;;  %13090 = vmatmul.mubr.msk.bf16.gmra.mrb[24].mxu1 %vm325_vm0, %v3698_v12  ;;  %v16397_v52 = vld [vmem:[#allocation2 + $0x251] sm:$0xff] }
  0xba   : > { %13093 = vmatprep.mubr.msk.bf16.mxu1 %vm325_vm0, %v3699_v34  ;;  %19344 = vst [vmem:[#allocation20_spill] sm:$0xff] %v16397_v52  ;;  %v3700_v55 = vpack.c.bf16 %v16397_v52, %v16395_v50 }
  0xbd   : > { %13400 = vmatmul.mubr.msk.bf16.gmra.mrb[28].mxu0 %vm325_vm0, %v3406_v32  ;;  %v683_v32 = vmax.f32 %v651_v36, 0.0  ;;  %v772_v36 = vpack.c.bf16 %v16387_v24, %v740_v33 }
  0xbe   : > { %13405 = vmatprep.mubr.msk.bf16.mxu0 %vm325_vm0, %v16223_v61  ;;  %v16392_v61 = vld [vmem:[%s19155_s3 + $0x60] sm:$0xff]  }
  0xbf   : > { %715 = vst.msk [vmem:[#allocation2 + $0x121] sm:$0xff] %vm325_vm0, %v683_v32  ;;  %v16410_v32 = vld [vmem:[#allocation2 + $0x20] sm:$0xff] }
  0xc0   : > { %v773_v33 = vpack.c.bf16 %v16412_v54, %v16410_v32 }
  0xc1   : > { %13094 = vmatmul.mubr.msk.bf16.gmra.mrb[28].mxu1 %vm325_vm0, %v3700_v55 }
  0xc2   : > { %13099 = vmatprep.mubr.msk.bf16.mxu1 %vm325_vm0, %v772_v36 }
  0xc5   : > { %13406 = vmatmul.mubr.msk.bf16.vlgmr.msra.gmra.mrb[0].mxu0 %vm325_vm0, %v16257_v13  ;;  %v16414_v13 = vld [vmem:[#allocation2 + $0x40] sm:$0xff] }
  0xc6   : > { %13438 = vmatpush3.bf16.msra.mxu0 %v16122_v27  ;;  %13409 = vmatprep.mubr.msk.bf16.mxu0 %vm325_vm0, %v16261_v15  ;;  %v16416_v27 = vld [vmem:[#allocation2 + $0x50] sm:$0xff]  ;;  %v12403_v15 = vunpack.c.h.bf16 %v16077_v41  ;;  %v16431_v41 = vld [vmem:[#allocation2 + $0x60] sm:$0xff] }
  0xc7   : > { %13471 = vmatprep.subr.bf16.mxu0 %v16392_v61  ;;  %v774_v36 = vpack.c.bf16 %v16416_v27, %v16414_v13 }
  0xc8   : > { %v620_v52 = vmul.f32 %v12403_v15, %v15965_v4  ;;  %v16435_v15 = vld [vmem:[#allocation2 + $0xb0] sm:$0xff] }
  0xc9   : > { %13100 = vmatmul.mubr.msk.bf16.vlgmr.msra.gmra.mrb[0].mxu1 %vm325_vm0, %v773_v33  ;;  %v3955_v33 = vld [vmem:[#allocation2 + $0xa2] sm:$0xff] }
  0xca   : > { %v659_v50 = vadd.f32 %v16055_v14, %v620_v52  ;;  %13103 = vmatprep.mubr.msk.bf16.mxu1 %vm325_vm0, %v774_v36  ;;  %13132 = vmatpush3.bf16.msra.mxu1 %v15423_v53  ;;  %v12419_v53 = vunpack.c.h.bf16 %v16116_v19  ;;  %v3681_v19 = vld [vmem:[#allocation2 + $0x281] sm:$0xff]  ;;  %v16495_v36 = vld [vmem:[#allocation2 + $0xb2] sm:$0xff] }
  0xcc   : > { %v691_v39 = vmax.f32 %v659_v50, 0.0  ;;  %v776_v50 = vpack.c.bf16 %v16435_v15, %v748_v51  ;;  %v16473_v51 = vld [vmem:[#allocation2 + $0x2b1] sm:$0xff] }
  0xcd   : > { %13410 = vmatmul.mubr.msk.bf16.gmra.mrb[4].mxu0 %vm325_vm0, %v16293_v28  ;;  %v16433_v28 = vld [vmem:[#allocation2 + $0x70] sm:$0xff] }
  0xce   : > { %13413 = vmatprep.mubr.msk.bf16.mxu0 %vm325_vm0, %v16296_v30  ;;  %723 = vst.msk [vmem:[#allocation2 + $0x1c1] sm:$0xff] %vm325_vm0, %v691_v39  ;;  %v775_v30 = vpack.c.bf16 %v16433_v28, %v16431_v41  ;;  %v628_v39 = vmul.f32 %v12419_v53, %v15965_v4  ;;  %v16511_v53 = vld [vmem:[#allocation2 + $0xd2] sm:$0xff] }
  0xd1   : > { %13104 = vmatmul.mubr.msk.bf16.gmra.mrb[4].mxu1 %vm325_vm0, %v775_v30  ;;  %v15425_v30 = vld [vmem:[%s19155_s3 + $0x18] sm:$0xff]  }
  0xd2   : > { %13107 = vmatprep.mubr.msk.bf16.mxu1 %vm325_vm0, %v776_v50  ;;  %v16509_v50 = vld [vmem:[#allocation2 + $0xc2] sm:$0xff]  ;;  %13165 = vmatprep.subr.bf16.mxu1 %v15425_v30 }
  0xd5   : > { %13414 = vmatmul.mubr.msk.bf16.gmra.mrb[8].mxu0 %vm325_vm0, %v16328_v47  ;;  %v667_v47 = vadd.f32 %v16055_v14, %v628_v39  ;;  %v16513_v39 = vld [vmem:[#allocation2 + $0xe2] sm:$0xff] }
  0xd6   : > { %13417 = vmatprep.mubr.msk.bf16.mxu0 %vm325_vm0, %v16332_v48 }
  0xd7   : > { %v699_v48 = vmax.f32 %v667_v47, 0.0 }
  0xd9   : > { %13108 = vmatmul.mubr.msk.bf16.gmra.mrb[8].mxu1 %vm325_vm0, %v16124_v29  ;;  %731 = vst.msk [vmem:[#allocation2 + $0x261] sm:$0xff] %vm325_vm0, %v699_v48  ;;  %v12435_v29 = vunpack.c.h.bf16 %v16171_v11  ;;  %v1271_v48 = vld [vmem:[#allocation2 + $0x2] sm:$0xff] }
  0xda   : > { %13111 = vmatprep.mubr.msk.bf16.mxu1 %vm325_vm0, %v16132_v35 }
  0xdb   : > { %v636_v35 = vmul.f32 %v12435_v29, %v15965_v4  ;;  %v16537_v29 = vld [vmem:[#allocation2 + $0x112] sm:$0xff] }
  0xdc   : > { %19347 = vst [vmem:[#allocation23_spill] sm:$0xff] %v16537_v29 }
  0xdd   : > { %13418 = vmatmul.mubr.msk.bf16.gmra.mrb[12].mxu0 %vm325_vm0, %v3696_v21  ;;  %v16460_v21 = vld [vmem:[#allocation2 + $0x291] sm:$0xff]  ;;  %v675_v52 = vadd.f32 %v16055_v14, %v636_v35  ;;  %v16491_v14 = vld [vmem:[#allocation2 + $0x2e1] sm:$0xff] }
  0xde   : > { %13421 = vmatprep.mubr.msk.bf16.mxu0 %vm325_vm0, %v16357_v23  ;;  %v3701_v23 = vpack.c.bf16 %v16460_v21, %v3681_v19  ;;  %v16525_v19 = vld [vmem:[#allocation2 + $0x12] sm:$0xff]  ;;  %v3963_v35 = vld [vmem:[#allocation2 + $0x142] sm:$0xff] }
  0xdf   : > { %v707_v11 = vmax.f32 %v675_v52, 0.0  ;;  %19345 = vst [vmem:[#allocation21_spill] sm:$0xff] %v16525_v19  ;;  %v16540_v52 = vld [vmem:[#allocation2 + $0x152] sm:$0xff] }
  0xe0   : > { %19348 = vst [vmem:[#allocation24_spill] sm:$0xff] %v16540_v52 }
  0xe1   : > { %13112 = vmatmul.mubr.msk.bf16.gmra.mrb[12].mxu1 %vm325_vm0, %v16141_v43  ;;  %v16477_v43 = vld [vmem:[#allocation2 + $0x2d1] sm:$0xff]  ;;  %739 = vst.msk [vmem:[#allocation2 + $0x301] sm:$0xff] %vm325_vm0, %v707_v11  ;;  %v16549_v11 = vld [vmem:[#allocation2 + $0x22] sm:$0xff] }
  0xe2   : > { %13115 = vmatprep.mubr.msk.bf16.mxu1 %vm325_vm0, %v16164_v7  ;;  %19349 = vst [vmem:[#allocation25_spill] sm:$0xff] %v16549_v11 }
  0xe5   : > { %13422 = vmatmul.mubr.msk.bf16.gmra.mrb[16].mxu0 %vm325_vm0, %v3698_v12  ;;  %v16475_v12 = vld [vmem:[#allocation2 + $0x2c1] sm:$0xff] }
  0xe6   : > { %13425 = vmatprep.mubr.msk.bf16.mxu0 %vm325_vm0, %v3699_v34  ;;  %v16471_v34 = vld [vmem:[#allocation2 + $0x2a1] sm:$0xff]  ;;  %v3703_v4 = vpack.c.bf16 %v16477_v43, %v16475_v12 }
  0xe7   : > { %v3702_v7 = vpack.c.bf16 %v16473_v51, %v16471_v34 }
  0xe9   : > { %13116 = vmatmul.mubr.msk.bf16.gmra.mrb[16].mxu1 %vm325_vm0, %v16195_v46 }
  0xea   : > { %13119 = vmatprep.mubr.msk.bf16.mxu1 %vm325_vm0, %v16202_v49  ;;  %v3987_v49 = vpack.c.bf16 %v16495_v36, %v3955_v33  ;;  %v16553_v33 = vld [vmem:[#allocation2 + $0x42] sm:$0xff] }
  0xeb   : > { %19351 = vst [vmem:[#allocation27_spill] sm:$0xff] %v16553_v33 }
  0xed   : > { %13426 = vmatmul.mubr.msk.bf16.gmra.mrb[20].mxu0 %vm325_vm0, %v3700_v55  ;;  %v16493_v55 = vld [vmem:[#allocation2 + $0x2f1] sm:$0xff] }
  0xee   : > { %13429 = vmatprep.mubr.msk.bf16.mxu0 %vm325_vm0, %v3701_v23  ;;  %v3704_v46 = vpack.c.bf16 %v16493_v55, %v16491_v14  ;;  %v16530_v23 = vld [vmem:[%s19155_s3 + $0x68] sm:$0xff]  }
  0xf1   : > { %13120 = vmatmul.mubr.msk.bf16.gmra.mrb[20].mxu1 %vm325_vm0, %v16227_v62  ;;  %v16515_v62 = vld [vmem:[#allocation2 + $0xf2] sm:$0xff] }
  0xf2   : > { %13123 = vmatprep.mubr.msk.bf16.mxu1 %vm325_vm0, %v16231_v63  ;;  %v3988_v63 = vpack.c.bf16 %v16511_v53, %v16509_v50  ;;  %v3989_v47 = vpack.c.bf16 %v16515_v62, %v16513_v39 }
  0xf5   : > { %13430 = vmatmul.mubr.msk.bf16.gmra.mrb[24].mxu0 %vm325_vm0, %v3702_v7 }
  0xf6   : > { %13433 = vmatprep.mubr.msk.bf16.mxu0 %vm325_vm0, %v3703_v4  ;;  %v16551_v4 = vld [vmem:[#allocation2 + $0x32] sm:$0xff] }
  0xf7   : > { %19350 = vst [vmem:[#allocation26_spill] sm:$0xff] %v16551_v4 }
  0xf9   : > { %13124 = vmatmul.mubr.msk.bf16.gmra.mrb[24].mxu1 %vm325_vm0, %v16265_v16  ;;  %v16535_v16 = vld [vmem:[#allocation2 + $0x102] sm:$0xff] }
  0xfa   : > { %13127 = vmatprep.mubr.msk.bf16.mxu1 %vm325_vm0, %v16271_v17  ;;  %19346 = vst [vmem:[#allocation22_spill] sm:$0xff] %v16535_v16  ;;  %v1303_v17 = vpack.c.bf16 %v16525_v19, %v1271_v48  ;;  %v3990_v7 = vpack.c.bf16 %v16537_v29, %v16535_v16  ;;  %v1304_v48 = vpack.c.bf16 %v16551_v4, %v16549_v11  ;;  %v16569_v29 = vld [vmem:[#allocation2 + $0x192] sm:$0xff]  ;;  %v16577_v11 = vld [vmem:[#allocation2 + $0x62] sm:$0xff] }
  0xfb   : > { %19356 = vst [vmem:[#allocation32_spill] sm:$0xff] %v16569_v29  ;;  %19357 = vst [vmem:[#allocation33_spill] sm:$0xff] %v16577_v11  ;;  %v16579_v16 = vld [vmem:[#allocation2 + $0x72] sm:$0xff] }
  0xfc   : > { %19358 = vst [vmem:[#allocation34_spill] sm:$0xff] %v16579_v16 }
  0xfd   : > { %13434 = vmatmul.mubr.msk.bf16.gmra.mrb[28].mxu0 %vm325_vm0, %v3704_v46  ;;  %v16555_v46 = vld [vmem:[#allocation2 + $0x52] sm:$0xff] }
  0xfe   : > { %13439 = vmatprep.mubr.msk.bf16.mxu0 %vm325_vm0, %v3987_v49  ;;  %19352 = vst [vmem:[#allocation28_spill] sm:$0xff] %v16555_v46 }
 0x101   : > { %13128 = vmatmul.mubr.msk.bf16.gmra.mrb[28].mxu1 %vm325_vm0, %v16300_v31  ;;  %v16561_v31 = vld [vmem:[#allocation2 + $0x162] sm:$0xff] }
 0x102   : > { %13133 = vmatprep.mubr.msk.bf16.mxu1 %vm325_vm0, %v1303_v17  ;;  %19353 = vst [vmem:[#allocation29_spill] sm:$0xff] %v16561_v31  ;;  %v1305_v17 = vpack.c.bf16 %v16555_v46, %v16553_v33  ;;  %v1306_v46 = vpack.c.bf16 %v16579_v16, %v16577_v11  ;;  %v3971_v33 = vld [vmem:[#allocation2 + $0x1e2] sm:$0xff] }
 0x103   : > { %v16598_v16 = vld [vmem:[#allocation2 + $0x202] sm:$0xff] }
 0x104   : > { %19362 = vst [vmem:[#allocation38_spill] sm:$0xff] %v16598_v16  ;;  %v16602_v11 = vld [vmem:[#allocation2 + $0x222] sm:$0xff] }
 0x105   : > { %13440 = vmatmul.mubr.msk.bf16.vlgmr.msra.gmra.mrb[0].mxu0 %vm325_vm0, %v3988_v63  ;;  %19364 = vst [vmem:[#allocation40_spill] sm:$0xff] %v16602_v11 }
 0x106   : > { %13472 = vmatpush3.bf16.msra.mxu0 %v16392_v61  ;;  %13443 = vmatprep.mubr.msk.bf16.mxu0 %vm325_vm0, %v3989_v47  ;;  %v3991_v61 = vpack.c.bf16 %v16540_v52, %v3963_v35  ;;  %v16563_v35 = vld [vmem:[#allocation2 + $0x172] sm:$0xff]  ;;  %v16567_v52 = vld [vmem:[#allocation2 + $0x182] sm:$0xff] }
 0x107   : > { %13505 = vmatprep.subr.bf16.mxu0 %v16530_v23  ;;  %19354 = vst [vmem:[#allocation30_spill] sm:$0xff] %v16563_v35  ;;  %19355 = vst [vmem:[#allocation31_spill] sm:$0xff] %v16567_v52  ;;  %v3992_v19 = vpack.c.bf16 %v16563_v35, %v16561_v31  ;;  %v3993_v4 = vpack.c.bf16 %v16569_v29, %v16567_v52  ;;  %v16585_v35 = vld [vmem:[#allocation2 + $0x1a2] sm:$0xff]  ;;  %v16589_v29 = vld [vmem:[#allocation2 + $0x1f2] sm:$0xff] }
 0x108   : > { %19359 = vst [vmem:[#allocation35_spill] sm:$0xff] %v16585_v35  ;;  %19361 = vst [vmem:[#allocation37_spill] sm:$0xff] %v16589_v29  ;;  %v16600_v52 = vld [vmem:[#allocation2 + $0x212] sm:$0xff] }
 0x109   : > { %13134 = vmatmul.mubr.msk.bf16.vlgmr.msra.gmra.mrb[0].mxu1 %vm325_vm0, %v1304_v48  ;;  %v16587_v48 = vld [vmem:[#allocation2 + $0x1b2] sm:$0xff]  ;;  %19363 = vst [vmem:[#allocation39_spill] sm:$0xff] %v16600_v52 }
 0x10a   : > { %13137 = vmatprep.mubr.msk.bf16.mxu1 %vm325_vm0, %v1305_v17  ;;  %13166 = vmatpush3.bf16.msra.mxu1 %v15425_v30  ;;  %19360 = vst [vmem:[#allocation36_spill] sm:$0xff] %v16587_v48  ;;  %v3994_v17 = vpack.c.bf16 %v16587_v48, %v16585_v35  ;;  %v3995_v30 = vpack.c.bf16 %v16589_v29, %v3971_v33  ;;  %v16604_v31 = vld [vmem:[#allocation2 + $0x232] sm:$0xff]  ;;  %v16614_v33 = vld [vmem:[#allocation2 + $0x242] sm:$0xff] }
 0x10b   : > { %19365 = vst [vmem:[#allocation41_spill] sm:$0xff] %v16604_v31  ;;  %v3996_v48 = vpack.c.bf16 %v16600_v52, %v16598_v16  ;;  %v3979_v29 = vld [vmem:[#allocation2 + $0x282] sm:$0xff]  ;;  %v16618_v35 = vld [vmem:[#allocation2 + $0x292] sm:$0xff] }
 0x10c   : > { %v16633_v16 = vld [vmem:[#allocation2 + $0x2d2] sm:$0xff] }
 0x10d   : > { %13444 = vmatmul.mubr.msk.bf16.gmra.mrb[4].mxu0 %vm325_vm0, %v3990_v7 }
 0x10e   : > { %13447 = vmatprep.mubr.msk.bf16.mxu0 %vm325_vm0, %v3991_v61 }
 0x111   : > { %13138 = vmatmul.mubr.msk.bf16.gmra.mrb[4].mxu1 %vm325_vm0, %v1306_v46  ;;  %v16616_v46 = vld [vmem:[#allocation2 + $0x252] sm:$0xff] }
 0x112   : > { %13141 = vmatprep.mubr.msk.bf16.mxu1 %vm325_vm0, %v3987_v49  ;;  %v3997_v49 = vpack.c.bf16 %v16604_v31, %v16602_v11  ;;  %19366 = vst [vmem:[#allocation42_spill] sm:$0xff] %v16616_v46  ;;  %v3998_v52 = vpack.c.bf16 %v16616_v46, %v16614_v33  ;;  %v16629_v31 = vld [vmem:[#allocation2 + $0x2b2] sm:$0xff]  ;;  %v16631_v11 = vld [vmem:[#allocation2 + $0x2c2] sm:$0xff] }
 0x113   : > { %19367 = vst [vmem:[#allocation43_spill] sm:$0xff] %v16629_v31 }
 0x115   : > { %13448 = vmatmul.mubr.msk.bf16.gmra.mrb[8].mxu0 %vm325_vm0, %v3992_v19 }
 0x116   : > { %13451 = vmatprep.mubr.msk.bf16.mxu0 %vm325_vm0, %v3993_v4 }
 0x119   : > { %13142 = vmatmul.mubr.msk.bf16.gmra.mrb[8].mxu1 %vm325_vm0, %v3988_v63  ;;  %v3999_v63 = vpack.c.bf16 %v16618_v35, %v3979_v29  ;;  %v4001_v29 = vpack.c.bf16 %v16633_v16, %v16631_v11 }
 0x11a   : > { %13145 = vmatprep.mubr.msk.bf16.mxu1 %vm325_vm0, %v3989_v47  ;;  %v16627_v47 = vld [vmem:[#allocation2 + $0x2a2] sm:$0xff] }
 0x11b   : > { %v4000_v46 = vpack.c.bf16 %v16629_v31, %v16627_v47 }
 0x11d   : > { %13452 = vmatmul.mubr.msk.bf16.gmra.mrb[12].mxu0 %vm325_vm0, %v3994_v17 }
 0x11e   : > { %13455 = vmatprep.mubr.msk.bf16.mxu0 %vm325_vm0, %v3995_v30 }
 0x121   : > { %13146 = vmatmul.mubr.msk.bf16.gmra.mrb[12].mxu1 %vm325_vm0, %v3990_v7  ;;  %v16643_v7 = vld [vmem:[#allocation2 + $0x2e2] sm:$0xff] }
 0x122   : > { %13149 = vmatprep.mubr.msk.bf16.mxu1 %vm325_vm0, %v3991_v61  ;;  %v16645_v61 = vld [vmem:[#allocation2 + $0x2f2] sm:$0xff] }
 0x123   : > { %19368 = vst [vmem:[#allocation44_spill] sm:$0xff] %v16645_v61  ;;  %v4002_v31 = vpack.c.bf16 %v16645_v61, %v16643_v7  ;;  %v16664_v61 = vld [vmem:[#allocation2 + $0xf0] sm:$0xff] }
 0x124   : > { %19372 = vst [vmem:[#allocation48_spill] sm:$0xff] %v16664_v61 }
 0x125   : > { %13456 = vmatmul.mubr.msk.bf16.gmra.mrb[16].mxu0 %vm325_vm0, %v3996_v48 }
 0x126   : > { %13459 = vmatprep.mubr.msk.bf16.mxu0 %vm325_vm0, %v3997_v49 }
 0x129   : > { %13150 = vmatmul.mubr.msk.bf16.gmra.mrb[16].mxu1 %vm325_vm0, %v3992_v19 }
 0x12a   : > { %13153 = vmatprep.mubr.msk.bf16.mxu1 %vm325_vm0, %v3993_v4  ;;  %v15427_v4 = vld [vmem:[%s19155_s3 + $0x20] sm:$0xff]  }
 0x12b   : > { %13199 = vmatprep.subr.bf16.mxu1 %v15427_v4 }
 0x12d   : > { %13460 = vmatmul.mubr.msk.bf16.gmra.mrb[20].mxu0 %vm325_vm0, %v3998_v52 }
 0x12e   : > { %13463 = vmatprep.mubr.msk.bf16.mxu0 %vm325_vm0, %v3999_v63  ;;  %v16647_v63 = vld [vmem:[#allocation2 + $0xc0] sm:$0xff] }
 0x12f   : > { %19369 = vst [vmem:[#allocation45_spill] sm:$0xff] %v16647_v63  ;;  %v4285_v19 = vpack.c.bf16 %v16647_v63, %v16435_v15  ;;  %v16682_v63 = vld [vmem:[#allocation2 + $0x110] sm:$0xff] }
 0x131   : > { %13154 = vmatmul.mubr.msk.bf16.gmra.mrb[20].mxu1 %vm325_vm0, %v3994_v17  ;;  %v16666_v17 = vld [vmem:[#allocation2 + $0x100] sm:$0xff] }
 0x132   : > { %13157 = vmatprep.mubr.msk.bf16.mxu1 %vm325_vm0, %v3995_v30  ;;  %19373 = vst [vmem:[#allocation49_spill] sm:$0xff] %v16666_v17  ;;  %v4287_v30 = vpack.c.bf16 %v16666_v17, %v16664_v61  ;;  %v4261_v17 = vld [vmem:[#allocation2 + $0x150] sm:$0xff] }
 0x135   : > { %13464 = vmatmul.mubr.msk.bf16.gmra.mrb[24].mxu0 %vm325_vm0, %v4000_v46  ;;  %v16660_v46 = vld [vmem:[#allocation2 + $0xd0] sm:$0xff] }
 0x136   : > { %13467 = vmatprep.mubr.msk.bf16.mxu0 %vm325_vm0, %v4001_v29  ;;  %19370 = vst [vmem:[#allocation46_spill] sm:$0xff] %v16660_v46  ;;  %v16662_v29 = vld [vmem:[#allocation2 + $0xe0] sm:$0xff] }
 0x137   : > { %19371 = vst [vmem:[#allocation47_spill] sm:$0xff] %v16662_v29  ;;  %v4286_v15 = vpack.c.bf16 %v16662_v29, %v16660_v46  ;;  %v16684_v29 = vld [vmem:[#allocation2 + $0x120] sm:$0xff]  ;;  %v1603_v46 = vpack.c.bf16 %v16414_v13, %v16412_v54 }
 0x138   : > { %19374 = vst [vmem:[#allocation50_spill] sm:$0xff] %v16684_v29  ;;  %v4288_v61 = vpack.c.bf16 %v16684_v29, %v16682_v63  ;;  %v16716_v13 = vld [vmem:[#allocation2 + $0x1c0] sm:$0xff] }
 0x139   : > { %13158 = vmatmul.mubr.msk.bf16.gmra.mrb[24].mxu1 %vm325_vm0, %v3996_v48  ;;  %v1602_v48 = vpack.c.bf16 %v16410_v32, %v16387_v24  ;;  %v16700_v24 = vld [vmem:[#allocation2 + $0x170] sm:$0xff]  ;;  %v1604_v32 = vpack.c.bf16 %v16431_v41, %v16416_v27  ;;  %v4295_v27 = vpack.c.bf16 %v16281_v22, %v16253_v10  ;;  %v16746_v10 = vld [vmem:[#allocation2 + $0x1a0] sm:$0xff] }
 0x13a   : > { %13161 = vmatprep.mubr.msk.bf16.mxu1 %vm325_vm0, %v3997_v49  ;;  %v16688_v49 = vld [vmem:[#allocation2 + $0x160] sm:$0xff]  ;;  %v4290_v29 = vpack.c.bf16 %v16187_v37, %v16700_v24  ;;  %v4292_v37 = vpack.c.bf16 %v16716_v13, %v16217_v1  ;;  %v16760_v41 = vld [vmem:[#allocation2 + $0x1b0] sm:$0xff] }
 0x13b   : > { %v16734_v1 = vld [vmem:[#allocation2 + $0x260] sm:$0xff] }
 0x13d   : > { %13468 = vmatmul.mubr.msk.bf16.gmra.mrb[28].mxu0 %vm325_vm0, %v4002_v31  ;;  %v16677_v31 = vld [vmem:[%s19155_s3 + $0x70] sm:$0xff]  }
 0x13e   : > { %13473 = vmatprep.mubr.msk.bf16.mxu0 %vm325_vm0, %v4285_v19 }
 0x141   : > { %13162 = vmatmul.mubr.msk.bf16.gmra.mrb[28].mxu1 %vm325_vm0, %v3998_v52  ;;  %v4291_v52 = vpack.c.bf16 %v16215_v58, %v16189_v38  ;;  %v4293_v38 = vpack.c.bf16 %v16241_v3, %v16220_v59  ;;  %v4294_v58 = vpack.c.bf16 %v16251_v9, %v16249_v8  ;;  %v4296_v59 = vpack.c.bf16 %v16734_v1, %v16287_v25  ;;  %v16742_v8 = vld [vmem:[#allocation2 + $0x180] sm:$0xff]  ;;  %v16744_v9 = vld [vmem:[#allocation2 + $0x190] sm:$0xff] }
 0x142   : > { %13167 = vmatprep.mubr.msk.bf16.mxu1 %vm325_vm0, %v1602_v48  ;;  %v4297_v3 = vpack.c.bf16 %v16317_v40, %v16289_v26  ;;  %v1611_v22 = vpack.c.bf16 %v16742_v8, %v16700_v24  ;;  %v1612_v25 = vpack.c.bf16 %v16746_v10, %v16744_v9  ;;  %v4298_v26 = vpack.c.bf16 %v16322_v44, %v16319_v42  ;;  %v16768_v42 = vld [vmem:[#allocation2 + $0x300] sm:$0xff] }
 0x143   : > { %v4299_v40 = vpack.c.bf16 %v16350_v57, %v16324_v45  ;;  %v4300_v45 = vpack.c.bf16 %v16768_v42, %v16352_v60  ;;  %v4583_v57 = vpack.c.bf16 %v16235_v0, %v16211_v56  ;;  %v4584_v0 = vpack.c.bf16 %v16243_v5, %v16237_v2  ;;  %v16814_v5 = vld [vmem:[#allocation2 + $0x121] sm:$0xff] }
 0x144   : > { %v4585_v48 = vpack.c.bf16 %v16273_v18, %v16245_v6  ;;  %v4586_v18 = vpack.c.bf16 %v16814_v5, %v16275_v20 }
 0x145   : > { %13474 = vmatmul.mubr.msk.bf16.vlgmr.msra.gmra.mrb[0].mxu0 %vm325_vm0, %v4286_v15 }
 0x146   : > { %13506 = vmatpush3.bf16.msra.mxu0 %v16530_v23  ;;  %13477 = vmatprep.mubr.msk.bf16.mxu0 %vm325_vm0, %v4287_v30  ;;  %v4289_v23 = vpack.c.bf16 %v16688_v49, %v4261_v17  ;;  %v16710_v17 = vld [vmem:[#allocation2 + $0x80] sm:$0xff] }
 0x147   : > { %13539 = vmatprep.subr.bf16.mxu0 %v16677_v31  ;;  %v1605_v54 = vpack.c.bf16 %v16710_v17, %v16433_v28  ;;  %v1594_v28 = vld [vmem:[#allocation2 + $0x1f0] sm:$0xff] }
 0x149   : > { %13168 = vmatmul.mubr.msk.bf16.vlgmr.msra.gmra.mrb[0].mxu1 %vm325_vm0, %v1603_v46  ;;  %v16779_v46 = vld [vmem:[#allocation2 + $0x220] sm:$0xff] }
 0x14a   : > { %13171 = vmatprep.mubr.msk.bf16.mxu1 %vm325_vm0, %v1604_v32  ;;  %13200 = vmatpush3.bf16.msra.mxu1 %v15427_v4  ;;  %v16777_v4 = vld [vmem:[#allocation2 + $0x210] sm:$0xff] }
 0x14b   : > { %v1615_v60 = vpack.c.bf16 %v16779_v46, %v16777_v4  ;;  %v1868_v32 = vld [vmem:[#allocation2 + $0x11] sm:$0xff] }
 0x14d   : > { %13478 = vmatmul.mubr.msk.bf16.gmra.mrb[4].mxu0 %vm325_vm0, %v4288_v61 }
 0x14e   : > { %13481 = vmatprep.mubr.msk.bf16.mxu0 %vm325_vm0, %v4289_v23 }
 0x151   : > { %13172 = vmatmul.mubr.msk.bf16.gmra.mrb[4].mxu1 %vm325_vm0, %v1605_v54  ;;  %v16807_v54 = vld [vmem:[%s19155_s3 + $0x78] sm:$0xff]  }
 0x152   : > { %13175 = vmatprep.mubr.msk.bf16.mxu1 %vm325_vm0, %v4285_v19  ;;  %v1613_v19 = vpack.c.bf16 %v16716_v13, %v16760_v41 }
 0x155   : > { %13482 = vmatmul.mubr.msk.bf16.gmra.mrb[8].mxu0 %vm325_vm0, %v4290_v29  ;;  %v16781_v29 = vld [vmem:[#allocation2 + $0x230] sm:$0xff] }
 0x156   : > { %13485 = vmatprep.mubr.msk.bf16.mxu0 %vm325_vm0, %v4291_v52  ;;  %v16802_v52 = vld [vmem:[#allocation2 + $0x21] sm:$0xff] }
 0x157   : > { %v1900_v6 = vpack.c.bf16 %v16802_v52, %v1868_v32 }
 0x159   : > { %13176 = vmatmul.mubr.msk.bf16.gmra.mrb[8].mxu1 %vm325_vm0, %v4286_v15  ;;  %v16783_v15 = vld [vmem:[#allocation2 + $0x240] sm:$0xff] }
 0x15a   : > { %13179 = vmatprep.mubr.msk.bf16.mxu1 %vm325_vm0, %v4287_v30  ;;  %v15429_v30 = vld [vmem:[%s19155_s3 + $0x28] sm:$0xff]   ;;  %v1616_v56 = vpack.c.bf16 %v16783_v15, %v16781_v29 }
 0x15b   : > { %13233 = vmatprep.subr.bf16.mxu1 %v15429_v30 }
 0x15d   : > { %13486 = vmatmul.mubr.msk.bf16.gmra.mrb[12].mxu0 %vm325_vm0, %v4292_v37  ;;  %v19375_v37 = vld [vmem:[#allocation7_spill] sm:$0xff] }
 0x15e   : > { %13489 = vmatprep.mubr.msk.bf16.mxu0 %vm325_vm0, %v4293_v38  ;;  %v19376_v38 = vld [vmem:[#allocation8_spill] sm:$0xff] }
 0x161   : > { %13180 = vmatmul.mubr.msk.bf16.gmra.mrb[12].mxu1 %vm325_vm0, %v4288_v61  ;;  %v16762_v61 = vld [vmem:[#allocation2 + $0x200] sm:$0xff] }
 0x162   : > { %13183 = vmatprep.mubr.msk.bf16.mxu1 %vm325_vm0, %v4289_v23  ;;  %v1614_v44 = vpack.c.bf16 %v16762_v61, %v1594_v28  ;;  %v16800_v23 = vld [vmem:[#allocation2 + $0x250] sm:$0xff]  ;;  %v19379_v28 = vld [vmem:[#allocation11_spill] sm:$0xff] }
 0x163   : > { %v1617_v2 = vpack.c.bf16 %v16734_v1, %v16800_v23 }
 0x165   : > { %13490 = vmatmul.mubr.msk.bf16.gmra.mrb[16].mxu0 %vm325_vm0, %v4294_v58  ;;  %v4587_v58 = vpack.c.bf16 %v19376_v38, %v19375_v37  ;;  %v16863_v38 = vld [vmem:[#allocation2 + $0xd1] sm:$0xff] }
 0x166   : > { %13493 = vmatprep.mubr.msk.bf16.mxu0 %vm325_vm0, %v4295_v27  ;;  %v16824_v27 = vld [vmem:[#allocation2 + $0x31] sm:$0xff] }
 0x169   : > { %13184 = vmatmul.mubr.msk.bf16.gmra.mrb[16].mxu1 %vm325_vm0, %v1611_v22 }
 0x16a   : > { %13187 = vmatprep.mubr.msk.bf16.mxu1 %vm325_vm0, %v1612_v25  ;;  %v19377_v25 = vld [vmem:[#allocation9_spill] sm:$0xff] }
 0x16d   : > { %13494 = vmatmul.mubr.msk.bf16.gmra.mrb[20].mxu0 %vm325_vm0, %v4296_v59  ;;  %v16828_v59 = vld [vmem:[#allocation2 + $0x51] sm:$0xff] }
 0x16e   : > { %13497 = vmatprep.mubr.msk.bf16.mxu0 %vm325_vm0, %v4297_v3  ;;  %v16830_v3 = vld [vmem:[#allocation2 + $0x61] sm:$0xff] }
 0x16f   : > { %v1902_v22 = vpack.c.bf16 %v16830_v3, %v16828_v59 }
 0x171   : > { %13188 = vmatmul.mubr.msk.bf16.gmra.mrb[20].mxu1 %vm325_vm0, %v1613_v19  ;;  %v19380_v19 = vld [vmem:[#allocation12_spill] sm:$0xff] }
 0x172   : > { %13191 = vmatprep.mubr.msk.bf16.mxu1 %vm325_vm0, %v1614_v44  ;;  %v4589_v44 = vpack.c.bf16 %v19380_v19, %v19379_v28  ;;  %v19385_v28 = vld [vmem:[#allocation17_spill] sm:$0xff] }
 0x175   : > { %13498 = vmatmul.mubr.msk.bf16.gmra.mrb[24].mxu0 %vm325_vm0, %v4298_v26  ;;  %v19378_v26 = vld [vmem:[#allocation10_spill] sm:$0xff] }
 0x176   : > { %13501 = vmatprep.mubr.msk.bf16.mxu0 %vm325_vm0, %v4299_v40  ;;  %v4588_v40 = vpack.c.bf16 %v19378_v26, %v19377_v25 }
 0x179   : > { %13192 = vmatmul.mubr.msk.bf16.gmra.mrb[24].mxu1 %vm325_vm0, %v1615_v60  ;;  %v1876_v60 = vld [vmem:[#allocation2 + $0xb1] sm:$0xff] }
 0x17a   : > { %13195 = vmatprep.mubr.msk.bf16.mxu1 %vm325_vm0, %v1616_v56  ;;  %v16848_v56 = vld [vmem:[#allocation2 + $0xc1] sm:$0xff] }
 0x17b   : > { %v1904_v32 = vpack.c.bf16 %v16848_v56, %v1876_v60  ;;  %v19387_v60 = vld [vmem:[#allocation19_spill] sm:$0xff] }
 0x17d   : > { %13502 = vmatmul.mubr.msk.bf16.gmra.mrb[28].mxu0 %vm325_vm0, %v4300_v45  ;;  %v16844_v45 = vld [vmem:[#allocation2 + $0x71] sm:$0xff] }
 0x17e   : > { %13507 = vmatprep.mubr.msk.bf16.mxu0 %vm325_vm0, %v4583_v57  ;;  %v16846_v57 = vld [vmem:[#allocation2 + $0x81] sm:$0xff] }
 0x181   : > { %13196 = vmatmul.mubr.msk.bf16.gmra.mrb[28].mxu1 %vm325_vm0, %v1617_v2  ;;  %v19381_v2 = vld [vmem:[#allocation13_spill] sm:$0xff] }
 0x182   : > { %13201 = vmatprep.mubr.msk.bf16.mxu1 %vm325_vm0, %v1900_v6 }
 0x185   : > { %13508 = vmatmul.mubr.msk.bf16.vlgmr.msra.gmra.mrb[0].mxu0 %vm325_vm0, %v4584_v0  ;;  %v1903_v0 = vpack.c.bf16 %v16846_v57, %v16844_v45 }
 0x186   : > { %13540 = vmatpush3.bf16.msra.mxu0 %v16677_v31  ;;  %13511 = vmatprep.mubr.msk.bf16.mxu0 %vm325_vm0, %v4585_v48  ;;  %v16826_v31 = vld [vmem:[#allocation2 + $0x41] sm:$0xff] }
 0x187   : > { %13573 = vmatprep.subr.bf16.mxu0 %v16807_v54  ;;  %v1901_v20 = vpack.c.bf16 %v16826_v31, %v16824_v27  ;;  %v16854_v48 = vld [vmem:[#allocation2 + $0x1c1] sm:$0xff] }
 0x188   : > { %v4590_v6 = vpack.c.bf16 %v16854_v48, %v19381_v2  ;;  %v1884_v2 = vld [vmem:[#allocation2 + $0x151] sm:$0xff] }
 0x189   : > { %13202 = vmatmul.mubr.msk.bf16.vlgmr.msra.gmra.mrb[0].mxu1 %vm325_vm0, %v1901_v20  ;;  %v16867_v20 = vld [vmem:[#allocation2 + $0xf1] sm:$0xff] }
 0x18a   : > { %13205 = vmatprep.mubr.msk.bf16.mxu1 %vm325_vm0, %v1902_v22  ;;  %13234 = vmatpush3.bf16.msra.mxu1 %v15429_v30  ;;  %v19382_v30 = vld [vmem:[#allocation14_spill] sm:$0xff]  ;;  %v16869_v22 = vld [vmem:[#allocation2 + $0x101] sm:$0xff] }
 0x18b   : > { %v1906_v26 = vpack.c.bf16 %v16869_v22, %v16867_v20 }
 0x18d   : > { %13512 = vmatmul.mubr.msk.bf16.gmra.mrb[4].mxu0 %vm325_vm0, %v4586_v18  ;;  %v19383_v18 = vld [vmem:[#allocation15_spill] sm:$0xff] }
 0x18e   : > { %13515 = vmatprep.mubr.msk.bf16.mxu0 %vm325_vm0, %v4587_v58  ;;  %v4591_v37 = vpack.c.bf16 %v19383_v18, %v19382_v30  ;;  %v16865_v58 = vld [vmem:[#allocation2 + $0xe1] sm:$0xff] }
 0x18f   : > { %v1905_v25 = vpack.c.bf16 %v16865_v58, %v16863_v38  ;;  %v16891_v18 = vld [vmem:[#allocation2 + $0x261] sm:$0xff] }
 0x190   : > { %19388 = vst [vmem:[#allocation7_spill] sm:$0xff] %v16891_v18 }
 0x191   : > { %13206 = vmatmul.mubr.msk.bf16.gmra.mrb[4].mxu1 %vm325_vm0, %v1903_v0 }
 0x192   : > { %13209 = vmatprep.mubr.msk.bf16.mxu1 %vm325_vm0, %v1904_v32  ;;  %v16883_v32 = vld [vmem:[#allocation2 + $0x111] sm:$0xff] }
 0x193   : > { %v1907_v30 = vpack.c.bf16 %v16814_v5, %v16883_v32 }
 0x195   : > { %13516 = vmatmul.mubr.msk.bf16.gmra.mrb[8].mxu0 %vm325_vm0, %v4588_v40  ;;  %v19384_v40 = vld [vmem:[#allocation16_spill] sm:$0xff] }
 0x196   : > { %13519 = vmatprep.mubr.msk.bf16.mxu0 %vm325_vm0, %v4589_v44  ;;  %v4592_v19 = vpack.c.bf16 %v19385_v28, %v19384_v40  ;;  %v19386_v44 = vld [vmem:[#allocation18_spill] sm:$0xff] }
 0x197   : > { %v4593_v0 = vpack.c.bf16 %v19387_v60, %v19386_v44  ;;  %v16900_v28 = vld [vmem:[#allocation2 + $0x171] sm:$0xff]  ;;  %v16906_v60 = vld [vmem:[#allocation2 + $0x1a1] sm:$0xff] }
 0x198   : > { %v16904_v44 = vld [vmem:[#allocation2 + $0x191] sm:$0xff] }
 0x199   : > { %13210 = vmatmul.mubr.msk.bf16.gmra.mrb[8].mxu1 %vm325_vm0, %v1905_v25  ;;  %v19389_v25 = vld [vmem:[#allocation20_spill] sm:$0xff] }
 0x19a   : > { %13213 = vmatprep.mubr.msk.bf16.mxu1 %vm325_vm0, %v1906_v26  ;;  %v4594_v40 = vpack.c.bf16 %v16891_v18, %v19389_v25  ;;  %v4595_v26 = vpack.c.bf16 %v16471_v34, %v16460_v21  ;;  %v1910_v21 = vpack.c.bf16 %v16906_v60, %v16904_v44  ;;  %v4596_v34 = vpack.c.bf16 %v16475_v12, %v16473_v51  ;;  %v16922_v25 = vld [vmem:[#allocation2 + $0x201] sm:$0xff] }
 0x19b   : > { %v16928_v51 = vld [vmem:[#allocation2 + $0x301] sm:$0xff] }
 0x19c   : > { %19390 = vst [vmem:[#allocation8_spill] sm:$0xff] %v16928_v51 }
 0x19d   : > { %13520 = vmatmul.mubr.msk.bf16.gmra.mrb[12].mxu0 %vm325_vm0, %v4590_v6  ;;  %v16885_v6 = vld [vmem:[#allocation2 + $0x161] sm:$0xff] }
 0x19e   : > { %13523 = vmatprep.mubr.msk.bf16.mxu0 %vm325_vm0, %v4591_v37  ;;  %v1908_v37 = vpack.c.bf16 %v16885_v6, %v1884_v2  ;;  %v4597_v2 = vpack.c.bf16 %v16491_v14, %v16477_v43  ;;  %v4598_v43 = vpack.c.bf16 %v16928_v51, %v16493_v55  ;;  %v4881_v14 = vpack.c.bf16 %v16509_v50, %v16495_v36  ;;  %v19402_v51 = vld [vmem:[#allocation29_spill] sm:$0xff] }
 0x19f   : > { %v4882_v50 = vpack.c.bf16 %v16513_v39, %v16511_v53  ;;  %v16972_v53 = vld [vmem:[#allocation2 + $0x122] sm:$0xff]  ;;  %v19398_v39 = vld [vmem:[#allocation21_spill] sm:$0xff] }
 0x1a0   : > { %19397 = vst [vmem:[#allocation14_spill] sm:$0xff] %v16972_v53 }
 0x1a1   : > { %13214 = vmatmul.mubr.msk.bf16.gmra.mrb[12].mxu1 %vm325_vm0, %v1907_v30  ;;  %v16920_v30 = vld [vmem:[#allocation2 + $0x1b1] sm:$0xff] }
 0x1a2   : > { %13217 = vmatprep.mubr.msk.bf16.mxu1 %vm325_vm0, %v1908_v37  ;;  %v1892_v37 = vld [vmem:[#allocation2 + $0x1f1] sm:$0xff] }
 0x1a3   : > { %v1912_v12 = vpack.c.bf16 %v16922_v25, %v1892_v37  ;;  %v19395_v37 = vld [vmem:[#allocation22_spill] sm:$0xff] }
 0x1a5   : > { %13524 = vmatmul.mubr.msk.bf16.gmra.mrb[16].mxu0 %vm325_vm0, %v4592_v19  ;;  %v16902_v19 = vld [vmem:[#allocation2 + $0x181] sm:$0xff] }
 0x1a6   : > { %13527 = vmatprep.mubr.msk.bf16.mxu0 %vm325_vm0, %v4593_v0  ;;  %v1909_v0 = vpack.c.bf16 %v16902_v19, %v16900_v28 }
 0x1a9   : > { %13218 = vmatmul.mubr.msk.bf16.gmra.mrb[16].mxu1 %vm325_vm0, %v1909_v0  ;;  %v16939_v0 = vld [vmem:[#allocation2 + $0x221] sm:$0xff] }
 0x1aa   : > { %13221 = vmatprep.mubr.msk.bf16.mxu1 %vm325_vm0, %v1910_v21  ;;  %19392 = vst [vmem:[#allocation10_spill] sm:$0xff] %v16939_v0  ;;  %v16941_v21 = vld [vmem:[#allocation2 + $0x231] sm:$0xff] }
 0x1ab   : > { %19393 = vst [vmem:[#allocation11_spill] sm:$0xff] %v16941_v21 }
 0x1ad   : > { %13528 = vmatmul.mubr.msk.bf16.gmra.mrb[20].mxu0 %vm325_vm0, %v4594_v40  ;;  %v1911_v40 = vpack.c.bf16 %v16854_v48, %v16920_v30 }
 0x1ae   : > { %13531 = vmatprep.mubr.msk.bf16.mxu0 %vm325_vm0, %v4595_v26  ;;  %v16937_v26 = vld [vmem:[#allocation2 + $0x211] sm:$0xff] }
 0x1af   : > { %19391 = vst [vmem:[#allocation9_spill] sm:$0xff] %v16937_v26  ;;  %v1913_v55 = vpack.c.bf16 %v16939_v0, %v16937_v26  ;;  %v19408_v0 = vld [vmem:[#allocation31_spill] sm:$0xff] }
 0x1b0   : > { %v19410_v26 = vld [vmem:[#allocation35_spill] sm:$0xff] }
 0x1b1   : > { %13222 = vmatmul.mubr.msk.bf16.gmra.mrb[20].mxu1 %vm325_vm0, %v1911_v40  ;;  %v4883_v40 = vpack.c.bf16 %v19395_v37, %v16515_v62  ;;  %v19399_v62 = vld [vmem:[#allocation25_spill] sm:$0xff] }
 0x1b2   : > { %13225 = vmatprep.mubr.msk.bf16.mxu1 %vm325_vm0, %v1912_v12  ;;  %v16960_v12 = vld [vmem:[#allocation2 + $0x251] sm:$0xff] }
 0x1b3   : > { %19396 = vst [vmem:[#allocation13_spill] sm:$0xff] %v16960_v12 }
 0x1b5   : > { %13532 = vmatmul.mubr.msk.bf16.gmra.mrb[24].mxu0 %vm325_vm0, %v4596_v34  ;;  %v16943_v34 = vld [vmem:[#allocation2 + $0x241] sm:$0xff] }
 0x1b6   : > { %13535 = vmatprep.mubr.msk.bf16.mxu0 %vm325_vm0, %v4597_v2  ;;  %19394 = vst [vmem:[#allocation12_spill] sm:$0xff] %v16943_v34  ;;  %v15431_v2 = vld [vmem:[%s19155_s3 + $0x30] sm:$0xff]   ;;  %v1914_v36 = vpack.c.bf16 %v16943_v34, %v16941_v21  ;;  %v19407_v21 = vld [vmem:[#allocation30_spill] sm:$0xff] }
 0x1b7   : > { %13267 = vmatprep.subr.bf16.mxu1 %v15431_v2 }
 0x1b9   : > { %13226 = vmatmul.mubr.msk.bf16.gmra.mrb[24].mxu1 %vm325_vm0, %v1913_v55  ;;  %v2198_v55 = vpack.c.bf16 %v19399_v62, %v19398_v39  ;;  %v19405_v39 = vld [vmem:[#allocation28_spill] sm:$0xff]  ;;  %v19406_v62 = vld [vmem:[#allocation33_spill] sm:$0xff] }
 0x1ba   : > { %13229 = vmatprep.mubr.msk.bf16.mxu1 %vm325_vm0, %v1914_v36  ;;  %v19400_v36 = vld [vmem:[#allocation23_spill] sm:$0xff] }
 0x1bb   : > { %v4884_v37 = vpack.c.bf16 %v16972_v53, %v19400_v36  ;;  %v4886_v36 = vpack.c.bf16 %v19408_v0, %v19407_v21  ;;  %v17003_v0 = vld [vmem:[#allocation2 + $0x1c2] sm:$0xff] }
 0x1bc   : > { %19413 = vst [vmem:[#allocation16_spill] sm:$0xff] %v17003_v0 }
 0x1bd   : > { %13536 = vmatmul.mubr.msk.bf16.gmra.mrb[28].mxu0 %vm325_vm0, %v4598_v43  ;;  %v16965_v43 = vld [vmem:[%s19155_s3 + $0x80] sm:$0xff]  }
 0x1be   : > { %13541 = vmatprep.mubr.msk.bf16.mxu0 %vm325_vm0, %v4881_v14  ;;  %v1915_v14 = vpack.c.bf16 %v16891_v18, %v16960_v12  ;;  %v2200_v12 = vpack.c.bf16 %v19406_v62, %v19405_v39  ;;  %v17012_v39 = vld [vmem:[#allocation2 + $0xd2] sm:$0xff]  ;;  %v17014_v62 = vld [vmem:[#allocation2 + $0xe2] sm:$0xff] }
 0x1c1   : > { %13230 = vmatmul.mubr.msk.bf16.gmra.mrb[28].mxu1 %vm325_vm0, %v1915_v14  ;;  %v19409_v14 = vld [vmem:[#allocation32_spill] sm:$0xff] }
 0x1c2   : > { %13235 = vmatprep.mubr.msk.bf16.mxu1 %vm325_vm0, %v2198_v55  ;;  %v16995_v55 = vld [vmem:[#allocation2 + $0x82] sm:$0xff] }
 0x1c3   : > { %19411 = vst [vmem:[#allocation15_spill] sm:$0xff] %v16995_v55 }
 0x1c5   : > { %13542 = vmatmul.mubr.msk.bf16.vlgmr.msra.gmra.mrb[0].mxu0 %vm325_vm0, %v4882_v50  ;;  %v19401_v50 = vld [vmem:[#allocation24_spill] sm:$0xff] }
 0x1c6   : > { %13574 = vmatpush3.bf16.msra.mxu0 %v16807_v54  ;;  %13545 = vmatprep.mubr.msk.bf16.mxu0 %vm325_vm0, %v4883_v40  ;;  %v4885_v34 = vpack.c.bf16 %v19402_v51, %v19401_v50  ;;  %v19403_v54 = vld [vmem:[#allocation26_spill] sm:$0xff]  ;;  %v19404_v40 = vld [vmem:[#allocation27_spill] sm:$0xff]  ;;  %v4887_v51 = vpack.c.bf16 %v19410_v26, %v19409_v14  ;;  %v19414_v26 = vld [vmem:[#allocation36_spill] sm:$0xff] }
 0x1c7   : > { %13607 = vmatprep.subr.bf16.mxu0 %v16965_v43  ;;  %v2199_v18 = vpack.c.bf16 %v19404_v40, %v19403_v54  ;;  %v16997_v50 = vld [vmem:[#allocation2 + $0xc2] sm:$0xff]  ;;  %v4888_v21 = vpack.c.bf16 %v17003_v0, %v19414_v26  ;;  %v19419_v26 = vld [vmem:[#allocation41_spill] sm:$0xff] }
 0x1c8   : > { %v17018_v14 = vld [vmem:[#allocation2 + $0x102] sm:$0xff] }
 0x1c9   : > { %13236 = vmatmul.mubr.msk.bf16.vlgmr.msra.gmra.mrb[0].mxu1 %vm325_vm0, %v2199_v18 }
 0x1ca   : > { %13239 = vmatprep.mubr.msk.bf16.mxu1 %vm325_vm0, %v2200_v12  ;;  %13268 = vmatpush3.bf16.msra.mxu1 %v15431_v2  ;;  %v19415_v2 = vld [vmem:[#allocation37_spill] sm:$0xff]  ;;  %v19416_v12 = vld [vmem:[#allocation38_spill] sm:$0xff] }
 0x1cb   : > { %v4889_v40 = vpack.c.bf16 %v19416_v12, %v19415_v2  ;;  %v4891_v2 = vpack.c.bf16 %v16614_v33, %v19419_v26  ;;  %v17032_v12 = vld [vmem:[#allocation2 + $0x112] sm:$0xff]  ;;  %v17051_v26 = vld [vmem:[#allocation2 + $0x182] sm:$0xff] }
 0x1cd   : > { %13546 = vmatmul.mubr.msk.bf16.gmra.mrb[4].mxu0 %vm325_vm0, %v4884_v37  ;;  %v2174_v37 = vld [vmem:[#allocation2 + $0xb2] sm:$0xff] }
 0x1ce   : > { %13549 = vmatprep.mubr.msk.bf16.mxu0 %vm325_vm0, %v4885_v34  ;;  %v19412_v34 = vld [vmem:[#allocation34_spill] sm:$0xff]  ;;  %v2202_v18 = vpack.c.bf16 %v16997_v50, %v2174_v37 }
 0x1cf   : > { %v2201_v54 = vpack.c.bf16 %v16995_v55, %v19412_v34  ;;  %v19417_v34 = vld [vmem:[#allocation39_spill] sm:$0xff] }
 0x1d0   : > { %v17034_v55 = vld [vmem:[#allocation2 + $0x162] sm:$0xff] }
 0x1d1   : > { %13240 = vmatmul.mubr.msk.bf16.gmra.mrb[4].mxu1 %vm325_vm0, %v2201_v54  ;;  %v19418_v54 = vld [vmem:[#allocation40_spill] sm:$0xff]  ;;  %19420 = vst [vmem:[#allocation17_spill] sm:$0xff] %v17034_v55 }
 0x1d2   : > { %13243 = vmatprep.mubr.msk.bf16.mxu1 %vm325_vm0, %v2202_v18  ;;  %v4890_v18 = vpack.c.bf16 %v19418_v54, %v19417_v34  ;;  %v17040_v34 = vld [vmem:[#allocation2 + $0x262] sm:$0xff]  ;;  %v19422_v54 = vld [vmem:[#allocation42_spill] sm:$0xff] }
 0x1d3   : > { %19421 = vst [vmem:[#allocation18_spill] sm:$0xff] %v17040_v34  ;;  %v4892_v33 = vpack.c.bf16 %v17040_v34, %v19422_v54  ;;  %v17069_v54 = vld [vmem:[#allocation2 + $0x1b2] sm:$0xff] }
 0x1d4   : > { %19426 = vst [vmem:[#allocation22_spill] sm:$0xff] %v17069_v54 }
 0x1d5   : > { %13550 = vmatmul.mubr.msk.bf16.gmra.mrb[8].mxu0 %vm325_vm0, %v4886_v36  ;;  %v17016_v36 = vld [vmem:[#allocation2 + $0xf2] sm:$0xff] }
 0x1d6   : > { %13553 = vmatprep.mubr.msk.bf16.mxu0 %vm325_vm0, %v4887_v51  ;;  %v2203_v51 = vpack.c.bf16 %v17014_v62, %v17012_v39  ;;  %v2204_v37 = vpack.c.bf16 %v17018_v14, %v17016_v36 }
 0x1d9   : > { %13244 = vmatmul.mubr.msk.bf16.gmra.mrb[8].mxu1 %vm325_vm0, %v2203_v51 }
 0x1da   : > { %13247 = vmatprep.mubr.msk.bf16.mxu1 %vm325_vm0, %v2204_v37  ;;  %v4893_v37 = vpack.c.bf16 %v16627_v47, %v16618_v35  ;;  %v19425_v47 = vld [vmem:[#allocation43_spill] sm:$0xff] }
 0x1dd   : > { %13554 = vmatmul.mubr.msk.bf16.gmra.mrb[12].mxu0 %vm325_vm0, %v4888_v21  ;;  %v2182_v21 = vld [vmem:[#allocation2 + $0x152] sm:$0xff] }
 0x1de   : > { %13557 = vmatprep.mubr.msk.bf16.mxu0 %vm325_vm0, %v4889_v40  ;;  %v2205_v40 = vpack.c.bf16 %v16972_v53, %v17032_v12  ;;  %v2206_v51 = vpack.c.bf16 %v17034_v55, %v2182_v21  ;;  %v17053_v53 = vld [vmem:[#allocation2 + $0x192] sm:$0xff]  ;;  %v17071_v55 = vld [vmem:[#allocation2 + $0x202] sm:$0xff] }
 0x1df   : > { %19423 = vst [vmem:[#allocation19_spill] sm:$0xff] %v17053_v53  ;;  %19427 = vst [vmem:[#allocation21_spill] sm:$0xff] %v17071_v55 }
 0x1e1   : > { %13248 = vmatmul.mubr.msk.bf16.gmra.mrb[12].mxu1 %vm325_vm0, %v2205_v40  ;;  %v4894_v40 = vpack.c.bf16 %v16631_v11, %v19425_v47  ;;  %v17077_v11 = vld [vmem:[#allocation2 + $0x302] sm:$0xff] }
 0x1e2   : > { %13251 = vmatprep.mubr.msk.bf16.mxu1 %vm325_vm0, %v2206_v51  ;;  %v4895_v51 = vpack.c.bf16 %v16643_v7, %v16633_v16  ;;  %19428 = vst [vmem:[#allocation25_spill] sm:$0xff] %v17077_v11  ;;  %v19429_v47 = vld [vmem:[#allocation44_spill] sm:$0xff]  ;;  %v19430_v7 = vld [vmem:[#allocation45_spill] sm:$0xff] }
 0x1e3   : > { %v4896_v16 = vpack.c.bf16 %v17077_v11, %v19429_v47  ;;  %v19434_v47 = vld [vmem:[#allocation47_spill] sm:$0xff]  ;;  %v19436_v11 = vld [vmem:[#allocation49_spill] sm:$0xff] }
 0x1e5   : > { %13558 = vmatmul.mubr.msk.bf16.gmra.mrb[16].mxu0 %vm325_vm0, %v4890_v18  ;;  %v17049_v18 = vld [vmem:[#allocation2 + $0x172] sm:$0xff] }
 0x1e6   : > { %13561 = vmatprep.mubr.msk.bf16.mxu0 %vm325_vm0, %v4891_v2  ;;  %v17055_v2 = vld [vmem:[#allocation2 + $0x1a2] sm:$0xff]  ;;  %v2207_v21 = vpack.c.bf16 %v17051_v26, %v17049_v18 }
 0x1e7   : > { %19424 = vst [vmem:[#allocation20_spill] sm:$0xff] %v17055_v2  ;;  %v2208_v35 = vpack.c.bf16 %v17055_v2, %v17053_v53  ;;  %v17088_v53 = vld [vmem:[#allocation2 + $0x222] sm:$0xff] }
 0x1e8   : > { %19432 = vst [vmem:[#allocation23_spill] sm:$0xff] %v17088_v53 }
 0x1e9   : > { %13252 = vmatmul.mubr.msk.bf16.gmra.mrb[16].mxu1 %vm325_vm0, %v2207_v21 }
 0x1ea   : > { %13255 = vmatprep.mubr.msk.bf16.mxu1 %vm325_vm0, %v2208_v35  ;;  %v19431_v35 = vld [vmem:[#allocation46_spill] sm:$0xff] }
 0x1eb   : > { %v5180_v2 = vpack.c.bf16 %v19431_v35, %v19430_v7  ;;  %v19435_v7 = vld [vmem:[#allocation48_spill] sm:$0xff] }
 0x1ec   : > { %v5181_v35 = vpack.c.bf16 %v19435_v7, %v19434_v47  ;;  %v5184_v7 = vpack.c.bf16 %v16700_v24, %v16688_v49  ;;  %v5186_v49 = vpack.c.bf16 %v16760_v41, %v16746_v10  ;;  %v2472_v24 = vld [vmem:[#allocation2 + $0x90] sm:$0xff]  ;;  %v2475_v10 = vld [vmem:[#allocation2 + $0xe0] sm:$0xff] }
 0x1ed   : > { %13562 = vmatmul.mubr.msk.bf16.gmra.mrb[20].mxu0 %vm325_vm0, %v4892_v33  ;;  %v2190_v33 = vld [vmem:[#allocation2 + $0x1f2] sm:$0xff] }
 0x1ee   : > { %13565 = vmatprep.mubr.msk.bf16.mxu0 %vm325_vm0, %v4893_v37  ;;  %v2209_v37 = vpack.c.bf16 %v17003_v0, %v17069_v54  ;;  %v2210_v21 = vpack.c.bf16 %v17071_v55, %v2190_v33  ;;  %v17090_v0 = vld [vmem:[#allocation2 + $0x232] sm:$0xff]  ;;  %v5182_v55 = vpack.c.bf16 %v16682_v63, %v19436_v11  ;;  %v2465_v54 = vld [vmem:[#allocation2 + $0x20] sm:$0xff] }
 0x1ef   : > { %v15433_v33 = vld [vmem:[%s19155_s3 + $0x38] sm:$0xff]   ;;  %v5155_v63 = vld [vmem:[#allocation2 + $0x130] sm:$0xff] }
 0x1f0   : > { %13301 = vmatprep.subr.bf16.mxu1 %v15433_v33  ;;  %v2476_v41 = vld [vmem:[#allocation2 + $0xf0] sm:$0xff] }
 0x1f1   : > { %13256 = vmatmul.mubr.msk.bf16.gmra.mrb[20].mxu1 %vm325_vm0, %v2209_v37 }
 0x1f2   : > { %13259 = vmatprep.mubr.msk.bf16.mxu1 %vm325_vm0, %v2210_v21 }
 0x1f5   : > { %13566 = vmatmul.mubr.msk.bf16.gmra.mrb[24].mxu0 %vm325_vm0, %v4894_v40  ;;  %v17086_v40 = vld [vmem:[#allocation2 + $0x212] sm:$0xff] }
 0x1f6   : > { %13569 = vmatprep.mubr.msk.bf16.mxu0 %vm325_vm0, %v4895_v51  ;;  %v17092_v51 = vld [vmem:[#allocation2 + $0x242] sm:$0xff]  ;;  %v2211_v37 = vpack.c.bf16 %v17088_v53, %v17086_v40  ;;  %v2466_v53 = vld [vmem:[#allocation2 + $0x30] sm:$0xff] }
 0x1f7   : > { %19433 = vst [vmem:[#allocation24_spill] sm:$0xff] %v17092_v51  ;;  %v2212_v21 = vpack.c.bf16 %v17092_v51, %v17090_v0  ;;  %v2497_v11 = vpack.c.bf16 %v2466_v53, %v2465_v54  ;;  %v2468_v51 = vld [vmem:[#allocation2 + $0x50] sm:$0xff]  ;;  %v2473_v54 = vld [vmem:[#allocation2 + $0xc0] sm:$0xff] }
 0x1f9   : > { %13260 = vmatmul.mubr.msk.bf16.gmra.mrb[24].mxu1 %vm325_vm0, %v2211_v37  ;;  %v19438_v37 = vld [vmem:[#allocation50_spill] sm:$0xff] }
 0x1fa   : > { %13263 = vmatprep.mubr.msk.bf16.mxu1 %vm325_vm0, %v2212_v21  ;;  %v5183_v21 = vpack.c.bf16 %v5155_v63, %v19438_v37 }
 0x1fd   : > { %13570 = vmatmul.mubr.msk.bf16.gmra.mrb[28].mxu0 %vm325_vm0, %v4896_v16  ;;  %v17109_v16 = vld [vmem:[#allocation2 + $0x252] sm:$0xff] }
 0x1fe   : > { %13575 = vmatprep.mubr.msk.bf16.mxu0 %vm325_vm0, %v5180_v2  ;;  %19437 = vst [vmem:[#allocation29_spill] sm:$0xff] %v17109_v16  ;;  %v17114_v2 = vld [vmem:[%s19155_s3 + $0x88] sm:$0xff]   ;;  %v2213_v47 = vpack.c.bf16 %v17040_v34, %v17109_v16  ;;  %v2469_v34 = vld [vmem:[#allocation2 + $0x60] sm:$0xff]  ;;  %v2470_v16 = vld [vmem:[#allocation2 + $0x70] sm:$0xff] }
 0x1ff   : > { %v2499_v53 = vpack.c.bf16 %v2470_v16, %v2469_v34  ;;  %v5163_v34 = vld [vmem:[#allocation2 + $0x1d0] sm:$0xff] }
 0x201   : > { %13264 = vmatmul.mubr.msk.bf16.gmra.mrb[28].mxu1 %vm325_vm0, %v2213_v47  ;;  %v2474_v47 = vld [vmem:[#allocation2 + $0xd0] sm:$0xff] }
 0x202   : > { %13269 = vmatprep.mubr.msk.bf16.mxu1 %vm325_vm0, %v2497_v11  ;;  %v2501_v16 = vpack.c.bf16 %v2474_v47, %v2473_v54  ;;  %v2478_v11 = vld [vmem:[#allocation2 + $0x110] sm:$0xff]  ;;  %v5176_v54 = vld [vmem:[#allocation2 + $0x2e0] sm:$0xff] }
 0x203   : > { %v5177_v47 = vld [vmem:[#allocation2 + $0x2f0] sm:$0xff] }
 0x205   : > { %13576 = vmatmul.mubr.msk.bf16.vlgmr.msra.gmra.mrb[0].mxu0 %vm325_vm0, %v5181_v35  ;;  %v2467_v35 = vld [vmem:[#allocation2 + $0x40] sm:$0xff] }
 0x206   : > { %13608 = vmatpush3.bf16.msra.mxu0 %v16965_v43  ;;  %13579 = vmatprep.mubr.msk.bf16.mxu0 %vm325_vm0, %v5182_v55  ;;  %v2498_v43 = vpack.c.bf16 %v2468_v51, %v2467_v35  ;;  %v5185_v55 = vpack.c.bf16 %v16744_v9, %v16742_v8  ;;  %v2500_v51 = vpack.c.bf16 %v2472_v24, %v16710_v17  ;;  %v5175_v24 = vld [vmem:[#allocation2 + $0x2d0] sm:$0xff] }
 0x207   : > { %13641 = vmatprep.subr.bf16.mxu0 %v17114_v2  ;;  %v5187_v8 = vpack.c.bf16 %v5163_v34, %v16716_v13  ;;  %v5188_v9 = vpack.c.bf16 %v16777_v4, %v16762_v61  ;;  %v2502_v17 = vpack.c.bf16 %v2476_v41, %v2475_v10  ;;  %v5189_v13 = vpack.c.bf16 %v16781_v29, %v16779_v46  ;;  %v2479_v4 = vld [vmem:[#allocation2 + $0x120] sm:$0xff]  ;;  %v5179_v10 = vld [vmem:[#allocation2 + $0x310] sm:$0xff] }
 0x208   : > { %v5190_v61 = vpack.c.bf16 %v16800_v23, %v16783_v15  ;;  %v2504_v35 = vpack.c.bf16 %v5155_v63, %v2479_v4  ;;  %v5172_v29 = vld [vmem:[#allocation2 + $0x2a0] sm:$0xff]  ;;  %v5195_v41 = vpack.c.bf16 %v5179_v10, %v16768_v42  ;;  %v5480_v42 = vpack.c.bf16 %v16883_v32, %v16869_v22 }
 0x209   : > { %13270 = vmatmul.mubr.msk.bf16.vlgmr.msra.gmra.mrb[0].mxu1 %vm325_vm0, %v2498_v43  ;;  %v5171_v43 = vld [vmem:[#allocation2 + $0x270] sm:$0xff]  ;;  %v5174_v63 = vld [vmem:[#allocation2 + $0x2c0] sm:$0xff]  ;;  %v5482_v32 = vpack.c.bf16 %v16900_v28, %v16885_v6 }
 0x20a   : > { %13273 = vmatprep.mubr.msk.bf16.mxu1 %vm325_vm0, %v2499_v53  ;;  %13302 = vmatpush3.bf16.msra.mxu1 %v15433_v33  ;;  %v2477_v33 = vld [vmem:[#allocation2 + $0x100] sm:$0xff]  ;;  %v5173_v53 = vld [vmem:[#allocation2 + $0x2b0] sm:$0xff]  ;;  %v5191_v15 = vpack.c.bf16 %v5171_v43, %v16734_v1  ;;  %v17173_v1 = vpack.c.bf16 %v5177_v47, %v5176_v54 }
 0x20b   : > { %v2503_v37 = vpack.c.bf16 %v2478_v11, %v2477_v33  ;;  %v17163_v23 = vpack.c.bf16 %v5173_v53, %v5172_v29  ;;  %v2770_v6 = vld [vmem:[#allocation2 + $0x91] sm:$0xff]  ;;  %v5474_v29 = vld [vmem:[#allocation2 + $0x2e1] sm:$0xff] }
 0x20c   : > { %v5469_v11 = vld [vmem:[#allocation2 + $0x271] sm:$0xff] }
 0x20d   : > { %13580 = vmatmul.mubr.msk.bf16.gmra.mrb[4].mxu0 %vm325_vm0, %v5183_v21  ;;  %v17151_v21 = vld [vmem:[#allocation2 + $0x160] sm:$0xff]  ;;  %v5475_v53 = vld [vmem:[#allocation2 + $0x2f1] sm:$0xff] }
 0x20e   : > { %13583 = vmatprep.mubr.msk.bf16.mxu0 %vm325_vm0, %v5184_v7  ;;  %v17153_v7 = vld [vmem:[#allocation2 + $0x170] sm:$0xff] }
 0x20f   : > { %v17159_v46 = vpack.c.bf16 %v17153_v7, %v17151_v21  ;;  %v5477_v47 = vld [vmem:[#allocation2 + $0x311] sm:$0xff] }
 0x211   : > { %13274 = vmatmul.mubr.msk.bf16.gmra.mrb[4].mxu1 %vm325_vm0, %v2500_v51  ;;  %v17170_v51 = vpack.c.bf16 %v5175_v24, %v5174_v63  ;;  %v17259_v63 = vpack.c.bf16 %v5475_v53, %v5474_v29  ;;  %v17262_v24 = vld [vmem:[#allocation2 + $0x1c1] sm:$0xff]  ;;  %v17341_v53 = vld [vmem:[#allocation2 + $0x2d2] sm:$0xff] }
 0x212   : > { %13277 = vmatprep.mubr.msk.bf16.mxu1 %vm325_vm0, %v2501_v16  ;;  %v17176_v16 = vld [vmem:[#allocation2 + $0x1c0] sm:$0xff]  ;;  %19461 = vst [vmem:[#allocation33_spill] sm:$0xff] %v17341_v53 }
 0x213   : > { %v17339_v29 = vld [vmem:[#allocation2 + $0x2c2] sm:$0xff] }
 0x214   : > { %19460 = vst [vmem:[#allocation28_spill] sm:$0xff] %v17339_v29 }
 0x215   : > { %13584 = vmatmul.mubr.msk.bf16.gmra.mrb[8].mxu0 %vm325_vm0, %v5185_v55 }
 0x216   : > { %13587 = vmatprep.mubr.msk.bf16.mxu0 %vm325_vm0, %v5186_v49 }
 0x219   : > { %13278 = vmatmul.mubr.msk.bf16.gmra.mrb[8].mxu1 %vm325_vm0, %v2502_v17  ;;  %v5470_v17 = vld [vmem:[#allocation2 + $0x2a1] sm:$0xff] }
 0x21a   : > { %13281 = vmatprep.mubr.msk.bf16.mxu1 %vm325_vm0, %v2503_v37  ;;  %v5471_v37 = vld [vmem:[#allocation2 + $0x2b1] sm:$0xff] }
 0x21b   : > { %v17250_v4 = vpack.c.bf16 %v5471_v37, %v5470_v17  ;;  %v3075_v17 = vld [vmem:[#allocation2 + $0x122] sm:$0xff]  ;;  %v5767_v37 = vld [vmem:[#allocation2 + $0x272] sm:$0xff] }
 0x21d   : > { %13588 = vmatmul.mubr.msk.bf16.gmra.mrb[12].mxu0 %vm325_vm0, %v5187_v8  ;;  %v2508_v8 = vpack.c.bf16 %v5163_v34, %v17176_v16  ;;  %v5479_v34 = vpack.c.bf16 %v16867_v20, %v16865_v58  ;;  %v5453_v58 = vld [vmem:[#allocation2 + $0x131] sm:$0xff]  ;;  %v2795_v20 = vpack.c.bf16 %v16824_v27, %v16802_v52  ;;  %v2797_v52 = vpack.c.bf16 %v16844_v45, %v16830_v3 }
 0x21e   : > { %13591 = vmatprep.mubr.msk.bf16.mxu0 %vm325_vm0, %v5188_v9  ;;  %v5481_v22 = vpack.c.bf16 %v5453_v58, %v16814_v5  ;;  %v5483_v5 = vpack.c.bf16 %v16904_v44, %v16902_v19  ;;  %v5484_v27 = vpack.c.bf16 %v16920_v30, %v16906_v60  ;;  %v19439_v45 = vld [vmem:[#allocation9_spill] sm:$0xff]  ;;  %v19440_v19 = vld [vmem:[#allocation10_spill] sm:$0xff]  ;;  %v19441_v44 = vld [vmem:[#allocation11_spill] sm:$0xff] }
 0x21f   : > { %v5486_v28 = vpack.c.bf16 %v19439_v45, %v16922_v25  ;;  %v5487_v60 = vpack.c.bf16 %v19441_v44, %v19440_v19  ;;  %v19443_v30 = vld [vmem:[#allocation13_spill] sm:$0xff]  ;;  %v19451_v45 = vld [vmem:[#allocation15_spill] sm:$0xff]  ;;  %v19452_v44 = vld [vmem:[#allocation16_spill] sm:$0xff] }
 0x220   : > { %v5759_v19 = vld [vmem:[#allocation2 + $0x1d2] sm:$0xff] }
 0x221   : > { %13282 = vmatmul.mubr.msk.bf16.gmra.mrb[12].mxu1 %vm325_vm0, %v2504_v35  ;;  %v5472_v35 = vld [vmem:[#allocation2 + $0x2c1] sm:$0xff] }
 0x222   : > { %13285 = vmatprep.mubr.msk.bf16.mxu1 %vm325_vm0, %v17159_v46 }
 0x225   : > { %13592 = vmatmul.mubr.msk.bf16.gmra.mrb[16].mxu0 %vm325_vm0, %v5189_v13 }
 0x226   : > { %13595 = vmatprep.mubr.msk.bf16.mxu0 %vm325_vm0, %v5190_v61 }
 0x229   : > { %13286 = vmatmul.mubr.msk.bf16.gmra.mrb[16].mxu1 %vm325_vm0, %v5185_v55  ;;  %v5478_v55 = vpack.c.bf16 %v16863_v38, %v16848_v56  ;;  %v17199_v56 = vld [vmem:[#allocation2 + $0x260] sm:$0xff]  ;;  %v17204_v38 = vld [vmem:[%s19155_s3 + $0x90] sm:$0xff]  }
 0x22a   : > { %13289 = vmatprep.mubr.msk.bf16.mxu1 %vm325_vm0, %v5186_v49  ;;  %v15435_v49 = vld [vmem:[%s19155_s3 + $0x40] sm:$0xff]  }
 0x22b   : > { %13335 = vmatprep.subr.bf16.mxu1 %v15435_v49 }
 0x22d   : > { %13596 = vmatmul.mubr.msk.bf16.gmra.mrb[20].mxu0 %vm325_vm0, %v5191_v15 }
 0x22e   : > { %13599 = vmatprep.mubr.msk.bf16.mxu0 %vm325_vm0, %v17163_v23 }
 0x231   : > { %13290 = vmatmul.mubr.msk.bf16.gmra.mrb[20].mxu1 %vm325_vm0, %v2508_v8  ;;  %v19445_v8 = vld [vmem:[#allocation8_spill] sm:$0xff] }
 0x232   : > { %13293 = vmatprep.mubr.msk.bf16.mxu1 %vm325_vm0, %v5188_v9  ;;  %v2512_v9 = vpack.c.bf16 %v5171_v43, %v17199_v56  ;;  %v5473_v43 = vld [vmem:[#allocation2 + $0x2d1] sm:$0xff]  ;;  %v5493_v10 = vpack.c.bf16 %v5477_v47, %v19445_v8  ;;  %v17349_v8 = vpack.c.bf16 %v17341_v53, %v17339_v29  ;;  %v17605_v53 = vld [vmem:[#allocation2 + $0x182] sm:$0xff] }
 0x233   : > { %v17256_v15 = vpack.c.bf16 %v5473_v43, %v5472_v35  ;;  %v19459_v35 = vld [vmem:[#allocation18_spill] sm:$0xff] }
 0x234   : > { %v17345_v47 = vld [vmem:[#allocation2 + $0x2f2] sm:$0xff] }
 0x235   : > { %13600 = vmatmul.mubr.msk.bf16.gmra.mrb[24].mxu0 %vm325_vm0, %v17170_v51  ;;  %19463 = vst [vmem:[#allocation31_spill] sm:$0xff] %v17345_v47  ;;  %v17607_v29 = vld [vmem:[#allocation2 + $0x192] sm:$0xff] }
 0x236   : > { %13603 = vmatprep.mubr.msk.bf16.mxu0 %vm325_vm0, %v17173_v1  ;;  %19487 = vst [vmem:[#allocation13_spill] sm:$0xff] %v17607_v29 }
 0x239   : > { %13294 = vmatmul.mubr.msk.bf16.gmra.mrb[24].mxu1 %vm325_vm0, %v5189_v13  ;;  %v19444_v13 = vld [vmem:[#allocation7_spill] sm:$0xff] }
 0x23a   : > { %13297 = vmatprep.mubr.msk.bf16.mxu1 %vm325_vm0, %v5190_v61  ;;  %v5489_v61 = vpack.c.bf16 %v5469_v11, %v19444_v13  ;;  %v17325_v13 = vld [vmem:[#allocation2 + $0x2a2] sm:$0xff] }
 0x23b   : > { %19457 = vst [vmem:[#allocation26_spill] sm:$0xff] %v17325_v13 }
 0x23d   : > { %13604 = vmatmul.mubr.msk.bf16.gmra.mrb[28].mxu0 %vm325_vm0, %v5195_v41  ;;  %v5776_v41 = vpack.c.bf16 %v17012_v39, %v16997_v50  ;;  %v3062_v50 = vld [vmem:[#allocation2 + $0x32] sm:$0xff] }
 0x23e   : > { %13609 = vmatprep.mubr.msk.bf16.mxu0 %vm325_vm0, %v5478_v55  ;;  %v17287_v39 = vld [vmem:[%s19155_s3 + $0x98] sm:$0xff]  }
 0x241   : > { %13298 = vmatmul.mubr.msk.bf16.gmra.mrb[28].mxu1 %vm325_vm0, %v2512_v9 }
 0x242   : > { %13303 = vmatprep.mubr.msk.bf16.mxu1 %vm325_vm0, %v2795_v20 }
 0x245   : > { %13610 = vmatmul.mubr.msk.bf16.vlgmr.msra.gmra.mrb[0].mxu0 %vm325_vm0, %v5479_v34 }
 0x246   : > { %13642 = vmatpush3.bf16.msra.mxu0 %v17114_v2  ;;  %13613 = vmatprep.mubr.msk.bf16.mxu0 %vm325_vm0, %v5480_v42  ;;  %v2796_v2 = vpack.c.bf16 %v16828_v59, %v16826_v31  ;;  %v2798_v31 = vpack.c.bf16 %v2770_v6, %v16846_v57  ;;  %v5461_v59 = vld [vmem:[#allocation2 + $0x1d1] sm:$0xff]  ;;  %v19442_v57 = vld [vmem:[#allocation12_spill] sm:$0xff] }
 0x247   : > { %13675 = vmatprep.subr.bf16.mxu0 %v17204_v38  ;;  %v5485_v3 = vpack.c.bf16 %v5461_v59, %v16854_v48  ;;  %v5488_v33 = vpack.c.bf16 %v19443_v30, %v19442_v57  ;;  %v2777_v48 = vld [vmem:[#allocation2 + $0x121] sm:$0xff]  ;;  %v2806_v54 = vpack.c.bf16 %v5461_v59, %v17262_v24  ;;  %v19450_v59 = vld [vmem:[#allocation22_spill] sm:$0xff]  ;;  %19486 = vst [vmem:[#allocation12_spill] sm:$0xff] %v17605_v53 }
 0x248   : > { %v2802_v25 = vpack.c.bf16 %v5453_v58, %v2777_v48  ;;  %v19447_v58 = vld [vmem:[#allocation17_spill] sm:$0xff]  ;;  %v19454_v30 = vld [vmem:[#allocation23_spill] sm:$0xff]  ;;  %v19455_v48 = vld [vmem:[#allocation24_spill] sm:$0xff] }
 0x249   : > { %13304 = vmatmul.mubr.msk.bf16.vlgmr.msra.gmra.mrb[0].mxu1 %vm325_vm0, %v2796_v2  ;;  %v5780_v20 = vpack.c.bf16 %v17049_v18, %v19447_v58  ;;  %v3065_v2 = vld [vmem:[#allocation2 + $0x62] sm:$0xff] }
 0x24a   : > { %13307 = vmatprep.mubr.msk.bf16.mxu1 %vm325_vm0, %v2797_v52  ;;  %13336 = vmatpush3.bf16.msra.mxu1 %v15435_v49  ;;  %v5778_v49 = vpack.c.bf16 %v17032_v12, %v17018_v14  ;;  %v19446_v12 = vld [vmem:[#allocation14_spill] sm:$0xff] }
 0x24b   : > { %v3066_v52 = vld [vmem:[#allocation2 + $0x72] sm:$0xff] }
 0x24d   : > { %13614 = vmatmul.mubr.msk.bf16.gmra.mrb[4].mxu0 %vm325_vm0, %v5481_v22  ;;  %v3063_v22 = vld [vmem:[#allocation2 + $0x42] sm:$0xff] }
 0x24e   : > { %13617 = vmatprep.mubr.msk.bf16.mxu0 %vm325_vm0, %v5482_v32 }
 0x251   : > { %13308 = vmatmul.mubr.msk.bf16.gmra.mrb[4].mxu1 %vm325_vm0, %v2798_v31  ;;  %v19449_v31 = vld [vmem:[#allocation20_spill] sm:$0xff] }
 0x252   : > { %13311 = vmatprep.mubr.msk.bf16.mxu1 %vm325_vm0, %v5478_v55  ;;  %v5777_v55 = vpack.c.bf16 %v17016_v36, %v17014_v62  ;;  %v5751_v36 = vld [vmem:[#allocation2 + $0x132] sm:$0xff]  ;;  %v5782_v18 = vpack.c.bf16 %v19450_v59, %v19449_v31  ;;  %v17412_v31 = vld [vmem:[#allocation2 + $0x220] sm:$0xff] }
 0x253   : > { %v5779_v9 = vpack.c.bf16 %v5751_v36, %v19446_v12  ;;  %v17372_v12 = vld [vmem:[#allocation2 + $0x180] sm:$0xff]  ;;  %v17414_v59 = vld [vmem:[#allocation2 + $0x230] sm:$0xff] }
 0x255   : > { %13618 = vmatmul.mubr.msk.bf16.gmra.mrb[8].mxu0 %vm325_vm0, %v5483_v5 }
 0x256   : > { %13621 = vmatprep.mubr.msk.bf16.mxu0 %vm325_vm0, %v5484_v27 }
 0x259   : > { %13312 = vmatmul.mubr.msk.bf16.gmra.mrb[8].mxu1 %vm325_vm0, %v5479_v34  ;;  %v17282_v34 = vld [vmem:[#allocation2 + $0x261] sm:$0xff] }
 0x25a   : > { %13315 = vmatprep.mubr.msk.bf16.mxu1 %vm325_vm0, %v5480_v42  ;;  %v3061_v42 = vld [vmem:[#allocation2 + $0x22] sm:$0xff]  ;;  %v2810_v62 = vpack.c.bf16 %v5469_v11, %v17282_v34 }
 0x25b   : > { %v3093_v14 = vpack.c.bf16 %v3062_v50, %v3061_v42  ;;  %v6043_v42 = vld [vmem:[#allocation2 + $0x140] sm:$0xff]  ;;  %v17364_v50 = vld [vmem:[#allocation2 + $0x150] sm:$0xff] }
 0x25d   : > { %13622 = vmatmul.mubr.msk.bf16.gmra.mrb[12].mxu0 %vm325_vm0, %v5485_v3  ;;  %v3068_v3 = vld [vmem:[#allocation2 + $0x92] sm:$0xff] }
 0x25e   : > { %13625 = vmatprep.mubr.msk.bf16.mxu0 %vm325_vm0, %v5486_v28 }
 0x261   : > { %13316 = vmatmul.mubr.msk.bf16.gmra.mrb[12].mxu1 %vm325_vm0, %v2802_v25  ;;  %v19456_v25 = vld [vmem:[#allocation29_spill] sm:$0xff] }
 0x262   : > { %13319 = vmatprep.mubr.msk.bf16.mxu1 %vm325_vm0, %v5482_v32  ;;  %v3064_v32 = vld [vmem:[#allocation2 + $0x52] sm:$0xff]  ;;  %v5786_v11 = vpack.c.bf16 %v19456_v25, %v19455_v48  ;;  %v17452_v48 = vld [vmem:[#allocation2 + $0x340] sm:$0xff] }
 0x263   : > { %v17454_v25 = vld [vmem:[#allocation2 + $0x350] sm:$0xff] }
 0x265   : > { %13626 = vmatmul.mubr.msk.bf16.gmra.mrb[16].mxu0 %vm325_vm0, %v5487_v60 }
 0x266   : > { %13629 = vmatprep.mubr.msk.bf16.mxu0 %vm325_vm0, %v5488_v33 }
 0x269   : > { %13320 = vmatmul.mubr.msk.bf16.gmra.mrb[16].mxu1 %vm325_vm0, %v5483_v5  ;;  %v3095_v5 = vpack.c.bf16 %v3066_v52, %v3065_v2  ;;  %v17393_v2 = vld [vmem:[#allocation2 + $0x1a0] sm:$0xff]  ;;  %v17395_v52 = vld [vmem:[#allocation2 + $0x1b0] sm:$0xff] }
 0x26a   : > { %13323 = vmatprep.mubr.msk.bf16.mxu1 %vm325_vm0, %v5484_v27  ;;  %v19448_v27 = vld [vmem:[#allocation19_spill] sm:$0xff] }
 0x26b   : > { %v5781_v6 = vpack.c.bf16 %v19448_v27, %v17051_v26  ;;  %v19453_v26 = vld [vmem:[#allocation21_spill] sm:$0xff]  ;;  %v17401_v27 = vpack.c.bf16 %v17395_v52, %v17393_v2 }
 0x26c   : > { %v5784_v57 = vpack.c.bf16 %v17086_v40, %v19453_v26  ;;  %v3100_v40 = vpack.c.bf16 %v5751_v36, %v3075_v17 }
 0x26d   : > { %13630 = vmatmul.mubr.msk.bf16.gmra.mrb[20].mxu0 %vm325_vm0, %v5489_v61  ;;  %v17327_v61 = vld [vmem:[#allocation2 + $0x2b2] sm:$0xff]  ;;  %19468 = vst [vmem:[#allocation36_spill] sm:$0xff] %v17401_v27 }
 0x26e   : > { %13633 = vmatprep.mubr.msk.bf16.mxu0 %vm325_vm0, %v17250_v4  ;;  %19458 = vst [vmem:[#allocation27_spill] sm:$0xff] %v17327_v61  ;;  %v17333_v43 = vpack.c.bf16 %v17327_v61, %v17325_v13  ;;  %v17628_v13 = vld [vmem:[#allocation2 + $0x1b2] sm:$0xff] }
 0x26f   : > { %19490 = vst [vmem:[#allocation14_spill] sm:$0xff] %v17628_v13 }
 0x271   : > { %13324 = vmatmul.mubr.msk.bf16.gmra.mrb[20].mxu1 %vm325_vm0, %v2806_v54  ;;  %v17343_v54 = vld [vmem:[#allocation2 + $0x2e2] sm:$0xff] }
 0x272   : > { %13327 = vmatprep.mubr.msk.bf16.mxu1 %vm325_vm0, %v5486_v28  ;;  %v3096_v28 = vpack.c.bf16 %v3068_v3, %v19451_v45  ;;  %19462 = vst [vmem:[#allocation30_spill] sm:$0xff] %v17343_v54  ;;  %v17422_v3 = vpack.c.bf16 %v17414_v59, %v17412_v31  ;;  %v17428_v45 = vld [vmem:[#allocation2 + $0x240] sm:$0xff] }
 0x274   : > { %19470 = vst [vmem:[#allocation38_spill] sm:$0xff] %v17422_v3 }
 0x275   : > { %13634 = vmatmul.mubr.msk.bf16.gmra.mrb[24].mxu0 %vm325_vm0, %v17256_v15 }
 0x276   : > { %13637 = vmatprep.mubr.msk.bf16.mxu0 %vm325_vm0, %v17259_v63 }
 0x279   : > { %13328 = vmatmul.mubr.msk.bf16.gmra.mrb[24].mxu1 %vm325_vm0, %v5487_v60  ;;  %v5783_v60 = vpack.c.bf16 %v5759_v19, %v19452_v44  ;;  %v17432_v44 = vld [vmem:[#allocation2 + $0x290] sm:$0xff] }
 0x27a   : > { %13331 = vmatprep.mubr.msk.bf16.mxu1 %vm325_vm0, %v5488_v33  ;;  %v5785_v33 = vpack.c.bf16 %v17090_v0, %v19454_v30  ;;  %v5787_v0 = vpack.c.bf16 %v5767_v37, %v19459_v35  ;;  %v17446_v30 = vld [vmem:[#allocation2 + $0x330] sm:$0xff] }
 0x27b   : > { %v17476_v35 = vld [vmem:[#allocation2 + $0x151] sm:$0xff] }
 0x27d   : > { %13638 = vmatmul.mubr.msk.bf16.gmra.mrb[28].mxu0 %vm325_vm0, %v5493_v10  ;;  %v17354_v10 = vpack.c.bf16 %v17345_v47, %v17343_v54 }
 0x27e   : > { %13643 = vmatprep.mubr.msk.bf16.mxu0 %vm325_vm0, %v5776_v41 }
 0x281   : > { %13332 = vmatmul.mubr.msk.bf16.gmra.mrb[28].mxu1 %vm325_vm0, %v2810_v62  ;;  %v19465_v62 = vld [vmem:[#allocation25_spill] sm:$0xff] }
 0x282   : > { %13337 = vmatprep.mubr.msk.bf16.mxu1 %vm325_vm0, %v3093_v14  ;;  %v6075_v14 = vpack.c.bf16 %v17364_v50, %v6043_v42  ;;  %v17488_v42 = vld [vmem:[#allocation2 + $0x171] sm:$0xff] }
 0x285   : > { %13644 = vmatmul.mubr.msk.bf16.vlgmr.msra.gmra.mrb[0].mxu0 %vm325_vm0, %v5777_v55 }
 0x286   : > { %13676 = vmatpush3.bf16.msra.mxu0 %v17204_v38  ;;  %13647 = vmatprep.mubr.msk.bf16.mxu0 %vm325_vm0, %v5778_v49  ;;  %v3094_v38 = vpack.c.bf16 %v3064_v32, %v3063_v22  ;;  %v15437_v22 = vld [vmem:[%s19155_s3 + $0xa0] sm:$0xff]  }
 0x287   : > { %13709 = vmatprep.subr.bf16.mxu0 %v17287_v39 }
 0x289   : > { %13338 = vmatmul.mubr.msk.bf16.vlgmr.msra.gmra.mrb[0].mxu1 %vm325_vm0, %v3094_v38  ;;  %v6051_v38 = vld [vmem:[#allocation2 + $0x1e0] sm:$0xff] }
 0x28a   : > { %13341 = vmatprep.mubr.msk.bf16.mxu1 %vm325_vm0, %v3095_v5  ;;  %v17397_v5 = vld [vmem:[#allocation2 + $0x1f0] sm:$0xff] }
 0x28d   : > { %13648 = vmatmul.mubr.msk.bf16.gmra.mrb[4].mxu0 %vm325_vm0, %v5779_v9  ;;  %v17374_v9 = vld [vmem:[#allocation2 + $0x190] sm:$0xff] }
 0x28e   : > { %13651 = vmatprep.mubr.msk.bf16.mxu0 %vm325_vm0, %v5780_v20  ;;  %v17379_v58 = vpack.c.bf16 %v17374_v9, %v17372_v12 }
 0x290   : > { %19466 = vst [vmem:[#allocation35_spill] sm:$0xff] %v17379_v58 }
 0x291   : > { %13342 = vmatmul.mubr.msk.bf16.gmra.mrb[4].mxu1 %vm325_vm0, %v3096_v28  ;;  %v17430_v28 = vld [vmem:[#allocation2 + $0x250] sm:$0xff] }
 0x292   : > { %13345 = vmatprep.mubr.msk.bf16.mxu1 %vm325_vm0, %v5776_v41  ;;  %v17357_v41 = vld [vmem:[#allocation2 + $0x1c2] sm:$0xff] }
 0x293   : > { %19464 = vst [vmem:[#allocation32_spill] sm:$0xff] %v17357_v41 }
 0x295   : > { %13652 = vmatmul.mubr.msk.bf16.gmra.mrb[8].mxu0 %vm325_vm0, %v5781_v6 }
 0x296   : > { %13655 = vmatprep.mubr.msk.bf16.mxu0 %vm325_vm0, %v5782_v18 }
 0x299   : > { %13346 = vmatmul.mubr.msk.bf16.gmra.mrb[8].mxu1 %vm325_vm0, %v5777_v55  ;;  %v3104_v55 = vpack.c.bf16 %v5759_v19, %v17357_v41  ;;  %v6059_v19 = vld [vmem:[#allocation2 + $0x280] sm:$0xff]  ;;  %v17630_v41 = vld [vmem:[#allocation2 + $0x1f2] sm:$0xff] }
 0x29a   : > { %13349 = vmatprep.mubr.msk.bf16.mxu1 %vm325_vm0, %v5778_v49  ;;  %v5775_v49 = vld [vmem:[#allocation2 + $0x312] sm:$0xff]  ;;  %v6083_v26 = vpack.c.bf16 %v17432_v44, %v6059_v19  ;;  %19491 = vst [vmem:[#allocation17_spill] sm:$0xff] %v17630_v41 }
 0x29b   : > { %v5791_v36 = vpack.c.bf16 %v5775_v49, %v19465_v62  ;;  %v17486_v49 = vld [vmem:[#allocation2 + $0x161] sm:$0xff]  ;;  %v17511_v19 = vld [vmem:[#allocation2 + $0x1b1] sm:$0xff] }
 0x29c   : > { %v17490_v62 = vld [vmem:[#allocation2 + $0x181] sm:$0xff] }
 0x29d   : > { %13656 = vmatmul.mubr.msk.bf16.gmra.mrb[12].mxu0 %vm325_vm0, %v5783_v60  ;;  %v17436_v60 = vpack.c.bf16 %v17430_v28, %v17428_v45 }
 0x29e   : > { %13659 = vmatprep.mubr.msk.bf16.mxu0 %vm325_vm0, %v5784_v57 }
 0x29f   : > { %19471 = vst [vmem:[#allocation39_spill] sm:$0xff] %v17436_v60 }
 0x2a1   : > { %13350 = vmatmul.mubr.msk.bf16.gmra.mrb[12].mxu1 %vm325_vm0, %v3100_v40  ;;  %v17474_v40 = vld [vmem:[#allocation2 + $0x390] sm:$0xff] }
 0x2a2   : > { %13353 = vmatprep.mubr.msk.bf16.mxu1 %vm325_vm0, %v5780_v20  ;;  %v17382_v20 = vld [vmem:[#allocation2 + $0x262] sm:$0xff] }
 0x2a3   : > { %19467 = vst [vmem:[#allocation34_spill] sm:$0xff] %v17382_v20  ;;  %v3108_v32 = vpack.c.bf16 %v5767_v37, %v17382_v20  ;;  %v6341_v37 = vld [vmem:[#allocation2 + $0x141] sm:$0xff] }
 0x2a4   : > { %v6647_v20 = vld [vmem:[#allocation2 + $0x1e2] sm:$0xff] }
 0x2a5   : > { %13660 = vmatmul.mubr.msk.bf16.gmra.mrb[16].mxu0 %vm325_vm0, %v5785_v33 }
 0x2a6   : > { %13663 = vmatprep.mubr.msk.bf16.mxu0 %vm325_vm0, %v5786_v11 }
 0x2a9   : > { %13354 = vmatmul.mubr.msk.bf16.gmra.mrb[16].mxu1 %vm325_vm0, %v5781_v6  ;;  %v17410_v6 = vld [vmem:[#allocation2 + $0x210] sm:$0xff] }
 0x2aa   : > { %13357 = vmatprep.mubr.msk.bf16.mxu1 %vm325_vm0, %v5782_v18 }
 0x2ad   : > { %13664 = vmatmul.mubr.msk.bf16.gmra.mrb[20].mxu0 %vm325_vm0, %v5787_v0 }
 0x2ae   : > { %13667 = vmatprep.mubr.msk.bf16.mxu0 %vm325_vm0, %v17333_v43 }
 0x2b1   : > { %13358 = vmatmul.mubr.msk.bf16.gmra.mrb[20].mxu1 %vm325_vm0, %v3104_v55  ;;  %v6373_v55 = vpack.c.bf16 %v17476_v35, %v6341_v37 }
 0x2b2   : > { %13361 = vmatprep.mubr.msk.bf16.mxu1 %vm325_vm0, %v5784_v57  ;;  %v6067_v57 = vld [vmem:[#allocation2 + $0x320] sm:$0xff] }
 0x2b5   : > { %13668 = vmatmul.mubr.msk.bf16.gmra.mrb[24].mxu0 %vm325_vm0, %v17349_v8 }
 0x2b6   : > { %13671 = vmatprep.mubr.msk.bf16.mxu0 %vm325_vm0, %v17354_v10 }
 0x2b9   : > { %13362 = vmatmul.mubr.msk.bf16.gmra.mrb[24].mxu1 %vm325_vm0, %v5785_v33  ;;  %v6087_v33 = vpack.c.bf16 %v17446_v30, %v6067_v57  ;;  %v17513_v57 = vld [vmem:[#allocation2 + $0x1f1] sm:$0xff] }
 0x2ba   : > { %13365 = vmatprep.mubr.msk.bf16.mxu1 %vm325_vm0, %v5786_v11  ;;  %v17456_v11 = vld [vmem:[#allocation2 + $0x360] sm:$0xff] }
 0x2bd   : > { %13672 = vmatmul.mubr.msk.bf16.gmra.mrb[28].mxu0 %vm325_vm0, %v5791_v36  ;;  %v17492_v36 = vld [vmem:[#allocation2 + $0x191] sm:$0xff] }
 0x2be   : > { %13677 = vmatprep.mubr.msk.bf16.mxu0 %vm325_vm0, %v6075_v14  ;;  %v17496_v14 = vpack.c.bf16 %v17488_v42, %v17486_v49 }
 0x2c0   : > { %19475 = vst [vmem:[#allocation43_spill] sm:$0xff] %v17496_v14 }
 0x2c1   : > { %13366 = vmatmul.mubr.msk.bf16.gmra.mrb[28].mxu1 %vm325_vm0, %v3108_v32  ;;  %v17500_v32 = vpack.c.bf16 %v17492_v36, %v17490_v62 }
 0x2c3   : > { %19476 = vst [vmem:[#allocation44_spill] sm:$0xff] %v17500_v32 }
 0x2c5   : > { %13678 = vmatmul.mubr.msk.bf16.vlgmr.msra.gmra.mrb[0].mxu0 %vm325_vm0, %v17159_v46  ;;  %v6079_v46 = vpack.c.bf16 %v17397_v5, %v6051_v38  ;;  %v15438_v38 = vld [vmem:[%s19155_s3 + $0xa8] sm:$0xff]  }
 0x2c6   : > { %13710 = vmatpush3.bf16.msra.mxu0 %v17287_v39  ;;  %13681 = vmatprep.mubr.msk.bf16.mxu0 %vm325_vm0, %v17379_v58  ;;  %v17408_v39 = vld [vmem:[#allocation2 + $0x200] sm:$0xff]  ;;  %v17591_v58 = vld [vmem:[#allocation2 + $0x152] sm:$0xff] }
 0x2c7   : > { %13743 = vmatprep.subr.bf16.mxu0 %v15437_v22  ;;  %v17418_v18 = vpack.c.bf16 %v17410_v6, %v17408_v39 }
 0x2c9   : > { %19469 = vst [vmem:[#allocation37_spill] sm:$0xff] %v17418_v18 }
 0x2cd   : > { %13682 = vmatmul.mubr.msk.bf16.gmra.mrb[4].mxu0 %vm325_vm0, %v17401_v27  ;;  %v6639_v27 = vld [vmem:[#allocation2 + $0x142] sm:$0xff] }
 0x2ce   : > { %13685 = vmatprep.mubr.msk.bf16.mxu0 %vm325_vm0, %v6079_v46  ;;  %v17509_v46 = vld [vmem:[#allocation2 + $0x1a1] sm:$0xff]  ;;  %v6671_v54 = vpack.c.bf16 %v17591_v58, %v6639_v27  ;;  %v17615_v27 = vpack.c.bf16 %v17607_v29, %v17605_v53  ;;  %v6675_v53 = vpack.c.bf16 %v17630_v41, %v6647_v20 }
 0x2cf   : > { %v6655_v41 = vld [vmem:[#allocation2 + $0x282] sm:$0xff] }
 0x2d0   : > { %19489 = vst [vmem:[#allocation8_spill] sm:$0xff] %v17615_v27 }
 0x2d5   : > { %13686 = vmatmul.mubr.msk.bf16.gmra.mrb[8].mxu0 %vm325_vm0, %v17418_v18 }
 0x2d6   : > { %13689 = vmatprep.mubr.msk.bf16.mxu0 %vm325_vm0, %v17422_v3 }
 0x2dd   : > { %13690 = vmatmul.mubr.msk.bf16.gmra.mrb[12].mxu0 %vm325_vm0, %v17436_v60 }
 0x2de   : > { %13693 = vmatprep.mubr.msk.bf16.mxu0 %vm325_vm0, %v6083_v26  ;;  %v6349_v26 = vld [vmem:[#allocation2 + $0x1e1] sm:$0xff] }
 0x2df   : > { %v6377_v37 = vpack.c.bf16 %v17513_v57, %v6349_v26 }
 0x2e5   : > { %13694 = vmatmul.mubr.msk.bf16.gmra.mrb[16].mxu0 %vm325_vm0, %v17163_v23  ;;  %v17458_v23 = vld [vmem:[#allocation2 + $0x370] sm:$0xff] }
 0x2e6   : > { %13697 = vmatprep.mubr.msk.bf16.mxu0 %vm325_vm0, %v17170_v51  ;;  %v17462_v51 = vpack.c.bf16 %v17454_v25, %v17452_v48  ;;  %v17466_v17 = vpack.c.bf16 %v17458_v23, %v17456_v11 }
 0x2e8   : > { %19472 = vst [vmem:[#allocation40_spill] sm:$0xff] %v17462_v51  ;;  %19473 = vst [vmem:[#allocation41_spill] sm:$0xff] %v17466_v17 }
 0x2ed   : > { %13698 = vmatmul.mubr.msk.bf16.gmra.mrb[20].mxu0 %vm325_vm0, %v17173_v1  ;;  %v17472_v1 = vld [vmem:[#allocation2 + $0x380] sm:$0xff] }
 0x2ee   : > { %13701 = vmatprep.mubr.msk.bf16.mxu0 %vm325_vm0, %v6087_v33  ;;  %v17480_v0 = vpack.c.bf16 %v17474_v40, %v17472_v1  ;;  %v17517_v33 = vpack.c.bf16 %v17511_v19, %v17509_v46 }
 0x2f0   : > { %19474 = vst [vmem:[#allocation42_spill] sm:$0xff] %v17480_v0  ;;  %19477 = vst [vmem:[#allocation45_spill] sm:$0xff] %v17517_v33 }
 0x2f5   : > { %13702 = vmatmul.mubr.msk.bf16.gmra.mrb[24].mxu0 %vm325_vm0, %v17462_v51  ;;  %v17547_v51 = vld [vmem:[#allocation2 + $0x291] sm:$0xff] }
 0x2f6   : > { %13705 = vmatprep.mubr.msk.bf16.mxu0 %vm325_vm0, %v17466_v17  ;;  %v6357_v17 = vld [vmem:[#allocation2 + $0x281] sm:$0xff] }
 0x2f7   : > { %v6381_v3 = vpack.c.bf16 %v17547_v51, %v6357_v17  ;;  %v17567_v17 = vld [vmem:[#allocation2 + $0x341] sm:$0xff] }
 0x2fd   : > { %13706 = vmatmul.mubr.msk.bf16.gmra.mrb[28].mxu0 %vm325_vm0, %v17480_v0 }
 0x2fe   : > { %13711 = vmatprep.mubr.msk.bf16.mxu0 %vm325_vm0, %v6373_v55  ;;  %v17525_v55 = vld [vmem:[#allocation2 + $0x211] sm:$0xff] }
 0x305   : > { %13712 = vmatmul.mubr.msk.bf16.vlgmr.msra.gmra.mrb[0].mxu0 %vm325_vm0, %v17496_v14  ;;  %v17529_v14 = vld [vmem:[#allocation2 + $0x231] sm:$0xff] }
 0x306   : > { %13744 = vmatpush3.bf16.msra.mxu0 %v15437_v22  ;;  %13715 = vmatprep.mubr.msk.bf16.mxu0 %vm325_vm0, %v17500_v32  ;;  %v17523_v22 = vld [vmem:[#allocation2 + $0x201] sm:$0xff] }
 0x307   : > { %13777 = vmatprep.subr.bf16.mxu0 %v15438_v38  ;;  %v17527_v32 = vld [vmem:[#allocation2 + $0x221] sm:$0xff]  ;;  %v17533_v0 = vpack.c.bf16 %v17525_v55, %v17523_v22 }
 0x308   : > { %v17537_v26 = vpack.c.bf16 %v17529_v14, %v17527_v32 }
 0x309   : > { %19478 = vst [vmem:[#allocation46_spill] sm:$0xff] %v17533_v0 }
 0x30a   : > { %19479 = vst [vmem:[#allocation47_spill] sm:$0xff] %v17537_v26 }
 0x30d   : > { %13716 = vmatmul.mubr.msk.bf16.gmra.mrb[4].mxu0 %vm325_vm0, %v17517_v33  ;;  %v17545_v33 = vld [vmem:[#allocation2 + $0x251] sm:$0xff] }
 0x30e   : > { %13719 = vmatprep.mubr.msk.bf16.mxu0 %vm325_vm0, %v6377_v37  ;;  %v17543_v37 = vld [vmem:[#allocation2 + $0x241] sm:$0xff] }
 0x30f   : > { %v17551_v60 = vpack.c.bf16 %v17545_v33, %v17543_v37 }
 0x311   : > { %19480 = vst [vmem:[#allocation48_spill] sm:$0xff] %v17551_v60 }
 0x315   : > { %13720 = vmatmul.mubr.msk.bf16.gmra.mrb[8].mxu0 %vm325_vm0, %v17533_v0  ;;  %v17561_v0 = vld [vmem:[#allocation2 + $0x331] sm:$0xff] }
 0x316   : > { %13723 = vmatprep.mubr.msk.bf16.mxu0 %vm325_vm0, %v17537_v26  ;;  %v6365_v26 = vld [vmem:[#allocation2 + $0x321] sm:$0xff] }
 0x317   : > { %v6385_v18 = vpack.c.bf16 %v17561_v0, %v6365_v26 }
 0x31d   : > { %13724 = vmatmul.mubr.msk.bf16.gmra.mrb[12].mxu0 %vm325_vm0, %v17551_v60  ;;  %v17569_v60 = vld [vmem:[#allocation2 + $0x351] sm:$0xff] }
 0x31e   : > { %13727 = vmatprep.mubr.msk.bf16.mxu0 %vm325_vm0, %v6381_v3  ;;  %v17571_v3 = vld [vmem:[#allocation2 + $0x361] sm:$0xff] }
 0x325   : > { %13728 = vmatmul.mubr.msk.bf16.gmra.mrb[16].mxu0 %vm325_vm0, %v17250_v4  ;;  %v17573_v4 = vld [vmem:[#allocation2 + $0x371] sm:$0xff] }
 0x326   : > { %13731 = vmatprep.mubr.msk.bf16.mxu0 %vm325_vm0, %v17256_v15  ;;  %v17577_v15 = vpack.c.bf16 %v17569_v60, %v17567_v17  ;;  %v17581_v26 = vpack.c.bf16 %v17573_v4, %v17571_v3 }
 0x328   : > { %19481 = vst [vmem:[#allocation49_spill] sm:$0xff] %v17577_v15  ;;  %19482 = vst [vmem:[#allocation50_spill] sm:$0xff] %v17581_v26 }
 0x32d   : > { %13732 = vmatmul.mubr.msk.bf16.gmra.mrb[20].mxu0 %vm325_vm0, %v17259_v63  ;;  %v17587_v63 = vld [vmem:[#allocation2 + $0x381] sm:$0xff] }
 0x32e   : > { %13735 = vmatprep.mubr.msk.bf16.mxu0 %vm325_vm0, %v6385_v18  ;;  %v17589_v18 = vld [vmem:[#allocation2 + $0x391] sm:$0xff] }
 0x32f   : > { %v17595_v47 = vpack.c.bf16 %v17589_v18, %v17587_v63 }
 0x331   : > { %19483 = vst [vmem:[#allocation9_spill] sm:$0xff] %v17595_v47 }
 0x335   : > { %13736 = vmatmul.mubr.msk.bf16.gmra.mrb[24].mxu0 %vm325_vm0, %v17577_v15  ;;  %v17601_v15 = vld [vmem:[#allocation2 + $0x162] sm:$0xff] }
 0x336   : > { %13739 = vmatprep.mubr.msk.bf16.mxu0 %vm325_vm0, %v17581_v26  ;;  %19484 = vst [vmem:[#allocation10_spill] sm:$0xff] %v17601_v15  ;;  %v17603_v26 = vld [vmem:[#allocation2 + $0x172] sm:$0xff] }
 0x337   : > { %19485 = vst [vmem:[#allocation11_spill] sm:$0xff] %v17603_v26  ;;  %v17611_v61 = vpack.c.bf16 %v17603_v26, %v17601_v15  ;;  %v17647_v26 = vld [vmem:[#allocation2 + $0x232] sm:$0xff] }
 0x338   : > { %19495 = vst [vmem:[#allocation15_spill] sm:$0xff] %v17647_v26 }
 0x339   : > { %19488 = vst [vmem:[#allocation7_spill] sm:$0xff] %v17611_v61 }
 0x33d   : > { %13740 = vmatmul.mubr.msk.bf16.gmra.mrb[28].mxu0 %vm325_vm0, %v17595_v47  ;;  %v17626_v47 = vld [vmem:[#allocation2 + $0x1a2] sm:$0xff] }
 0x33e   : > { %13745 = vmatprep.mubr.msk.bf16.mxu0 %vm325_vm0, %v6671_v54  ;;  %v17620_v54 = vld [vmem:[%s19155_s3 + $0xb0] sm:$0xff]   ;;  %v17635_v29 = vpack.c.bf16 %v17628_v13, %v17626_v47 }
 0x33f   : > { %v17665_v13 = vld [vmem:[#allocation2 + $0x292] sm:$0xff] }
 0x340   : > { %19492 = vst [vmem:[#allocation19_spill] sm:$0xff] %v17635_v29 }
 0x345   : > { %13746 = vmatmul.mubr.msk.bf16.vlgmr.msra.gmra.mrb[0].mxu0 %vm325_vm0, %v17611_v61  ;;  %v17645_v61 = vld [vmem:[#allocation2 + $0x222] sm:$0xff] }
 0x346   : > { %13778 = vmatpush3.bf16.msra.mxu0 %v15438_v38  ;;  %13749 = vmatprep.mubr.msk.bf16.mxu0 %vm325_vm0, %v17615_v27  ;;  %v17641_v38 = vld [vmem:[#allocation2 + $0x202] sm:$0xff]  ;;  %v17643_v27 = vld [vmem:[#allocation2 + $0x212] sm:$0xff]  ;;  %19494 = vst [vmem:[#allocation22_spill] sm:$0xff] %v17645_v61  ;;  %v17655_v20 = vpack.c.bf16 %v17647_v26, %v17645_v61  ;;  %v6679_v26 = vpack.c.bf16 %v17665_v13, %v6655_v41 }
 0x347   : > { %13811 = vmatprep.subr.bf16.mxu0 %v17620_v54  ;;  %19493 = vst [vmem:[#allocation20_spill] sm:$0xff] %v17643_v27  ;;  %v17651_v15 = vpack.c.bf16 %v17643_v27, %v17641_v38 }
 0x348   : > { %19497 = vst [vmem:[#allocation21_spill] sm:$0xff] %v17655_v20 }
 0x349   : > { %19496 = vst [vmem:[#allocation16_spill] sm:$0xff] %v17651_v15 }
 0x34d   : > { %13750 = vmatmul.mubr.msk.bf16.gmra.mrb[4].mxu0 %vm325_vm0, %v17635_v29  ;;  %v17663_v29 = vld [vmem:[#allocation2 + $0x252] sm:$0xff] }
 0x34e   : > { %13753 = vmatprep.mubr.msk.bf16.mxu0 %vm325_vm0, %v6675_v53  ;;  %v17661_v53 = vld [vmem:[#allocation2 + $0x242] sm:$0xff]  ;;  %19499 = vst [vmem:[#allocation24_spill] sm:$0xff] %v17663_v29 }
 0x34f   : > { %19498 = vst [vmem:[#allocation23_spill] sm:$0xff] %v17661_v53  ;;  %v17669_v27 = vpack.c.bf16 %v17663_v29, %v17661_v53  ;;  %v6663_v29 = vld [vmem:[#allocation2 + $0x322] sm:$0xff]  ;;  %v17685_v53 = vld [vmem:[#allocation2 + $0x332] sm:$0xff] }
 0x351   : > { %19500 = vst [vmem:[#allocation29_spill] sm:$0xff] %v17669_v27 }
 0x355   : > { %13754 = vmatmul.mubr.msk.bf16.gmra.mrb[8].mxu0 %vm325_vm0, %v17651_v15 }
 0x356   : > { %13757 = vmatprep.mubr.msk.bf16.mxu0 %vm325_vm0, %v17655_v20 }
 0x35c   : > { %v17675_v15 = vpop.f32.mrb[0].mxu1 }
 0x35d   : > { %13758 = vmatmul.mubr.msk.bf16.gmra.mrb[12].mxu0 %vm325_vm0, %v17669_v27  ;;  %19501 = vst [vmem:[#allocation18_spill] sm:$0xff] %v17675_v15  ;;  %v17679_v20 = vpop.f32.mrb[1].mxu1  ;;  %v6683_v27 = vpack.c.bf16 %v17685_v53, %v6663_v29  ;;  %v17703_v15 = vld [vmem:[#allocation2 + $0x362] sm:$0xff] }
 0x35e   : > { %13761 = vmatprep.mubr.msk.bf16.mxu0 %vm325_vm0, %v6679_v26  ;;  %19502 = vst [vmem:[#allocation25_spill] sm:$0xff] %v17679_v20  ;;  %v17683_v61 = vpop.f32.mrb[2].mxu1  ;;  %v17697_v20 = vld [vmem:[#allocation2 + $0x342] sm:$0xff] }
 0x35f   : > { %19503 = vst [vmem:[#allocation51_spill] sm:$0xff] %v17683_v61  ;;  %v17687_v41 = vpop.f32.mrb[3].mxu1  ;;  %19507 = vst [vmem:[#allocation55_spill] sm:$0xff] %v17697_v20 }
 0x360   : > { %19504 = vst [vmem:[#allocation52_spill] sm:$0xff] %v17687_v41  ;;  %v17705_v41 = vld [vmem:[#allocation2 + $0x372] sm:$0xff] }
 0x361   : > { %19510 = vst [vmem:[#allocation58_spill] sm:$0xff] %v17705_v41 }
 0x364   : > { %v17690_v26 = vpop.f32.mrb[4].mxu1 }
 0x365   : > { %13762 = vmatmul.mubr.msk.bf16.gmra.mrb[16].mxu0 %vm325_vm0, %v17333_v43  ;;  %19505 = vst [vmem:[#allocation53_spill] sm:$0xff] %v17690_v26  ;;  %v17694_v43 = vpop.f32.mrb[5].mxu1 }
 0x366   : > { %13765 = vmatprep.mubr.msk.bf16.mxu0 %vm325_vm0, %v17349_v8  ;;  %19506 = vst [vmem:[#allocation54_spill] sm:$0xff] %v17694_v43  ;;  %v17699_v8 = vld [vmem:[#allocation2 + $0x352] sm:$0xff]  ;;  %v17701_v61 = vpop.f32.mrb[6].mxu1  ;;  %v17725_v43 = vld [vmem:[#allocation2 + $0x382] sm:$0xff] }
 0x367   : > { %19508 = vst [vmem:[#allocation56_spill] sm:$0xff] %v17699_v8  ;;  %19509 = vst [vmem:[#allocation57_spill] sm:$0xff] %v17701_v61  ;;  %v17707_v29 = vpop.f32.mrb[7].mxu1  ;;  %v17711_v26 = vpack.c.bf16 %v17699_v8, %v17697_v20 }
 0x368   : > { %19511 = vst [vmem:[#allocation59_spill] sm:$0xff] %v17707_v29  ;;  %v17727_v29 = vld [vmem:[#allocation2 + $0x392] sm:$0xff] }
 0x369   : > { %19512 = vst [vmem:[#allocation60_spill] sm:$0xff] %v17711_v26  ;;  %19516 = vst [vmem:[#allocation64_spill] sm:$0xff] %v17727_v29 }
 0x36d   : > { %13766 = vmatmul.mubr.msk.bf16.gmra.mrb[20].mxu0 %vm325_vm0, %v17354_v10  ;;  %v17715_v10 = vpack.c.bf16 %v17705_v41, %v17703_v15  ;;  %v17735_v41 = vpack.c.bf16 %v17727_v29, %v17725_v43  ;;  %v6972_v29 = vpack.c.bf16 %v17393_v2, %v17374_v9  ;;  %v6974_v9 = vpack.c.bf16 %v17408_v39, %v17397_v5 }
 0x36e   : > { %13769 = vmatprep.mubr.msk.bf16.mxu0 %vm325_vm0, %v6683_v27  ;;  %v17717_v27 = vpop.f32.mrb[8].mxu1 }
 0x36f   : > { %19513 = vst [vmem:[#allocation61_spill] sm:$0xff] %v17715_v10  ;;  %19514 = vst [vmem:[#allocation62_spill] sm:$0xff] %v17717_v27  ;;  %v17721_v61 = vpop.f32.mrb[9].mxu1  ;;  %v6970_v27 = vpack.c.bf16 %v17151_v21, %v17364_v50  ;;  %v15440_v21 = vld [vmem:[%s19155_s3 + $0xb8] sm:$0xff]  }
 0x370   : > { %19515 = vst [vmem:[#allocation63_spill] sm:$0xff] %v17721_v61  ;;  %v17729_v8 = vpop.f32.mrb[10].mxu1 }
 0x371   : > { %19517 = vst [vmem:[#allocation65_spill] sm:$0xff] %v17729_v8  ;;  %v17731_v20 = vpop.f32.mrb[11].mxu1 }
 0x372   : > { %19518 = vst [vmem:[#allocation66_spill] sm:$0xff] %v17731_v20  ;;  %v6971_v20 = vpack.c.bf16 %v17372_v12, %v17153_v7  ;;  %v6973_v12 = vpack.c.bf16 %v17176_v16, %v17395_v52  ;;  %v6976_v16 = vpack.c.bf16 %v17428_v45, %v17414_v59 }
 0x375   : > { %13770 = vmatmul.mubr.msk.bf16.gmra.mrb[24].mxu0 %vm325_vm0, %v17711_v26  ;;  %v17739_v26 = vpop.f32.mrb[12].mxu1 }
 0x376   : > { %13773 = vmatprep.mubr.msk.bf16.mxu0 %vm325_vm0, %v17715_v10  ;;  %v17743_v61 = vpop.f32.mrb[13].mxu1 }
 0x377   : > { %19519 = vst [vmem:[#allocation67_spill] sm:$0xff] %v17743_v61  ;;  %v17746_v10 = vpop.f32.mrb[14].mxu1 }
 0x378   : > { %v17748_v8 = vpop.f32.mrb[15].mxu1 }
 0x37c   : > { %v17757_v50 = vpop.f32.mrb[16].mxu1 }
 0x37d   : > { %13774 = vmatmul.mubr.msk.bf16.gmra.mrb[28].mxu0 %vm325_vm0, %v17735_v41  ;;  %v17760_v61 = vpop.f32.mrb[17].mxu1 }
 0x37e   : > { %13779 = vmatprep.mubr.msk.bf16.mxu0 %vm325_vm0, %v6970_v27  ;;  %v17764_v27 = vpop.f32.mrb[18].mxu1 }
 0x37f   : > { %v17766_v7 = vpop.f32.mrb[19].mxu1 }
 0x380   : > { %19520 = vst [vmem:[#allocation68_spill] sm:$0xff] %v17766_v7  ;;  %v6975_v7 = vpack.c.bf16 %v17412_v31, %v17410_v6  ;;  %v6977_v6 = vpack.c.bf16 %v17199_v56, %v17430_v28  ;;  %v17816_v56 = vld [vmem:[#allocation2 + $0x2e0] sm:$0xff] }
 0x384   : > { %v17772_v2 = vpop.f32.mrb[20].mxu1 }
 0x385   : > { %13780 = vmatmul.mubr.msk.bf16.vlgmr.msra.gmra.mrb[0].mxu0 %vm325_vm0, %v6971_v20  ;;  %v17775_v20 = vpop.f32.mrb[21].mxu1 }
 0x386   : > { %13812 = vmatpush3.bf16.msra.mxu0 %v17620_v54  ;;  %13783 = vmatprep.mubr.msk.bf16.mxu0 %vm325_vm0, %v6972_v29  ;;  %v17778_v54 = vpop.f32.mrb[22].mxu1 }
 0x387   : > { %13845 = vmatprep.subr.bf16.mxu0 %v15440_v21  ;;  %v17780_v29 = vpop.f32.mrb[23].mxu1 }
 0x38c   : > { %v17786_v52 = vpop.f32.mrb[24].mxu1 }
 0x38d   : > { %13784 = vmatmul.mubr.msk.bf16.gmra.mrb[4].mxu0 %vm325_vm0, %v6973_v12  ;;  %v17789_v5 = vpop.f32.mrb[25].mxu1  ;;  %v17794_v12 = vld [vmem:[#allocation2 + $0x2a0] sm:$0xff] }
 0x38e   : > { %13787 = vmatprep.mubr.msk.bf16.mxu0 %vm325_vm0, %v6974_v9  ;;  %19521 = vst [vmem:[#allocation69_spill] sm:$0xff] %v17789_v5  ;;  %v17792_v39 = vpop.f32.mrb[26].mxu1  ;;  %v6978_v31 = vpack.c.bf16 %v17794_v12, %v17432_v44 }
 0x38f   : > { %19522 = vst [vmem:[#allocation70_spill] sm:$0xff] %v17792_v39  ;;  %v17796_v9 = vpop.f32.mrb[27].mxu1 }
 0x390   : > { %19523 = vst [vmem:[#allocation71_spill] sm:$0xff] %v17796_v9  ;;  %v17814_v9 = vld [vmem:[#allocation2 + $0x2d0] sm:$0xff] }
 0x394   : > { %v17802_v59 = vpop.f32.mrb[28].mxu1 }
 0x395   : > { %13788 = vmatmul.mubr.msk.bf16.gmra.mrb[8].mxu0 %vm325_vm0, %v6975_v7  ;;  %19524 = vst [vmem:[#allocation72_spill] sm:$0xff] %v17802_v59  ;;  %v17805_v45 = vpop.f32.mrb[29].mxu1  ;;  %v17808_v7 = vld [vmem:[#allocation2 + $0x2b0] sm:$0xff]  ;;  %v6983_v59 = vpack.c.bf16 %v17456_v11, %v17454_v25  ;;  %v7270_v25 = vpack.c.bf16 %v17509_v46, %v17492_v36  ;;  %v15441_v11 = vld [vmem:[%s19155_s3 + $0xc0] sm:$0xff]  }
 0x396   : > { %13791 = vmatprep.mubr.msk.bf16.mxu0 %vm325_vm0, %v6976_v16  ;;  %19525 = vst [vmem:[#allocation73_spill] sm:$0xff] %v17805_v45  ;;  %v17810_v16 = vld [vmem:[#allocation2 + $0x2c0] sm:$0xff]  ;;  %v17812_v39 = vpop.f32.mrb[30].mxu1 }
 0x397   : > { %19526 = vst [vmem:[#allocation74_spill] sm:$0xff] %v17812_v39  ;;  %v17818_v28 = vpop.f32.mrb[31].mxu1  ;;  %v6979_v44 = vpack.c.bf16 %v17810_v16, %v17808_v7  ;;  %v17828_v45 = vld [vmem:[#allocation2 + $0x300] sm:$0xff] }
 0x398   : > { %19527 = vst [vmem:[#allocation75_spill] sm:$0xff] %v17818_v28  ;;  %v6982_v28 = vpack.c.bf16 %v17452_v48, %v17446_v30  ;;  %v7268_v30 = vpack.c.bf16 %v17486_v49, %v17476_v35  ;;  %v7269_v48 = vpack.c.bf16 %v17490_v62, %v17488_v42  ;;  %v7274_v35 = vpack.c.bf16 %v17543_v37, %v17529_v14  ;;  %v17871_v49 = vld [vmem:[#allocation2 + $0x2a1] sm:$0xff]  ;;  %v17879_v62 = vld [vmem:[#allocation2 + $0x2b1] sm:$0xff] }
 0x399   : > { %v7276_v42 = vpack.c.bf16 %v17871_v49, %v17547_v51  ;;  %v17881_v36 = vld [vmem:[#allocation2 + $0x2c1] sm:$0xff]  ;;  %v17883_v14 = vld [vmem:[#allocation2 + $0x2d1] sm:$0xff] }
 0x39a   : > { %v7277_v46 = vpack.c.bf16 %v17881_v36, %v17879_v62  ;;  %v17893_v51 = vld [vmem:[#allocation2 + $0x2f1] sm:$0xff]  ;;  %v17909_v37 = vld [vmem:[#allocation2 + $0x3a1] sm:$0xff] }
 0x39d   : > { %13792 = vmatmul.mubr.msk.bf16.gmra.mrb[12].mxu0 %vm325_vm0, %v6977_v6  ;;  %v6980_v6 = vpack.c.bf16 %v17816_v56, %v17814_v9 }
 0x39e   : > { %13795 = vmatprep.mubr.msk.bf16.mxu0 %vm325_vm0, %v6978_v31  ;;  %v17826_v31 = vld [vmem:[#allocation2 + $0x2f0] sm:$0xff] }
 0x39f   : > { %v6981_v39 = vpack.c.bf16 %v17828_v45, %v17826_v31 }
 0x3a5   : > { %13796 = vmatmul.mubr.msk.bf16.gmra.mrb[16].mxu0 %vm325_vm0, %v6979_v44  ;;  %v6984_v44 = vpack.c.bf16 %v17472_v1, %v17458_v23  ;;  %v7271_v23 = vpack.c.bf16 %v17262_v24, %v17511_v19  ;;  %v7272_v1 = vpack.c.bf16 %v17523_v22, %v17513_v57  ;;  %v7275_v24 = vpack.c.bf16 %v17282_v34, %v17545_v33  ;;  %v17895_v19 = vld [vmem:[#allocation2 + $0x301] sm:$0xff] }
 0x3a6   : > { %13799 = vmatprep.mubr.msk.bf16.mxu0 %vm325_vm0, %v6980_v6  ;;  %v17842_v6 = vld [vmem:[#allocation2 + $0x3a0] sm:$0xff]  ;;  %v7279_v57 = vpack.c.bf16 %v17895_v19, %v17893_v51  ;;  %v7280_v33 = vpack.c.bf16 %v17567_v17, %v17561_v0  ;;  %v7281_v22 = vpack.c.bf16 %v17571_v3, %v17569_v60  ;;  %v19528_v0 = vld [vmem:[#allocation10_spill] sm:$0xff]  ;;  %v19530_v3 = vld [vmem:[#allocation12_spill] sm:$0xff] }
 0x3a7   : > { %v6985_v5 = vpack.c.bf16 %v17842_v6, %v17474_v40  ;;  %v7273_v40 = vpack.c.bf16 %v17527_v32, %v17525_v55  ;;  %v17885_v32 = vld [vmem:[#allocation2 + $0x2e1] sm:$0xff]  ;;  %v7282_v55 = vpack.c.bf16 %v17587_v63, %v17573_v4  ;;  %v7566_v17 = vpack.c.bf16 %v19528_v0, %v17591_v58  ;;  %v19531_v4 = vld [vmem:[#allocation13_spill] sm:$0xff]  ;;  %v19532_v58 = vld [vmem:[#allocation14_spill] sm:$0xff] }
 0x3a8   : > { %v7278_v34 = vpack.c.bf16 %v17885_v32, %v17883_v14  ;;  %v19529_v60 = vld [vmem:[#allocation11_spill] sm:$0xff]  ;;  %v7568_v63 = vpack.c.bf16 %v17626_v47, %v19531_v4  ;;  %v19535_v47 = vld [vmem:[#allocation20_spill] sm:$0xff] }
 0x3ad   : > { %13800 = vmatmul.mubr.msk.bf16.gmra.mrb[20].mxu0 %vm325_vm0, %v6981_v39  ;;  %v15442_v39 = vld [vmem:[%s19155_s3 + $0xc8] sm:$0xff]  }
 0x3ae   : > { %13803 = vmatprep.mubr.msk.bf16.mxu0 %vm325_vm0, %v6982_v28  ;;  %v19534_v28 = vld [vmem:[#allocation17_spill] sm:$0xff] }
 0x3b5   : > { %13804 = vmatmul.mubr.msk.bf16.gmra.mrb[24].mxu0 %vm325_vm0, %v6983_v59 }
 0x3b6   : > { %13807 = vmatprep.mubr.msk.bf16.mxu0 %vm325_vm0, %v6984_v44  ;;  %v7570_v44 = vpack.c.bf16 %v17641_v38, %v19534_v28 }
 0x3bd   : > { %13808 = vmatmul.mubr.msk.bf16.gmra.mrb[28].mxu0 %vm325_vm0, %v6985_v5  ;;  %v7567_v5 = vpack.c.bf16 %v19530_v3, %v19529_v60  ;;  %v19548_v60 = vld [vmem:[#allocation56_spill] sm:$0xff] }
 0x3be   : > { %13813 = vmatprep.mubr.msk.bf16.mxu0 %vm325_vm0, %v7268_v30  ;;  %v19536_v30 = vld [vmem:[#allocation22_spill] sm:$0xff]  ;;  %v7579_v3 = vpack.c.bf16 %v17703_v15, %v19548_v60  ;;  %v15443_v15 = vld [vmem:[%s19155_s3 + $0xd0] sm:$0xff]  }
 0x3bf   : > { %v8146_v60 = vld [vmem:[#allocation2 + $0x271] sm:$0xff] }
 0x3c5   : > { %13814 = vmatmul.mubr.msk.bf16.vlgmr.msra.gmra.mrb[0].mxu0 %vm325_vm0, %v7269_v48  ;;  %v7571_v48 = vpack.c.bf16 %v19536_v30, %v19535_v47  ;;  %v7839_v47 = vld [vmem:[#allocation2 + $0x1c0] sm:$0xff]  ;;  %v7840_v30 = vld [vmem:[#allocation2 + $0x1d0] sm:$0xff] }
 0x3c6   : > { %13846 = vmatpush3.bf16.msra.mxu0 %v15440_v21  ;;  %13817 = vmatprep.mubr.msk.bf16.mxu0 %vm325_vm0, %v7270_v25  ;;  %v7283_v21 = vpack.c.bf16 %v17909_v37, %v17589_v18  ;;  %v19533_v18 = vld [vmem:[#allocation32_spill] sm:$0xff]  ;;  %v19537_v25 = vld [vmem:[#allocation15_spill] sm:$0xff] }
 0x3c7   : > { %13879 = vmatprep.subr.bf16.mxu0 %v15441_v11  ;;  %v7569_v59 = vpack.c.bf16 %v19533_v18, %v19532_v58  ;;  %v7833_v58 = vld [vmem:[#allocation2 + $0x160] sm:$0xff]  ;;  %v7834_v18 = vld [vmem:[#allocation2 + $0x170] sm:$0xff] }
 0x3c8   : > { %v7865_v28 = vpack.c.bf16 %v7834_v18, %v7833_v58  ;;  %v8173_v58 = vpack.c.bf16 %v17893_v51, %v17885_v32  ;;  %v8154_v18 = vld [vmem:[#allocation2 + $0x311] sm:$0xff]  ;;  %v19568_v32 = vld [vmem:[#allocation7_spill] sm:$0xff]  ;;  %v19569_v51 = vld [vmem:[#allocation8_spill] sm:$0xff] }
 0x3cd   : > { %13818 = vmatmul.mubr.msk.bf16.gmra.mrb[4].mxu0 %vm325_vm0, %v7271_v23  ;;  %v19538_v23 = vld [vmem:[#allocation23_spill] sm:$0xff] }
 0x3ce   : > { %13821 = vmatprep.mubr.msk.bf16.mxu0 %vm325_vm0, %v7272_v1  ;;  %v7572_v1 = vpack.c.bf16 %v19538_v23, %v19537_v25  ;;  %v19553_v25 = vld [vmem:[#allocation37_spill] sm:$0xff]  ;;  %v19554_v23 = vld [vmem:[#allocation38_spill] sm:$0xff] }
 0x3d5   : > { %13822 = vmatmul.mubr.msk.bf16.gmra.mrb[8].mxu0 %vm325_vm0, %v7273_v40  ;;  %v19540_v40 = vld [vmem:[#allocation34_spill] sm:$0xff] }
 0x3d6   : > { %13825 = vmatprep.mubr.msk.bf16.mxu0 %vm325_vm0, %v7274_v35 }
 0x3dd   : > { %13826 = vmatmul.mubr.msk.bf16.gmra.mrb[12].mxu0 %vm325_vm0, %v7275_v24  ;;  %v19541_v24 = vld [vmem:[#allocation26_spill] sm:$0xff] }
 0x3de   : > { %13829 = vmatprep.mubr.msk.bf16.mxu0 %vm325_vm0, %v7276_v42  ;;  %v7574_v38 = vpack.c.bf16 %v19541_v24, %v17665_v13  ;;  %v19542_v42 = vld [vmem:[#allocation27_spill] sm:$0xff]  ;;  %v7874_v24 = vpack.c.bf16 %v17814_v9, %v17810_v16  ;;  %v7864_v9 = vld [vmem:[#allocation2 + $0x3b0] sm:$0xff] }
 0x3df   : > { %v19547_v13 = vld [vmem:[#allocation55_spill] sm:$0xff]  ;;  %v7880_v16 = vpack.c.bf16 %v7864_v9, %v17842_v6  ;;  %v8138_v6 = vld [vmem:[#allocation2 + $0x1d1] sm:$0xff] }
 0x3e0   : > { %v8460_v9 = vld [vmem:[#allocation2 + $0x3b2] sm:$0xff] }
 0x3e5   : > { %13830 = vmatmul.mubr.msk.bf16.gmra.mrb[16].mxu0 %vm325_vm0, %v7277_v46  ;;  %v19543_v46 = vld [vmem:[#allocation28_spill] sm:$0xff] }
 0x3e6   : > { %13833 = vmatprep.mubr.msk.bf16.mxu0 %vm325_vm0, %v7278_v34  ;;  %v7575_v34 = vpack.c.bf16 %v19543_v46, %v19542_v42  ;;  %v7856_v42 = vld [vmem:[#allocation2 + $0x310] sm:$0xff] }
 0x3e7   : > { %v7876_v46 = vpack.c.bf16 %v7856_v42, %v17828_v45  ;;  %v15444_v45 = vld [vmem:[%s19158_s6 + $0x8] sm:$0xff]  }
 0x3e8   : > { %13981 = vmatprep.subr.bf16.mxu1 %v15444_v45 }
 0x3e9   : > { %13982 = vmatpush3.bf16.msra.mxu1 %v15444_v45 }
 0x3ed   : > { %13834 = vmatmul.mubr.msk.bf16.gmra.mrb[20].mxu0 %vm325_vm0, %v7279_v57  ;;  %v19544_v57 = vld [vmem:[#allocation33_spill] sm:$0xff] }
 0x3ee   : > { %13837 = vmatprep.mubr.msk.bf16.mxu0 %vm325_vm0, %v7280_v33  ;;  %v19545_v33 = vld [vmem:[#allocation30_spill] sm:$0xff] }
 0x3f5   : > { %13838 = vmatmul.mubr.msk.bf16.gmra.mrb[24].mxu0 %vm325_vm0, %v7281_v22  ;;  %v7576_v22 = vpack.c.bf16 %v19545_v33, %v19544_v57  ;;  %v19561_v57 = vld [vmem:[#allocation45_spill] sm:$0xff]  ;;  %v8137_v33 = vld [vmem:[#allocation2 + $0x1c1] sm:$0xff] }
 0x3f6   : > { %13841 = vmatprep.mubr.msk.bf16.mxu0 %vm325_vm0, %v7282_v55  ;;  %v17950_v55 = vld [vmem:[#allocation2 + $0x302] sm:$0xff] }
 0x3fd   : > { %13842 = vmatmul.mubr.msk.bf16.gmra.mrb[28].mxu0 %vm325_vm0, %v7283_v21  ;;  %v19546_v21 = vld [vmem:[#allocation31_spill] sm:$0xff] }
 0x3fe   : > { %13847 = vmatprep.mubr.msk.bf16.mxu0 %vm325_vm0, %v7566_v17  ;;  %v7577_v0 = vpack.c.bf16 %v17950_v55, %v19546_v21  ;;  %v7578_v17 = vpack.c.bf16 %v19547_v13, %v17685_v53  ;;  %v19562_v21 = vld [vmem:[#allocation46_spill] sm:$0xff]  ;;  %v19564_v13 = vld [vmem:[#allocation48_spill] sm:$0xff] }
 0x405   : > { %13848 = vmatmul.mubr.msk.bf16.vlgmr.msra.gmra.mrb[0].mxu0 %vm325_vm0, %v7567_v5  ;;  %v19549_v5 = vld [vmem:[#allocation58_spill] sm:$0xff] }
 0x406   : > { %13880 = vmatpush3.bf16.msra.mxu0 %v15441_v11  ;;  %13851 = vmatprep.mubr.msk.bf16.mxu0 %vm325_vm0, %v7568_v63  ;;  %v19539_v11 = vld [vmem:[#allocation24_spill] sm:$0xff]  ;;  %v7580_v4 = vpack.c.bf16 %v17725_v43, %v19549_v5  ;;  %v19551_v43 = vld [vmem:[#allocation35_spill] sm:$0xff]  ;;  %v8171_v5 = vpack.c.bf16 %v17879_v62, %v17871_v49  ;;  %v19565_v49 = vld [vmem:[#allocation49_spill] sm:$0xff] }
 0x407   : > { %13913 = vmatprep.subr.bf16.mxu0 %v15442_v39  ;;  %v7573_v35 = vpack.c.bf16 %v19540_v40, %v19539_v11  ;;  %v17964_v63 = vld [vmem:[#allocation2 + $0x3a2] sm:$0xff]  ;;  %v19566_v62 = vld [vmem:[#allocation50_spill] sm:$0xff] }
 0x408   : > { %v7847_v11 = vld [vmem:[#allocation2 + $0x260] sm:$0xff] }
 0x40d   : > { %13852 = vmatmul.mubr.msk.bf16.gmra.mrb[4].mxu0 %vm325_vm0, %v7569_v59  ;;  %v19550_v59 = vld [vmem:[#allocation64_spill] sm:$0xff] }
 0x40e   : > { %13855 = vmatprep.mubr.msk.bf16.mxu0 %vm325_vm0, %v7570_v44  ;;  %v7581_v53 = vpack.c.bf16 %v17964_v63, %v19550_v59  ;;  %v19552_v44 = vld [vmem:[#allocation36_spill] sm:$0xff]  ;;  %v8174_v59 = vpack.c.bf16 %v8154_v18, %v17895_v19  ;;  %v19570_v19 = vld [vmem:[#allocation19_spill] sm:$0xff] }
 0x415   : > { %13856 = vmatmul.mubr.msk.bf16.gmra.mrb[8].mxu0 %vm325_vm0, %v7571_v48  ;;  %v7868_v48 = vpack.c.bf16 %v7840_v30, %v7839_v47  ;;  %v19573_v47 = vld [vmem:[#allocation29_spill] sm:$0xff]  ;;  %v8443_v30 = vld [vmem:[#allocation2 + $0x262] sm:$0xff] }
 0x416   : > { %13859 = vmatprep.mubr.msk.bf16.mxu0 %vm325_vm0, %v7572_v1  ;;  %v19555_v1 = vld [vmem:[#allocation39_spill] sm:$0xff] }
 0x41d   : > { %13860 = vmatmul.mubr.msk.bf16.gmra.mrb[12].mxu0 %vm325_vm0, %v7573_v35  ;;  %v7873_v35 = vpack.c.bf16 %v17808_v7, %v17794_v12  ;;  %v19556_v12 = vld [vmem:[#allocation40_spill] sm:$0xff]  ;;  %v19557_v7 = vld [vmem:[#allocation41_spill] sm:$0xff] }
 0x41e   : > { %13863 = vmatprep.mubr.msk.bf16.mxu0 %vm325_vm0, %v7574_v38  ;;  %v7875_v38 = vpack.c.bf16 %v17826_v31, %v17816_v56  ;;  %v19559_v56 = vld [vmem:[#allocation43_spill] sm:$0xff]  ;;  %v19560_v31 = vld [vmem:[#allocation44_spill] sm:$0xff] }
 0x425   : > { %13864 = vmatmul.mubr.msk.bf16.gmra.mrb[16].mxu0 %vm325_vm0, %v7575_v34  ;;  %v19558_v34 = vld [vmem:[#allocation42_spill] sm:$0xff] }
 0x426   : > { %13867 = vmatprep.mubr.msk.bf16.mxu0 %vm325_vm0, %v7576_v22  ;;  %v8166_v22 = vpack.c.bf16 %v8138_v6, %v8137_v33  ;;  %v19577_v33 = vld [vmem:[#allocation25_spill] sm:$0xff] }
 0x42d   : > { %13868 = vmatmul.mubr.msk.bf16.gmra.mrb[20].mxu0 %vm325_vm0, %v7577_v0  ;;  %v19563_v0 = vld [vmem:[#allocation47_spill] sm:$0xff] }
 0x42e   : > { %13871 = vmatprep.mubr.msk.bf16.mxu0 %vm325_vm0, %v7578_v17  ;;  %v8145_v17 = vld [vmem:[#allocation2 + $0x261] sm:$0xff] }
 0x435   : > { %13872 = vmatmul.mubr.msk.bf16.gmra.mrb[24].mxu0 %vm325_vm0, %v7579_v3  ;;  %v8170_v3 = vpack.c.bf16 %v8146_v60, %v8145_v17 }
 0x436   : > { %13875 = vmatprep.mubr.msk.bf16.mxu0 %vm325_vm0, %v7580_v4  ;;  %v8172_v4 = vpack.c.bf16 %v17883_v14, %v17881_v36  ;;  %v8162_v36 = vld [vmem:[#allocation2 + $0x3b1] sm:$0xff] }
 0x437   : > { %v8178_v14 = vpack.c.bf16 %v8162_v36, %v17909_v37  ;;  %v19572_v37 = vld [vmem:[#allocation21_spill] sm:$0xff] }
 0x43d   : > { %13876 = vmatmul.mubr.msk.bf16.gmra.mrb[28].mxu0 %vm325_vm0, %v7581_v53  ;;  %v19567_v53 = vld [vmem:[#allocation9_spill] sm:$0xff] }
 0x43e   : > { %13881 = vmatprep.mubr.msk.bf16.mxu0 %vm325_vm0, %v7865_v28  ;;  %v8435_v28 = vld [vmem:[#allocation2 + $0x1c2] sm:$0xff] }
 0x445   : > { %13882 = vmatmul.mubr.msk.bf16.vlgmr.msra.gmra.mrb[0].mxu0 %vm325_vm0, %v19551_v43 }
 0x446   : > { %13914 = vmatpush3.bf16.msra.mxu0 %v15442_v39  ;;  %13885 = vmatprep.mubr.msk.bf16.mxu0 %vm325_vm0, %v19552_v44  ;;  %v7848_v39 = vld [vmem:[#allocation2 + $0x270] sm:$0xff]  ;;  %v19571_v44 = vld [vmem:[#allocation16_spill] sm:$0xff] }
 0x447   : > { %13947 = vmatprep.subr.bf16.mxu0 %v15443_v15  ;;  %v7872_v40 = vpack.c.bf16 %v7848_v39, %v7847_v11  ;;  %v8447_v39 = vld [vmem:[#allocation2 + $0x2c2] sm:$0xff] }
 0x44d   : > { %13886 = vmatmul.mubr.msk.bf16.gmra.mrb[4].mxu0 %vm325_vm0, %v7868_v48  ;;  %v8444_v48 = vld [vmem:[#allocation2 + $0x272] sm:$0xff] }
 0x44e   : > { %13889 = vmatprep.mubr.msk.bf16.mxu0 %vm325_vm0, %v19553_v25  ;;  %v8445_v25 = vld [vmem:[#allocation2 + $0x2a2] sm:$0xff] }
 0x455   : > { %13890 = vmatmul.mubr.msk.bf16.gmra.mrb[8].mxu0 %vm325_vm0, %v19554_v23  ;;  %v8446_v23 = vld [vmem:[#allocation2 + $0x2b2] sm:$0xff] }
 0x456   : > { %13893 = vmatprep.mubr.msk.bf16.mxu0 %vm325_vm0, %v19555_v1  ;;  %v8468_v1 = vpack.c.bf16 %v8444_v48, %v8443_v30  ;;  %v8469_v11 = vpack.c.bf16 %v8446_v23, %v8445_v25  ;;  %v19582_v30 = vld [vmem:[#allocation57_spill] sm:$0xff] }
 0x45d   : > { %13894 = vmatmul.mubr.msk.bf16.gmra.mrb[12].mxu0 %vm325_vm0, %v7872_v40  ;;  %v8448_v40 = vld [vmem:[#allocation2 + $0x2d2] sm:$0xff] }
 0x45e   : > { %13897 = vmatprep.mubr.msk.bf16.mxu0 %vm325_vm0, %v7873_v35  ;;  %v8449_v35 = vld [vmem:[#allocation2 + $0x2e2] sm:$0xff] }
 0x465   : > { %13898 = vmatmul.mubr.msk.bf16.gmra.mrb[16].mxu0 %vm325_vm0, %v7874_v24  ;;  %v8450_v24 = vld [vmem:[#allocation2 + $0x2f2] sm:$0xff] }
 0x466   : > { %13901 = vmatprep.mubr.msk.bf16.mxu0 %vm325_vm0, %v7875_v38  ;;  %v8470_v38 = vpack.c.bf16 %v8448_v40, %v8447_v39  ;;  %v8471_v42 = vpack.c.bf16 %v8450_v24, %v8449_v35 }
 0x46d   : > { %13902 = vmatmul.mubr.msk.bf16.gmra.mrb[20].mxu0 %vm325_vm0, %v7876_v46  ;;  %v8452_v46 = vld [vmem:[#allocation2 + $0x312] sm:$0xff] }
 0x46e   : > { %13905 = vmatprep.mubr.msk.bf16.mxu0 %vm325_vm0, %v19556_v12  ;;  %v8472_v12 = vpack.c.bf16 %v8452_v46, %v17950_v55  ;;  %v18070_v55 = vld [vmem:[%s19158_s6] sm:$0xff]  }
 0x46f   : > { %14015 = vmatprep.subr.bf16.mxu1 %v18070_v55  ;;  %v8919_v46 = vld [vmem:[#allocation3 + $0x1] sm:$0xff] }
 0x475   : > { %13906 = vmatmul.mubr.msk.bf16.gmra.mrb[24].mxu0 %vm325_vm0, %v19557_v7  ;;  %v19574_v7 = vld [vmem:[#allocation60_spill] sm:$0xff] }
 0x476   : > { %13909 = vmatprep.mubr.msk.bf16.mxu0 %vm325_vm0, %v19558_v34  ;;  %v19575_v34 = vld [vmem:[#allocation61_spill] sm:$0xff] }
 0x47d   : > { %13910 = vmatmul.mubr.msk.bf16.gmra.mrb[28].mxu0 %vm325_vm0, %v7880_v16  ;;  %v8476_v16 = vpack.c.bf16 %v8460_v9, %v17964_v63  ;;  %v18082_v63 = vld [vmem:[%s19157_s5] ss:$0 sm:$0xff] }
 0x47e   : > { %13915 = vmatprep.mubr.msk.bf16.mxu0 %vm325_vm0, %v19559_v56  ;;  %v18076_v56 = vld [vmem:[%s19156_s4] ss:$0 sm:$0xff] }
 0x485   : > { %13916 = vmatmul.mubr.msk.bf16.vlgmr.msra.gmra.mrb[0].mxu0 %vm325_vm0, %v19560_v31  ;;  %v19576_v31 = vld [vmem:[#allocation18_spill] sm:$0xff] }
 0x486   : > { %13948 = vmatpush3.bf16.msra.mxu0 %v15443_v15  ;;  %13919 = vmatprep.mubr.msk.bf16.mxu0 %vm325_vm0, %v19561_v57  ;;  %v8436_v15 = vld [vmem:[#allocation2 + $0x1d2] sm:$0xff] }
 0x487   : > { %v8464_v43 = vpack.c.bf16 %v8436_v15, %v8435_v28 }
 0x48d   : > { %13920 = vmatmul.mubr.msk.bf16.gmra.mrb[4].mxu0 %vm325_vm0, %v8166_v22 }
 0x48e   : > { %13923 = vmatprep.mubr.msk.bf16.mxu0 %vm325_vm0, %v19562_v21 }
 0x495   : > { %13924 = vmatmul.mubr.msk.bf16.gmra.mrb[8].mxu0 %vm325_vm0, %v19563_v0  ;;  %v19578_v0 = vld [vmem:[#allocation51_spill] sm:$0xff] }
 0x496   : > { %13927 = vmatprep.mubr.msk.bf16.mxu0 %vm325_vm0, %v19564_v13 }
 0x49d   : > { %13928 = vmatmul.mubr.msk.bf16.gmra.mrb[12].mxu0 %vm325_vm0, %v8170_v3  ;;  %v19579_v3 = vld [vmem:[#allocation52_spill] sm:$0xff] }
 0x49e   : > { %13931 = vmatprep.mubr.msk.bf16.mxu0 %vm325_vm0, %v8171_v5 }
 0x4a5   : > { %13932 = vmatmul.mubr.msk.bf16.gmra.mrb[16].mxu0 %vm325_vm0, %v8172_v4 }
 0x4a6   : > { %13935 = vmatprep.mubr.msk.bf16.mxu0 %vm325_vm0, %v8173_v58 }
 0x4ad   : > { %13936 = vmatmul.mubr.msk.bf16.gmra.mrb[20].mxu0 %vm325_vm0, %v8174_v59 }
 0x4ae   : > { %13939 = vmatprep.mubr.msk.bf16.mxu0 %vm325_vm0, %v19565_v49 }
 0x4b5   : > { %13940 = vmatmul.mubr.msk.bf16.gmra.mrb[24].mxu0 %vm325_vm0, %v19566_v62 }
 0x4b6   : > { %13943 = vmatprep.mubr.msk.bf16.mxu0 %vm325_vm0, %v19567_v53 }
 0x4bd   : > { %13944 = vmatmul.mubr.msk.bf16.gmra.mrb[28].mxu0 %vm325_vm0, %v8178_v14 }
 0x4be   : > { %13949 = vmatprep.mubr.msk.bf16.mxu0 %vm325_vm0, %v19568_v32 }
 0x4c5   : > { %13950 = vmatmul.mubr.msk.bf16.vlgmr.msra.gmra.mrb[0].mxu0 %vm325_vm0, %v19569_v51  ;;  %v19580_v51 = vld [vmem:[#allocation53_spill] sm:$0xff] }
 0x4c6   : > { %13953 = vmatprep.mubr.msk.bf16.mxu0 %vm325_vm0, %v19570_v19 }
 0x4cd   : > { %13954 = vmatmul.mubr.msk.bf16.gmra.mrb[4].mxu0 %vm325_vm0, %v8464_v43  ;;  %v19581_v43 = vld [vmem:[#allocation54_spill] sm:$0xff] }
 0x4ce   : > { %13957 = vmatprep.mubr.msk.bf16.mxu0 %vm325_vm0, %v19571_v44 }
 0x4d5   : > { %13958 = vmatmul.mubr.msk.bf16.gmra.mrb[8].mxu0 %vm325_vm0, %v19572_v37 }
 0x4d6   : > { %13961 = vmatprep.mubr.msk.bf16.mxu0 %vm325_vm0, %v19573_v47 }
 0x4dd   : > { %13962 = vmatmul.mubr.msk.bf16.gmra.mrb[12].mxu0 %vm325_vm0, %v8468_v1  ;;  %v19583_v1 = vld [vmem:[#allocation59_spill] sm:$0xff] }
 0x4de   : > { %13965 = vmatprep.mubr.msk.bf16.mxu0 %vm325_vm0, %v8469_v11 }
 0x4e5   : > { %13966 = vmatmul.mubr.msk.bf16.gmra.mrb[16].mxu0 %vm325_vm0, %v8470_v38 }
 0x4e6   : > { %13969 = vmatprep.mubr.msk.bf16.mxu0 %vm325_vm0, %v8471_v42 }
 0x4ed   : > { %13970 = vmatmul.mubr.msk.bf16.gmra.mrb[20].mxu0 %vm325_vm0, %v8472_v12 }
 0x4ee   : > { %13973 = vmatprep.mubr.msk.bf16.mxu0 %vm325_vm0, %v19574_v7 }
 0x4f5   : > { %13974 = vmatmul.mubr.msk.bf16.gmra.mrb[24].mxu0 %vm325_vm0, %v19575_v34 }
 0x4f6   : > { %13977 = vmatprep.mubr.msk.bf16.mxu0 %vm325_vm0, %v17735_v41 }
 0x4fd   : > { %13978 = vmatmul.mubr.msk.bf16.gmra.mrb[28].mxu0 %vm325_vm0, %v8476_v16  ;;  %v19584_v16 = vld [vmem:[#allocation62_spill] sm:$0xff] }
 0x598   : > { %v13951_v45 = vpop.f32.mrb[0].mxu0 }
 0x599   : > { %v14287_v41 = vadd.f32 %v13951_v45, %v19576_v31  ;;  %v8568_v57 = vpop.f32.mrb[1].mxu0 }
 0x59a   : > { %v14288_v6 = vadd.f32 %v8568_v57, %v19577_v33  ;;  %v13952_v22 = vpop.f32.mrb[2].mxu0  ;;  %v19585_v33 = vld [vmem:[#allocation63_spill] sm:$0xff] }
 0x59b   : > { %v8736_v21 = vmul.f32 %v14287_v41, %v18076_v56  ;;  %v14289_v13 = vadd.f32 %v13952_v22, %v19578_v0  ;;  %v8571_v17 = vpop.f32.mrb[3].mxu0 }
 0x59c   : > { %v8734_v60 = vmul.f32 %v14288_v6, %v18076_v56  ;;  %v14290_v5 = vadd.f32 %v8571_v17, %v19579_v3 }
 0x59d   : > { %v8775_v4 = vadd.f32 %v18082_v63, %v8736_v21  ;;  %v8737_v58 = vmul.f32 %v14289_v13, %v18076_v56  ;;  %v18123_v13 = vld [vmem:[%s19158_s6 + $0x10] sm:$0xff]  }
 0x59e   : > { %v8773_v18 = vadd.f32 %v18082_v63, %v8734_v60  ;;  %v8735_v59 = vmul.f32 %v14290_v5, %v18076_v56  ;;  %v19586_v5 = vld [vmem:[#allocation65_spill] sm:$0xff] }
 0x59f   : > { %v8807_v49 = vmax.f32 %v8775_v4, 0.0  ;;  %v8776_v62 = vadd.f32 %v18082_v63, %v8737_v58 }
 0x5a0   : > { %v8805_v53 = vmax.f32 %v8773_v18, 0.0  ;;  %v8774_v36 = vadd.f32 %v18082_v63, %v8735_v59  ;;  %v13955_v14 = vpop.f32.mrb[4].mxu0 }
 0x5a1   : > { %8839 = vst.msk [vmem:[#allocation3 + $0x31] sm:$0xff] %vm325_vm0, %v8807_v49  ;;  %v8808_v32 = vmax.f32 %v8776_v62, 0.0  ;;  %v14291_v19 = vadd.f32 %v13955_v14, %v19580_v51  ;;  %v8584_v28 = vpop.f32.mrb[5].mxu0 }
 0x5a2   : > { %8837 = vst.msk [vmem:[#allocation3 + $0x11] sm:$0xff] %vm325_vm0, %v8805_v53  ;;  %v8806_v15 = vmax.f32 %v8774_v36, 0.0  ;;  %v14292_v44 = vadd.f32 %v8584_v28, %v19581_v43  ;;  %v13956_v37 = vpop.f32.mrb[6].mxu0  ;;  %v19587_v36 = vld [vmem:[#allocation66_spill] sm:$0xff] }
 0x5a3   : > { %8840 = vst.msk [vmem:[#allocation3 + $0x41] sm:$0xff] %vm325_vm0, %v8808_v32  ;;  %v8740_v47 = vmul.f32 %v14291_v19, %v18076_v56  ;;  %v14293_v48 = vadd.f32 %v13956_v37, %v19582_v30  ;;  %v8587_v25 = vpop.f32.mrb[7].mxu0 }
 0x5a4   : > { %8838 = vst.msk [vmem:[#allocation3 + $0x21] sm:$0xff] %vm325_vm0, %v8806_v15  ;;  %v8738_v23 = vmul.f32 %v14292_v44, %v18076_v56  ;;  %v14294_v11 = vadd.f32 %v8587_v25, %v19583_v1  ;;  %v19609_v44 = vld [vmem:[#allocation72_spill] sm:$0xff] }
 0x5a5   : > { %v8779_v39 = vadd.f32 %v18082_v63, %v8740_v47  ;;  %v8741_v40 = vmul.f32 %v14293_v48, %v18076_v56 }
 0x5a6   : > { %v8777_v35 = vadd.f32 %v18082_v63, %v8738_v23  ;;  %v8739_v24 = vmul.f32 %v14294_v11, %v18076_v56 }
 0x5a7   : > { %v8811_v38 = vmax.f32 %v8779_v39, 0.0  ;;  %v8780_v42 = vadd.f32 %v18082_v63, %v8741_v40 }
 0x5a8   : > { %v8809_v12 = vmax.f32 %v8777_v35, 0.0  ;;  %v8778_v7 = vadd.f32 %v18082_v63, %v8739_v24  ;;  %v13959_v34 = vpop.f32.mrb[8].mxu0  ;;  %v18118_v0 = vld [vmem:[#allocation3 + $0x31] sm:$0xff] }
 0x5a9   : > { %8843 = vst.msk [vmem:[#allocation3 + $0x71] sm:$0xff] %vm325_vm0, %v8811_v38  ;;  %v8812_v9 = vmax.f32 %v8780_v42, 0.0  ;;  %v14295_v45 = vadd.f32 %v13959_v34, %v19584_v16  ;;  %v8600_v31 = vpop.f32.mrb[9].mxu0  ;;  %v18113_v41 = vld [vmem:[#allocation3 + $0x11] sm:$0xff]  ;;  %v19590_v34 = vld [vmem:[#allocation67_spill] sm:$0xff] }
 0x5aa   : > { %8841 = vst.msk [vmem:[#allocation3 + $0x51] sm:$0xff] %vm325_vm0, %v8809_v12  ;;  %v8810_v57 = vmax.f32 %v8778_v7, 0.0  ;;  %v14296_v6 = vadd.f32 %v8600_v31, %v19585_v33  ;;  %v13960_v22 = vpop.f32.mrb[10].mxu0  ;;  %v8951_v21 = vpack.c.bf16 %v18113_v41, %v8919_v46  ;;  %v18125_v17 = vld [vmem:[#allocation3 + $0x30] sm:$0xff]  ;;  %v18127_v60 = vld [vmem:[#allocation3 + $0x40] sm:$0xff] }
 0x5ab   : > { %8844 = vst.msk [vmem:[#allocation3 + $0x81] sm:$0xff] %vm325_vm0, %v8812_v9  ;;  %v8744_v3 = vmul.f32 %v14295_v45, %v18076_v56  ;;  %v14297_v4 = vadd.f32 %v13960_v22, %v19586_v5  ;;  %v8603_v58 = vpop.f32.mrb[11].mxu0  ;;  %v18132_v18 = vld [vmem:[#allocation3 + $0x21] sm:$0xff]  ;;  %v18146_v51 = vld [vmem:[#allocation3 + $0x10] sm:$0xff] }
 0x5ac   : > { %v18134_v59 = vld [vmem:[#allocation3 + $0x41] sm:$0xff]  ;;  %8842 = vst.msk [vmem:[#allocation3 + $0x61] sm:$0xff] %vm325_vm0, %v8810_v57  ;;  %v8742_v53 = vmul.f32 %v14296_v6, %v18076_v56  ;;  %v14298_v14 = vadd.f32 %v8603_v58, %v19587_v36  ;;  %13983 = vmatprep.mubr.msk.bf16.mxu1 %vm325_vm0, %v8951_v21  ;;  %v8952_v32 = vpack.c.bf16 %v18118_v0, %v18132_v18  ;;  %v18159_v30 = vld [vmem:[#allocation3 + $0x12] sm:$0xff] }
 0x5ad   : > { %v18136_v49 = vld [vmem:[#allocation3 + $0x20] sm:$0xff]  ;;  %v8783_v15 = vadd.f32 %v18082_v63, %v8744_v3  ;;  %v8745_v43 = vmul.f32 %v14297_v4, %v18076_v56  ;;  %v18161_v48 = vld [vmem:[#allocation3 + $0x32] sm:$0xff] }
 0x5ae   : > { %v18148_v19 = vld [vmem:[#allocation3 + $0x22] sm:$0xff]  ;;  %v8781_v37 = vadd.f32 %v18082_v63, %v8742_v53  ;;  %v8743_v47 = vmul.f32 %v14298_v14, %v18076_v56  ;;  %13984 = vmatmul.mubr.msk.bf16.vlgmr.msra.gmra.mrb[32].mxu1 %vm325_vm0, %v8952_v32  ;;  %19588 = vst [vmem:[#allocation10_spill] sm:$0xff] %v18161_v48 }
 0x5af   : > { %v18150_v28 = vld [vmem:[#allocation3 + $0x42] sm:$0xff]  ;;  %v8815_v1 = vmax.f32 %v8783_v15, 0.0  ;;  %v8784_v11 = vadd.f32 %v18082_v63, %v8745_v43  ;;  %14016 = vmatpush3.bf16.msra.mxu1 %v18070_v55 }
 0x5b0   : > { %v8813_v35 = vmax.f32 %v8781_v37, 0.0  ;;  %v8782_v24 = vadd.f32 %v18082_v63, %v8743_v47  ;;  %v13963_v38 = vpop.f32.mrb[12].mxu0  ;;  %14049 = vmatprep.subr.bf16.mxu1 %v18123_v13  ;;  %v18188_v6 = vld [vmem:[#allocation3 + $0x71] sm:$0xff]  ;;  %v8927_v47 = vld [vmem:[#allocation3 + $0xa1] sm:$0xff] }
 0x5b1   : > { %8847 = vst.msk [vmem:[#allocation3 + $0xd1] sm:$0xff] %vm325_vm0, %v8815_v1  ;;  %v8816_v42 = vmax.f32 %v8784_v11, 0.0  ;;  %v14299_v46 = vadd.f32 %v13963_v38, %v17739_v26  ;;  %v8616_v12 = vpop.f32.mrb[13].mxu0  ;;  %v18177_v7 = vld [vmem:[#allocation3 + $0x51] sm:$0xff]  ;;  %19591 = vst [vmem:[#allocation12_spill] sm:$0xff] %v18188_v6 }
 0x5b2   : > { %19589 = vst [vmem:[#allocation11_spill] sm:$0xff] %v18177_v7  ;;  %8845 = vst.msk [vmem:[#allocation3 + $0xb1] sm:$0xff] %vm325_vm0, %v8813_v35  ;;  %v8814_v55 = vmax.f32 %v8782_v24, 0.0  ;;  %v14300_v9 = vadd.f32 %v8616_v12, %v19590_v34  ;;  %v13964_v16 = vpop.f32.mrb[14].mxu0  ;;  %v8953_v45 = vpack.c.bf16 %v18177_v7, %v18134_v59  ;;  %v18198_v4 = vld [vmem:[#allocation3 + $0x50] sm:$0xff] }
 0x5b3   : > { %8848 = vst.msk [vmem:[#allocation3 + $0xe1] sm:$0xff] %vm325_vm0, %v8816_v42  ;;  %v8748_v31 = vmul.f32 %v14299_v46, %v18076_v56  ;;  %v14301_v57 = vadd.f32 %v13964_v16, %v17746_v10  ;;  %v8619_v33 = vpop.f32.mrb[15].mxu0  ;;  %v18186_v26 = vld [vmem:[#allocation3 + $0x61] sm:$0xff]  ;;  %v18209_v32 = vld [vmem:[#allocation3 + $0x52] sm:$0xff] }
 0x5b4   : > { %v18190_v22 = vld [vmem:[#allocation3 + $0x60] sm:$0xff]  ;;  %8846 = vst.msk [vmem:[#allocation3 + $0xc1] sm:$0xff] %vm325_vm0, %v8814_v55  ;;  %v8746_v21 = vmul.f32 %v14300_v9, %v18076_v56  ;;  %v14302_v3 = vadd.f32 %v8619_v33, %v17748_v8  ;;  %13987 = vmatprep.mubr.msk.bf16.mxu1 %vm325_vm0, %v8953_v45  ;;  %v8954_v5 = vpack.c.bf16 %v18188_v6, %v18186_v26  ;;  %v18522_v7 = vld [vmem:[#allocation3 + $0x70] sm:$0xff] }
 0x5b5   : > { %v18200_v10 = vld [vmem:[#allocation3 + $0x62] sm:$0xff]  ;;  %v8787_v58 = vadd.f32 %v18082_v63, %v8748_v31  ;;  %v8749_v53 = vmul.f32 %v14301_v57, %v18076_v56  ;;  %v18526_v6 = vpack.c.bf16 %v18522_v7, %v18190_v22 }
 0x5b6   : > { %v8785_v14 = vadd.f32 %v18082_v63, %v8746_v21  ;;  %v8747_v8 = vmul.f32 %v14302_v3, %v18076_v56  ;;  %13988 = vmatmul.mubr.msk.bf16.gmra.mrb[36].mxu1 %vm325_vm0, %v8954_v5 }
 0x5b7   : > { %v8819_v43 = vmax.f32 %v8787_v58, 0.0  ;;  %v8788_v37 = vadd.f32 %v18082_v63, %v8749_v53  ;;  %19630 = vst [vmem:[#allocation45_spill] sm:$0xff] %v18526_v6 }
 0x5b8   : > { %v8817_v11 = vmax.f32 %v8785_v14, 0.0  ;;  %v8786_v35 = vadd.f32 %v18082_v63, %v8747_v8  ;;  %v13967_v24 = vpop.f32.mrb[16].mxu0  ;;  %v18224_v45 = vld [vmem:[#allocation3 + $0xd1] sm:$0xff]  ;;  %v19596_v14 = vld [vmem:[#allocation68_spill] sm:$0xff] }
 0x5b9   : > { %8851 = vst.msk [vmem:[#allocation3 + $0x111] sm:$0xff] %vm325_vm0, %v8819_v43  ;;  %v8820_v38 = vmax.f32 %v8788_v37, 0.0  ;;  %v14303_v42 = vadd.f32 %v13967_v24, %v17757_v50  ;;  %v8632_v46 = vpop.f32.mrb[17].mxu0  ;;  %v18219_v12 = vld [vmem:[#allocation3 + $0xb1] sm:$0xff]  ;;  %19593 = vst [vmem:[#allocation14_spill] sm:$0xff] %v18224_v45  ;;  %v19606_v24 = vld [vmem:[#allocation71_spill] sm:$0xff] }
 0x5ba   : > { %19592 = vst [vmem:[#allocation13_spill] sm:$0xff] %v18219_v12  ;;  %8849 = vst.msk [vmem:[#allocation3 + $0xf1] sm:$0xff] %vm325_vm0, %v8817_v11  ;;  %v8818_v55 = vmax.f32 %v8786_v35, 0.0  ;;  %v14304_v34 = vadd.f32 %v8632_v46, %v17760_v61  ;;  %v13968_v9 = vpop.f32.mrb[18].mxu0  ;;  %v8955_v16 = vpack.c.bf16 %v18219_v12, %v8927_v47  ;;  %v18226_v31 = vld [vmem:[#allocation3 + $0xd0] sm:$0xff]  ;;  %v18228_v57 = vld [vmem:[#allocation3 + $0xe0] sm:$0xff] }
 0x5bb   : > { %8852 = vst.msk [vmem:[#allocation3 + $0x121] sm:$0xff] %vm325_vm0, %v8820_v38  ;;  %v8752_v50 = vmul.f32 %v14303_v42, %v18076_v56  ;;  %v14305_v33 = vadd.f32 %v13968_v9, %v17764_v27  ;;  %v8635_v21 = vpop.f32.mrb[19].mxu0  ;;  %v18233_v3 = vld [vmem:[#allocation3 + $0xc1] sm:$0xff]  ;;  %v18247_v43 = vld [vmem:[#allocation3 + $0xb0] sm:$0xff] }
 0x5bc   : > { %19594 = vst [vmem:[#allocation32_spill] sm:$0xff] %v18233_v3  ;;  %v18235_v5 = vld [vmem:[#allocation3 + $0xe1] sm:$0xff]  ;;  %8850 = vst.msk [vmem:[#allocation3 + $0x101] sm:$0xff] %vm325_vm0, %v8818_v55  ;;  %v8750_v53 = vmul.f32 %v14304_v34, %v18076_v56  ;;  %v14306_v8 = vadd.f32 %v8635_v21, %v19596_v14  ;;  %13991 = vmatprep.mubr.msk.bf16.mxu1 %vm325_vm0, %v8955_v16  ;;  %v8956_v27 = vpack.c.bf16 %v18224_v45, %v18233_v3  ;;  %v18260_v46 = vld [vmem:[#allocation3 + $0xb2] sm:$0xff] }
 0x5bd   : > { %19595 = vst [vmem:[#allocation17_spill] sm:$0xff] %v18235_v5  ;;  %v18237_v61 = vld [vmem:[#allocation3 + $0xc0] sm:$0xff]  ;;  %v8791_v11 = vadd.f32 %v18082_v63, %v8752_v50  ;;  %v8753_v35 = vmul.f32 %v14305_v33, %v18076_v56  ;;  %v18262_v55 = vld [vmem:[#allocation3 + $0xd2] sm:$0xff] }
 0x5be   : > { %v18249_v37 = vld [vmem:[#allocation3 + $0xc2] sm:$0xff]  ;;  %v8789_v38 = vadd.f32 %v18082_v63, %v8750_v53  ;;  %v8751_v42 = vmul.f32 %v14306_v8, %v18076_v56  ;;  %13992 = vmatmul.mubr.msk.bf16.gmra.mrb[40].mxu1 %vm325_vm0, %v8956_v27 }
 0x5bf   : > { %v18251_v47 = vld [vmem:[#allocation3 + $0xe2] sm:$0xff]  ;;  %v8823_v16 = vmax.f32 %v8791_v11, 0.0  ;;  %v8792_v50 = vadd.f32 %v18082_v63, %v8753_v35 }
 0x5c0   : > { %v8821_v53 = vmax.f32 %v8789_v38, 0.0  ;;  %v8790_v14 = vadd.f32 %v18082_v63, %v8751_v42  ;;  %v13971_v8 = vpop.f32.mrb[20].mxu0  ;;  %v8943_v45 = vld [vmem:[#allocation3 + $0x1e1] sm:$0xff] }
 0x5c1   : > { %8855 = vst.msk [vmem:[#allocation3 + $0x171] sm:$0xff] %vm325_vm0, %v8823_v16  ;;  %v8824_v27 = vmax.f32 %v8792_v50, 0.0  ;;  %v14307_v1 = vadd.f32 %v13971_v8, %v17772_v2  ;;  %v8648_v40 = vpop.f32.mrb[21].mxu0  ;;  %v18276_v39 = vld [vmem:[#allocation3 + $0xf1] sm:$0xff] }
 0x5c2   : > { %19597 = vst [vmem:[#allocation20_spill] sm:$0xff] %v18276_v39  ;;  %8853 = vst.msk [vmem:[#allocation3 + $0x151] sm:$0xff] %vm325_vm0, %v8821_v53  ;;  %v8822_v11 = vmax.f32 %v8790_v14, 0.0  ;;  %v14308_v35 = vadd.f32 %v8648_v40, %v17775_v20  ;;  %v13972_v33 = vpop.f32.mrb[22].mxu0  ;;  %v8957_v38 = vpack.c.bf16 %v18276_v39, %v18235_v5  ;;  %v18287_v8 = vld [vmem:[#allocation3 + $0x111] sm:$0xff] }
 0x5c3   : > { %8856 = vst.msk [vmem:[#allocation3 + $0x181] sm:$0xff] %vm325_vm0, %v8824_v27  ;;  %v8756_v42 = vmul.f32 %v14307_v1, %v18076_v56  ;;  %v14309_v16 = vadd.f32 %v13972_v33, %v17778_v54  ;;  %v8651_v50 = vpop.f32.mrb[23].mxu0  ;;  %v18285_v2 = vld [vmem:[#allocation3 + $0x101] sm:$0xff]  ;;  %19599 = vst [vmem:[#allocation15_spill] sm:$0xff] %v18287_v8  ;;  %v18297_v53 = vld [vmem:[#allocation3 + $0xf0] sm:$0xff] }
 0x5c4   : > { %19598 = vst [vmem:[#allocation22_spill] sm:$0xff] %v18285_v2  ;;  %v18289_v21 = vld [vmem:[#allocation3 + $0x100] sm:$0xff]  ;;  %8854 = vst.msk [vmem:[#allocation3 + $0x161] sm:$0xff] %vm325_vm0, %v8822_v11  ;;  %v8754_v20 = vmul.f32 %v14308_v35, %v18076_v56  ;;  %v14310_v40 = vadd.f32 %v8651_v50, %v17780_v29  ;;  %13995 = vmatprep.mubr.msk.bf16.mxu1 %vm325_vm0, %v8957_v38  ;;  %v8958_v1 = vpack.c.bf16 %v18287_v8, %v18285_v2  ;;  %v18308_v35 = vld [vmem:[#allocation3 + $0xf2] sm:$0xff] }
 0x5c5   : > { %v18299_v54 = vld [vmem:[#allocation3 + $0x102] sm:$0xff]  ;;  %v8795_v33 = vadd.f32 %v18082_v63, %v8756_v42  ;;  %v8757_v14 = vmul.f32 %v14309_v16, %v18076_v56 }
 0x5c6   : > { %v8793_v11 = vadd.f32 %v18082_v63, %v8754_v20  ;;  %v8755_v29 = vmul.f32 %v14310_v40, %v18076_v56  ;;  %13996 = vmatmul.mubr.msk.bf16.gmra.mrb[44].mxu1 %vm325_vm0, %v8958_v1  ;;  %v8935_v42 = vld [vmem:[#allocation3 + $0x141] sm:$0xff] }
 0x5c7   : > { %v8827_v50 = vmax.f32 %v8795_v33, 0.0  ;;  %v8796_v9 = vadd.f32 %v18082_v63, %v8757_v14  ;;  %v19601_v14 = vld [vmem:[#allocation69_spill] sm:$0xff] }
 0x5c8   : > { %v8825_v34 = vmax.f32 %v8793_v11, 0.0  ;;  %v8794_v15 = vadd.f32 %v18082_v63, %v8755_v29  ;;  %v13975_v20 = vpop.f32.mrb[24].mxu0  ;;  %v18323_v11 = vld [vmem:[#allocation3 + $0x171] sm:$0xff] }
 0x5c9   : > { %8859 = vst.msk [vmem:[#allocation3 + $0x1b1] sm:$0xff] %vm325_vm0, %v8827_v50  ;;  %v8828_v40 = vmax.f32 %v8796_v9, 0.0  ;;  %v14311_v1 = vadd.f32 %v13975_v20, %v17786_v52  ;;  %v8664_v23 = vpop.f32.mrb[25].mxu0  ;;  %v18318_v25 = vld [vmem:[#allocation3 + $0x151] sm:$0xff]  ;;  %19602 = vst [vmem:[#allocation24_spill] sm:$0xff] %v18323_v11 }
 0x5ca   : > { %19600 = vst [vmem:[#allocation23_spill] sm:$0xff] %v18318_v25  ;;  %8857 = vst.msk [vmem:[#allocation3 + $0x191] sm:$0xff] %vm325_vm0, %v8825_v34  ;;  %v8826_v33 = vmax.f32 %v8794_v15, 0.0  ;;  %v14312_v38 = vadd.f32 %v8664_v23, %v19601_v14  ;;  %v13976_v27 = vpop.f32.mrb[26].mxu0  ;;  %v8959_v16 = vpack.c.bf16 %v18318_v25, %v8935_v42  ;;  %v18325_v29 = vld [vmem:[#allocation3 + $0x170] sm:$0xff]  ;;  %v18327_v58 = vld [vmem:[#allocation3 + $0x180] sm:$0xff] }
 0x5cb   : > { %8860 = vst.msk [vmem:[#allocation3 + $0x1c1] sm:$0xff] %vm325_vm0, %v8828_v40  ;;  %v8760_v52 = vmul.f32 %v14311_v1, %v18076_v56  ;;  %v19603_v9 = vld [vmem:[#allocation70_spill] sm:$0xff]  ;;  %v8667_v20 = vpop.f32.mrb[27].mxu0  ;;  %v18332_v34 = vld [vmem:[#allocation3 + $0x161] sm:$0xff]  ;;  %v18348_v1 = vld [vmem:[#allocation3 + $0x150] sm:$0xff] }
 0x5cc   : > { %v14313_v50 = vadd.f32 %v13976_v27, %v19603_v9  ;;  %19604 = vst [vmem:[#allocation34_spill] sm:$0xff] %v18332_v34  ;;  %v18334_v15 = vld [vmem:[#allocation3 + $0x181] sm:$0xff]  ;;  %8858 = vst.msk [vmem:[#allocation3 + $0x1a1] sm:$0xff] %vm325_vm0, %v8826_v33  ;;  %v8758_v14 = vmul.f32 %v14312_v38, %v18076_v56  ;;  %v14314_v40 = vadd.f32 %v8667_v20, %v19606_v24  ;;  %13999 = vmatprep.mubr.msk.bf16.mxu1 %vm325_vm0, %v8959_v16  ;;  %v18362_v20 = vld [vmem:[#allocation3 + $0x152] sm:$0xff] }
 0x5cd   : > { %19605 = vst [vmem:[#allocation26_spill] sm:$0xff] %v18334_v15  ;;  %v18336_v23 = vld [vmem:[#allocation3 + $0x160] sm:$0xff]  ;;  %v18346_v27 = vpack.c.bf16 %v18323_v11, %v18332_v34  ;;  %v8799_v42 = vadd.f32 %v18082_v63, %v8760_v52  ;;  %19608 = vst [vmem:[#allocation28_spill] sm:$0xff] %v18362_v20  ;;  %v18364_v62 = vld [vmem:[#allocation3 + $0x172] sm:$0xff] }
 0x5ce   : > { %v18350_v9 = vld [vmem:[#allocation3 + $0x162] sm:$0xff]  ;;  %v8761_v33 = vmul.f32 %v14313_v50, %v18076_v56  ;;  %v8797_v24 = vadd.f32 %v18082_v63, %v8758_v14  ;;  %v8759_v16 = vmul.f32 %v14314_v40, %v18076_v56 }
 0x5cf   : > { %19607 = vst [vmem:[#allocation27_spill] sm:$0xff] %v18346_v27  ;;  %v18352_v36 = vld [vmem:[#allocation3 + $0x182] sm:$0xff]  ;;  %14000 = vmatmul.mubr.msk.bf16.gmra.mrb[48].mxu1 %vm325_vm0, %v18346_v27  ;;  %v8831_v50 = vmax.f32 %v8799_v42, 0.0 }
 0x5d0   : > { %v8800_v38 = vadd.f32 %v18082_v63, %v8761_v33  ;;  %v8829_v27 = vmax.f32 %v8797_v24, 0.0  ;;  %v8798_v8 = vadd.f32 %v18082_v63, %v8759_v16  ;;  %v13979_v39 = vpop.f32.mrb[28].mxu0  ;;  %v19611_v33 = vld [vmem:[#allocation73_spill] sm:$0xff] }
 0x5d1   : > { %8863 = vst.msk [vmem:[#allocation3 + $0x211] sm:$0xff] %vm325_vm0, %v8831_v50  ;;  %v14315_v25 = vadd.f32 %v13979_v39, %v19609_v44  ;;  %v8680_v34 = vpop.f32.mrb[29].mxu0  ;;  %v18378_v52 = vld [vmem:[#allocation3 + $0x191] sm:$0xff] }
 0x5d2   : > { %v8832_v2 = vmax.f32 %v8800_v38, 0.0  ;;  %19610 = vst [vmem:[#allocation33_spill] sm:$0xff] %v18378_v52  ;;  %8861 = vst.msk [vmem:[#allocation3 + $0x1f1] sm:$0xff] %vm325_vm0, %v8829_v27  ;;  %v8830_v42 = vmax.f32 %v8798_v8, 0.0  ;;  %v14316_v14 = vadd.f32 %v8680_v34, %v19611_v33  ;;  %v13980_v11 = vpop.f32.mrb[30].mxu0  ;;  %v18384_v24 = vpack.c.bf16 %v18378_v52, %v18334_v15  ;;  %v19613_v38 = vld [vmem:[#allocation74_spill] sm:$0xff] }
 0x5d3   : > { %v8764_v16 = vmul.f32 %v14315_v25, %v18076_v56  ;;  %v14317_v50 = vadd.f32 %v13980_v11, %v19613_v38  ;;  %v8683_v44 = vpop.f32.mrb[31].mxu0  ;;  %v18389_v39 = vld [vmem:[#allocation3 + $0x1a1] sm:$0xff]  ;;  %v18391_v40 = vld [vmem:[#allocation3 + $0x1b1] sm:$0xff] }
 0x5d4   : > { %19612 = vst [vmem:[#allocation30_spill] sm:$0xff] %v18384_v24  ;;  %8864 = vst.msk [vmem:[#allocation3 + $0x221] sm:$0xff] %vm325_vm0, %v8832_v2  ;;  %v18393_v27 = vld [vmem:[#allocation3 + $0x1a0] sm:$0xff]  ;;  %v8762_v8 = vmul.f32 %v14316_v14, %v18076_v56  ;;  %14003 = vmatprep.mubr.msk.bf16.mxu1 %vm325_vm0, %v18384_v24  ;;  %v18402_v25 = vpack.c.bf16 %v18391_v40, %v18389_v39  ;;  %v18404_v2 = vld [vmem:[#allocation3 + $0x190] sm:$0xff] }
 0x5d5   : > { %19614 = vst [vmem:[#allocation31_spill] sm:$0xff] %v18389_v39  ;;  %19615 = vst [vmem:[#allocation55_spill] sm:$0xff] %v18391_v40  ;;  %v19616_v34 = vld [vmem:[#allocation75_spill] sm:$0xff]  ;;  %v8803_v38 = vadd.f32 %v18082_v63, %v8764_v16  ;;  %v8765_v15 = vmul.f32 %v14317_v50, %v18076_v56 }
 0x5d6   : > { %8862 = vst.msk [vmem:[#allocation3 + $0x201] sm:$0xff] %vm325_vm0, %v8830_v42  ;;  %v14318_v33 = vadd.f32 %v8683_v44, %v19616_v34  ;;  %19617 = vst [vmem:[#allocation56_spill] sm:$0xff] %v18402_v25  ;;  %v18406_v11 = vld [vmem:[#allocation3 + $0x1a2] sm:$0xff]  ;;  %v8801_v42 = vadd.f32 %v18082_v63, %v8762_v8  ;;  %v18416_v34 = vld [vmem:[#allocation3 + $0x192] sm:$0xff] }
 0x5d7   : > { %14004 = vmatmul.mubr.msk.bf16.gmra.mrb[52].mxu1 %vm325_vm0, %v18402_v25  ;;  %v8835_v40 = vmax.f32 %v8803_v38, 0.0  ;;  %v8804_v16 = vadd.f32 %v18082_v63, %v8765_v15 }
 0x5d8   : > { %v8763_v44 = vmul.f32 %v14318_v33, %v18076_v56  ;;  %v8833_v14 = vmax.f32 %v8801_v42, 0.0  ;;  %v18424_v5 = vld [vmem:[#allocation3 + $0x211] sm:$0xff] }
 0x5d9   : > { %19618 = vst [vmem:[#allocation58_spill] sm:$0xff] %v18424_v5  ;;  %v18426_v56 = vld [vmem:[#allocation3 + $0x210] sm:$0xff]  ;;  %8867 = vst.msk [vmem:[#allocation3 + $0x251] sm:$0xff] %vm325_vm0, %v8835_v40  ;;  %v8836_v33 = vmax.f32 %v8804_v16, 0.0 }
 0x5da   : > { %v8802_v8 = vadd.f32 %v18082_v63, %v8763_v44  ;;  %v18429_v25 = vld [vmem:[#allocation3 + $0x1f1] sm:$0xff]  ;;  %8865 = vst.msk [vmem:[#allocation3 + $0x231] sm:$0xff] %vm325_vm0, %v8833_v14 }
 0x5db   : > { %19619 = vst [vmem:[#allocation64_spill] sm:$0xff] %v18429_v25  ;;  %v18431_v24 = vld [vmem:[#allocation3 + $0x1f0] sm:$0xff]  ;;  %v8963_v42 = vpack.c.bf16 %v18429_v25, %v8943_v45  ;;  %v18437_v50 = vld [vmem:[#allocation3 + $0x221] sm:$0xff]  ;;  %8868 = vst.msk [vmem:[#allocation3 + $0x261] sm:$0xff] %vm325_vm0, %v8836_v33 }
 0x5dc   : > { %v18433_v38 = vld [vmem:[#allocation3 + $0x212] sm:$0xff]  ;;  %v8834_v15 = vmax.f32 %v8802_v8, 0.0  ;;  %19620 = vst [vmem:[#allocation35_spill] sm:$0xff] %v18437_v50  ;;  %v18439_v63 = vld [vmem:[#allocation3 + $0x220] sm:$0xff] }
 0x5dd   : > { %v18441_v44 = vld [vmem:[#allocation3 + $0x222] sm:$0xff]  ;;  %14007 = vmatprep.mubr.msk.bf16.mxu1 %vm325_vm0, %v8963_v42  ;;  %v18462_v39 = vld [vmem:[#allocation3 + $0x1f2] sm:$0xff] }
 0x5de   : > { %v18444_v40 = vld [vmem:[#allocation3 + $0x201] sm:$0xff]  ;;  %8866 = vst.msk [vmem:[#allocation3 + $0x241] sm:$0xff] %vm325_vm0, %v8834_v15 }
 0x5df   : > { %19621 = vst [vmem:[#allocation36_spill] sm:$0xff] %v18444_v40  ;;  %v18446_v16 = vld [vmem:[#allocation3 + $0x200] sm:$0xff]  ;;  %v18460_v33 = vpack.c.bf16 %v18424_v5, %v18444_v40 }
 0x5e0   : > { %v18448_v52 = vld [vmem:[#allocation3 + $0x202] sm:$0xff]  ;;  %v18478_v8 = vld [vmem:[#allocation3 + $0x251] sm:$0xff] }
 0x5e1   : > { %19622 = vst [vmem:[#allocation37_spill] sm:$0xff] %v18460_v33  ;;  %14008 = vmatmul.mubr.msk.bf16.gmra.mrb[56].mxu1 %vm325_vm0, %v18460_v33  ;;  %v18472_v15 = vld [vmem:[#allocation3 + $0x231] sm:$0xff]  ;;  %19625 = vst [vmem:[#allocation40_spill] sm:$0xff] %v18478_v8  ;;  %v8869_v5 = vld [vmem:[#allocation3] sm:$0xff] }
 0x5e2   : > { %19623 = vst [vmem:[#allocation38_spill] sm:$0xff] %v18472_v15  ;;  %v18476_v42 = vpack.c.bf16 %v18472_v15, %v18437_v50  ;;  %v18480_v3 = vld [vmem:[#allocation3 + $0x230] sm:$0xff]  ;;  %v8901_v40 = vpack.c.bf16 %v18146_v51, %v8869_v5  ;;  %v15447_v50 = vld [vmem:[%s19158_s6 + $0x18] sm:$0xff]   ;;  %v18515_v5 = vpack.c.bf16 %v18198_v4, %v18127_v60 }
 0x5e3   : > { %v18494_v33 = vld [vmem:[#allocation3 + $0x232] sm:$0xff] }
 0x5e4   : > { %19624 = vst [vmem:[#allocation39_spill] sm:$0xff] %v18476_v42  ;;  %14011 = vmatprep.mubr.msk.bf16.mxu1 %vm325_vm0, %v18476_v42  ;;  %v18508_v42 = vpack.c.bf16 %v18125_v17, %v18136_v49  ;;  %19629 = vst [vmem:[#allocation44_spill] sm:$0xff] %v18515_v5  ;;  %v18588_v15 = vld [vmem:[#allocation3 + $0x250] sm:$0xff] }
 0x5e5   : > { %v18482_v12 = vld [vmem:[#allocation3 + $0x241] sm:$0xff] }
 0x5e6   : > { %19626 = vst [vmem:[#allocation41_spill] sm:$0xff] %v18482_v12  ;;  %v18484_v14 = vld [vmem:[#allocation3 + $0x240] sm:$0xff]  ;;  %v18492_v45 = vpack.c.bf16 %v18478_v8, %v18482_v12  ;;  %19628 = vst [vmem:[#allocation43_spill] sm:$0xff] %v18508_v42  ;;  %v18566_v8 = vld [vmem:[#allocation3 + $0x1b0] sm:$0xff]  ;;  %v18607_v12 = vpack.c.bf16 %v18209_v32, %v18150_v28 }
 0x5e7   : > { %v18486_v25 = vld [vmem:[#allocation3 + $0x242] sm:$0xff] }
 0x5e8   : > { %19627 = vst [vmem:[#allocation42_spill] sm:$0xff] %v18492_v45  ;;  %19641 = vst [vmem:[#allocation21_spill] sm:$0xff] %v18607_v12 }
 0x5e9   : > { %14012 = vmatmul.mubr.msk.bf16.gmra.mrb[60].mxu1 %vm325_vm0, %v18492_v45 }
 0x5ea   : > { %14017 = vmatprep.mubr.msk.bf16.mxu1 %vm325_vm0, %v8901_v40  ;;  %v8877_v40 = vld [vmem:[#allocation3 + $0xa0] sm:$0xff] }
 0x5eb   : > { %v8905_v45 = vpack.c.bf16 %v18247_v43, %v8877_v40  ;;  %v8885_v40 = vld [vmem:[#allocation3 + $0x140] sm:$0xff] }
 0x5f1   : > { %14018 = vmatmul.mubr.msk.bf16.vlgmr.msra.gmra.mrb[32].mxu1 %vm325_vm0, %v18508_v42  ;;  %v18544_v42 = vld [vmem:[#allocation3 + $0x110] sm:$0xff] }
 0x5f2   : > { %14050 = vmatpush3.bf16.msra.mxu1 %v18123_v13  ;;  %14021 = vmatprep.mubr.msk.bf16.mxu1 %vm325_vm0, %v18515_v5  ;;  %v18534_v13 = vpack.c.bf16 %v18226_v31, %v18237_v61  ;;  %v18538_v5 = vpack.c.bf16 %v18297_v53, %v18228_v57 }
 0x5f3   : > { %14083 = vmatprep.subr.bf16.mxu1 %v15447_v50 }
 0x5f4   : > { %19631 = vst [vmem:[#allocation46_spill] sm:$0xff] %v18534_v13  ;;  %19632 = vst [vmem:[#allocation47_spill] sm:$0xff] %v18538_v5 }
 0x5f9   : > { %14022 = vmatmul.mubr.msk.bf16.gmra.mrb[36].mxu1 %vm325_vm0, %v18526_v6  ;;  %v8909_v6 = vpack.c.bf16 %v18348_v1, %v8885_v40  ;;  %v8893_v40 = vld [vmem:[#allocation3 + $0x1e0] sm:$0xff] }
 0x5fa   : > { %14025 = vmatprep.mubr.msk.bf16.mxu1 %vm325_vm0, %v8905_v45  ;;  %v18548_v45 = vpack.c.bf16 %v18544_v42, %v18289_v21 }
 0x5fc   : > { %19633 = vst [vmem:[#allocation48_spill] sm:$0xff] %v18548_v45 }
 0x601   : > { %14026 = vmatmul.mubr.msk.bf16.gmra.mrb[40].mxu1 %vm325_vm0, %v18534_v13  ;;  %v18556_v13 = vpack.c.bf16 %v18325_v29, %v18336_v23 }
 0x602   : > { %14029 = vmatprep.mubr.msk.bf16.mxu1 %vm325_vm0, %v18538_v5  ;;  %v18560_v5 = vpack.c.bf16 %v18404_v2, %v18327_v58 }
 0x603   : > { %19634 = vst [vmem:[#allocation49_spill] sm:$0xff] %v18556_v13 }
 0x604   : > { %19635 = vst [vmem:[#allocation50_spill] sm:$0xff] %v18560_v5 }
 0x609   : > { %14030 = vmatmul.mubr.msk.bf16.gmra.mrb[44].mxu1 %vm325_vm0, %v18548_v45  ;;  %v8913_v45 = vpack.c.bf16 %v18431_v24, %v8893_v40  ;;  %v9400_v40 = vld [vmem:[#allocation3 + $0x2] sm:$0xff] }
 0x60a   : > { %14033 = vmatprep.mubr.msk.bf16.mxu1 %vm325_vm0, %v8909_v6  ;;  %v18570_v6 = vpack.c.bf16 %v18566_v8, %v18393_v27 }
 0x60c   : > { %19636 = vst [vmem:[#allocation9_spill] sm:$0xff] %v18570_v6 }
 0x611   : > { %14034 = vmatmul.mubr.msk.bf16.gmra.mrb[48].mxu1 %vm325_vm0, %v18556_v13  ;;  %v18578_v13 = vpack.c.bf16 %v18426_v56, %v18446_v16 }
 0x612   : > { %14037 = vmatprep.mubr.msk.bf16.mxu1 %vm325_vm0, %v18560_v5  ;;  %v18582_v5 = vpack.c.bf16 %v18480_v3, %v18439_v63 }
 0x613   : > { %19637 = vst [vmem:[#allocation7_spill] sm:$0xff] %v18578_v13 }
 0x614   : > { %19638 = vst [vmem:[#allocation8_spill] sm:$0xff] %v18582_v5 }
 0x619   : > { %14038 = vmatmul.mubr.msk.bf16.gmra.mrb[52].mxu1 %vm325_vm0, %v18570_v6  ;;  %v9432_v6 = vpack.c.bf16 %v18159_v30, %v9400_v40  ;;  %v18613_v40 = vld [vmem:[#allocation3 + $0x72] sm:$0xff] }
 0x61a   : > { %14041 = vmatprep.mubr.msk.bf16.mxu1 %vm325_vm0, %v8913_v45  ;;  %v18592_v45 = vpack.c.bf16 %v18588_v15, %v18484_v14 }
 0x61c   : > { %19639 = vst [vmem:[#allocation19_spill] sm:$0xff] %v18592_v45 }
 0x621   : > { %14042 = vmatmul.mubr.msk.bf16.gmra.mrb[56].mxu1 %vm325_vm0, %v18578_v13  ;;  %v18600_v13 = vpack.c.bf16 %v18161_v48, %v18148_v19 }
 0x622   : > { %14045 = vmatprep.mubr.msk.bf16.mxu1 %vm325_vm0, %v18582_v5  ;;  %v15448_v5 = vld [vmem:[%s19158_s6 + $0x20] sm:$0xff]  }
 0x623   : > { %19640 = vst [vmem:[#allocation16_spill] sm:$0xff] %v18600_v13 }
 0x629   : > { %14046 = vmatmul.mubr.msk.bf16.gmra.mrb[60].mxu1 %vm325_vm0, %v18592_v45  ;;  %v18617_v45 = vpack.c.bf16 %v18613_v40, %v18200_v10 }
 0x62a   : > { %14051 = vmatprep.mubr.msk.bf16.mxu1 %vm325_vm0, %v9432_v6  ;;  %v9408_v6 = vld [vmem:[#allocation3 + $0xa2] sm:$0xff] }
 0x62b   : > { %19642 = vst [vmem:[#allocation29_spill] sm:$0xff] %v18617_v45  ;;  %v9436_v48 = vpack.c.bf16 %v18260_v46, %v9408_v6  ;;  %v9416_v6 = vld [vmem:[#allocation3 + $0x142] sm:$0xff] }
 0x631   : > { %14052 = vmatmul.mubr.msk.bf16.vlgmr.msra.gmra.mrb[32].mxu1 %vm325_vm0, %v18600_v13  ;;  %v18635_v13 = vld [vmem:[#allocation3 + $0x112] sm:$0xff] }
 0x632   : > { %14084 = vmatpush3.bf16.msra.mxu1 %v15447_v50  ;;  %14055 = vmatprep.mubr.msk.bf16.mxu1 %vm325_vm0, %v18607_v12  ;;  %v18625_v50 = vpack.c.bf16 %v18262_v55, %v18249_v37  ;;  %v18629_v12 = vpack.c.bf16 %v18308_v35, %v18251_v47 }
 0x633   : > { %14117 = vmatprep.subr.bf16.mxu1 %v15448_v5 }
 0x634   : > { %19643 = vst [vmem:[#allocation60_spill] sm:$0xff] %v18625_v50  ;;  %19644 = vst [vmem:[#allocation61_spill] sm:$0xff] %v18629_v12 }
 0x639   : > { %14056 = vmatmul.mubr.msk.bf16.gmra.mrb[36].mxu1 %vm325_vm0, %v18617_v45  ;;  %v9440_v45 = vpack.c.bf16 %v18362_v20, %v9416_v6  ;;  %v9424_v6 = vld [vmem:[#allocation3 + $0x1e2] sm:$0xff]  ;;  %v18657_v20 = vld [vmem:[#allocation3 + $0x1b2] sm:$0xff] }
 0x63a   : > { %14059 = vmatprep.mubr.msk.bf16.mxu1 %vm325_vm0, %v9436_v48  ;;  %v18639_v48 = vpack.c.bf16 %v18635_v13, %v18299_v54 }
 0x63c   : > { %19645 = vst [vmem:[#allocation18_spill] sm:$0xff] %v18639_v48 }
 0x641   : > { %14060 = vmatmul.mubr.msk.bf16.gmra.mrb[40].mxu1 %vm325_vm0, %v18625_v50  ;;  %v18647_v50 = vpack.c.bf16 %v18364_v62, %v18350_v9 }
 0x642   : > { %14063 = vmatprep.mubr.msk.bf16.mxu1 %vm325_vm0, %v18629_v12  ;;  %v18651_v12 = vpack.c.bf16 %v18416_v34, %v18352_v36 }
 0x643   : > { %19646 = vst [vmem:[#allocation25_spill] sm:$0xff] %v18647_v50 }
 0x644   : > { %19647 = vst [vmem:[#allocation51_spill] sm:$0xff] %v18651_v12 }
 0x649   : > { %14064 = vmatmul.mubr.msk.bf16.gmra.mrb[44].mxu1 %vm325_vm0, %v18639_v48  ;;  %v9444_v48 = vpack.c.bf16 %v18462_v39, %v9424_v6  ;;  %v18679_v6 = vld [vmem:[#allocation3 + $0x252] sm:$0xff] }
 0x64a   : > { %14067 = vmatprep.mubr.msk.bf16.mxu1 %vm325_vm0, %v9440_v45  ;;  %v18661_v45 = vpack.c.bf16 %v18657_v20, %v18406_v11  ;;  %19651 = vst [vmem:[#allocation57_spill] sm:$0xff] %v18679_v6 }
 0x64c   : > { %19648 = vst [vmem:[#allocation52_spill] sm:$0xff] %v18661_v45 }
 0x651   : > { %14068 = vmatmul.mubr.msk.bf16.gmra.mrb[48].mxu1 %vm325_vm0, %v18647_v50  ;;  %v18669_v50 = vpack.c.bf16 %v18433_v38, %v18448_v52 }
 0x652   : > { %14071 = vmatprep.mubr.msk.bf16.mxu1 %vm325_vm0, %v18651_v12  ;;  %v18673_v12 = vpack.c.bf16 %v18494_v33, %v18441_v44 }
 0x653   : > { %19649 = vst [vmem:[#allocation53_spill] sm:$0xff] %v18669_v50 }
 0x654   : > { %19650 = vst [vmem:[#allocation54_spill] sm:$0xff] %v18673_v12 }
 0x659   : > { %14072 = vmatmul.mubr.msk.bf16.gmra.mrb[52].mxu1 %vm325_vm0, %v18661_v45  ;;  %v18683_v45 = vpack.c.bf16 %v18679_v6, %v18486_v25  ;;  %v19655_v6 = vpack.c.bf16 %v18190_v22, %v18198_v4  ;;  %v18719_v22 = vld [vmem:[#allocation3 + $0x120] sm:$0xff]  ;;  %v19659_v4 = vpack.c.bf16 %v18336_v23, %v18348_v1  ;;  %v19665_v23 = vpack.c.bf16 %v18132_v18, %v18113_v41  ;;  %v15450_v1 = vld [vmem:[%s19158_s6 + $0x30] sm:$0xff]   ;;  %v19669_v41 = vld [vmem:[#allocation12_spill] sm:$0xff] }
 0x65a   : > { %14075 = vmatprep.mubr.msk.bf16.mxu1 %vm325_vm0, %v9444_v48  ;;  %v19653_v48 = vpack.c.bf16 %v18136_v49, %v18146_v51  ;;  %v19656_v51 = vpack.c.bf16 %v18237_v61, %v18247_v43  ;;  %v19662_v43 = vpack.c.bf16 %v18446_v16, %v18431_v24  ;;  %v19667_v24 = vld [vmem:[#allocation11_spill] sm:$0xff] }
 0x65b   : > { %19652 = vst [vmem:[#allocation59_spill] sm:$0xff] %v18683_v45 }
 0x661   : > { %14076 = vmatmul.mubr.msk.bf16.gmra.mrb[56].mxu1 %vm325_vm0, %v18669_v50  ;;  %v15449_v50 = vld [vmem:[%s19158_s6 + $0x28] sm:$0xff]  }
 0x662   : > { %14079 = vmatprep.mubr.msk.bf16.mxu1 %vm325_vm0, %v18673_v12  ;;  %v19654_v12 = vpack.c.bf16 %v18127_v60, %v18125_v17  ;;  %v19657_v17 = vpack.c.bf16 %v18228_v57, %v18226_v31  ;;  %v19658_v60 = vpack.c.bf16 %v18289_v21, %v18297_v53  ;;  %v19661_v31 = vpack.c.bf16 %v18393_v27, %v18404_v2  ;;  %v18736_v57 = vld [vmem:[#allocation3 + $0x1c0] sm:$0xff] }
 0x663   : > { %v9741_v61 = vpack.c.bf16 %v18736_v57, %v18566_v8  ;;  %v19664_v21 = vpack.c.bf16 %v18484_v14, %v18480_v3  ;;  %v18753_v53 = vld [vmem:[#allocation3 + $0x260] sm:$0xff]  ;;  %v19666_v3 = vpack.c.bf16 %v18134_v59, %v18118_v0  ;;  %v19668_v27 = vpack.c.bf16 %v18186_v26, %v19667_v24  ;;  %v19673_v0 = vld [vmem:[#allocation17_spill] sm:$0xff]  ;;  %v19674_v59 = vld [vmem:[#allocation14_spill] sm:$0xff] }
 0x664   : > { %v18773_v2 = vld [vmem:[#allocation3 + $0x81] sm:$0xff]  ;;  %v19675_v14 = vpack.c.bf16 %v19673_v0, %v19674_v59  ;;  %v19676_v26 = vld [vmem:[#allocation22_spill] sm:$0xff]  ;;  %v19700_v0 = vpack.c.bf16 %v18148_v19, %v18159_v30  ;;  %v19704_v30 = vpack.c.bf16 %v18249_v37, %v18260_v46 }
 0x665   : > { %v10031_v18 = vpack.c.bf16 %v18773_v2, %v19669_v41  ;;  %v19677_v8 = vld [vmem:[#allocation20_spill] sm:$0xff]  ;;  %v19697_v41 = vld [vmem:[#allocation38_spill] sm:$0xff] }
 0x666   : > { %v15451_v59 = vld [vmem:[%s19158_s6 + $0x38] sm:$0xff]   ;;  %v19707_v37 = vld [vmem:[#allocation28_spill] sm:$0xff] }
 0x667   : > { %v19708_v46 = vpack.c.bf16 %v18350_v9, %v19707_v37  ;;  %v19711_v9 = vpack.c.bf16 %v18448_v52, %v18462_v39  ;;  %v19715_v52 = vld [vmem:[#allocation43_spill] sm:$0xff] }
 0x668   : > { %v15452_v39 = vld [vmem:[%s19158_s6 + $0x40] sm:$0xff]  }
 0x669   : > { %14080 = vmatmul.mubr.msk.bf16.gmra.mrb[60].mxu1 %vm325_vm0, %v18683_v45  ;;  %v18702_v45 = vld [vmem:[#allocation3 + $0x80] sm:$0xff] }
 0x66a   : > { %14085 = vmatprep.mubr.msk.bf16.mxu1 %vm325_vm0, %v19653_v48  ;;  %v9733_v49 = vpack.c.bf16 %v18702_v45, %v18522_v7  ;;  %v9737_v7 = vpack.c.bf16 %v18719_v22, %v18544_v42  ;;  %v18790_v42 = vld [vmem:[#allocation3 + $0x121] sm:$0xff] }
 0x66b   : > { %v19681_v48 = vld [vmem:[#allocation23_spill] sm:$0xff] }
 0x671   : > { %14086 = vmatmul.mubr.msk.bf16.vlgmr.msra.gmra.mrb[32].mxu1 %vm325_vm0, %v19654_v12  ;;  %v19660_v12 = vpack.c.bf16 %v18327_v58, %v18325_v29  ;;  %v19663_v58 = vpack.c.bf16 %v18439_v63, %v18426_v56  ;;  %v9745_v29 = vpack.c.bf16 %v18753_v53, %v18588_v15  ;;  %v19670_v56 = vld [vmem:[#allocation32_spill] sm:$0xff]  ;;  %v19671_v63 = vld [vmem:[#allocation13_spill] sm:$0xff]  ;;  %v19678_v15 = vpack.c.bf16 %v19676_v26, %v19677_v8 }
 0x672   : > { %14118 = vmatpush3.bf16.msra.mxu1 %v15448_v5  ;;  %14089 = vmatprep.mubr.msk.bf16.mxu1 %vm325_vm0, %v19655_v6  ;;  %v19672_v16 = vpack.c.bf16 %v19670_v56, %v19671_v63  ;;  %v19679_v5 = vld [vmem:[#allocation15_spill] sm:$0xff]  ;;  %v19680_v6 = vld [vmem:[#allocation34_spill] sm:$0xff]  ;;  %v19699_v63 = vld [vmem:[#allocation40_spill] sm:$0xff]  ;;  %v19703_v8 = vpack.c.bf16 %v18200_v10, %v18209_v32  ;;  %v19706_v10 = vpack.c.bf16 %v18299_v54, %v18308_v35 }
 0x673   : > { %14151 = vmatprep.subr.bf16.mxu1 %v15449_v50  ;;  %v18824_v56 = vld [vmem:[#allocation3 + $0x261] sm:$0xff] }
 0x674   : > { %v18861_v32 = vld [vmem:[#allocation3 + $0x122] sm:$0xff] }
 0x675   : > { %v18878_v54 = vld [vmem:[#allocation3 + $0x1c2] sm:$0xff] }
 0x676   : > { %v10337_v35 = vpack.c.bf16 %v18878_v54, %v18657_v20  ;;  %v19714_v20 = vld [vmem:[#allocation57_spill] sm:$0xff] }
 0x679   : > { %14090 = vmatmul.mubr.msk.bf16.gmra.mrb[36].mxu1 %vm325_vm0, %v9733_v49  ;;  %v19682_v49 = vpack.c.bf16 %v19680_v6, %v19681_v48  ;;  %v19721_v48 = vld [vmem:[#allocation49_spill] sm:$0xff] }
 0x67a   : > { %14093 = vmatprep.mubr.msk.bf16.mxu1 %vm325_vm0, %v19656_v51  ;;  %v19683_v51 = vld [vmem:[#allocation26_spill] sm:$0xff] }
 0x681   : > { %14094 = vmatmul.mubr.msk.bf16.gmra.mrb[40].mxu1 %vm325_vm0, %v19657_v17  ;;  %v19684_v17 = vld [vmem:[#allocation24_spill] sm:$0xff] }
 0x682   : > { %14097 = vmatprep.mubr.msk.bf16.mxu1 %vm325_vm0, %v19658_v60  ;;  %v19685_v60 = vpack.c.bf16 %v19683_v51, %v19684_v17  ;;  %v10616_v51 = vld [vmem:[#allocation3 + $0x1d0] sm:$0xff] }
 0x683   : > { %v10636_v17 = vpack.c.bf16 %v10616_v51, %v18736_v57  ;;  %v10894_v57 = vld [vmem:[#allocation3 + $0x51] sm:$0xff] }
 0x689   : > { %14098 = vmatmul.mubr.msk.bf16.gmra.mrb[44].mxu1 %vm325_vm0, %v9737_v7  ;;  %v19686_v7 = vld [vmem:[#allocation31_spill] sm:$0xff] }
 0x68a   : > { %14101 = vmatprep.mubr.msk.bf16.mxu1 %vm325_vm0, %v19659_v4  ;;  %v19687_v4 = vld [vmem:[#allocation33_spill] sm:$0xff] }
 0x691   : > { %14102 = vmatmul.mubr.msk.bf16.gmra.mrb[48].mxu1 %vm325_vm0, %v19660_v12  ;;  %v19688_v12 = vpack.c.bf16 %v19686_v7, %v19687_v4  ;;  %v19726_v7 = vld [vmem:[#allocation19_spill] sm:$0xff]  ;;  %v10624_v4 = vld [vmem:[#allocation3 + $0x270] sm:$0xff] }
 0x692   : > { %14105 = vmatprep.mubr.msk.bf16.mxu1 %vm325_vm0, %v19661_v31  ;;  %v18807_v31 = vld [vmem:[#allocation3 + $0x1c1] sm:$0xff] }
 0x699   : > { %14106 = vmatmul.mubr.msk.bf16.gmra.mrb[52].mxu1 %vm325_vm0, %v9741_v61  ;;  %v19689_v61 = vld [vmem:[#allocation55_spill] sm:$0xff] }
 0x69a   : > { %14109 = vmatprep.mubr.msk.bf16.mxu1 %vm325_vm0, %v19662_v43  ;;  %v10039_v43 = vpack.c.bf16 %v18807_v31, %v19689_v61  ;;  %v10640_v61 = vpack.c.bf16 %v10624_v4, %v18753_v53 }
 0x6a1   : > { %14110 = vmatmul.mubr.msk.bf16.gmra.mrb[56].mxu1 %vm325_vm0, %v19663_v58  ;;  %v19690_v58 = vld [vmem:[#allocation36_spill] sm:$0xff] }
 0x6a2   : > { %14113 = vmatprep.mubr.msk.bf16.mxu1 %vm325_vm0, %v19664_v21  ;;  %v19691_v21 = vld [vmem:[#allocation64_spill] sm:$0xff] }
 0x6a9   : > { %14114 = vmatmul.mubr.msk.bf16.gmra.mrb[60].mxu1 %vm325_vm0, %v9745_v29  ;;  %v19692_v29 = vpack.c.bf16 %v19690_v58, %v19691_v21  ;;  %v10895_v21 = vld [vmem:[#allocation3 + $0x61] sm:$0xff] }
 0x6aa   : > { %14119 = vmatprep.mubr.msk.bf16.mxu1 %vm325_vm0, %v19665_v23  ;;  %v19693_v23 = vld [vmem:[#allocation35_spill] sm:$0xff] }
 0x6b1   : > { %14120 = vmatmul.mubr.msk.bf16.vlgmr.msra.gmra.mrb[32].mxu1 %vm325_vm0, %v19666_v3  ;;  %v19694_v3 = vld [vmem:[#allocation58_spill] sm:$0xff] }
 0x6b2   : > { %14152 = vmatpush3.bf16.msra.mxu1 %v15449_v50  ;;  %14123 = vmatprep.mubr.msk.bf16.mxu1 %vm325_vm0, %v19668_v27  ;;  %v10035_v50 = vpack.c.bf16 %v18790_v42, %v19679_v5  ;;  %v19695_v24 = vpack.c.bf16 %v19693_v23, %v19694_v3  ;;  %v19696_v27 = vld [vmem:[#allocation41_spill] sm:$0xff]  ;;  %v19720_v5 = vld [vmem:[#allocation48_spill] sm:$0xff] }
 0x6b3   : > { %14185 = vmatprep.subr.bf16.mxu1 %v15450_v1  ;;  %v10896_v3 = vld [vmem:[#allocation3 + $0x71] sm:$0xff] }
 0x6b9   : > { %14124 = vmatmul.mubr.msk.bf16.gmra.mrb[36].mxu1 %vm325_vm0, %v10031_v18  ;;  %v19698_v18 = vpack.c.bf16 %v19696_v27, %v19697_v41  ;;  %v10898_v27 = vld [vmem:[#allocation3 + $0x91] sm:$0xff]  ;;  %v10899_v41 = vld [vmem:[#allocation3 + $0xc1] sm:$0xff] }
 0x6ba   : > { %14127 = vmatprep.mubr.msk.bf16.mxu1 %vm325_vm0, %v19672_v16  ;;  %v10043_v16 = vpack.c.bf16 %v18824_v56, %v19699_v63  ;;  %v10926_v53 = vpack.c.bf16 %v10898_v27, %v18773_v2  ;;  %v19727_v2 = vld [vmem:[#allocation27_spill] sm:$0xff] }
 0x6c1   : > { %14128 = vmatmul.mubr.msk.bf16.gmra.mrb[40].mxu1 %vm325_vm0, %v19675_v14  ;;  %v19701_v14 = vld [vmem:[#allocation10_spill] sm:$0xff] }
 0x6c2   : > { %14131 = vmatprep.mubr.msk.bf16.mxu1 %vm325_vm0, %v19678_v15  ;;  %v19702_v26 = vpack.c.bf16 %v18150_v28, %v19701_v14  ;;  %v18844_v15 = vld [vmem:[#allocation3 + $0x82] sm:$0xff]  ;;  %v19705_v28 = vpack.c.bf16 %v18251_v47, %v18262_v55  ;;  %v19709_v47 = vpack.c.bf16 %v18352_v36, %v18364_v62  ;;  %v19710_v55 = vpack.c.bf16 %v18406_v11, %v18416_v34 }
 0x6c3   : > { %v10329_v19 = vpack.c.bf16 %v18844_v15, %v18613_v40  ;;  %v10333_v40 = vpack.c.bf16 %v18861_v32, %v18635_v13  ;;  %v19712_v62 = vpack.c.bf16 %v18441_v44, %v18433_v38  ;;  %v19713_v36 = vpack.c.bf16 %v18486_v25, %v18494_v33  ;;  %v18895_v11 = vld [vmem:[#allocation3 + $0x262] sm:$0xff]  ;;  %v19717_v25 = vld [vmem:[#allocation45_spill] sm:$0xff]  ;;  %v19718_v13 = vld [vmem:[#allocation46_spill] sm:$0xff] }
 0x6c4   : > { %v10341_v34 = vpack.c.bf16 %v18895_v11, %v19714_v20  ;;  %v19716_v38 = vld [vmem:[#allocation44_spill] sm:$0xff]  ;;  %v10600_v44 = vld [vmem:[#allocation3 + $0x90] sm:$0xff] }
 0x6c5   : > { %v10628_v33 = vpack.c.bf16 %v10600_v44, %v18702_v45  ;;  %v19722_v45 = vld [vmem:[#allocation50_spill] sm:$0xff]  ;;  %v19741_v44 = vld [vmem:[#allocation52_spill] sm:$0xff] }
 0x6c9   : > { %14132 = vmatmul.mubr.msk.bf16.gmra.mrb[44].mxu1 %vm325_vm0, %v10035_v50  ;;  %v10608_v50 = vld [vmem:[#allocation3 + $0x130] sm:$0xff] }
 0x6ca   : > { %14135 = vmatprep.mubr.msk.bf16.mxu1 %vm325_vm0, %v19682_v49  ;;  %v10632_v6 = vpack.c.bf16 %v10608_v50, %v18719_v22  ;;  %v19723_v49 = vld [vmem:[#allocation9_spill] sm:$0xff]  ;;  %v19725_v22 = vld [vmem:[#allocation8_spill] sm:$0xff] }
 0x6cb   : > { %v11220_v50 = vld [vmem:[#allocation3 + $0x272] sm:$0xff] }
 0x6d1   : > { %14136 = vmatmul.mubr.msk.bf16.gmra.mrb[48].mxu1 %vm325_vm0, %v19685_v60  ;;  %v19724_v60 = vld [vmem:[#allocation7_spill] sm:$0xff] }
 0x6d2   : > { %14139 = vmatprep.mubr.msk.bf16.mxu1 %vm325_vm0, %v19688_v12  ;;  %v10891_v12 = vld [vmem:[#allocation3 + $0x21] sm:$0xff] }
 0x6d9   : > { %14140 = vmatmul.mubr.msk.bf16.gmra.mrb[52].mxu1 %vm325_vm0, %v10039_v43  ;;  %v10892_v43 = vld [vmem:[#allocation3 + $0x31] sm:$0xff] }
 0x6da   : > { %14143 = vmatprep.mubr.msk.bf16.mxu1 %vm325_vm0, %v19692_v29  ;;  %v10923_v58 = vpack.c.bf16 %v10892_v43, %v10891_v12  ;;  %v10893_v29 = vld [vmem:[#allocation3 + $0x41] sm:$0xff] }
 0x6db   : > { %v10924_v23 = vpack.c.bf16 %v10894_v57, %v10893_v29  ;;  %v11491_v43 = vld [vmem:[%s18998_s22 + $0x20] sm:$0xff]  ;;  %v11494_v57 = vld [vmem:[%s18998_s22 + $0x38] sm:$0xff] }
 0x6e1   : > { %14144 = vmatmul.mubr.msk.bf16.gmra.mrb[56].mxu1 %vm325_vm0, %v19695_v24  ;;  %v10925_v24 = vpack.c.bf16 %v10896_v3, %v10895_v21 }
 0x6e2   : > { %14147 = vmatprep.mubr.msk.bf16.mxu1 %vm325_vm0, %v19698_v18  ;;  %v10900_v18 = vld [vmem:[#allocation3 + $0xd1] sm:$0xff] }
 0x6e3   : > { %v10927_v63 = vpack.c.bf16 %v10900_v18, %v10899_v41  ;;  %v11497_v18 = vld [vmem:[%s18998_s22 + $0x50] sm:$0xff] }
 0x6e9   : > { %14148 = vmatmul.mubr.msk.bf16.gmra.mrb[60].mxu1 %vm325_vm0, %v10043_v16  ;;  %v10902_v16 = vld [vmem:[#allocation3 + $0xf1] sm:$0xff] }
 0x6ea   : > { %14153 = vmatprep.mubr.msk.bf16.mxu1 %vm325_vm0, %v19700_v0  ;;  %v10903_v0 = vld [vmem:[#allocation3 + $0x101] sm:$0xff] }
 0x6f1   : > { %14154 = vmatmul.mubr.msk.bf16.vlgmr.msra.gmra.mrb[32].mxu1 %vm325_vm0, %v19702_v26  ;;  %v10904_v26 = vld [vmem:[#allocation3 + $0x111] sm:$0xff] }
 0x6f2   : > { %14186 = vmatpush3.bf16.msra.mxu1 %v15450_v1  ;;  %14157 = vmatprep.mubr.msk.bf16.mxu1 %vm325_vm0, %v19703_v8  ;;  %v19719_v1 = vld [vmem:[#allocation47_spill] sm:$0xff]  ;;  %v10929_v8 = vpack.c.bf16 %v10904_v26, %v10903_v0  ;;  %v11498_v0 = vld [vmem:[%s18998_s22 + $0x58] sm:$0xff]  ;;  %v11496_v26 = vld [vmem:[%s18998_s22 + $0x48] sm:$0xff] }
 0x6f3   : > { %14219 = vmatprep.subr.bf16.mxu1 %v15451_v59 }
 0x6f9   : > { %14158 = vmatmul.mubr.msk.bf16.gmra.mrb[36].mxu1 %vm325_vm0, %v10329_v19  ;;  %v10906_v19 = vld [vmem:[#allocation3 + $0x131] sm:$0xff] }
 0x6fa   : > { %14161 = vmatprep.mubr.msk.bf16.mxu1 %vm325_vm0, %v19704_v30  ;;  %v10930_v30 = vpack.c.bf16 %v10906_v19, %v18790_v42  ;;  %v19731_v42 = vld [vmem:[#allocation39_spill] sm:$0xff] }
 0x701   : > { %14162 = vmatmul.mubr.msk.bf16.gmra.mrb[40].mxu1 %vm325_vm0, %v19705_v28  ;;  %v19728_v28 = vld [vmem:[#allocation30_spill] sm:$0xff] }
 0x702   : > { %14165 = vmatprep.mubr.msk.bf16.mxu1 %vm325_vm0, %v19706_v10  ;;  %v19729_v10 = vld [vmem:[#allocation56_spill] sm:$0xff] }
 0x709   : > { %14166 = vmatmul.mubr.msk.bf16.gmra.mrb[44].mxu1 %vm325_vm0, %v10333_v40  ;;  %v10914_v40 = vld [vmem:[#allocation3 + $0x1d1] sm:$0xff] }
 0x70a   : > { %14169 = vmatprep.mubr.msk.bf16.mxu1 %vm325_vm0, %v19708_v46  ;;  %v10934_v37 = vpack.c.bf16 %v10914_v40, %v18807_v31  ;;  %v19730_v46 = vld [vmem:[#allocation37_spill] sm:$0xff]  ;;  %v11499_v40 = vld [vmem:[%s18998_s22 + $0x60] sm:$0xff] }
 0x70b   : > { %v19734_v31 = vld [vmem:[#allocation21_spill] sm:$0xff] }
 0x711   : > { %14170 = vmatmul.mubr.msk.bf16.gmra.mrb[48].mxu1 %vm325_vm0, %v19709_v47  ;;  %v19732_v47 = vld [vmem:[#allocation42_spill] sm:$0xff] }
 0x712   : > { %14173 = vmatprep.mubr.msk.bf16.mxu1 %vm325_vm0, %v19710_v55  ;;  %v10922_v55 = vld [vmem:[#allocation3 + $0x271] sm:$0xff] }
 0x719   : > { %14174 = vmatmul.mubr.msk.bf16.gmra.mrb[52].mxu1 %vm325_vm0, %v10337_v35  ;;  %v10938_v35 = vpack.c.bf16 %v10922_v55, %v18824_v56  ;;  %v19737_v56 = vld [vmem:[#allocation61_spill] sm:$0xff]  ;;  %v11500_v55 = vld [vmem:[%s18998_s22 + $0x68] sm:$0xff] }
 0x71a   : > { %14177 = vmatprep.mubr.msk.bf16.mxu1 %vm325_vm0, %v19711_v9  ;;  %v19733_v9 = vld [vmem:[#allocation16_spill] sm:$0xff] }
 0x721   : > { %14178 = vmatmul.mubr.msk.bf16.gmra.mrb[56].mxu1 %vm325_vm0, %v19712_v62  ;;  %v19735_v62 = vld [vmem:[#allocation29_spill] sm:$0xff] }
 0x722   : > { %14181 = vmatprep.mubr.msk.bf16.mxu1 %vm325_vm0, %v19713_v36  ;;  %v11196_v36 = vld [vmem:[#allocation3 + $0x92] sm:$0xff] }
 0x723   : > { %v11224_v20 = vpack.c.bf16 %v11196_v36, %v18844_v15  ;;  %v19740_v15 = vld [vmem:[#allocation51_spill] sm:$0xff] }
 0x729   : > { %14182 = vmatmul.mubr.msk.bf16.gmra.mrb[60].mxu1 %vm325_vm0, %v10341_v34  ;;  %v19736_v34 = vld [vmem:[#allocation60_spill] sm:$0xff] }
 0x72a   : > { %14187 = vmatprep.mubr.msk.bf16.mxu1 %vm325_vm0, %v19715_v52  ;;  %v19738_v52 = vld [vmem:[#allocation18_spill] sm:$0xff] }
 0x731   : > { %14188 = vmatmul.mubr.msk.bf16.vlgmr.msra.gmra.mrb[32].mxu1 %vm325_vm0, %v19716_v38 }
 0x732   : > { %14220 = vmatpush3.bf16.msra.mxu1 %v15451_v59  ;;  %14191 = vmatprep.mubr.msk.bf16.mxu1 %vm325_vm0, %v19717_v25  ;;  %v10901_v59 = vld [vmem:[#allocation3 + $0xe1] sm:$0xff]  ;;  %v19739_v25 = vld [vmem:[#allocation25_spill] sm:$0xff] }
 0x733   : > { %14253 = vmatprep.subr.bf16.mxu1 %v15452_v39  ;;  %v10928_v14 = vpack.c.bf16 %v10902_v16, %v10901_v59 }
 0x739   : > { %14192 = vmatmul.mubr.msk.bf16.gmra.mrb[36].mxu1 %vm325_vm0, %v10628_v33  ;;  %v11212_v33 = vld [vmem:[#allocation3 + $0x1d2] sm:$0xff] }
 0x73a   : > { %14195 = vmatprep.mubr.msk.bf16.mxu1 %vm325_vm0, %v19718_v13  ;;  %v11232_v13 = vpack.c.bf16 %v11212_v33, %v18878_v54  ;;  %v11489_v54 = vld [vmem:[%s18998_s22 + $0x10] sm:$0xff] }
 0x741   : > { %14196 = vmatmul.mubr.msk.bf16.gmra.mrb[40].mxu1 %vm325_vm0, %v19719_v1  ;;  %v19742_v1 = vld [vmem:[#allocation53_spill] sm:$0xff] }
 0x742   : > { %14199 = vmatprep.mubr.msk.bf16.mxu1 %vm325_vm0, %v19720_v5  ;;  %v19744_v5 = vld [vmem:[#allocation59_spill] sm:$0xff] }
 0x749   : > { %14200 = vmatmul.mubr.msk.bf16.gmra.mrb[44].mxu1 %vm325_vm0, %v10632_v6  ;;  %v11236_v6 = vpack.c.bf16 %v11220_v50, %v18895_v11  ;;  %v11490_v11 = vld [vmem:[%s18998_s22 + $0x18] sm:$0xff] }
 0x74a   : > { %14203 = vmatprep.mubr.msk.bf16.mxu1 %vm325_vm0, %v19721_v48  ;;  %v11487_v48 = vld [vmem:[%s18998_s22] sm:$0xff] }
 0x751   : > { %14204 = vmatmul.mubr.msk.bf16.gmra.mrb[48].mxu1 %vm325_vm0, %v19722_v45 }
 0x752   : > { %14207 = vmatprep.mubr.msk.bf16.mxu1 %vm325_vm0, %v19723_v49 }
 0x759   : > { %14208 = vmatmul.mubr.msk.bf16.gmra.mrb[52].mxu1 %vm325_vm0, %v10636_v17  ;;  %v11488_v17 = vld [vmem:[%s18998_s22 + $0x8] sm:$0xff] }
 0x75a   : > { %14211 = vmatprep.mubr.msk.bf16.mxu1 %vm325_vm0, %v19724_v60 }
 0x761   : > { %14212 = vmatmul.mubr.msk.bf16.gmra.mrb[56].mxu1 %vm325_vm0, %v19725_v22 }
 0x762   : > { %14215 = vmatprep.mubr.msk.bf16.mxu1 %vm325_vm0, %v19726_v7 }
 0x769   : > { %14216 = vmatmul.mubr.msk.bf16.gmra.mrb[60].mxu1 %vm325_vm0, %v10640_v61  ;;  %v11493_v61 = vld [vmem:[%s18998_s22 + $0x30] sm:$0xff] }
 0x76a   : > { %14221 = vmatprep.mubr.msk.bf16.mxu1 %vm325_vm0, %v10923_v58 }
 0x771   : > { %14222 = vmatmul.mubr.msk.bf16.vlgmr.msra.gmra.mrb[32].mxu1 %vm325_vm0, %v10924_v23  ;;  %v11492_v23 = vld [vmem:[%s18998_s22 + $0x28] sm:$0xff] }
 0x772   : > { %14254 = vmatpush3.bf16.msra.mxu1 %v15452_v39  ;;  %14225 = vmatprep.mubr.msk.bf16.mxu1 %vm325_vm0, %v10925_v24  ;;  %v11204_v39 = vld [vmem:[#allocation3 + $0x132] sm:$0xff] }
 0x773   : > { %v11228_v38 = vpack.c.bf16 %v11204_v39, %v18861_v32  ;;  %v19743_v32 = vld [vmem:[#allocation54_spill] sm:$0xff] }
 0x779   : > { %14226 = vmatmul.mubr.msk.bf16.gmra.mrb[36].mxu1 %vm325_vm0, %v10926_v53 }
 0x77a   : > { %14229 = vmatprep.mubr.msk.bf16.mxu1 %vm325_vm0, %v10927_v63  ;;  %v11495_v63 = vld [vmem:[%s18998_s22 + $0x40] sm:$0xff] }
 0x781   : > { %14230 = vmatmul.mubr.msk.bf16.gmra.mrb[40].mxu1 %vm325_vm0, %v10928_v14 }
 0x782   : > { %14233 = vmatprep.mubr.msk.bf16.mxu1 %vm325_vm0, %v10929_v8 }
 0x789   : > { %14234 = vmatmul.mubr.msk.bf16.gmra.mrb[44].mxu1 %vm325_vm0, %v10930_v30 }
 0x78a   : > { %14237 = vmatprep.mubr.msk.bf16.mxu1 %vm325_vm0, %v19727_v2 }
 0x791   : > { %14238 = vmatmul.mubr.msk.bf16.gmra.mrb[48].mxu1 %vm325_vm0, %v19728_v28 }
 0x792   : > { %14241 = vmatprep.mubr.msk.bf16.mxu1 %vm325_vm0, %v19729_v10  ;;  %v11501_v10 = vld [vmem:[%s18998_s22 + $0x70] sm:$0xff] }
 0x799   : > { %14242 = vmatmul.mubr.msk.bf16.gmra.mrb[52].mxu1 %vm325_vm0, %v10934_v37 }
 0x79a   : > { %14245 = vmatprep.mubr.msk.bf16.mxu1 %vm325_vm0, %v19730_v46  ;;  %v11502_v46 = vld [vmem:[%s18998_s22 + $0x78] sm:$0xff] }
 0x7a1   : > { %14246 = vmatmul.mubr.msk.bf16.gmra.mrb[56].mxu1 %vm325_vm0, %v19731_v42 }
 0x7a2   : > { %14249 = vmatprep.mubr.msk.bf16.mxu1 %vm325_vm0, %v19732_v47 }
 0x7a9   : > { %14250 = vmatmul.mubr.msk.bf16.gmra.mrb[60].mxu1 %vm325_vm0, %v10938_v35 }
 0x7aa   : > { %14255 = vmatprep.mubr.msk.bf16.mxu1 %vm325_vm0, %v19733_v9 }
 0x7b1   : > { %14256 = vmatmul.mubr.msk.bf16.vlgmr.msra.gmra.mrb[32].mxu1 %vm325_vm0, %v19734_v31 }
 0x7b2   : > { %14259 = vmatprep.mubr.msk.bf16.mxu1 %vm325_vm0, %v19735_v62 }
 0x7b9   : > { %14260 = vmatmul.mubr.msk.bf16.gmra.mrb[36].mxu1 %vm325_vm0, %v11224_v20  ;;  %v11505_v20 = vld [vmem:[%s18998_s22 + $0x90] sm:$0xff] }
 0x7ba   : > { %14263 = vmatprep.mubr.msk.bf16.mxu1 %vm325_vm0, %v19736_v34  ;;  %v11503_v34 = vld [vmem:[%s18998_s22 + $0x80] sm:$0xff] }
 0x7c1   : > { %14264 = vmatmul.mubr.msk.bf16.gmra.mrb[40].mxu1 %vm325_vm0, %v19737_v56 }
 0x7c2   : > { %14267 = vmatprep.mubr.msk.bf16.mxu1 %vm325_vm0, %v19738_v52  ;;  %v11506_v52 = vld [vmem:[%s18998_s22 + $0x98] sm:$0xff] }
 0x7c9   : > { %14268 = vmatmul.mubr.msk.bf16.gmra.mrb[44].mxu1 %vm325_vm0, %v11228_v38 }
 0x7ca   : > { %14271 = vmatprep.mubr.msk.bf16.mxu1 %vm325_vm0, %v19739_v25  ;;  %v11504_v25 = vld [vmem:[%s18998_s22 + $0x88] sm:$0xff] }
 0x7d1   : > { %14272 = vmatmul.mubr.msk.bf16.gmra.mrb[48].mxu1 %vm325_vm0, %v19740_v15 }
 0x7d2   : > { %14275 = vmatprep.mubr.msk.bf16.mxu1 %vm325_vm0, %v19741_v44 }
 0x7d9   : > { %14276 = vmatmul.mubr.msk.bf16.gmra.mrb[52].mxu1 %vm325_vm0, %v11232_v13 }
 0x7da   : > { %14279 = vmatprep.mubr.msk.bf16.mxu1 %vm325_vm0, %v19742_v1 }
 0x7e1   : > { %14280 = vmatmul.mubr.msk.bf16.gmra.mrb[56].mxu1 %vm325_vm0, %v19743_v32  ;;  %v11509_v32 = vld [vmem:[%s18998_s22 + $0xb0] sm:$0xff] }
 0x7e2   : > { %14283 = vmatprep.mubr.msk.bf16.mxu1 %vm325_vm0, %v19744_v5  ;;  %v11507_v5 = vld [vmem:[%s18998_s22 + $0xa0] sm:$0xff] }
 0x7e9   : > { %14284 = vmatmul.mubr.msk.bf16.gmra.mrb[60].mxu1 %vm325_vm0, %v11236_v6  ;;  %v11510_v6 = vld [vmem:[%s18998_s22 + $0xb8] sm:$0xff] }
 0x884   : > { %v14257_v45 = vpop.f32.mrb[32].mxu1 }
 0x885   : > { %v11521_v49 = vadd.f32 %v14257_v45, %v11489_v54  ;;  %v11328_v51 = vpop.f32.mrb[33].mxu1  ;;  %v11508_v45 = vld [vmem:[%s18998_s22 + $0xa8] sm:$0xff] }
 0x886   : > { %v11519_v60 = vadd.f32 %v11487_v48, %v11328_v51  ;;  %v14258_v22 = vpop.f32.mrb[34].mxu1 }
 0x887   : > { %11553 = vst.msk [vmem:[%s19006_s21 + $0x10] sm:$0xff] %vm325_vm0, %v11521_v49  ;;  %v11522_v7 = vadd.f32 %v14258_v22, %v11490_v11  ;;  %v11331_v4 = vpop.f32.mrb[35].mxu1  ;;  %v11513_v22 = vld [vmem:[%s18998_s22 + $0xd0] sm:$0xff] }
 0x888   : > { %11551 = vst.msk [vmem:[%s19006_s21] sm:$0xff] %vm325_vm0, %v11519_v60  ;;  %v11520_v12 = vadd.f32 %v11488_v17, %v11331_v4 }
 0x889   : > { %11554 = vst.msk [vmem:[%s19006_s21 + $0x18] sm:$0xff] %vm325_vm0, %v11522_v7  ;;  %v11511_v7 = vld [vmem:[%s18998_s22 + $0xc0] sm:$0xff] }
 0x88a   : > { %11552 = vst.msk [vmem:[%s19006_s21 + $0x8] sm:$0xff] %vm325_vm0, %v11520_v12  ;;  %v11514_v12 = vld [vmem:[%s18998_s22 + $0xd8] sm:$0xff] }
 0x88c   : > { %v14261_v58 = vpop.f32.mrb[36].mxu1 }
 0x88d   : > { %v11525_v21 = vadd.f32 %v14261_v58, %v11493_v61  ;;  %v11344_v29 = vpop.f32.mrb[37].mxu1  ;;  %v11512_v58 = vld [vmem:[%s18998_s22 + $0xc8] sm:$0xff] }
 0x88e   : > { %v11523_v3 = vadd.f32 %v11491_v43, %v11344_v29  ;;  %v14262_v24 = vpop.f32.mrb[38].mxu1 }
 0x88f   : > { %11557 = vst.msk [vmem:[%s19006_s21 + $0x30] sm:$0xff] %vm325_vm0, %v11525_v21  ;;  %v11526_v27 = vadd.f32 %v14262_v24, %v11494_v57  ;;  %v11347_v41 = vpop.f32.mrb[39].mxu1  ;;  %v11517_v24 = vld [vmem:[%s18998_s22 + $0xf0] sm:$0xff] }
 0x890   : > { %11555 = vst.msk [vmem:[%s19006_s21 + $0x20] sm:$0xff] %vm325_vm0, %v11523_v3  ;;  %v11524_v53 = vadd.f32 %v11492_v23, %v11347_v41 }
 0x891   : > { %11558 = vst.msk [vmem:[%s19006_s21 + $0x38] sm:$0xff] %vm325_vm0, %v11526_v27  ;;  %v11515_v27 = vld [vmem:[%s18998_s22 + $0xe0] sm:$0xff] }
 0x892   : > { %11556 = vst.msk [vmem:[%s19006_s21 + $0x28] sm:$0xff] %vm325_vm0, %v11524_v53  ;;  %v11518_v53 = vld [vmem:[%s18998_s22 + $0xf8] sm:$0xff] }
 0x894   : > { %v14265_v16 = vpop.f32.mrb[40].mxu1 }
 0x895   : > { %v11529_v59 = vadd.f32 %v14265_v16, %v11497_v18  ;;  %v11360_v14 = vpop.f32.mrb[41].mxu1  ;;  %v11516_v16 = vld [vmem:[%s18998_s22 + $0xe8] sm:$0xff] }
 0x896   : > { %v11527_v8 = vadd.f32 %v11495_v63, %v11360_v14  ;;  %v14266_v19 = vpop.f32.mrb[42].mxu1 }
 0x897   : > { %11561 = vst.msk [vmem:[%s19006_s21 + $0x50] sm:$0xff] %vm325_vm0, %v11529_v59  ;;  %v11530_v30 = vadd.f32 %v14266_v19, %v11498_v0  ;;  %v11363_v2 = vpop.f32.mrb[43].mxu1 }
 0x898   : > { %11559 = vst.msk [vmem:[%s19006_s21 + $0x40] sm:$0xff] %vm325_vm0, %v11527_v8  ;;  %v11528_v28 = vadd.f32 %v11496_v26, %v11363_v2 }
 0x899   : > { %11562 = vst.msk [vmem:[%s19006_s21 + $0x58] sm:$0xff] %vm325_vm0, %v11530_v30 }
 0x89a   : > { %11560 = vst.msk [vmem:[%s19006_s21 + $0x48] sm:$0xff] %vm325_vm0, %v11528_v28 }
 0x89c   : > { %v14269_v37 = vpop.f32.mrb[44].mxu1 }
 0x89d   : > { %v11533_v42 = vadd.f32 %v14269_v37, %v11501_v10  ;;  %v11376_v47 = vpop.f32.mrb[45].mxu1 }
 0x89e   : > { %v11531_v35 = vadd.f32 %v11499_v40, %v11376_v47  ;;  %v14270_v9 = vpop.f32.mrb[46].mxu1 }
 0x89f   : > { %11565 = vst.msk [vmem:[%s19006_s21 + $0x70] sm:$0xff] %vm325_vm0, %v11533_v42  ;;  %v11534_v31 = vadd.f32 %v14270_v9, %v11502_v46  ;;  %v11379_v62 = vpop.f32.mrb[47].mxu1 }
 0x8a0   : > { %11563 = vst.msk [vmem:[%s19006_s21 + $0x60] sm:$0xff] %vm325_vm0, %v11531_v35  ;;  %v11532_v36 = vadd.f32 %v11500_v55, %v11379_v62 }
 0x8a1   : > { %11566 = vst.msk [vmem:[%s19006_s21 + $0x78] sm:$0xff] %vm325_vm0, %v11534_v31 }
 0x8a2   : > { %11564 = vst.msk [vmem:[%s19006_s21 + $0x68] sm:$0xff] %vm325_vm0, %v11532_v36 }
 0x8a4   : > { %v14273_v56 = vpop.f32.mrb[48].mxu1 }
 0x8a5   : > { %v11537_v39 = vadd.f32 %v14273_v56, %v11505_v20  ;;  %v11392_v38 = vpop.f32.mrb[49].mxu1 }
 0x8a6   : > { %v11535_v15 = vadd.f32 %v11503_v34, %v11392_v38  ;;  %v14274_v44 = vpop.f32.mrb[50].mxu1 }
 0x8a7   : > { %11569 = vst.msk [vmem:[%s19006_s21 + $0x90] sm:$0xff] %vm325_vm0, %v11537_v39  ;;  %v11538_v33 = vadd.f32 %v14274_v44, %v11506_v52  ;;  %v11395_v13 = vpop.f32.mrb[51].mxu1 }
 0x8a8   : > { %11567 = vst.msk [vmem:[%s19006_s21 + $0x80] sm:$0xff] %vm325_vm0, %v11535_v15  ;;  %v11536_v1 = vadd.f32 %v11504_v25, %v11395_v13 }
 0x8a9   : > { %11570 = vst.msk [vmem:[%s19006_s21 + $0x98] sm:$0xff] %vm325_vm0, %v11538_v33 }
 0x8aa   : > { %11568 = vst.msk [vmem:[%s19006_s21 + $0x88] sm:$0xff] %vm325_vm0, %v11536_v1 }
 0x8ac   : > { %v14277_v50 = vpop.f32.mrb[52].mxu1 }
 0x8ad   : > { %v11541_v54 = vadd.f32 %v14277_v50, %v11509_v32  ;;  %v11408_v48 = vpop.f32.mrb[53].mxu1 }
 0x8ae   : > { %v11539_v11 = vadd.f32 %v11507_v5, %v11408_v48  ;;  %v14278_v49 = vpop.f32.mrb[54].mxu1 }
 0x8af   : > { %11573 = vst.msk [vmem:[%s19006_s21 + $0xb0] sm:$0xff] %vm325_vm0, %v11541_v54  ;;  %v11542_v51 = vadd.f32 %v14278_v49, %v11510_v6  ;;  %v11411_v17 = vpop.f32.mrb[55].mxu1 }
 0x8b0   : > { %11571 = vst.msk [vmem:[%s19006_s21 + $0xa0] sm:$0xff] %vm325_vm0, %v11539_v11  ;;  %v11540_v60 = vadd.f32 %v11508_v45, %v11411_v17 }
 0x8b1   : > { %11574 = vst.msk [vmem:[%s19006_s21 + $0xb8] sm:$0xff] %vm325_vm0, %v11542_v51 }
 0x8b2   : > { %11572 = vst.msk [vmem:[%s19006_s21 + $0xa8] sm:$0xff] %vm325_vm0, %v11540_v60 }
 0x8b4   : > { %v14281_v4 = vpop.f32.mrb[56].mxu1 }
 0x8b5   : > { %v11545_v61 = vadd.f32 %v14281_v4, %v11513_v22  ;;  %v11424_v43 = vpop.f32.mrb[57].mxu1 }
 0x8b6   : > { %v11543_v57 = vadd.f32 %v11511_v7, %v11424_v43  ;;  %v14282_v21 = vpop.f32.mrb[58].mxu1 }
 0x8b7   : > { %11577 = vst.msk [vmem:[%s19006_s21 + $0xd0] sm:$0xff] %vm325_vm0, %v11545_v61  ;;  %v11546_v29 = vadd.f32 %v14282_v21, %v11514_v12  ;;  %v11427_v23 = vpop.f32.mrb[59].mxu1 }
 0x8b8   : > { %11575 = vst.msk [vmem:[%s19006_s21 + $0xc0] sm:$0xff] %vm325_vm0, %v11543_v57  ;;  %v11544_v3 = vadd.f32 %v11512_v58, %v11427_v23 }
 0x8b9   : > { %11578 = vst.msk [vmem:[%s19006_s21 + $0xd8] sm:$0xff] %vm325_vm0, %v11546_v29 }
 0x8ba   : > { %11576 = vst.msk [vmem:[%s19006_s21 + $0xc8] sm:$0xff] %vm325_vm0, %v11544_v3 }
 0x8bc   : > { %v14285_v41 = vpop.f32.mrb[60].mxu1 }
 0x8bd   : > { %v11549_v18 = vadd.f32 %v14285_v41, %v11517_v24  ;;  %v11440_v63 = vpop.f32.mrb[61].mxu1 }
 0x8be   : > { %v11547_v0 = vadd.f32 %v11515_v27, %v11440_v63  ;;  %v14286_v59 = vpop.f32.mrb[62].mxu1 }
 0x8bf   : > { %11581 = vst.msk [vmem:[%s19006_s21 + $0xf0] sm:$0xff] %vm325_vm0, %v11549_v18  ;;  %v11550_v14 = vadd.f32 %v14286_v59, %v11518_v53  ;;  %v11443_v26 = vpop.f32.mrb[63].mxu1 }
 0x8c0   : > { %11579 = vst.msk [vmem:[%s19006_s21 + $0xe0] sm:$0xff] %vm325_vm0, %v11547_v0  ;;  %v11548_v8 = vadd.f32 %v11516_v16, %v11443_v26 }
 0x8c1   : > { %11582 = vst.msk [vmem:[%s19006_s21 + $0xf8] sm:$0xff] %vm325_vm0, %v11550_v14 }
 0x8c2   : > { %11580 = vst.msk [vmem:[%s19006_s21 + $0xe8] sm:$0xff] %vm325_vm0, %v11548_v8 }
 0x8c3   : > { %15466 = shalt.err (!%p15463_p3)
}
 0x8c4   : > { %s15467_s18 = scalar_lea.hbm %s19099_s12, 4096  ;;  %s15471_s21 = scalar_lea.hbm %s19160_s8, 8192 }
 0x8c5   : > { %p15468_p4 = scmp.ne.s32.totalorder %s19099_s12, %s15467_s18  ;;  %p15472_p9 = scmp.lt.u32.totalorder %s19099_s12, %s19160_s8 }
 0x8c6   : > { %p15473_p10 = scmp.lt.u32.totalorder %s15471_s21, %s15467_s18  ;;  %p15475_p12 = scmp.lt.u32.totalorder %s15467_s18, %s19099_s12 }
 0x8c7   : > { %p15469_p7 = pnand %p15468_p4, %p15604_p5 }
 0x8c8   : > { %p15474_p11 = por %p15473_p10, %p15472_p9 }
 0x8c9   : > { %p15470_p8 = pneg %p15469_p7 }
 0x8ca   : > { %p15476_p13 = por %p15475_p12, %p15474_p11 }
 0x8cc   : > { %p15477_p0 = pnand %p15476_p13, %p15470_p8 }
 0x8ce   : > { %15480 = shalt.err (!%p15477_p0)
}
 0x8cf   : > { %s15519_s10 = smov 128   ;;  %s15520_s13 = smov 8  }
 0x8d0   : > { %15375 = dma.vmem_to_hbm [thread:$0]  (%p15604_p5), %s19101_s25, 4096, %s19099_s12, %s19111_s9, %s15519_s10, %s15519_s10, %s15520_s13  }
 0x8d1 PF: > { %p15381_p1 = scmp.ge.s32.totalorder %s15515_s30, 2  ;;  %s11612_s17 = sand.u32 1, %s15503_s27  }
 0x8d2   : > { %s11613_s19 = scalar_lea.sflag [#allocation5], %s11612_s17 }
 0x8d3   : > { %p15378_p2 = pnand %p15381_p1, %p15608_p6 }
 0x8d5   : > { %15498 = dma.done.wait (!%p15378_p2), %s11613_s19, 4096  }
 0x8d6   : > { %15500 = vsyncadd (!%p15378_p2), %s11613_s19, 4294963200  ;;  %p18_p3 = scmp.ge.s32.totalorder %s15591_s11, 4   ;;  %s19745_s27 = smov %s15507_s28 }
 0x8d7   : > { %s19746_s28 = smov %s15511_s29  ;;  %s19747_s29 = smov %s15602_s14 }
 0x8d8   : > { %s19748_s30 = smov %s15591_s11  ;;  %20 = sbr.rel (!%p18_p3) target bundleno = 3 (0x3), region = 137 }
 0x8df   :  { %11618 = vsyncpa [#allocation5], 1 }
 0x8e0   :  { %11620 = vsyncpa [#allocation5 + $0x1], 1 }

</bundles_post_ra>
